<compile_context>
chip_gen: v7x
topology: tpu7x:2x2x1
jax: 0.10.0
libtpu: 0.0.40
codegen_flags: <defaults>
</compile_context>

<pallas_src>
import functools

import jax
import jax.numpy as jnp
from jax import lax
from jax.experimental import pallas as pl
from jax.experimental.pallas import tpu as pltpu


def _round_up(x, m):
    return (x + m - 1) // m * m


# -----------------------------------------------------------------------------
# Fused SRCNN kernel: one batch image per grid step, all three conv layers.
#
# Layout: the zero-padded (Hb x Wb) image is flattened row-major; output pixel
# (i, j) lives at flat position r = i*Wb + j of a lane-dense length-L vector
# (L = round_up(H*Wb, 128)).  Activation slabs are (C, M) with the valid span
# at columns [MR, MR+L) and zero margins of MR=128 lanes on each side, so a
# conv tap with offset `delta` is just the value slice [MR+delta : MR+delta+L).
# -----------------------------------------------------------------------------
def _srcnn_fused_kernel(x_ref, mask_ref, w1_ref, b1_ref, w2_ref, b2_ref,
                        w3_ref, b3_ref, o_ref,
                        h1_ref, h2_ref, pan_ref, pan1_ref, *, Wb, L, M, MR):
    mask = mask_ref[...]                                    # (1, L) f32

    # ---- layer 1: 1 -> 64, k=9  -> single (64,88)x(88,L) bf16 MXU matmul ----
    x_slab = x_ref[0]                                       # (1, M) f32, image at [0, Hb*Wb)
    pan1_ref[80:88, :] = jnp.zeros((8, L), jnp.float32)     # zero pad taps 81..87 (row 80 rewritten)
    for kh in range(9):
        for kw in range(9):
            t = kh * 9 + kw
            off = kh * Wb + kw                              # static lane offset of this tap
            pan1_ref[t:t + 1, :] = x_slab[:, off:off + L]
    a1 = jnp.dot(w1_ref[...], pan1_ref[...].astype(jnp.bfloat16),
                 preferred_element_type=jnp.float32)        # (64, L) f32
    a1 = jnp.maximum(a1 + b1_ref[...], 0.0) * mask
    # store masked activations; re-zero ONLY the halo margins (every step)
    h1_ref[:, 0:MR] = jnp.zeros((64, MR), jnp.bfloat16)
    h1_ref[:, MR + L:M] = jnp.zeros((64, M - MR - L), jnp.bfloat16)
    h1_ref[:, MR:MR + L] = a1.astype(jnp.bfloat16)

    # ---- layer 2: 64 -> 32, k=5 -> single (32,1600)x(1600,L) matmul ---------
    h1_slab = h1_ref[...]                                   # (64, M) bf16, loaded once
    for kh in range(5):
        for kw in range(5):
            t = kh * 5 + kw
            off = MR + (kh - 2) * Wb + (kw - 2)
            pan_ref[t * 64:(t + 1) * 64, :] = h1_slab[:, off:off + L]
    a2 = jnp.dot(w2_ref[...], pan_ref[...],
                 preferred_element_type=jnp.float32)        # (32, L) f32
    a2 = jnp.maximum(a2 + b2_ref[...], 0.0) * mask
    h2_ref[:, 0:MR] = jnp.zeros((32, MR), jnp.bfloat16)
    h2_ref[:, MR + L:M] = jnp.zeros((32, M - MR - L), jnp.bfloat16)
    h2_ref[:, MR:MR + L] = a2.astype(jnp.bfloat16)

    # ---- layer 3: 32 -> 1 (Cout padded to 8), k=5 ---------------------------
    h2_slab = h2_ref[...]                                   # (32, M) bf16
    for kh in range(5):
        for kw in range(5):
            t = kh * 5 + kw
            off = MR + (kh - 2) * Wb + (kw - 2)
            pan_ref[t * 32:(t + 1) * 32, :] = h2_slab[:, off:off + L]
    a3 = jnp.dot(w3_ref[...], pan_ref[0:25 * 32, :],
                 preferred_element_type=jnp.float32) + b3_ref[...]   # (8, L) f32
    o_ref[0] = a3[0:1, :].astype(o_ref.dtype)               # lane-dense (1, L) store


# -----------------------------------------------------------------------------
# Wrapper: host-side layout glue (pure data movement) + the fused pallas_call.
# -----------------------------------------------------------------------------
def srcnn_forward(x_nchw, params):
    """Matches SRCNN.forward: relu(conv1) -> relu(conv2) -> conv3.  I/O is NCHW f32."""
    (w1, b1), (w2, b2), (w3, b3) = params
    N, Cin, H, W = x_nchw.shape
    assert Cin == 1

    P1 = 4                                     # layer-1 halo; layers 2/3 need 2
    Hb, Wb = H + 2 * P1, W + 2 * P1            # zero-padded spatial extent
    L = _round_up(H * Wb, 128)                 # lane-dense compute length (row stride Wb)
    MR = 128                                   # zero-margin width (lanes)
    M = L + 2 * MR                             # slab width
    # whole-image-in-VMEM plan; fine for SRCNN-sized inputs.
    # TODO(synk): strip-tile rows (4-px halo) + vmem_limit_bytes for large images.
    assert 2 * P1 * (Wb + 1) <= 2 * MR, "image too wide for the whole-image plan"
    assert 2 * (Wb + 1) <= MR

    # host glue (pure layout): zero-pad, flatten, extend to the slab width
    xflat = jnp.pad(x_nchw, ((0, 0), (0, 0), (P1, P1), (P1, P1))).reshape(N, 1, Hb * Wb)
    xbuf = jnp.pad(xflat, ((0, 0), (0, 0), (0, M - Hb * Wb)))            # (N, 1, M) f32

    # validity mask over the computed span: position r -> pixel (r//Wb, r%Wb)
    col = jnp.arange(L, dtype=jnp.int32)
    mask = (((col % Wb) < W) & (col < H * Wb)).astype(jnp.float32).reshape(1, L)

    # lane-dense weights (Cout, K*K*Cin); panel-row order is t = kh*K + kw, then cin
    w1k = jnp.pad(w1.reshape(81, 64).T, ((0, 0), (0, 7))).astype(jnp.bfloat16)      # (64, 88)
    w2k = w2.reshape(25 * 64, 32).T.astype(jnp.bfloat16)                            # (32, 1600)
    w3k = jnp.pad(w3.reshape(25 * 32, 1).T, ((0, 7), (0, 0))).astype(jnp.bfloat16)  # (8, 800)
    b1k = b1.reshape(64, 1).astype(jnp.float32)
    b2k = b2.reshape(32, 1).astype(jnp.float32)
    b3k = jnp.pad(b3.reshape(1, 1), ((0, 7), (0, 0))).astype(jnp.float32)           # (8, 1)

    flops = 2 * N * L * (64 * 88 + 32 * 1600 + 8 * 800)
    bytes_accessed = (xbuf.size * 4 + mask.size * 4 + N * L * 4
                      + (w1k.size + w2k.size + w3k.size) * 2
                      + (b1k.size + b2k.size + b3k.size) * 4)

    kernel = functools.partial(_srcnn_fused_kernel, Wb=Wb, L=L, M=M, MR=MR)
    out = pl.pallas_call(
        kernel,
        out_shape=jax.ShapeDtypeStruct((N, 1, L), jnp.float32),
        grid=(N,),
        in_specs=[
            pl.BlockSpec((1, 1, M), lambda n: (n, 0, 0)),      # padded flat image (f32)
            pl.BlockSpec((1, L), lambda n: (0, 0)),            # validity mask (f32)
            pl.BlockSpec((64, 88), lambda n: (0, 0)),          # layer-1 weights (bf16)
            pl.BlockSpec((64, 1), lambda n: (0, 0)),           # layer-1 bias (f32)
            pl.BlockSpec((32, 1600), lambda n: (0, 0)),        # layer-2 weights (bf16)
            pl.BlockSpec((32, 1), lambda n: (0, 0)),           # layer-2 bias (f32)
            pl.BlockSpec((8, 800), lambda n: (0, 0)),          # layer-3 weights (bf16, Cout pad 8)
            pl.BlockSpec((8, 1), lambda n: (0, 0)),            # layer-3 bias (padded)
        ],
        out_specs=pl.BlockSpec((1, 1, L), lambda n: (n, 0, 0)),
        scratch_shapes=[
            pltpu.VMEM((64, M), jnp.bfloat16),                 # h1 slab (VMEM-resident)
            pltpu.VMEM((32, M), jnp.bfloat16),                 # h2 slab (VMEM-resident)
            pltpu.VMEM((25 * 64, L), jnp.bfloat16),            # shared im2col panel (layers 2/3)
            pltpu.VMEM((88, L), jnp.float32),                  # layer-1 im2col panel
        ],
        compiler_params=pltpu.CompilerParams(
            dimension_semantics=("parallel",)),                # batch across TensorCores (v7x)
        cost_estimate=pl.CostEstimate(flops=int(flops), transcendentals=0,
                                      bytes_accessed=int(bytes_accessed)),
    )(xbuf, mask, w1k, b1k, w2k, b2k, w3k, b3k)

    # extract valid pixels: position r = i*Wb + j -> (i, j); already NCHW.
    return out[:, :, :H * Wb].reshape(N, 1, H, Wb)[:, :, :, :W]


# -----------------------------------------------------------------------------
# SRCNN parameters (deterministic init, PyTorch Conv2d-style uniform bounds)
# -----------------------------------------------------------------------------
def init_srcnn_params(key):
    def conv_init(kw, kb, K, Cin, Cout):
        bound = 1.0 / jnp.sqrt(float(Cin * K * K))
        w = jax.random.uniform(kw, (K, K, Cin, Cout), jnp.float32, -bound, bound)
        b = jax.random.uniform(kb, (Cout,), jnp.float32, -bound, bound)
        return w, b

    ks = jax.random.split(key, 6)
    p1 = conv_init(ks[0], ks[1], 9, 1, 64)
    p2 = conv_init(ks[2], ks[3], 5, 64, 32)
    p3 = conv_init(ks[4], ks[5], 5, 32, 1)
    return p1, p2, p3


# Pure-JAX reference with matched numerics (all layers: bf16 inputs on the MXU,
# f32 accumulation), so the check is tight despite the bf16 compute path.
def srcnn_reference(x_nchw, params):
    (w1, b1), (w2, b2), (w3, b3) = params

    def conv_bf16(x, w):
        return lax.conv_general_dilated(
            x.astype(jnp.bfloat16), w.astype(jnp.bfloat16),
            window_strides=(1, 1), padding="SAME",
            dimension_numbers=("NCHW", "HWIO", "NCHW"),
            preferred_element_type=jnp.float32)

    h1 = jnp.maximum(conv_bf16(x_nchw, w1) + b1.reshape(1, -1, 1, 1), 0.0)
    h2 = jnp.maximum(conv_bf16(h1, w2) + b2.reshape(1, -1, 1, 1), 0.0)
    return conv_bf16(h2, w3) + b3.reshape(1, -1, 1, 1)


if __name__ == "__main__":
    key = jax.random.PRNGKey(0)
    k_par, k_x = jax.random.split(key)

    params = init_srcnn_params(k_par)
    # SRCNN takes single-channel images: NCHW = (batch=2, C=1, H=16, W=16)
    x = jax.random.normal(k_x, (2, 1, 16, 16), dtype=jnp.float32)

    fwd = jax.jit(srcnn_forward)
    out = jax.block_until_ready(fwd(x, params))
    assert out.shape == (2, 1, 16, 16), out.shape

    ref = jax.block_until_ready(srcnn_reference(x, params))
    max_err = float(jnp.max(jnp.abs(out - ref)))
    assert jnp.allclose(out, ref, atol=5e-3, rtol=5e-3), max_err

    print("KERNEL_OK")
</pallas_src>

<mosaic_0001>
module attributes {stable_mosaic.version = 11 : i64} {
  func.func @_srcnn_fused_kernel(%arg0: i32, %arg1: memref<1x1x640xf32, #tpu.memory_space<vmem>>, %arg2: memref<1x384xf32, #tpu.memory_space<vmem>>, %arg3: memref<64x88xbf16, #tpu.memory_space<vmem>>, %arg4: memref<64x1xf32, #tpu.memory_space<vmem>>, %arg5: memref<32x1600xbf16, #tpu.memory_space<vmem>>, %arg6: memref<32x1xf32, #tpu.memory_space<vmem>>, %arg7: memref<8x800xbf16, #tpu.memory_space<vmem>>, %arg8: memref<8x1xf32, #tpu.memory_space<vmem>>, %arg9: memref<1x1x384xf32, #tpu.memory_space<vmem>>, %arg10: memref<64x640xbf16, #tpu.memory_space<vmem>>, %arg11: memref<32x640xbf16, #tpu.memory_space<vmem>>, %arg12: memref<1600x384xbf16, #tpu.memory_space<vmem>>, %arg13: memref<88x384xf32, #tpu.memory_space<vmem>>) attributes {dimension_semantics = [#tpu.dimension_semantics<parallel>], iteration_bounds = array<i64: 2>, scalar_prefetch = 0 : i64, scratch_operands = 4 : i64, tpu.core_type = #tpu.core_type<tc>, window_params = [{transform_indices = @transform_0, window_bounds = array<i64: 1, 1, 640>}, {pipeline_mode = #tpu.pipeline_mode<synchronous>, transform_indices = @transform_1, window_bounds = array<i64: 1, 384>}, {pipeline_mode = #tpu.pipeline_mode<synchronous>, transform_indices = @transform_2, window_bounds = array<i64: 64, 88>}, {pipeline_mode = #tpu.pipeline_mode<synchronous>, transform_indices = @transform_3, window_bounds = array<i64: 64, 1>}, {pipeline_mode = #tpu.pipeline_mode<synchronous>, transform_indices = @transform_4, window_bounds = array<i64: 32, 1600>}, {pipeline_mode = #tpu.pipeline_mode<synchronous>, transform_indices = @transform_5, window_bounds = array<i64: 32, 1>}, {pipeline_mode = #tpu.pipeline_mode<synchronous>, transform_indices = @transform_6, window_bounds = array<i64: 8, 800>}, {pipeline_mode = #tpu.pipeline_mode<synchronous>, transform_indices = @transform_7, window_bounds = array<i64: 8, 1>}, {transform_indices = @transform_8, window_bounds = array<i64: 1, 1, 384>}]} {
    %c0 = arith.constant 0 : index
    %c0_0 = arith.constant 0 : index
    %0 = vector.load %arg2[%c0, %c0_0] : memref<1x384xf32, #tpu.memory_space<vmem>>, vector<1x384xf32>
    %c0_1 = arith.constant 0 : index
    %c0_2 = arith.constant 0 : index
    %c0_3 = arith.constant 0 : index
    %1 = vector.load %arg1[%c0_1, %c0_2, %c0_3] : memref<1x1x640xf32, #tpu.memory_space<vmem>>, vector<1x1x640xf32>
    %2 = vector.shape_cast %1 : vector<1x1x640xf32> to vector<1x640xf32>
    %cst = arith.constant 0.000000e+00 : f32
    %3 = vector.broadcast %cst : f32 to vector<8x384xf32>
    %c80 = arith.constant 80 : index
    %c0_4 = arith.constant 0 : index
    %4 = vector.load %arg13[%c80, %c0_4] : memref<88x384xf32, #tpu.memory_space<vmem>>, vector<8x384xf32>
    tpu.vector_store %arg13[%c80, %c0_4], %3 {strides = array<i32>} : memref<88x384xf32, #tpu.memory_space<vmem>>, vector<8x384xf32>,
    %5 = vector.extract_strided_slice %2 {offsets = [0, 0], sizes = [1, 384], strides = [1, 1]} : vector<1x640xf32> to vector<1x384xf32>
    %c0_5 = arith.constant 0 : index
    %c0_6 = arith.constant 0 : index
    %6 = vector.load %arg13[%c0_5, %c0_6] : memref<88x384xf32, #tpu.memory_space<vmem>>, vector<1x384xf32>
    tpu.vector_store %arg13[%c0_5, %c0_6], %5 {strides = array<i32>} : memref<88x384xf32, #tpu.memory_space<vmem>>, vector<1x384xf32>,
    %7 = vector.extract_strided_slice %2 {offsets = [0, 1], sizes = [1, 384], strides = [1, 1]} : vector<1x640xf32> to vector<1x384xf32>
    %c1 = arith.constant 1 : index
    %c0_7 = arith.constant 0 : index
    %8 = vector.load %arg13[%c1, %c0_7] : memref<88x384xf32, #tpu.memory_space<vmem>>, vector<1x384xf32>
    tpu.vector_store %arg13[%c1, %c0_7], %7 {strides = array<i32>} : memref<88x384xf32, #tpu.memory_space<vmem>>, vector<1x384xf32>,
    %9 = vector.extract_strided_slice %2 {offsets = [0, 2], sizes = [1, 384], strides = [1, 1]} : vector<1x640xf32> to vector<1x384xf32>
    %c2 = arith.constant 2 : index
    %c0_8 = arith.constant 0 : index
    %10 = vector.load %arg13[%c2, %c0_8] : memref<88x384xf32, #tpu.memory_space<vmem>>, vector<1x384xf32>
    tpu.vector_store %arg13[%c2, %c0_8], %9 {strides = array<i32>} : memref<88x384xf32, #tpu.memory_space<vmem>>, vector<1x384xf32>,
    %11 = vector.extract_strided_slice %2 {offsets = [0, 3], sizes = [1, 384], strides = [1, 1]} : vector<1x640xf32> to vector<1x384xf32>
    %c3 = arith.constant 3 : index
    %c0_9 = arith.constant 0 : index
    %12 = vector.load %arg13[%c3, %c0_9] : memref<88x384xf32, #tpu.memory_space<vmem>>, vector<1x384xf32>
    tpu.vector_store %arg13[%c3, %c0_9], %11 {strides = array<i32>} : memref<88x384xf32, #tpu.memory_space<vmem>>, vector<1x384xf32>,
    %13 = vector.extract_strided_slice %2 {offsets = [0, 4], sizes = [1, 384], strides = [1, 1]} : vector<1x640xf32> to vector<1x384xf32>
    %c4 = arith.constant 4 : index
    %c0_10 = arith.constant 0 : index
    %14 = vector.load %arg13[%c4, %c0_10] : memref<88x384xf32, #tpu.memory_space<vmem>>, vector<1x384xf32>
    tpu.vector_store %arg13[%c4, %c0_10], %13 {strides = array<i32>} : memref<88x384xf32, #tpu.memory_space<vmem>>, vector<1x384xf32>,
    %15 = vector.extract_strided_slice %2 {offsets = [0, 5], sizes = [1, 384], strides = [1, 1]} : vector<1x640xf32> to vector<1x384xf32>
    %c5 = arith.constant 5 : index
    %c0_11 = arith.constant 0 : index
    %16 = vector.load %arg13[%c5, %c0_11] : memref<88x384xf32, #tpu.memory_space<vmem>>, vector<1x384xf32>
    tpu.vector_store %arg13[%c5, %c0_11], %15 {strides = array<i32>} : memref<88x384xf32, #tpu.memory_space<vmem>>, vector<1x384xf32>,
    %17 = vector.extract_strided_slice %2 {offsets = [0, 6], sizes = [1, 384], strides = [1, 1]} : vector<1x640xf32> to vector<1x384xf32>
    %c6 = arith.constant 6 : index
    %c0_12 = arith.constant 0 : index
    %18 = vector.load %arg13[%c6, %c0_12] : memref<88x384xf32, #tpu.memory_space<vmem>>, vector<1x384xf32>
    tpu.vector_store %arg13[%c6, %c0_12], %17 {strides = array<i32>} : memref<88x384xf32, #tpu.memory_space<vmem>>, vector<1x384xf32>,
    %19 = vector.extract_strided_slice %2 {offsets = [0, 7], sizes = [1, 384], strides = [1, 1]} : vector<1x640xf32> to vector<1x384xf32>
    %c7 = arith.constant 7 : index
    %c0_13 = arith.constant 0 : index
    %20 = vector.load %arg13[%c7, %c0_13] : memref<88x384xf32, #tpu.memory_space<vmem>>, vector<1x384xf32>
    tpu.vector_store %arg13[%c7, %c0_13], %19 {strides = array<i32>} : memref<88x384xf32, #tpu.memory_space<vmem>>, vector<1x384xf32>,
    %21 = vector.extract_strided_slice %2 {offsets = [0, 8], sizes = [1, 384], strides = [1, 1]} : vector<1x640xf32> to vector<1x384xf32>
    %c8 = arith.constant 8 : index
    %c0_14 = arith.constant 0 : index
    %22 = vector.load %arg13[%c8, %c0_14] : memref<88x384xf32, #tpu.memory_space<vmem>>, vector<1x384xf32>
    tpu.vector_store %arg13[%c8, %c0_14], %21 {strides = array<i32>} : memref<88x384xf32, #tpu.memory_space<vmem>>, vector<1x384xf32>,
    %23 = vector.extract_strided_slice %2 {offsets = [0, 24], sizes = [1, 384], strides = [1, 1]} : vector<1x640xf32> to vector<1x384xf32>
    %c9 = arith.constant 9 : index
    %c0_15 = arith.constant 0 : index
    %24 = vector.load %arg13[%c9, %c0_15] : memref<88x384xf32, #tpu.memory_space<vmem>>, vector<1x384xf32>
    tpu.vector_store %arg13[%c9, %c0_15], %23 {strides = array<i32>} : memref<88x384xf32, #tpu.memory_space<vmem>>, vector<1x384xf32>,
    %25 = vector.extract_strided_slice %2 {offsets = [0, 25], sizes = [1, 384], strides = [1, 1]} : vector<1x640xf32> to vector<1x384xf32>
    %c10 = arith.constant 10 : index
    %c0_16 = arith.constant 0 : index
    %26 = vector.load %arg13[%c10, %c0_16] : memref<88x384xf32, #tpu.memory_space<vmem>>, vector<1x384xf32>
    tpu.vector_store %arg13[%c10, %c0_16], %25 {strides = array<i32>} : memref<88x384xf32, #tpu.memory_space<vmem>>, vector<1x384xf32>,
    %27 = vector.extract_strided_slice %2 {offsets = [0, 26], sizes = [1, 384], strides = [1, 1]} : vector<1x640xf32> to vector<1x384xf32>
    %c11 = arith.constant 11 : index
    %c0_17 = arith.constant 0 : index
    %28 = vector.load %arg13[%c11, %c0_17] : memref<88x384xf32, #tpu.memory_space<vmem>>, vector<1x384xf32>
    tpu.vector_store %arg13[%c11, %c0_17], %27 {strides = array<i32>} : memref<88x384xf32, #tpu.memory_space<vmem>>, vector<1x384xf32>,
    %29 = vector.extract_strided_slice %2 {offsets = [0, 27], sizes = [1, 384], strides = [1, 1]} : vector<1x640xf32> to vector<1x384xf32>
    %c12 = arith.constant 12 : index
    %c0_18 = arith.constant 0 : index
    %30 = vector.load %arg13[%c12, %c0_18] : memref<88x384xf32, #tpu.memory_space<vmem>>, vector<1x384xf32>
    tpu.vector_store %arg13[%c12, %c0_18], %29 {strides = array<i32>} : memref<88x384xf32, #tpu.memory_space<vmem>>, vector<1x384xf32>,
    %31 = vector.extract_strided_slice %2 {offsets = [0, 28], sizes = [1, 384], strides = [1, 1]} : vector<1x640xf32> to vector<1x384xf32>
    %c13 = arith.constant 13 : index
    %c0_19 = arith.constant 0 : index
    %32 = vector.load %arg13[%c13, %c0_19] : memref<88x384xf32, #tpu.memory_space<vmem>>, vector<1x384xf32>
    tpu.vector_store %arg13[%c13, %c0_19], %31 {strides = array<i32>} : memref<88x384xf32, #tpu.memory_space<vmem>>, vector<1x384xf32>,
    %33 = vector.extract_strided_slice %2 {offsets = [0, 29], sizes = [1, 384], strides = [1, 1]} : vector<1x640xf32> to vector<1x384xf32>
    %c14 = arith.constant 14 : index
    %c0_20 = arith.constant 0 : index
    %34 = vector.load %arg13[%c14, %c0_20] : memref<88x384xf32, #tpu.memory_space<vmem>>, vector<1x384xf32>
    tpu.vector_store %arg13[%c14, %c0_20], %33 {strides = array<i32>} : memref<88x384xf32, #tpu.memory_space<vmem>>, vector<1x384xf32>,
    %35 = vector.extract_strided_slice %2 {offsets = [0, 30], sizes = [1, 384], strides = [1, 1]} : vector<1x640xf32> to vector<1x384xf32>
    %c15 = arith.constant 15 : index
    %c0_21 = arith.constant 0 : index
    %36 = vector.load %arg13[%c15, %c0_21] : memref<88x384xf32, #tpu.memory_space<vmem>>, vector<1x384xf32>
    tpu.vector_store %arg13[%c15, %c0_21], %35 {strides = array<i32>} : memref<88x384xf32, #tpu.memory_space<vmem>>, vector<1x384xf32>,
    %37 = vector.extract_strided_slice %2 {offsets = [0, 31], sizes = [1, 384], strides = [1, 1]} : vector<1x640xf32> to vector<1x384xf32>
    %c16 = arith.constant 16 : index
    %c0_22 = arith.constant 0 : index
    %38 = vector.load %arg13[%c16, %c0_22] : memref<88x384xf32, #tpu.memory_space<vmem>>, vector<1x384xf32>
    tpu.vector_store %arg13[%c16, %c0_22], %37 {strides = array<i32>} : memref<88x384xf32, #tpu.memory_space<vmem>>, vector<1x384xf32>,
    %39 = vector.extract_strided_slice %2 {offsets = [0, 32], sizes = [1, 384], strides = [1, 1]} : vector<1x640xf32> to vector<1x384xf32>
    %c17 = arith.constant 17 : index
    %c0_23 = arith.constant 0 : index
    %40 = vector.load %arg13[%c17, %c0_23] : memref<88x384xf32, #tpu.memory_space<vmem>>, vector<1x384xf32>
    tpu.vector_store %arg13[%c17, %c0_23], %39 {strides = array<i32>} : memref<88x384xf32, #tpu.memory_space<vmem>>, vector<1x384xf32>,
    %41 = vector.extract_strided_slice %2 {offsets = [0, 48], sizes = [1, 384], strides = [1, 1]} : vector<1x640xf32> to vector<1x384xf32>
    %c18 = arith.constant 18 : index
    %c0_24 = arith.constant 0 : index
    %42 = vector.load %arg13[%c18, %c0_24] : memref<88x384xf32, #tpu.memory_space<vmem>>, vector<1x384xf32>
    tpu.vector_store %arg13[%c18, %c0_24], %41 {strides = array<i32>} : memref<88x384xf32, #tpu.memory_space<vmem>>, vector<1x384xf32>,
    %43 = vector.extract_strided_slice %2 {offsets = [0, 49], sizes = [1, 384], strides = [1, 1]} : vector<1x640xf32> to vector<1x384xf32>
    %c19 = arith.constant 19 : index
    %c0_25 = arith.constant 0 : index
    %44 = vector.load %arg13[%c19, %c0_25] : memref<88x384xf32, #tpu.memory_space<vmem>>, vector<1x384xf32>
    tpu.vector_store %arg13[%c19, %c0_25], %43 {strides = array<i32>} : memref<88x384xf32, #tpu.memory_space<vmem>>, vector<1x384xf32>,
    %45 = vector.extract_strided_slice %2 {offsets = [0, 50], sizes = [1, 384], strides = [1, 1]} : vector<1x640xf32> to vector<1x384xf32>
    %c20 = arith.constant 20 : index
    %c0_26 = arith.constant 0 : index
    %46 = vector.load %arg13[%c20, %c0_26] : memref<88x384xf32, #tpu.memory_space<vmem>>, vector<1x384xf32>
    tpu.vector_store %arg13[%c20, %c0_26], %45 {strides = array<i32>} : memref<88x384xf32, #tpu.memory_space<vmem>>, vector<1x384xf32>,
    %47 = vector.extract_strided_slice %2 {offsets = [0, 51], sizes = [1, 384], strides = [1, 1]} : vector<1x640xf32> to vector<1x384xf32>
    %c21 = arith.constant 21 : index
    %c0_27 = arith.constant 0 : index
    %48 = vector.load %arg13[%c21, %c0_27] : memref<88x384xf32, #tpu.memory_space<vmem>>, vector<1x384xf32>
    tpu.vector_store %arg13[%c21, %c0_27], %47 {strides = array<i32>} : memref<88x384xf32, #tpu.memory_space<vmem>>, vector<1x384xf32>,
    %49 = vector.extract_strided_slice %2 {offsets = [0, 52], sizes = [1, 384], strides = [1, 1]} : vector<1x640xf32> to vector<1x384xf32>
    %c22 = arith.constant 22 : index
    %c0_28 = arith.constant 0 : index
    %50 = vector.load %arg13[%c22, %c0_28] : memref<88x384xf32, #tpu.memory_space<vmem>>, vector<1x384xf32>
    tpu.vector_store %arg13[%c22, %c0_28], %49 {strides = array<i32>} : memref<88x384xf32, #tpu.memory_space<vmem>>, vector<1x384xf32>,
    %51 = vector.extract_strided_slice %2 {offsets = [0, 53], sizes = [1, 384], strides = [1, 1]} : vector<1x640xf32> to vector<1x384xf32>
    %c23 = arith.constant 23 : index
    %c0_29 = arith.constant 0 : index
    %52 = vector.load %arg13[%c23, %c0_29] : memref<88x384xf32, #tpu.memory_space<vmem>>, vector<1x384xf32>
    tpu.vector_store %arg13[%c23, %c0_29], %51 {strides = array<i32>} : memref<88x384xf32, #tpu.memory_space<vmem>>, vector<1x384xf32>,
    %53 = vector.extract_strided_slice %2 {offsets = [0, 54], sizes = [1, 384], strides = [1, 1]} : vector<1x640xf32> to vector<1x384xf32>
    %c24 = arith.constant 24 : index
    %c0_30 = arith.constant 0 : index
    %54 = vector.load %arg13[%c24, %c0_30] : memref<88x384xf32, #tpu.memory_space<vmem>>, vector<1x384xf32>
    tpu.vector_store %arg13[%c24, %c0_30], %53 {strides = array<i32>} : memref<88x384xf32, #tpu.memory_space<vmem>>, vector<1x384xf32>,
    %55 = vector.extract_strided_slice %2 {offsets = [0, 55], sizes = [1, 384], strides = [1, 1]} : vector<1x640xf32> to vector<1x384xf32>
    %c25 = arith.constant 25 : index
    %c0_31 = arith.constant 0 : index
    %56 = vector.load %arg13[%c25, %c0_31] : memref<88x384xf32, #tpu.memory_space<vmem>>, vector<1x384xf32>
    tpu.vector_store %arg13[%c25, %c0_31], %55 {strides = array<i32>} : memref<88x384xf32, #tpu.memory_space<vmem>>, vector<1x384xf32>,
    %57 = vector.extract_strided_slice %2 {offsets = [0, 56], sizes = [1, 384], strides = [1, 1]} : vector<1x640xf32> to vector<1x384xf32>
    %c26 = arith.constant 26 : index
    %c0_32 = arith.constant 0 : index
    %58 = vector.load %arg13[%c26, %c0_32] : memref<88x384xf32, #tpu.memory_space<vmem>>, vector<1x384xf32>
    tpu.vector_store %arg13[%c26, %c0_32], %57 {strides = array<i32>} : memref<88x384xf32, #tpu.memory_space<vmem>>, vector<1x384xf32>,
    %59 = vector.extract_strided_slice %2 {offsets = [0, 72], sizes = [1, 384], strides = [1, 1]} : vector<1x640xf32> to vector<1x384xf32>
    %c27 = arith.constant 27 : index
    %c0_33 = arith.constant 0 : index
    %60 = vector.load %arg13[%c27, %c0_33] : memref<88x384xf32, #tpu.memory_space<vmem>>, vector<1x384xf32>
    tpu.vector_store %arg13[%c27, %c0_33], %59 {strides = array<i32>} : memref<88x384xf32, #tpu.memory_space<vmem>>, vector<1x384xf32>,
    %61 = vector.extract_strided_slice %2 {offsets = [0, 73], sizes = [1, 384], strides = [1, 1]} : vector<1x640xf32> to vector<1x384xf32>
    %c28 = arith.constant 28 : index
    %c0_34 = arith.constant 0 : index
    %62 = vector.load %arg13[%c28, %c0_34] : memref<88x384xf32, #tpu.memory_space<vmem>>, vector<1x384xf32>
    tpu.vector_store %arg13[%c28, %c0_34], %61 {strides = array<i32>} : memref<88x384xf32, #tpu.memory_space<vmem>>, vector<1x384xf32>,
    %63 = vector.extract_strided_slice %2 {offsets = [0, 74], sizes = [1, 384], strides = [1, 1]} : vector<1x640xf32> to vector<1x384xf32>
    %c29 = arith.constant 29 : index
    %c0_35 = arith.constant 0 : index
    %64 = vector.load %arg13[%c29, %c0_35] : memref<88x384xf32, #tpu.memory_space<vmem>>, vector<1x384xf32>
    tpu.vector_store %arg13[%c29, %c0_35], %63 {strides = array<i32>} : memref<88x384xf32, #tpu.memory_space<vmem>>, vector<1x384xf32>,
    %65 = vector.extract_strided_slice %2 {offsets = [0, 75], sizes = [1, 384], strides = [1, 1]} : vector<1x640xf32> to vector<1x384xf32>
    %c30 = arith.constant 30 : index
    %c0_36 = arith.constant 0 : index
    %66 = vector.load %arg13[%c30, %c0_36] : memref<88x384xf32, #tpu.memory_space<vmem>>, vector<1x384xf32>
    tpu.vector_store %arg13[%c30, %c0_36], %65 {strides = array<i32>} : memref<88x384xf32, #tpu.memory_space<vmem>>, vector<1x384xf32>,
    %67 = vector.extract_strided_slice %2 {offsets = [0, 76], sizes = [1, 384], strides = [1, 1]} : vector<1x640xf32> to vector<1x384xf32>
    %c31 = arith.constant 31 : index
    %c0_37 = arith.constant 0 : index
    %68 = vector.load %arg13[%c31, %c0_37] : memref<88x384xf32, #tpu.memory_space<vmem>>, vector<1x384xf32>
    tpu.vector_store %arg13[%c31, %c0_37], %67 {strides = array<i32>} : memref<88x384xf32, #tpu.memory_space<vmem>>, vector<1x384xf32>,
    %69 = vector.extract_strided_slice %2 {offsets = [0, 77], sizes = [1, 384], strides = [1, 1]} : vector<1x640xf32> to vector<1x384xf32>
    %c32 = arith.constant 32 : index
    %c0_38 = arith.constant 0 : index
    %70 = vector.load %arg13[%c32, %c0_38] : memref<88x384xf32, #tpu.memory_space<vmem>>, vector<1x384xf32>
    tpu.vector_store %arg13[%c32, %c0_38], %69 {strides = array<i32>} : memref<88x384xf32, #tpu.memory_space<vmem>>, vector<1x384xf32>,
    %71 = vector.extract_strided_slice %2 {offsets = [0, 78], sizes = [1, 384], strides = [1, 1]} : vector<1x640xf32> to vector<1x384xf32>
    %c33 = arith.constant 33 : index
    %c0_39 = arith.constant 0 : index
    %72 = vector.load %arg13[%c33, %c0_39] : memref<88x384xf32, #tpu.memory_space<vmem>>, vector<1x384xf32>
    tpu.vector_store %arg13[%c33, %c0_39], %71 {strides = array<i32>} : memref<88x384xf32, #tpu.memory_space<vmem>>, vector<1x384xf32>,
    %73 = vector.extract_strided_slice %2 {offsets = [0, 79], sizes = [1, 384], strides = [1, 1]} : vector<1x640xf32> to vector<1x384xf32>
    %c34 = arith.constant 34 : index
    %c0_40 = arith.constant 0 : index
    %74 = vector.load %arg13[%c34, %c0_40] : memref<88x384xf32, #tpu.memory_space<vmem>>, vector<1x384xf32>
    tpu.vector_store %arg13[%c34, %c0_40], %73 {strides = array<i32>} : memref<88x384xf32, #tpu.memory_space<vmem>>, vector<1x384xf32>,
    %75 = vector.extract_strided_slice %2 {offsets = [0, 80], sizes = [1, 384], strides = [1, 1]} : vector<1x640xf32> to vector<1x384xf32>
    %c35 = arith.constant 35 : index
    %c0_41 = arith.constant 0 : index
    %76 = vector.load %arg13[%c35, %c0_41] : memref<88x384xf32, #tpu.memory_space<vmem>>, vector<1x384xf32>
    tpu.vector_store %arg13[%c35, %c0_41], %75 {strides = array<i32>} : memref<88x384xf32, #tpu.memory_space<vmem>>, vector<1x384xf32>,
    %77 = vector.extract_strided_slice %2 {offsets = [0, 96], sizes = [1, 384], strides = [1, 1]} : vector<1x640xf32> to vector<1x384xf32>
    %c36 = arith.constant 36 : index
    %c0_42 = arith.constant 0 : index
    %78 = vector.load %arg13[%c36, %c0_42] : memref<88x384xf32, #tpu.memory_space<vmem>>, vector<1x384xf32>
    tpu.vector_store %arg13[%c36, %c0_42], %77 {strides = array<i32>} : memref<88x384xf32, #tpu.memory_space<vmem>>, vector<1x384xf32>,
    %79 = vector.extract_strided_slice %2 {offsets = [0, 97], sizes = [1, 384], strides = [1, 1]} : vector<1x640xf32> to vector<1x384xf32>
    %c37 = arith.constant 37 : index
    %c0_43 = arith.constant 0 : index
    %80 = vector.load %arg13[%c37, %c0_43] : memref<88x384xf32, #tpu.memory_space<vmem>>, vector<1x384xf32>
    tpu.vector_store %arg13[%c37, %c0_43], %79 {strides = array<i32>} : memref<88x384xf32, #tpu.memory_space<vmem>>, vector<1x384xf32>,
    %81 = vector.extract_strided_slice %2 {offsets = [0, 98], sizes = [1, 384], strides = [1, 1]} : vector<1x640xf32> to vector<1x384xf32>
    %c38 = arith.constant 38 : index
    %c0_44 = arith.constant 0 : index
    %82 = vector.load %arg13[%c38, %c0_44] : memref<88x384xf32, #tpu.memory_space<vmem>>, vector<1x384xf32>
    tpu.vector_store %arg13[%c38, %c0_44], %81 {strides = array<i32>} : memref<88x384xf32, #tpu.memory_space<vmem>>, vector<1x384xf32>,
    %83 = vector.extract_strided_slice %2 {offsets = [0, 99], sizes = [1, 384], strides = [1, 1]} : vector<1x640xf32> to vector<1x384xf32>
    %c39 = arith.constant 39 : index
    %c0_45 = arith.constant 0 : index
    %84 = vector.load %arg13[%c39, %c0_45] : memref<88x384xf32, #tpu.memory_space<vmem>>, vector<1x384xf32>
    tpu.vector_store %arg13[%c39, %c0_45], %83 {strides = array<i32>} : memref<88x384xf32, #tpu.memory_space<vmem>>, vector<1x384xf32>,
    %85 = vector.extract_strided_slice %2 {offsets = [0, 100], sizes = [1, 384], strides = [1, 1]} : vector<1x640xf32> to vector<1x384xf32>
    %c40 = arith.constant 40 : index
    %c0_46 = arith.constant 0 : index
    %86 = vector.load %arg13[%c40, %c0_46] : memref<88x384xf32, #tpu.memory_space<vmem>>, vector<1x384xf32>
    tpu.vector_store %arg13[%c40, %c0_46], %85 {strides = array<i32>} : memref<88x384xf32, #tpu.memory_space<vmem>>, vector<1x384xf32>,
    %87 = vector.extract_strided_slice %2 {offsets = [0, 101], sizes = [1, 384], strides = [1, 1]} : vector<1x640xf32> to vector<1x384xf32>
    %c41 = arith.constant 41 : index
    %c0_47 = arith.constant 0 : index
    %88 = vector.load %arg13[%c41, %c0_47] : memref<88x384xf32, #tpu.memory_space<vmem>>, vector<1x384xf32>
    tpu.vector_store %arg13[%c41, %c0_47], %87 {strides = array<i32>} : memref<88x384xf32, #tpu.memory_space<vmem>>, vector<1x384xf32>,
    %89 = vector.extract_strided_slice %2 {offsets = [0, 102], sizes = [1, 384], strides = [1, 1]} : vector<1x640xf32> to vector<1x384xf32>
    %c42 = arith.constant 42 : index
    %c0_48 = arith.constant 0 : index
    %90 = vector.load %arg13[%c42, %c0_48] : memref<88x384xf32, #tpu.memory_space<vmem>>, vector<1x384xf32>
    tpu.vector_store %arg13[%c42, %c0_48], %89 {strides = array<i32>} : memref<88x384xf32, #tpu.memory_space<vmem>>, vector<1x384xf32>,
    %91 = vector.extract_strided_slice %2 {offsets = [0, 103], sizes = [1, 384], strides = [1, 1]} : vector<1x640xf32> to vector<1x384xf32>
    %c43 = arith.constant 43 : index
    %c0_49 = arith.constant 0 : index
    %92 = vector.load %arg13[%c43, %c0_49] : memref<88x384xf32, #tpu.memory_space<vmem>>, vector<1x384xf32>
    tpu.vector_store %arg13[%c43, %c0_49], %91 {strides = array<i32>} : memref<88x384xf32, #tpu.memory_space<vmem>>, vector<1x384xf32>,
    %93 = vector.extract_strided_slice %2 {offsets = [0, 104], sizes = [1, 384], strides = [1, 1]} : vector<1x640xf32> to vector<1x384xf32>
    %c44 = arith.constant 44 : index
    %c0_50 = arith.constant 0 : index
    %94 = vector.load %arg13[%c44, %c0_50] : memref<88x384xf32, #tpu.memory_space<vmem>>, vector<1x384xf32>
    tpu.vector_store %arg13[%c44, %c0_50], %93 {strides = array<i32>} : memref<88x384xf32, #tpu.memory_space<vmem>>, vector<1x384xf32>,
    %95 = vector.extract_strided_slice %2 {offsets = [0, 120], sizes = [1, 384], strides = [1, 1]} : vector<1x640xf32> to vector<1x384xf32>
    %c45 = arith.constant 45 : index
    %c0_51 = arith.constant 0 : index
    %96 = vector.load %arg13[%c45, %c0_51] : memref<88x384xf32, #tpu.memory_space<vmem>>, vector<1x384xf32>
    tpu.vector_store %arg13[%c45, %c0_51], %95 {strides = array<i32>} : memref<88x384xf32, #tpu.memory_space<vmem>>, vector<1x384xf32>,
    %97 = vector.extract_strided_slice %2 {offsets = [0, 121], sizes = [1, 384], strides = [1, 1]} : vector<1x640xf32> to vector<1x384xf32>
    %c46 = arith.constant 46 : index
    %c0_52 = arith.constant 0 : index
    %98 = vector.load %arg13[%c46, %c0_52] : memref<88x384xf32, #tpu.memory_space<vmem>>, vector<1x384xf32>
    tpu.vector_store %arg13[%c46, %c0_52], %97 {strides = array<i32>} : memref<88x384xf32, #tpu.memory_space<vmem>>, vector<1x384xf32>,
    %99 = vector.extract_strided_slice %2 {offsets = [0, 122], sizes = [1, 384], strides = [1, 1]} : vector<1x640xf32> to vector<1x384xf32>
    %c47 = arith.constant 47 : index
    %c0_53 = arith.constant 0 : index
    %100 = vector.load %arg13[%c47, %c0_53] : memref<88x384xf32, #tpu.memory_space<vmem>>, vector<1x384xf32>
    tpu.vector_store %arg13[%c47, %c0_53], %99 {strides = array<i32>} : memref<88x384xf32, #tpu.memory_space<vmem>>, vector<1x384xf32>,
    %101 = vector.extract_strided_slice %2 {offsets = [0, 123], sizes = [1, 384], strides = [1, 1]} : vector<1x640xf32> to vector<1x384xf32>
    %c48 = arith.constant 48 : index
    %c0_54 = arith.constant 0 : index
    %102 = vector.load %arg13[%c48, %c0_54] : memref<88x384xf32, #tpu.memory_space<vmem>>, vector<1x384xf32>
    tpu.vector_store %arg13[%c48, %c0_54], %101 {strides = array<i32>} : memref<88x384xf32, #tpu.memory_space<vmem>>, vector<1x384xf32>,
    %103 = vector.extract_strided_slice %2 {offsets = [0, 124], sizes = [1, 384], strides = [1, 1]} : vector<1x640xf32> to vector<1x384xf32>
    %c49 = arith.constant 49 : index
    %c0_55 = arith.constant 0 : index
    %104 = vector.load %arg13[%c49, %c0_55] : memref<88x384xf32, #tpu.memory_space<vmem>>, vector<1x384xf32>
    tpu.vector_store %arg13[%c49, %c0_55], %103 {strides = array<i32>} : memref<88x384xf32, #tpu.memory_space<vmem>>, vector<1x384xf32>,
    %105 = vector.extract_strided_slice %2 {offsets = [0, 125], sizes = [1, 384], strides = [1, 1]} : vector<1x640xf32> to vector<1x384xf32>
    %c50 = arith.constant 50 : index
    %c0_56 = arith.constant 0 : index
    %106 = vector.load %arg13[%c50, %c0_56] : memref<88x384xf32, #tpu.memory_space<vmem>>, vector<1x384xf32>
    tpu.vector_store %arg13[%c50, %c0_56], %105 {strides = array<i32>} : memref<88x384xf32, #tpu.memory_space<vmem>>, vector<1x384xf32>,
    %107 = vector.extract_strided_slice %2 {offsets = [0, 126], sizes = [1, 384], strides = [1, 1]} : vector<1x640xf32> to vector<1x384xf32>
    %c51 = arith.constant 51 : index
    %c0_57 = arith.constant 0 : index
    %108 = vector.load %arg13[%c51, %c0_57] : memref<88x384xf32, #tpu.memory_space<vmem>>, vector<1x384xf32>
    tpu.vector_store %arg13[%c51, %c0_57], %107 {strides = array<i32>} : memref<88x384xf32, #tpu.memory_space<vmem>>, vector<1x384xf32>,
    %109 = vector.extract_strided_slice %2 {offsets = [0, 127], sizes = [1, 384], strides = [1, 1]} : vector<1x640xf32> to vector<1x384xf32>
    %c52 = arith.constant 52 : index
    %c0_58 = arith.constant 0 : index
    %110 = vector.load %arg13[%c52, %c0_58] : memref<88x384xf32, #tpu.memory_space<vmem>>, vector<1x384xf32>
    tpu.vector_store %arg13[%c52, %c0_58], %109 {strides = array<i32>} : memref<88x384xf32, #tpu.memory_space<vmem>>, vector<1x384xf32>,
    %111 = vector.extract_strided_slice %2 {offsets = [0, 128], sizes = [1, 384], strides = [1, 1]} : vector<1x640xf32> to vector<1x384xf32>
    %c53 = arith.constant 53 : index
    %c0_59 = arith.constant 0 : index
    %112 = vector.load %arg13[%c53, %c0_59] : memref<88x384xf32, #tpu.memory_space<vmem>>, vector<1x384xf32>
    tpu.vector_store %arg13[%c53, %c0_59], %111 {strides = array<i32>} : memref<88x384xf32, #tpu.memory_space<vmem>>, vector<1x384xf32>,
    %113 = vector.extract_strided_slice %2 {offsets = [0, 144], sizes = [1, 384], strides = [1, 1]} : vector<1x640xf32> to vector<1x384xf32>
    %c54 = arith.constant 54 : index
    %c0_60 = arith.constant 0 : index
    %114 = vector.load %arg13[%c54, %c0_60] : memref<88x384xf32, #tpu.memory_space<vmem>>, vector<1x384xf32>
    tpu.vector_store %arg13[%c54, %c0_60], %113 {strides = array<i32>} : memref<88x384xf32, #tpu.memory_space<vmem>>, vector<1x384xf32>,
    %115 = vector.extract_strided_slice %2 {offsets = [0, 145], sizes = [1, 384], strides = [1, 1]} : vector<1x640xf32> to vector<1x384xf32>
    %c55 = arith.constant 55 : index
    %c0_61 = arith.constant 0 : index
    %116 = vector.load %arg13[%c55, %c0_61] : memref<88x384xf32, #tpu.memory_space<vmem>>, vector<1x384xf32>
    tpu.vector_store %arg13[%c55, %c0_61], %115 {strides = array<i32>} : memref<88x384xf32, #tpu.memory_space<vmem>>, vector<1x384xf32>,
    %117 = vector.extract_strided_slice %2 {offsets = [0, 146], sizes = [1, 384], strides = [1, 1]} : vector<1x640xf32> to vector<1x384xf32>
    %c56 = arith.constant 56 : index
    %c0_62 = arith.constant 0 : index
    %118 = vector.load %arg13[%c56, %c0_62] : memref<88x384xf32, #tpu.memory_space<vmem>>, vector<1x384xf32>
    tpu.vector_store %arg13[%c56, %c0_62], %117 {strides = array<i32>} : memref<88x384xf32, #tpu.memory_space<vmem>>, vector<1x384xf32>,
    %119 = vector.extract_strided_slice %2 {offsets = [0, 147], sizes = [1, 384], strides = [1, 1]} : vector<1x640xf32> to vector<1x384xf32>
    %c57 = arith.constant 57 : index
    %c0_63 = arith.constant 0 : index
    %120 = vector.load %arg13[%c57, %c0_63] : memref<88x384xf32, #tpu.memory_space<vmem>>, vector<1x384xf32>
    tpu.vector_store %arg13[%c57, %c0_63], %119 {strides = array<i32>} : memref<88x384xf32, #tpu.memory_space<vmem>>, vector<1x384xf32>,
    %121 = vector.extract_strided_slice %2 {offsets = [0, 148], sizes = [1, 384], strides = [1, 1]} : vector<1x640xf32> to vector<1x384xf32>
    %c58 = arith.constant 58 : index
    %c0_64 = arith.constant 0 : index
    %122 = vector.load %arg13[%c58, %c0_64] : memref<88x384xf32, #tpu.memory_space<vmem>>, vector<1x384xf32>
    tpu.vector_store %arg13[%c58, %c0_64], %121 {strides = array<i32>} : memref<88x384xf32, #tpu.memory_space<vmem>>, vector<1x384xf32>,
    %123 = vector.extract_strided_slice %2 {offsets = [0, 149], sizes = [1, 384], strides = [1, 1]} : vector<1x640xf32> to vector<1x384xf32>
    %c59 = arith.constant 59 : index
    %c0_65 = arith.constant 0 : index
    %124 = vector.load %arg13[%c59, %c0_65] : memref<88x384xf32, #tpu.memory_space<vmem>>, vector<1x384xf32>
    tpu.vector_store %arg13[%c59, %c0_65], %123 {strides = array<i32>} : memref<88x384xf32, #tpu.memory_space<vmem>>, vector<1x384xf32>,
    %125 = vector.extract_strided_slice %2 {offsets = [0, 150], sizes = [1, 384], strides = [1, 1]} : vector<1x640xf32> to vector<1x384xf32>
    %c60 = arith.constant 60 : index
    %c0_66 = arith.constant 0 : index
    %126 = vector.load %arg13[%c60, %c0_66] : memref<88x384xf32, #tpu.memory_space<vmem>>, vector<1x384xf32>
    tpu.vector_store %arg13[%c60, %c0_66], %125 {strides = array<i32>} : memref<88x384xf32, #tpu.memory_space<vmem>>, vector<1x384xf32>,
    %127 = vector.extract_strided_slice %2 {offsets = [0, 151], sizes = [1, 384], strides = [1, 1]} : vector<1x640xf32> to vector<1x384xf32>
    %c61 = arith.constant 61 : index
    %c0_67 = arith.constant 0 : index
    %128 = vector.load %arg13[%c61, %c0_67] : memref<88x384xf32, #tpu.memory_space<vmem>>, vector<1x384xf32>
    tpu.vector_store %arg13[%c61, %c0_67], %127 {strides = array<i32>} : memref<88x384xf32, #tpu.memory_space<vmem>>, vector<1x384xf32>,
    %129 = vector.extract_strided_slice %2 {offsets = [0, 152], sizes = [1, 384], strides = [1, 1]} : vector<1x640xf32> to vector<1x384xf32>
    %c62 = arith.constant 62 : index
    %c0_68 = arith.constant 0 : index
    %130 = vector.load %arg13[%c62, %c0_68] : memref<88x384xf32, #tpu.memory_space<vmem>>, vector<1x384xf32>
    tpu.vector_store %arg13[%c62, %c0_68], %129 {strides = array<i32>} : memref<88x384xf32, #tpu.memory_space<vmem>>, vector<1x384xf32>,
    %131 = vector.extract_strided_slice %2 {offsets = [0, 168], sizes = [1, 384], strides = [1, 1]} : vector<1x640xf32> to vector<1x384xf32>
    %c63 = arith.constant 63 : index
    %c0_69 = arith.constant 0 : index
    %132 = vector.load %arg13[%c63, %c0_69] : memref<88x384xf32, #tpu.memory_space<vmem>>, vector<1x384xf32>
    tpu.vector_store %arg13[%c63, %c0_69], %131 {strides = array<i32>} : memref<88x384xf32, #tpu.memory_space<vmem>>, vector<1x384xf32>,
    %133 = vector.extract_strided_slice %2 {offsets = [0, 169], sizes = [1, 384], strides = [1, 1]} : vector<1x640xf32> to vector<1x384xf32>
    %c64 = arith.constant 64 : index
    %c0_70 = arith.constant 0 : index
    %134 = vector.load %arg13[%c64, %c0_70] : memref<88x384xf32, #tpu.memory_space<vmem>>, vector<1x384xf32>
    tpu.vector_store %arg13[%c64, %c0_70], %133 {strides = array<i32>} : memref<88x384xf32, #tpu.memory_space<vmem>>, vector<1x384xf32>,
    %135 = vector.extract_strided_slice %2 {offsets = [0, 170], sizes = [1, 384], strides = [1, 1]} : vector<1x640xf32> to vector<1x384xf32>
    %c65 = arith.constant 65 : index
    %c0_71 = arith.constant 0 : index
    %136 = vector.load %arg13[%c65, %c0_71] : memref<88x384xf32, #tpu.memory_space<vmem>>, vector<1x384xf32>
    tpu.vector_store %arg13[%c65, %c0_71], %135 {strides = array<i32>} : memref<88x384xf32, #tpu.memory_space<vmem>>, vector<1x384xf32>,
    %137 = vector.extract_strided_slice %2 {offsets = [0, 171], sizes = [1, 384], strides = [1, 1]} : vector<1x640xf32> to vector<1x384xf32>
    %c66 = arith.constant 66 : index
    %c0_72 = arith.constant 0 : index
    %138 = vector.load %arg13[%c66, %c0_72] : memref<88x384xf32, #tpu.memory_space<vmem>>, vector<1x384xf32>
    tpu.vector_store %arg13[%c66, %c0_72], %137 {strides = array<i32>} : memref<88x384xf32, #tpu.memory_space<vmem>>, vector<1x384xf32>,
    %139 = vector.extract_strided_slice %2 {offsets = [0, 172], sizes = [1, 384], strides = [1, 1]} : vector<1x640xf32> to vector<1x384xf32>
    %c67 = arith.constant 67 : index
    %c0_73 = arith.constant 0 : index
    %140 = vector.load %arg13[%c67, %c0_73] : memref<88x384xf32, #tpu.memory_space<vmem>>, vector<1x384xf32>
    tpu.vector_store %arg13[%c67, %c0_73], %139 {strides = array<i32>} : memref<88x384xf32, #tpu.memory_space<vmem>>, vector<1x384xf32>,
    %141 = vector.extract_strided_slice %2 {offsets = [0, 173], sizes = [1, 384], strides = [1, 1]} : vector<1x640xf32> to vector<1x384xf32>
    %c68 = arith.constant 68 : index
    %c0_74 = arith.constant 0 : index
    %142 = vector.load %arg13[%c68, %c0_74] : memref<88x384xf32, #tpu.memory_space<vmem>>, vector<1x384xf32>
    tpu.vector_store %arg13[%c68, %c0_74], %141 {strides = array<i32>} : memref<88x384xf32, #tpu.memory_space<vmem>>, vector<1x384xf32>,
    %143 = vector.extract_strided_slice %2 {offsets = [0, 174], sizes = [1, 384], strides = [1, 1]} : vector<1x640xf32> to vector<1x384xf32>
    %c69 = arith.constant 69 : index
    %c0_75 = arith.constant 0 : index
    %144 = vector.load %arg13[%c69, %c0_75] : memref<88x384xf32, #tpu.memory_space<vmem>>, vector<1x384xf32>
    tpu.vector_store %arg13[%c69, %c0_75], %143 {strides = array<i32>} : memref<88x384xf32, #tpu.memory_space<vmem>>, vector<1x384xf32>,
    %145 = vector.extract_strided_slice %2 {offsets = [0, 175], sizes = [1, 384], strides = [1, 1]} : vector<1x640xf32> to vector<1x384xf32>
    %c70 = arith.constant 70 : index
    %c0_76 = arith.constant 0 : index
    %146 = vector.load %arg13[%c70, %c0_76] : memref<88x384xf32, #tpu.memory_space<vmem>>, vector<1x384xf32>
    tpu.vector_store %arg13[%c70, %c0_76], %145 {strides = array<i32>} : memref<88x384xf32, #tpu.memory_space<vmem>>, vector<1x384xf32>,
    %147 = vector.extract_strided_slice %2 {offsets = [0, 176], sizes = [1, 384], strides = [1, 1]} : vector<1x640xf32> to vector<1x384xf32>
    %c71 = arith.constant 71 : index
    %c0_77 = arith.constant 0 : index
    %148 = vector.load %arg13[%c71, %c0_77] : memref<88x384xf32, #tpu.memory_space<vmem>>, vector<1x384xf32>
    tpu.vector_store %arg13[%c71, %c0_77], %147 {strides = array<i32>} : memref<88x384xf32, #tpu.memory_space<vmem>>, vector<1x384xf32>,
    %149 = vector.extract_strided_slice %2 {offsets = [0, 192], sizes = [1, 384], strides = [1, 1]} : vector<1x640xf32> to vector<1x384xf32>
    %c72 = arith.constant 72 : index
    %c0_78 = arith.constant 0 : index
    %150 = vector.load %arg13[%c72, %c0_78] : memref<88x384xf32, #tpu.memory_space<vmem>>, vector<1x384xf32>
    tpu.vector_store %arg13[%c72, %c0_78], %149 {strides = array<i32>} : memref<88x384xf32, #tpu.memory_space<vmem>>, vector<1x384xf32>,
    %151 = vector.extract_strided_slice %2 {offsets = [0, 193], sizes = [1, 384], strides = [1, 1]} : vector<1x640xf32> to vector<1x384xf32>
    %c73 = arith.constant 73 : index
    %c0_79 = arith.constant 0 : index
    %152 = vector.load %arg13[%c73, %c0_79] : memref<88x384xf32, #tpu.memory_space<vmem>>, vector<1x384xf32>
    tpu.vector_store %arg13[%c73, %c0_79], %151 {strides = array<i32>} : memref<88x384xf32, #tpu.memory_space<vmem>>, vector<1x384xf32>,
    %153 = vector.extract_strided_slice %2 {offsets = [0, 194], sizes = [1, 384], strides = [1, 1]} : vector<1x640xf32> to vector<1x384xf32>
    %c74 = arith.constant 74 : index
    %c0_80 = arith.constant 0 : index
    %154 = vector.load %arg13[%c74, %c0_80] : memref<88x384xf32, #tpu.memory_space<vmem>>, vector<1x384xf32>
    tpu.vector_store %arg13[%c74, %c0_80], %153 {strides = array<i32>} : memref<88x384xf32, #tpu.memory_space<vmem>>, vector<1x384xf32>,
    %155 = vector.extract_strided_slice %2 {offsets = [0, 195], sizes = [1, 384], strides = [1, 1]} : vector<1x640xf32> to vector<1x384xf32>
    %c75 = arith.constant 75 : index
    %c0_81 = arith.constant 0 : index
    %156 = vector.load %arg13[%c75, %c0_81] : memref<88x384xf32, #tpu.memory_space<vmem>>, vector<1x384xf32>
    tpu.vector_store %arg13[%c75, %c0_81], %155 {strides = array<i32>} : memref<88x384xf32, #tpu.memory_space<vmem>>, vector<1x384xf32>,
    %157 = vector.extract_strided_slice %2 {offsets = [0, 196], sizes = [1, 384], strides = [1, 1]} : vector<1x640xf32> to vector<1x384xf32>
    %c76 = arith.constant 76 : index
    %c0_82 = arith.constant 0 : index
    %158 = vector.load %arg13[%c76, %c0_82] : memref<88x384xf32, #tpu.memory_space<vmem>>, vector<1x384xf32>
    tpu.vector_store %arg13[%c76, %c0_82], %157 {strides = array<i32>} : memref<88x384xf32, #tpu.memory_space<vmem>>, vector<1x384xf32>,
    %159 = vector.extract_strided_slice %2 {offsets = [0, 197], sizes = [1, 384], strides = [1, 1]} : vector<1x640xf32> to vector<1x384xf32>
    %c77 = arith.constant 77 : index
    %c0_83 = arith.constant 0 : index
    %160 = vector.load %arg13[%c77, %c0_83] : memref<88x384xf32, #tpu.memory_space<vmem>>, vector<1x384xf32>
    tpu.vector_store %arg13[%c77, %c0_83], %159 {strides = array<i32>} : memref<88x384xf32, #tpu.memory_space<vmem>>, vector<1x384xf32>,
    %161 = vector.extract_strided_slice %2 {offsets = [0, 198], sizes = [1, 384], strides = [1, 1]} : vector<1x640xf32> to vector<1x384xf32>
    %c78 = arith.constant 78 : index
    %c0_84 = arith.constant 0 : index
    %162 = vector.load %arg13[%c78, %c0_84] : memref<88x384xf32, #tpu.memory_space<vmem>>, vector<1x384xf32>
    tpu.vector_store %arg13[%c78, %c0_84], %161 {strides = array<i32>} : memref<88x384xf32, #tpu.memory_space<vmem>>, vector<1x384xf32>,
    %163 = vector.extract_strided_slice %2 {offsets = [0, 199], sizes = [1, 384], strides = [1, 1]} : vector<1x640xf32> to vector<1x384xf32>
    %c79 = arith.constant 79 : index
    %c0_85 = arith.constant 0 : index
    %164 = vector.load %arg13[%c79, %c0_85] : memref<88x384xf32, #tpu.memory_space<vmem>>, vector<1x384xf32>
    tpu.vector_store %arg13[%c79, %c0_85], %163 {strides = array<i32>} : memref<88x384xf32, #tpu.memory_space<vmem>>, vector<1x384xf32>,
    %165 = vector.extract_strided_slice %2 {offsets = [0, 200], sizes = [1, 384], strides = [1, 1]} : vector<1x640xf32> to vector<1x384xf32>
    %c80_86 = arith.constant 80 : index
    %c0_87 = arith.constant 0 : index
    %166 = vector.load %arg13[%c80_86, %c0_87] : memref<88x384xf32, #tpu.memory_space<vmem>>, vector<1x384xf32>
    tpu.vector_store %arg13[%c80_86, %c0_87], %165 {strides = array<i32>} : memref<88x384xf32, #tpu.memory_space<vmem>>, vector<1x384xf32>,
    %c0_88 = arith.constant 0 : index
    %c0_89 = arith.constant 0 : index
    %167 = vector.load %arg3[%c0_88, %c0_89] : memref<64x88xbf16, #tpu.memory_space<vmem>>, vector<64x88xbf16>
    %c0_90 = arith.constant 0 : index
    %c0_91 = arith.constant 0 : index
    %168 = vector.load %arg13[%c0_90, %c0_91] : memref<88x384xf32, #tpu.memory_space<vmem>>, vector<88x384xf32>
    %169 = arith.truncf %168 : vector<88x384xf32> to vector<88x384xbf16>
    %cst_92 = arith.constant dense<0.000000e+00> : vector<64x384xf32>
    %170 = tpu.matmul %167, %169, %cst_92 {dimension_numbers = #tpu.dot_dimension_numbers<[1], [0], [0], [1], [0, 0, 1, 1], [], []>} : vector<64x88xbf16>, vector<88x384xbf16>, vector<64x384xf32> -> vector<64x384xf32>
    %c0_93 = arith.constant 0 : index
    %c0_94 = arith.constant 0 : index
    %171 = vector.load %arg4[%c0_93, %c0_94] : memref<64x1xf32, #tpu.memory_space<vmem>>, vector<64x1xf32>
    %172 = vector.broadcast %171 : vector<64x1xf32> to vector<64x384xf32>
    %173 = arith.addf %170, %172 : vector<64x384xf32>
    %cst_95 = arith.constant 0.000000e+00 : f32
    %174 = vector.broadcast %cst_95 : f32 to vector<64x384xf32>
    %175 = arith.maximumf %173, %174 : vector<64x384xf32>
    %176 = vector.broadcast %0 : vector<1x384xf32> to vector<64x384xf32>
    %177 = arith.mulf %175, %176 : vector<64x384xf32>
    %cst_96 = arith.constant 0.000000e+00 : bf16
    %178 = vector.broadcast %cst_96 : bf16 to vector<64x128xbf16>
    %c0_97 = arith.constant 0 : index
    %c0_98 = arith.constant 0 : index
    %179 = vector.load %arg10[%c0_97, %c0_98] : memref<64x640xbf16, #tpu.memory_space<vmem>>, vector<64x128xbf16>
    tpu.vector_store %arg10[%c0_97, %c0_98], %178 {strides = array<i32>} : memref<64x640xbf16, #tpu.memory_space<vmem>>, vector<64x128xbf16>,
    %cst_99 = arith.constant 0.000000e+00 : bf16
    %180 = vector.broadcast %cst_99 : bf16 to vector<64x128xbf16>
    %c0_100 = arith.constant 0 : index
    %c512 = arith.constant 512 : index
    %181 = vector.load %arg10[%c0_100, %c512] : memref<64x640xbf16, #tpu.memory_space<vmem>>, vector<64x128xbf16>
    tpu.vector_store %arg10[%c0_100, %c512], %180 {strides = array<i32>} : memref<64x640xbf16, #tpu.memory_space<vmem>>, vector<64x128xbf16>,
    %182 = arith.truncf %177 : vector<64x384xf32> to vector<64x384xbf16>
    %c0_101 = arith.constant 0 : index
    %c128 = arith.constant 128 : index
    %183 = vector.load %arg10[%c0_101, %c128] : memref<64x640xbf16, #tpu.memory_space<vmem>>, vector<64x384xbf16>
    tpu.vector_store %arg10[%c0_101, %c128], %182 {strides = array<i32>} : memref<64x640xbf16, #tpu.memory_space<vmem>>, vector<64x384xbf16>,
    %c0_102 = arith.constant 0 : index
    %c0_103 = arith.constant 0 : index
    %184 = vector.load %arg10[%c0_102, %c0_103] : memref<64x640xbf16, #tpu.memory_space<vmem>>, vector<64x640xbf16>
    %185 = vector.extract_strided_slice %184 {offsets = [0, 78], sizes = [64, 384], strides = [1, 1]} : vector<64x640xbf16> to vector<64x384xbf16>
    %c0_104 = arith.constant 0 : index
    %c0_105 = arith.constant 0 : index
    %186 = vector.load %arg12[%c0_104, %c0_105] : memref<1600x384xbf16, #tpu.memory_space<vmem>>, vector<64x384xbf16>
    tpu.vector_store %arg12[%c0_104, %c0_105], %185 {strides = array<i32>} : memref<1600x384xbf16, #tpu.memory_space<vmem>>, vector<64x384xbf16>,
    %187 = vector.extract_strided_slice %184 {offsets = [0, 79], sizes = [64, 384], strides = [1, 1]} : vector<64x640xbf16> to vector<64x384xbf16>
    %c64_106 = arith.constant 64 : index
    %c0_107 = arith.constant 0 : index
    %188 = vector.load %arg12[%c64_106, %c0_107] : memref<1600x384xbf16, #tpu.memory_space<vmem>>, vector<64x384xbf16>
    tpu.vector_store %arg12[%c64_106, %c0_107], %187 {strides = array<i32>} : memref<1600x384xbf16, #tpu.memory_space<vmem>>, vector<64x384xbf16>,
    %189 = vector.extract_strided_slice %184 {offsets = [0, 80], sizes = [64, 384], strides = [1, 1]} : vector<64x640xbf16> to vector<64x384xbf16>
    %c128_108 = arith.constant 128 : index
    %c0_109 = arith.constant 0 : index
    %190 = vector.load %arg12[%c128_108, %c0_109] : memref<1600x384xbf16, #tpu.memory_space<vmem>>, vector<64x384xbf16>
    tpu.vector_store %arg12[%c128_108, %c0_109], %189 {strides = array<i32>} : memref<1600x384xbf16, #tpu.memory_space<vmem>>, vector<64x384xbf16>,
    %191 = vector.extract_strided_slice %184 {offsets = [0, 81], sizes = [64, 384], strides = [1, 1]} : vector<64x640xbf16> to vector<64x384xbf16>
    %c192 = arith.constant 192 : index
    %c0_110 = arith.constant 0 : index
    %192 = vector.load %arg12[%c192, %c0_110] : memref<1600x384xbf16, #tpu.memory_space<vmem>>, vector<64x384xbf16>
    tpu.vector_store %arg12[%c192, %c0_110], %191 {strides = array<i32>} : memref<1600x384xbf16, #tpu.memory_space<vmem>>, vector<64x384xbf16>,
    %193 = vector.extract_strided_slice %184 {offsets = [0, 82], sizes = [64, 384], strides = [1, 1]} : vector<64x640xbf16> to vector<64x384xbf16>
    %c256 = arith.constant 256 : index
    %c0_111 = arith.constant 0 : index
    %194 = vector.load %arg12[%c256, %c0_111] : memref<1600x384xbf16, #tpu.memory_space<vmem>>, vector<64x384xbf16>
    tpu.vector_store %arg12[%c256, %c0_111], %193 {strides = array<i32>} : memref<1600x384xbf16, #tpu.memory_space<vmem>>, vector<64x384xbf16>,
    %195 = vector.extract_strided_slice %184 {offsets = [0, 102], sizes = [64, 384], strides = [1, 1]} : vector<64x640xbf16> to vector<64x384xbf16>
    %c320 = arith.constant 320 : index
    %c0_112 = arith.constant 0 : index
    %196 = vector.load %arg12[%c320, %c0_112] : memref<1600x384xbf16, #tpu.memory_space<vmem>>, vector<64x384xbf16>
    tpu.vector_store %arg12[%c320, %c0_112], %195 {strides = array<i32>} : memref<1600x384xbf16, #tpu.memory_space<vmem>>, vector<64x384xbf16>,
    %197 = vector.extract_strided_slice %184 {offsets = [0, 103], sizes = [64, 384], strides = [1, 1]} : vector<64x640xbf16> to vector<64x384xbf16>
    %c384 = arith.constant 384 : index
    %c0_113 = arith.constant 0 : index
    %198 = vector.load %arg12[%c384, %c0_113] : memref<1600x384xbf16, #tpu.memory_space<vmem>>, vector<64x384xbf16>
    tpu.vector_store %arg12[%c384, %c0_113], %197 {strides = array<i32>} : memref<1600x384xbf16, #tpu.memory_space<vmem>>, vector<64x384xbf16>,
    %199 = vector.extract_strided_slice %184 {offsets = [0, 104], sizes = [64, 384], strides = [1, 1]} : vector<64x640xbf16> to vector<64x384xbf16>
    %c448 = arith.constant 448 : index
    %c0_114 = arith.constant 0 : index
    %200 = vector.load %arg12[%c448, %c0_114] : memref<1600x384xbf16, #tpu.memory_space<vmem>>, vector<64x384xbf16>
    tpu.vector_store %arg12[%c448, %c0_114], %199 {strides = array<i32>} : memref<1600x384xbf16, #tpu.memory_space<vmem>>, vector<64x384xbf16>,
    %201 = vector.extract_strided_slice %184 {offsets = [0, 105], sizes = [64, 384], strides = [1, 1]} : vector<64x640xbf16> to vector<64x384xbf16>
    %c512_115 = arith.constant 512 : index
    %c0_116 = arith.constant 0 : index
    %202 = vector.load %arg12[%c512_115, %c0_116] : memref<1600x384xbf16, #tpu.memory_space<vmem>>, vector<64x384xbf16>
    tpu.vector_store %arg12[%c512_115, %c0_116], %201 {strides = array<i32>} : memref<1600x384xbf16, #tpu.memory_space<vmem>>, vector<64x384xbf16>,
    %203 = vector.extract_strided_slice %184 {offsets = [0, 106], sizes = [64, 384], strides = [1, 1]} : vector<64x640xbf16> to vector<64x384xbf16>
    %c576 = arith.constant 576 : index
    %c0_117 = arith.constant 0 : index
    %204 = vector.load %arg12[%c576, %c0_117] : memref<1600x384xbf16, #tpu.memory_space<vmem>>, vector<64x384xbf16>
    tpu.vector_store %arg12[%c576, %c0_117], %203 {strides = array<i32>} : memref<1600x384xbf16, #tpu.memory_space<vmem>>, vector<64x384xbf16>,
    %205 = vector.extract_strided_slice %184 {offsets = [0, 126], sizes = [64, 384], strides = [1, 1]} : vector<64x640xbf16> to vector<64x384xbf16>
    %c640 = arith.constant 640 : index
    %c0_118 = arith.constant 0 : index
    %206 = vector.load %arg12[%c640, %c0_118] : memref<1600x384xbf16, #tpu.memory_space<vmem>>, vector<64x384xbf16>
    tpu.vector_store %arg12[%c640, %c0_118], %205 {strides = array<i32>} : memref<1600x384xbf16, #tpu.memory_space<vmem>>, vector<64x384xbf16>,
    %207 = vector.extract_strided_slice %184 {offsets = [0, 127], sizes = [64, 384], strides = [1, 1]} : vector<64x640xbf16> to vector<64x384xbf16>
    %c704 = arith.constant 704 : index
    %c0_119 = arith.constant 0 : index
    %208 = vector.load %arg12[%c704, %c0_119] : memref<1600x384xbf16, #tpu.memory_space<vmem>>, vector<64x384xbf16>
    tpu.vector_store %arg12[%c704, %c0_119], %207 {strides = array<i32>} : memref<1600x384xbf16, #tpu.memory_space<vmem>>, vector<64x384xbf16>,
    %209 = vector.extract_strided_slice %184 {offsets = [0, 128], sizes = [64, 384], strides = [1, 1]} : vector<64x640xbf16> to vector<64x384xbf16>
    %c768 = arith.constant 768 : index
    %c0_120 = arith.constant 0 : index
    %210 = vector.load %arg12[%c768, %c0_120] : memref<1600x384xbf16, #tpu.memory_space<vmem>>, vector<64x384xbf16>
    tpu.vector_store %arg12[%c768, %c0_120], %209 {strides = array<i32>} : memref<1600x384xbf16, #tpu.memory_space<vmem>>, vector<64x384xbf16>,
    %211 = vector.extract_strided_slice %184 {offsets = [0, 129], sizes = [64, 384], strides = [1, 1]} : vector<64x640xbf16> to vector<64x384xbf16>
    %c832 = arith.constant 832 : index
    %c0_121 = arith.constant 0 : index
    %212 = vector.load %arg12[%c832, %c0_121] : memref<1600x384xbf16, #tpu.memory_space<vmem>>, vector<64x384xbf16>
    tpu.vector_store %arg12[%c832, %c0_121], %211 {strides = array<i32>} : memref<1600x384xbf16, #tpu.memory_space<vmem>>, vector<64x384xbf16>,
    %213 = vector.extract_strided_slice %184 {offsets = [0, 130], sizes = [64, 384], strides = [1, 1]} : vector<64x640xbf16> to vector<64x384xbf16>
    %c896 = arith.constant 896 : index
    %c0_122 = arith.constant 0 : index
    %214 = vector.load %arg12[%c896, %c0_122] : memref<1600x384xbf16, #tpu.memory_space<vmem>>, vector<64x384xbf16>
    tpu.vector_store %arg12[%c896, %c0_122], %213 {strides = array<i32>} : memref<1600x384xbf16, #tpu.memory_space<vmem>>, vector<64x384xbf16>,
    %215 = vector.extract_strided_slice %184 {offsets = [0, 150], sizes = [64, 384], strides = [1, 1]} : vector<64x640xbf16> to vector<64x384xbf16>
    %c960 = arith.constant 960 : index
    %c0_123 = arith.constant 0 : index
    %216 = vector.load %arg12[%c960, %c0_123] : memref<1600x384xbf16, #tpu.memory_space<vmem>>, vector<64x384xbf16>
    tpu.vector_store %arg12[%c960, %c0_123], %215 {strides = array<i32>} : memref<1600x384xbf16, #tpu.memory_space<vmem>>, vector<64x384xbf16>,
    %217 = vector.extract_strided_slice %184 {offsets = [0, 151], sizes = [64, 384], strides = [1, 1]} : vector<64x640xbf16> to vector<64x384xbf16>
    %c1024 = arith.constant 1024 : index
    %c0_124 = arith.constant 0 : index
    %218 = vector.load %arg12[%c1024, %c0_124] : memref<1600x384xbf16, #tpu.memory_space<vmem>>, vector<64x384xbf16>
    tpu.vector_store %arg12[%c1024, %c0_124], %217 {strides = array<i32>} : memref<1600x384xbf16, #tpu.memory_space<vmem>>, vector<64x384xbf16>,
    %219 = vector.extract_strided_slice %184 {offsets = [0, 152], sizes = [64, 384], strides = [1, 1]} : vector<64x640xbf16> to vector<64x384xbf16>
    %c1088 = arith.constant 1088 : index
    %c0_125 = arith.constant 0 : index
    %220 = vector.load %arg12[%c1088, %c0_125] : memref<1600x384xbf16, #tpu.memory_space<vmem>>, vector<64x384xbf16>
    tpu.vector_store %arg12[%c1088, %c0_125], %219 {strides = array<i32>} : memref<1600x384xbf16, #tpu.memory_space<vmem>>, vector<64x384xbf16>,
    %221 = vector.extract_strided_slice %184 {offsets = [0, 153], sizes = [64, 384], strides = [1, 1]} : vector<64x640xbf16> to vector<64x384xbf16>
    %c1152 = arith.constant 1152 : index
    %c0_126 = arith.constant 0 : index
    %222 = vector.load %arg12[%c1152, %c0_126] : memref<1600x384xbf16, #tpu.memory_space<vmem>>, vector<64x384xbf16>
    tpu.vector_store %arg12[%c1152, %c0_126], %221 {strides = array<i32>} : memref<1600x384xbf16, #tpu.memory_space<vmem>>, vector<64x384xbf16>,
    %223 = vector.extract_strided_slice %184 {offsets = [0, 154], sizes = [64, 384], strides = [1, 1]} : vector<64x640xbf16> to vector<64x384xbf16>
    %c1216 = arith.constant 1216 : index
    %c0_127 = arith.constant 0 : index
    %224 = vector.load %arg12[%c1216, %c0_127] : memref<1600x384xbf16, #tpu.memory_space<vmem>>, vector<64x384xbf16>
    tpu.vector_store %arg12[%c1216, %c0_127], %223 {strides = array<i32>} : memref<1600x384xbf16, #tpu.memory_space<vmem>>, vector<64x384xbf16>,
    %225 = vector.extract_strided_slice %184 {offsets = [0, 174], sizes = [64, 384], strides = [1, 1]} : vector<64x640xbf16> to vector<64x384xbf16>
    %c1280 = arith.constant 1280 : index
    %c0_128 = arith.constant 0 : index
    %226 = vector.load %arg12[%c1280, %c0_128] : memref<1600x384xbf16, #tpu.memory_space<vmem>>, vector<64x384xbf16>
    tpu.vector_store %arg12[%c1280, %c0_128], %225 {strides = array<i32>} : memref<1600x384xbf16, #tpu.memory_space<vmem>>, vector<64x384xbf16>,
    %227 = vector.extract_strided_slice %184 {offsets = [0, 175], sizes = [64, 384], strides = [1, 1]} : vector<64x640xbf16> to vector<64x384xbf16>
    %c1344 = arith.constant 1344 : index
    %c0_129 = arith.constant 0 : index
    %228 = vector.load %arg12[%c1344, %c0_129] : memref<1600x384xbf16, #tpu.memory_space<vmem>>, vector<64x384xbf16>
    tpu.vector_store %arg12[%c1344, %c0_129], %227 {strides = array<i32>} : memref<1600x384xbf16, #tpu.memory_space<vmem>>, vector<64x384xbf16>,
    %229 = vector.extract_strided_slice %184 {offsets = [0, 176], sizes = [64, 384], strides = [1, 1]} : vector<64x640xbf16> to vector<64x384xbf16>
    %c1408 = arith.constant 1408 : index
    %c0_130 = arith.constant 0 : index
    %230 = vector.load %arg12[%c1408, %c0_130] : memref<1600x384xbf16, #tpu.memory_space<vmem>>, vector<64x384xbf16>
    tpu.vector_store %arg12[%c1408, %c0_130], %229 {strides = array<i32>} : memref<1600x384xbf16, #tpu.memory_space<vmem>>, vector<64x384xbf16>,
    %231 = vector.extract_strided_slice %184 {offsets = [0, 177], sizes = [64, 384], strides = [1, 1]} : vector<64x640xbf16> to vector<64x384xbf16>
    %c1472 = arith.constant 1472 : index
    %c0_131 = arith.constant 0 : index
    %232 = vector.load %arg12[%c1472, %c0_131] : memref<1600x384xbf16, #tpu.memory_space<vmem>>, vector<64x384xbf16>
    tpu.vector_store %arg12[%c1472, %c0_131], %231 {strides = array<i32>} : memref<1600x384xbf16, #tpu.memory_space<vmem>>, vector<64x384xbf16>,
    %233 = vector.extract_strided_slice %184 {offsets = [0, 178], sizes = [64, 384], strides = [1, 1]} : vector<64x640xbf16> to vector<64x384xbf16>
    %c1536 = arith.constant 1536 : index
    %c0_132 = arith.constant 0 : index
    %234 = vector.load %arg12[%c1536, %c0_132] : memref<1600x384xbf16, #tpu.memory_space<vmem>>, vector<64x384xbf16>
    tpu.vector_store %arg12[%c1536, %c0_132], %233 {strides = array<i32>} : memref<1600x384xbf16, #tpu.memory_space<vmem>>, vector<64x384xbf16>,
    %c0_133 = arith.constant 0 : index
    %c0_134 = arith.constant 0 : index
    %235 = vector.load %arg5[%c0_133, %c0_134] : memref<32x1600xbf16, #tpu.memory_space<vmem>>, vector<32x1600xbf16>
    %c0_135 = arith.constant 0 : index
    %c0_136 = arith.constant 0 : index
    %236 = vector.load %arg12[%c0_135, %c0_136] : memref<1600x384xbf16, #tpu.memory_space<vmem>>, vector<1600x384xbf16>
    %cst_137 = arith.constant dense<0.000000e+00> : vector<32x384xf32>
    %237 = tpu.matmul %235, %236, %cst_137 {dimension_numbers = #tpu.dot_dimension_numbers<[1], [0], [0], [1], [0, 0, 1, 1], [], []>} : vector<32x1600xbf16>, vector<1600x384xbf16>, vector<32x384xf32> -> vector<32x384xf32>
    %c0_138 = arith.constant 0 : index
    %c0_139 = arith.constant 0 : index
    %238 = vector.load %arg6[%c0_138, %c0_139] : memref<32x1xf32, #tpu.memory_space<vmem>>, vector<32x1xf32>
    %239 = vector.broadcast %238 : vector<32x1xf32> to vector<32x384xf32>
    %240 = arith.addf %237, %239 : vector<32x384xf32>
    %cst_140 = arith.constant 0.000000e+00 : f32
    %241 = vector.broadcast %cst_140 : f32 to vector<32x384xf32>
    %242 = arith.maximumf %240, %241 : vector<32x384xf32>
    %243 = vector.broadcast %0 : vector<1x384xf32> to vector<32x384xf32>
    %244 = arith.mulf %242, %243 : vector<32x384xf32>
    %cst_141 = arith.constant 0.000000e+00 : bf16
    %245 = vector.broadcast %cst_141 : bf16 to vector<32x128xbf16>
    %c0_142 = arith.constant 0 : index
    %c0_143 = arith.constant 0 : index
    %246 = vector.load %arg11[%c0_142, %c0_143] : memref<32x640xbf16, #tpu.memory_space<vmem>>, vector<32x128xbf16>
    tpu.vector_store %arg11[%c0_142, %c0_143], %245 {strides = array<i32>} : memref<32x640xbf16, #tpu.memory_space<vmem>>, vector<32x128xbf16>,
    %cst_144 = arith.constant 0.000000e+00 : bf16
    %247 = vector.broadcast %cst_144 : bf16 to vector<32x128xbf16>
    %c0_145 = arith.constant 0 : index
    %c512_146 = arith.constant 512 : index
    %248 = vector.load %arg11[%c0_145, %c512_146] : memref<32x640xbf16, #tpu.memory_space<vmem>>, vector<32x128xbf16>
    tpu.vector_store %arg11[%c0_145, %c512_146], %247 {strides = array<i32>} : memref<32x640xbf16, #tpu.memory_space<vmem>>, vector<32x128xbf16>,
    %249 = arith.truncf %244 : vector<32x384xf32> to vector<32x384xbf16>
    %c0_147 = arith.constant 0 : index
    %c128_148 = arith.constant 128 : index
    %250 = vector.load %arg11[%c0_147, %c128_148] : memref<32x640xbf16, #tpu.memory_space<vmem>>, vector<32x384xbf16>
    tpu.vector_store %arg11[%c0_147, %c128_148], %249 {strides = array<i32>} : memref<32x640xbf16, #tpu.memory_space<vmem>>, vector<32x384xbf16>,
    %c0_149 = arith.constant 0 : index
    %c0_150 = arith.constant 0 : index
    %251 = vector.load %arg11[%c0_149, %c0_150] : memref<32x640xbf16, #tpu.memory_space<vmem>>, vector<32x640xbf16>
    %252 = vector.extract_strided_slice %251 {offsets = [0, 78], sizes = [32, 384], strides = [1, 1]} : vector<32x640xbf16> to vector<32x384xbf16>
    %c0_151 = arith.constant 0 : index
    %c0_152 = arith.constant 0 : index
    %253 = vector.load %arg12[%c0_151, %c0_152] : memref<1600x384xbf16, #tpu.memory_space<vmem>>, vector<32x384xbf16>
    tpu.vector_store %arg12[%c0_151, %c0_152], %252 {strides = array<i32>} : memref<1600x384xbf16, #tpu.memory_space<vmem>>, vector<32x384xbf16>,
    %254 = vector.extract_strided_slice %251 {offsets = [0, 79], sizes = [32, 384], strides = [1, 1]} : vector<32x640xbf16> to vector<32x384xbf16>
    %c32_153 = arith.constant 32 : index
    %c0_154 = arith.constant 0 : index
    %255 = vector.load %arg12[%c32_153, %c0_154] : memref<1600x384xbf16, #tpu.memory_space<vmem>>, vector<32x384xbf16>
    tpu.vector_store %arg12[%c32_153, %c0_154], %254 {strides = array<i32>} : memref<1600x384xbf16, #tpu.memory_space<vmem>>, vector<32x384xbf16>,
    %256 = vector.extract_strided_slice %251 {offsets = [0, 80], sizes = [32, 384], strides = [1, 1]} : vector<32x640xbf16> to vector<32x384xbf16>
    %c64_155 = arith.constant 64 : index
    %c0_156 = arith.constant 0 : index
    %257 = vector.load %arg12[%c64_155, %c0_156] : memref<1600x384xbf16, #tpu.memory_space<vmem>>, vector<32x384xbf16>
    tpu.vector_store %arg12[%c64_155, %c0_156], %256 {strides = array<i32>} : memref<1600x384xbf16, #tpu.memory_space<vmem>>, vector<32x384xbf16>,
    %258 = vector.extract_strided_slice %251 {offsets = [0, 81], sizes = [32, 384], strides = [1, 1]} : vector<32x640xbf16> to vector<32x384xbf16>
    %c96 = arith.constant 96 : index
    %c0_157 = arith.constant 0 : index
    %259 = vector.load %arg12[%c96, %c0_157] : memref<1600x384xbf16, #tpu.memory_space<vmem>>, vector<32x384xbf16>
    tpu.vector_store %arg12[%c96, %c0_157], %258 {strides = array<i32>} : memref<1600x384xbf16, #tpu.memory_space<vmem>>, vector<32x384xbf16>,
    %260 = vector.extract_strided_slice %251 {offsets = [0, 82], sizes = [32, 384], strides = [1, 1]} : vector<32x640xbf16> to vector<32x384xbf16>
    %c128_158 = arith.constant 128 : index
    %c0_159 = arith.constant 0 : index
    %261 = vector.load %arg12[%c128_158, %c0_159] : memref<1600x384xbf16, #tpu.memory_space<vmem>>, vector<32x384xbf16>
    tpu.vector_store %arg12[%c128_158, %c0_159], %260 {strides = array<i32>} : memref<1600x384xbf16, #tpu.memory_space<vmem>>, vector<32x384xbf16>,
    %262 = vector.extract_strided_slice %251 {offsets = [0, 102], sizes = [32, 384], strides = [1, 1]} : vector<32x640xbf16> to vector<32x384xbf16>
    %c160 = arith.constant 160 : index
    %c0_160 = arith.constant 0 : index
    %263 = vector.load %arg12[%c160, %c0_160] : memref<1600x384xbf16, #tpu.memory_space<vmem>>, vector<32x384xbf16>
    tpu.vector_store %arg12[%c160, %c0_160], %262 {strides = array<i32>} : memref<1600x384xbf16, #tpu.memory_space<vmem>>, vector<32x384xbf16>,
    %264 = vector.extract_strided_slice %251 {offsets = [0, 103], sizes = [32, 384], strides = [1, 1]} : vector<32x640xbf16> to vector<32x384xbf16>
    %c192_161 = arith.constant 192 : index
    %c0_162 = arith.constant 0 : index
    %265 = vector.load %arg12[%c192_161, %c0_162] : memref<1600x384xbf16, #tpu.memory_space<vmem>>, vector<32x384xbf16>
    tpu.vector_store %arg12[%c192_161, %c0_162], %264 {strides = array<i32>} : memref<1600x384xbf16, #tpu.memory_space<vmem>>, vector<32x384xbf16>,
    %266 = vector.extract_strided_slice %251 {offsets = [0, 104], sizes = [32, 384], strides = [1, 1]} : vector<32x640xbf16> to vector<32x384xbf16>
    %c224 = arith.constant 224 : index
    %c0_163 = arith.constant 0 : index
    %267 = vector.load %arg12[%c224, %c0_163] : memref<1600x384xbf16, #tpu.memory_space<vmem>>, vector<32x384xbf16>
    tpu.vector_store %arg12[%c224, %c0_163], %266 {strides = array<i32>} : memref<1600x384xbf16, #tpu.memory_space<vmem>>, vector<32x384xbf16>,
    %268 = vector.extract_strided_slice %251 {offsets = [0, 105], sizes = [32, 384], strides = [1, 1]} : vector<32x640xbf16> to vector<32x384xbf16>
    %c256_164 = arith.constant 256 : index
    %c0_165 = arith.constant 0 : index
    %269 = vector.load %arg12[%c256_164, %c0_165] : memref<1600x384xbf16, #tpu.memory_space<vmem>>, vector<32x384xbf16>
    tpu.vector_store %arg12[%c256_164, %c0_165], %268 {strides = array<i32>} : memref<1600x384xbf16, #tpu.memory_space<vmem>>, vector<32x384xbf16>,
    %270 = vector.extract_strided_slice %251 {offsets = [0, 106], sizes = [32, 384], strides = [1, 1]} : vector<32x640xbf16> to vector<32x384xbf16>
    %c288 = arith.constant 288 : index
    %c0_166 = arith.constant 0 : index
    %271 = vector.load %arg12[%c288, %c0_166] : memref<1600x384xbf16, #tpu.memory_space<vmem>>, vector<32x384xbf16>
    tpu.vector_store %arg12[%c288, %c0_166], %270 {strides = array<i32>} : memref<1600x384xbf16, #tpu.memory_space<vmem>>, vector<32x384xbf16>,
    %272 = vector.extract_strided_slice %251 {offsets = [0, 126], sizes = [32, 384], strides = [1, 1]} : vector<32x640xbf16> to vector<32x384xbf16>
    %c320_167 = arith.constant 320 : index
    %c0_168 = arith.constant 0 : index
    %273 = vector.load %arg12[%c320_167, %c0_168] : memref<1600x384xbf16, #tpu.memory_space<vmem>>, vector<32x384xbf16>
    tpu.vector_store %arg12[%c320_167, %c0_168], %272 {strides = array<i32>} : memref<1600x384xbf16, #tpu.memory_space<vmem>>, vector<32x384xbf16>,
    %274 = vector.extract_strided_slice %251 {offsets = [0, 127], sizes = [32, 384], strides = [1, 1]} : vector<32x640xbf16> to vector<32x384xbf16>
    %c352 = arith.constant 352 : index
    %c0_169 = arith.constant 0 : index
    %275 = vector.load %arg12[%c352, %c0_169] : memref<1600x384xbf16, #tpu.memory_space<vmem>>, vector<32x384xbf16>
    tpu.vector_store %arg12[%c352, %c0_169], %274 {strides = array<i32>} : memref<1600x384xbf16, #tpu.memory_space<vmem>>, vector<32x384xbf16>,
    %276 = vector.extract_strided_slice %251 {offsets = [0, 128], sizes = [32, 384], strides = [1, 1]} : vector<32x640xbf16> to vector<32x384xbf16>
    %c384_170 = arith.constant 384 : index
    %c0_171 = arith.constant 0 : index
    %277 = vector.load %arg12[%c384_170, %c0_171] : memref<1600x384xbf16, #tpu.memory_space<vmem>>, vector<32x384xbf16>
    tpu.vector_store %arg12[%c384_170, %c0_171], %276 {strides = array<i32>} : memref<1600x384xbf16, #tpu.memory_space<vmem>>, vector<32x384xbf16>,
    %278 = vector.extract_strided_slice %251 {offsets = [0, 129], sizes = [32, 384], strides = [1, 1]} : vector<32x640xbf16> to vector<32x384xbf16>
    %c416 = arith.constant 416 : index
    %c0_172 = arith.constant 0 : index
    %279 = vector.load %arg12[%c416, %c0_172] : memref<1600x384xbf16, #tpu.memory_space<vmem>>, vector<32x384xbf16>
    tpu.vector_store %arg12[%c416, %c0_172], %278 {strides = array<i32>} : memref<1600x384xbf16, #tpu.memory_space<vmem>>, vector<32x384xbf16>,
    %280 = vector.extract_strided_slice %251 {offsets = [0, 130], sizes = [32, 384], strides = [1, 1]} : vector<32x640xbf16> to vector<32x384xbf16>
    %c448_173 = arith.constant 448 : index
    %c0_174 = arith.constant 0 : index
    %281 = vector.load %arg12[%c448_173, %c0_174] : memref<1600x384xbf16, #tpu.memory_space<vmem>>, vector<32x384xbf16>
    tpu.vector_store %arg12[%c448_173, %c0_174], %280 {strides = array<i32>} : memref<1600x384xbf16, #tpu.memory_space<vmem>>, vector<32x384xbf16>,
    %282 = vector.extract_strided_slice %251 {offsets = [0, 150], sizes = [32, 384], strides = [1, 1]} : vector<32x640xbf16> to vector<32x384xbf16>
    %c480 = arith.constant 480 : index
    %c0_175 = arith.constant 0 : index
    %283 = vector.load %arg12[%c480, %c0_175] : memref<1600x384xbf16, #tpu.memory_space<vmem>>, vector<32x384xbf16>
    tpu.vector_store %arg12[%c480, %c0_175], %282 {strides = array<i32>} : memref<1600x384xbf16, #tpu.memory_space<vmem>>, vector<32x384xbf16>,
    %284 = vector.extract_strided_slice %251 {offsets = [0, 151], sizes = [32, 384], strides = [1, 1]} : vector<32x640xbf16> to vector<32x384xbf16>
    %c512_176 = arith.constant 512 : index
    %c0_177 = arith.constant 0 : index
    %285 = vector.load %arg12[%c512_176, %c0_177] : memref<1600x384xbf16, #tpu.memory_space<vmem>>, vector<32x384xbf16>
    tpu.vector_store %arg12[%c512_176, %c0_177], %284 {strides = array<i32>} : memref<1600x384xbf16, #tpu.memory_space<vmem>>, vector<32x384xbf16>,
    %286 = vector.extract_strided_slice %251 {offsets = [0, 152], sizes = [32, 384], strides = [1, 1]} : vector<32x640xbf16> to vector<32x384xbf16>
    %c544 = arith.constant 544 : index
    %c0_178 = arith.constant 0 : index
    %287 = vector.load %arg12[%c544, %c0_178] : memref<1600x384xbf16, #tpu.memory_space<vmem>>, vector<32x384xbf16>
    tpu.vector_store %arg12[%c544, %c0_178], %286 {strides = array<i32>} : memref<1600x384xbf16, #tpu.memory_space<vmem>>, vector<32x384xbf16>,
    %288 = vector.extract_strided_slice %251 {offsets = [0, 153], sizes = [32, 384], strides = [1, 1]} : vector<32x640xbf16> to vector<32x384xbf16>
    %c576_179 = arith.constant 576 : index
    %c0_180 = arith.constant 0 : index
    %289 = vector.load %arg12[%c576_179, %c0_180] : memref<1600x384xbf16, #tpu.memory_space<vmem>>, vector<32x384xbf16>
    tpu.vector_store %arg12[%c576_179, %c0_180], %288 {strides = array<i32>} : memref<1600x384xbf16, #tpu.memory_space<vmem>>, vector<32x384xbf16>,
    %290 = vector.extract_strided_slice %251 {offsets = [0, 154], sizes = [32, 384], strides = [1, 1]} : vector<32x640xbf16> to vector<32x384xbf16>
    %c608 = arith.constant 608 : index
    %c0_181 = arith.constant 0 : index
    %291 = vector.load %arg12[%c608, %c0_181] : memref<1600x384xbf16, #tpu.memory_space<vmem>>, vector<32x384xbf16>
    tpu.vector_store %arg12[%c608, %c0_181], %290 {strides = array<i32>} : memref<1600x384xbf16, #tpu.memory_space<vmem>>, vector<32x384xbf16>,
    %292 = vector.extract_strided_slice %251 {offsets = [0, 174], sizes = [32, 384], strides = [1, 1]} : vector<32x640xbf16> to vector<32x384xbf16>
    %c640_182 = arith.constant 640 : index
    %c0_183 = arith.constant 0 : index
    %293 = vector.load %arg12[%c640_182, %c0_183] : memref<1600x384xbf16, #tpu.memory_space<vmem>>, vector<32x384xbf16>
    tpu.vector_store %arg12[%c640_182, %c0_183], %292 {strides = array<i32>} : memref<1600x384xbf16, #tpu.memory_space<vmem>>, vector<32x384xbf16>,
    %294 = vector.extract_strided_slice %251 {offsets = [0, 175], sizes = [32, 384], strides = [1, 1]} : vector<32x640xbf16> to vector<32x384xbf16>
    %c672 = arith.constant 672 : index
    %c0_184 = arith.constant 0 : index
    %295 = vector.load %arg12[%c672, %c0_184] : memref<1600x384xbf16, #tpu.memory_space<vmem>>, vector<32x384xbf16>
    tpu.vector_store %arg12[%c672, %c0_184], %294 {strides = array<i32>} : memref<1600x384xbf16, #tpu.memory_space<vmem>>, vector<32x384xbf16>,
    %296 = vector.extract_strided_slice %251 {offsets = [0, 176], sizes = [32, 384], strides = [1, 1]} : vector<32x640xbf16> to vector<32x384xbf16>
    %c704_185 = arith.constant 704 : index
    %c0_186 = arith.constant 0 : index
    %297 = vector.load %arg12[%c704_185, %c0_186] : memref<1600x384xbf16, #tpu.memory_space<vmem>>, vector<32x384xbf16>
    tpu.vector_store %arg12[%c704_185, %c0_186], %296 {strides = array<i32>} : memref<1600x384xbf16, #tpu.memory_space<vmem>>, vector<32x384xbf16>,
    %298 = vector.extract_strided_slice %251 {offsets = [0, 177], sizes = [32, 384], strides = [1, 1]} : vector<32x640xbf16> to vector<32x384xbf16>
    %c736 = arith.constant 736 : index
    %c0_187 = arith.constant 0 : index
    %299 = vector.load %arg12[%c736, %c0_187] : memref<1600x384xbf16, #tpu.memory_space<vmem>>, vector<32x384xbf16>
    tpu.vector_store %arg12[%c736, %c0_187], %298 {strides = array<i32>} : memref<1600x384xbf16, #tpu.memory_space<vmem>>, vector<32x384xbf16>,
    %300 = vector.extract_strided_slice %251 {offsets = [0, 178], sizes = [32, 384], strides = [1, 1]} : vector<32x640xbf16> to vector<32x384xbf16>
    %c768_188 = arith.constant 768 : index
    %c0_189 = arith.constant 0 : index
    %301 = vector.load %arg12[%c768_188, %c0_189] : memref<1600x384xbf16, #tpu.memory_space<vmem>>, vector<32x384xbf16>
    tpu.vector_store %arg12[%c768_188, %c0_189], %300 {strides = array<i32>} : memref<1600x384xbf16, #tpu.memory_space<vmem>>, vector<32x384xbf16>,
    %c0_190 = arith.constant 0 : index
    %c0_191 = arith.constant 0 : index
    %302 = vector.load %arg7[%c0_190, %c0_191] : memref<8x800xbf16, #tpu.memory_space<vmem>>, vector<8x800xbf16>
    %c0_192 = arith.constant 0 : index
    %c0_193 = arith.constant 0 : index
    %303 = vector.load %arg12[%c0_192, %c0_193] : memref<1600x384xbf16, #tpu.memory_space<vmem>>, vector<800x384xbf16>
    %cst_194 = arith.constant dense<0.000000e+00> : vector<8x384xf32>
    %304 = tpu.matmul %302, %303, %cst_194 {dimension_numbers = #tpu.dot_dimension_numbers<[1], [0], [0], [1], [0, 0, 1, 1], [], []>} : vector<8x800xbf16>, vector<800x384xbf16>, vector<8x384xf32> -> vector<8x384xf32>
    %c0_195 = arith.constant 0 : index
    %c0_196 = arith.constant 0 : index
    %305 = vector.load %arg8[%c0_195, %c0_196] : memref<8x1xf32, #tpu.memory_space<vmem>>, vector<8x1xf32>
    %306 = vector.broadcast %305 : vector<8x1xf32> to vector<8x384xf32>
    %307 = arith.addf %304, %306 : vector<8x384xf32>
    %308 = vector.extract_strided_slice %307 {offsets = [0, 0], sizes = [1, 384], strides = [1, 1]} : vector<8x384xf32> to vector<1x384xf32>
    %c0_197 = arith.constant 0 : index
    %c0_198 = arith.constant 0 : index
    %c0_199 = arith.constant 0 : index
    %309 = vector.load %arg9[%c0_197, %c0_198, %c0_199] : memref<1x1x384xf32, #tpu.memory_space<vmem>>, vector<1x1x384xf32>
    %310 = vector.shape_cast %309 : vector<1x1x384xf32> to vector<1x384xf32>
    %311 = vector.shape_cast %308 : vector<1x384xf32> to vector<1x1x384xf32>
    tpu.vector_store %arg9[%c0_197, %c0_198, %c0_199], %311 {strides = array<i32>} : memref<1x1x384xf32, #tpu.memory_space<vmem>>, vector<1x1x384xf32>,
    return
  }
  func.func @transform_0(%arg0: i32) -> (i32, i32, i32) {
    %c0_i32 = arith.constant 0 : i32
    %c0_i32_0 = arith.constant 0 : i32
    %c0_i32_1 = arith.constant 0 : i32
    return %arg0, %c0_i32, %c0_i32_0 : i32, i32, i32
  }
  func.func @transform_1(%arg0: i32) -> (i32, i32) {
    %c0_i32 = arith.constant 0 : i32
    %c0_i32_0 = arith.constant 0 : i32
    %c0_i32_1 = arith.constant 0 : i32
    return %c0_i32, %c0_i32_0 : i32, i32
  }
  func.func @transform_2(%arg0: i32) -> (i32, i32) {
    %c0_i32 = arith.constant 0 : i32
    %c0_i32_0 = arith.constant 0 : i32
    %c0_i32_1 = arith.constant 0 : i32
    return %c0_i32, %c0_i32_0 : i32, i32
  }
  func.func @transform_3(%arg0: i32) -> (i32, i32) {
    %c0_i32 = arith.constant 0 : i32
    %c0_i32_0 = arith.constant 0 : i32
    %c0_i32_1 = arith.constant 0 : i32
    return %c0_i32, %c0_i32_0 : i32, i32
  }
  func.func @transform_4(%arg0: i32) -> (i32, i32) {
    %c0_i32 = arith.constant 0 : i32
    %c0_i32_0 = arith.constant 0 : i32
    %c0_i32_1 = arith.constant 0 : i32
    return %c0_i32, %c0_i32_0 : i32, i32
  }
  func.func @transform_5(%arg0: i32) -> (i32, i32) {
    %c0_i32 = arith.constant 0 : i32
    %c0_i32_0 = arith.constant 0 : i32
    %c0_i32_1 = arith.constant 0 : i32
    return %c0_i32, %c0_i32_0 : i32, i32
  }
  func.func @transform_6(%arg0: i32) -> (i32, i32) {
    %c0_i32 = arith.constant 0 : i32
    %c0_i32_0 = arith.constant 0 : i32
    %c0_i32_1 = arith.constant 0 : i32
    return %c0_i32, %c0_i32_0 : i32, i32
  }
  func.func @transform_7(%arg0: i32) -> (i32, i32) {
    %c0_i32 = arith.constant 0 : i32
    %c0_i32_0 = arith.constant 0 : i32
    %c0_i32_1 = arith.constant 0 : i32
    return %c0_i32, %c0_i32_0 : i32, i32
  }
  func.func @transform_8(%arg0: i32) -> (i32, i32, i32) {
    %c0_i32 = arith.constant 0 : i32
    %c0_i32_0 = arith.constant 0 : i32
    %c0_i32_1 = arith.constant 0 : i32
    return %arg0, %c0_i32, %c0_i32_0 : i32, i32, i32
  }
}

</mosaic_0001>

<bundles_post_ra>
// kernel: srcnn_forward.1
= control target key start
LH: loop header
LB: loop body
LE: loop exit
PB: predicated region body
PF: predicated region fallthrough
CT: control target
= control target key end

     0   :  { %s6754_s27 = smov 0   ;;  %s10383_s0 = inlined_call_operand.vmem [shape: f32[2,1,640], index: 0, kind: input, shape index: {}]   ;;  %s10384_s1 = inlined_call_operand.vmem [shape: f32[1,384], index: 1, kind: input, shape index: {}]   ;;  %s10385_s2 = inlined_call_operand.vmem [shape: bf16[64,88], index: 2, kind: input, shape index: {}]   ;;  %s10386_s3 = inlined_call_operand.vmem [shape: f32[64,1], index: 3, kind: input, shape index: {}]   ;;  %s10387_s4 = inlined_call_operand.vmem [shape: bf16[32,1600], index: 4, kind: input, shape index: {}]   ;;  %s10388_s5 = inlined_call_operand.vmem [shape: f32[32,1], index: 5, kind: input, shape index: {}]   ;;  %s10389_s6 = inlined_call_operand.vmem [shape: bf16[8,800], index: 6, kind: input, shape index: {}]   ;;  %s10390_s7 = inlined_call_operand.vmem [shape: f32[8,1], index: 7, kind: input, shape index: {}]   ;;  %s10391_s8 = inlined_call_operand.vmem [shape: f32[2,1,384], index: 8, kind: output, shape index: {}]  }
   0x1   :  { %10595 = sst [smem:[#allocation89_spill]] %s10383_s0 }
   0x2   :  { %10596 = sst [smem:[#allocation90_spill]] %s10384_s1 }
   0x3   :  { %10597 = sst [smem:[#allocation91_spill]] %s10385_s2 }
   0x4   :  { %10598 = sst [smem:[#allocation92_spill]] %s10386_s3 }
   0x5   :  { %10599 = sst [smem:[#allocation93_spill]] %s10387_s4 }
   0x6   :  { %10600 = sst [smem:[#allocation94_spill]] %s10388_s5 }
   0x7 LB: > { %s5812_s28 = sadd.s32 4294967295, %s6623_s27   ;;  %p5816_p0 = scmp.ge.s32.totalorder %s6623_s27, 1  ;;  %s6623_s27 = sphi %s6754_s27, %s18_s27  }
   0x8   : > { %p261_p1 = scmp.lt.s32.totalorder %s6623_s27, 3 }
   0xa   : > { %p262_p2 = pnand %p5816_p0, %p261_p1 }
   0xc   : > { %265 = sbr.rel (%p262_p2) target bundleno = 2214 (0x8a6), region = 52 }
  0x13   : > { %p293_p3 = scmp.lt.s32.totalorder %s5812_s28, 1  ;;  %v307_v0 = vlaneseq  ;;  %s10601_s0 = sld [smem:[#allocation89_spill]]  ;;  %v10602_v2 = vmov 0  ;;  %v10424_v3 = vmov 0.0   ;;  %vm335_vm1 = vcmask 1022976  }
  0x14   : > { %s6625_s11 = smov 125   ;;  %s10490_s12 = smov 127   ;;  %304 = vst [vmem:[#allocation5 + $0xf0] sm:$0xff] %v10424_v3  ;;  %305 = vst [vmem:[#allocation5 + $0xf8] sm:$0xff] %v10424_v3  ;;  %vm317_vm2 = vcmask 1039360   ;;  %vm344_vm3 = vcmask 1014784  }
  0x15   : > { %s11145_s28 = smov (!%p293_p3, %s5812_s28), 1  ;;  %vm6771_vm0 = vcmp.lt.s32.totalorder %v307_v0, 384  ;;  %s6627_s13 = smov 124   ;;  %306 = vst [vmem:[#allocation5 + $0x100] sm:$0xff] %v10424_v3  ;;  %vm326_vm4 = vcmask 1031168   ;;  %vm362_vm5 = vcmask 998400  }
  0x16   : > { %s6235_s29 = smul.u32 5, %s11145_s28  ;;  %v10603_v2 = vsel %vm6771_vm0, 4294967295, %v10602_v2  ;;  %s10493_s14 = smov 126   ;;  %vm353_vm6 = vcmask 1006592   ;;  %vm380_vm7 = vcmask 982016   ;;  %vm371_vm8 = vcmask 990208  }
  0x17   : > { %10604 = vst [vmem:[#allocation6_spill] sm:$0xff] %v10603_v2  ;;  %s6629_s15 = smov 122   ;;  %s6630_s16 = smov 123   ;;  %vm10405_vm9 = vcmask 842752   ;;  %vm10406_vm10 = vcmask 850944   ;;  %vm416_vm11 = vcmask 826368  }
  0x18   : > { %s6631_s17 = smov 120   ;;  %s6632_s18 = smov 121   ;;  %vm10404_vm12 = vcmask 834560   ;;  %vm434_vm13 = vcmask 809984   ;;  %vm425_vm14 = vcmask 818176   ;;  %vm452_vm15 = vcmask 793600  }
  0x19   : > { %s296_s10 = scalar_lea.vmem %s10601_s0, %s6235_s29  ;;  %s10416_s19 = smov 103  }
  0x1a   : > { %v6768_v1 = vld [vmem:[%s296_s10] sm:$0x1f]  ;;  %s10418_s20 = smov 104   ;;  %s6635_s21 = smov 101  }
  0x1b   : > { %332 = vrot.lane.b32.xlu1 %v6768_v1, %s6625_s11  ;;  %314 = vrot.lane.b32.xlu0 %v6768_v1, %s10490_s12  ;;  %311 = vst.msk [vmem:[#allocation5] ss:$8 sm:$0x7] %vm6771_vm0, %v6768_v1  ;;  %s10414_s22 = smov 102   ;;  %s6637_s23 = smov 99   ;;  %v782_v4 = vrot.slane %v6768_v1, 1 }
  0x1c   : > { %s6638_s24 = smov 100   ;;  %s6639_s25 = smov 97  }
  0x1d   : > { %s6640_s26 = smov 98   ;;  %s10396_s29 = smov 80   ;;  %785 = vst.msk [vmem:[#allocation5 + $0x95] ss:$8 sm:$0x7] %vm6771_vm0, %v782_v4 }
  0x1e   : > { %s6642_s30 = smov 96   ;;  %s10392_s9 = smov 78  }
  0x1f   : > { %341 = vrot.lane.b32.xlu1 %v6768_v1, %s6627_s13  ;;  %323 = vrot.lane.b32.xlu0 %v6768_v1, %s10493_s14  ;;  %s10394_s10 = smov 79   ;;  %s6645_s11 = smov 76  }
  0x20   : > { %s6646_s13 = smov 77   ;;  %s10605_s2 = sld [smem:[#allocation91_spill]] }
  0x21   : > { %s10606_s3 = sld [smem:[#allocation92_spill]]  ;;  %s10608_s1 = sld [smem:[#allocation90_spill]] }
  0x22   : > { %s10644_s4 = sld [smem:[#allocation93_spill]]  ;;  %s10912_s5 = sld [smem:[#allocation94_spill]] }
  0x23   : > { %359 = vrot.lane.b32.xlu1 %v6768_v1, %s6629_s15  ;;  %350 = vrot.lane.b32.xlu0 %v6768_v1, %s6630_s16  ;;  %s6648_s15 = smov 74   ;;  %s6649_s16 = smov 75  }
  0x24   : > { %s10979_s0 = smov 22  }
  0x27   : > { %377 = vrot.lane.b32.xlu1 %v6768_v1, %s6631_s17  ;;  %368 = vrot.lane.b32.xlu0 %v6768_v1, %s6632_s18  ;;  %s6650_s17 = smov 72   ;;  %s6651_s18 = smov 73  }
  0x2b   : > { %395 = vrot.lane.b32.xlu1 %v6768_v1, %s10416_s19  ;;  %386 = vrot.lane.b32.xlu0 %v6768_v1, %s10418_s20  ;;  %s10682_s19 = smov 104   ;;  %s10795_s20 = smov 79  }
  0x2f   : > { %413 = vrot.lane.b32.xlu1 %v6768_v1, %s6635_s21  ;;  %404 = vrot.lane.b32.xlu0 %v6768_v1, %s10414_s22  ;;  %s6652_s21 = smov 55   ;;  %s10975_s22 = smov 49  }
  0x33   : > { %431 = vrot.lane.b32.xlu1 %v6768_v1, %s6637_s23  ;;  %422 = vrot.lane.b32.xlu0 %v6768_v1, %s6638_s24  ;;  %s6653_s23 = smov 56   ;;  %s6654_s24 = smov 53  }
  0x37   : > { %449 = vrot.lane.b32.xlu1 %v6768_v1, %s6639_s25  ;;  %440 = vrot.lane.b32.xlu0 %v6768_v1, %s6640_s26  ;;  %s6655_s25 = smov 54   ;;  %s6656_s26 = smov 51  }
  0x3b   : > { %467 = vrot.lane.b32.xlu1 %v6768_v1, %s10396_s29  ;;  %458 = vrot.lane.b32.xlu0 %v6768_v1, %s6642_s30  ;;  %s6657_s30 = smov 52   ;;  %s6696_s29 = smov 61  }
  0x3f   : > { %485 = vrot.lane.b32.xlu1 %v6768_v1, %s10392_s9  ;;  %476 = vrot.lane.b32.xlu0 %v6768_v1, %s10394_s10  ;;  %s6680_s9 = smov 109   ;;  %s6683_s10 = smov 108  }
  0x43   : > { %503 = vrot.lane.b32.xlu1 %v6768_v1, %s6645_s11  ;;  %494 = vrot.lane.b32.xlu0 %v6768_v1, %s6646_s13  ;;  %s10556_s11 = smov 49   ;;  %s10514_s13 = smov 50  }
  0x47   : > { %521 = vrot.lane.b32.xlu1 %v6768_v1, %s6648_s15  ;;  %512 = vrot.lane.b32.xlu0 %v6768_v1, %s6649_s16  ;;  %s6660_s15 = smov 32   ;;  %s10508_s16 = smov 48  }
  0x4b   : > { %539 = vrot.lane.b32.xlu1 %v6768_v1, %s6650_s17  ;;  %530 = vrot.lane.b32.xlu0 %v6768_v1, %s6651_s18  ;;  %s6662_s17 = smov 30   ;;  %s6663_s18 = smov 31  }
  0x4f   : > { %557 = vrot.lane.b32.xlu1 %v6768_v1, %s6652_s21  ;;  %548 = vrot.lane.b32.xlu0 %v6768_v1, %s6653_s23  ;;  %s6664_s21 = smov 28   ;;  %s6665_s23 = smov 29  }
  0x53   : > { %575 = vrot.lane.b32.xlu1 %v6768_v1, %s6654_s24  ;;  %566 = vrot.lane.b32.xlu0 %v6768_v1, %s6655_s25  ;;  %s10542_s24 = smov 26   ;;  %s6667_s25 = smov 27  }
  0x57   : > { %593 = vrot.lane.b32.xlu1 %v6768_v1, %s6656_s26  ;;  %584 = vrot.lane.b32.xlu0 %v6768_v1, %s6657_s30  ;;  %s10540_s26 = smov 24   ;;  %s10563_s30 = smov 25  }
  0x5b   : > { %611 = vrot.lane.b32.xlu1 %v6768_v1, %s10556_s11  ;;  %602 = vrot.lane.b32.xlu0 %v6768_v1, %s10514_s13 }
  0x5f   : > { %629 = vrot.lane.b32.xlu1 %v6768_v1, %s6660_s15  ;;  %620 = vrot.lane.b32.xlu0 %v6768_v1, %s10508_s16  ;;  %s6670_s15 = smov 7  }
  0x63   : > { %647 = vrot.lane.b32.xlu1 %v6768_v1, %s6662_s17  ;;  %638 = vrot.lane.b32.xlu0 %v6768_v1, %s6663_s18  ;;  %s6671_s17 = smov 8   ;;  %s6672_s18 = smov 5  }
  0x67   : > { %665 = vrot.lane.b32.xlu1 %v6768_v1, %s6664_s21  ;;  %656 = vrot.lane.b32.xlu0 %v6768_v1, %s6665_s23  ;;  %s6673_s21 = smov 6   ;;  %s6674_s23 = smov 3  }
  0x6b   : > { %683 = vrot.lane.b32.xlu1 %v6768_v1, %s10542_s24  ;;  %674 = vrot.lane.b32.xlu0 %v6768_v1, %s6667_s25  ;;  %s6675_s25 = smov 4  }
  0x6f   : > { %701 = vrot.lane.b32.xlu1 %v6768_v1, %s10540_s26  ;;  %692 = vrot.lane.b32.xlu0 %v6768_v1, %s10563_s30 }
  0x73   : > { %719 = vrot.lane.b32.xlu1 %v6768_v1, %s6670_s15  ;;  %710 = vrot.lane.b32.xlu0 %v6768_v1, %s6671_s17  ;;  %s10552_s15 = smov 1   ;;  %s10559_s17 = smov 2  }
  0x77   : > { %737 = vrot.lane.b32.xlu1 %v6768_v1, %s6672_s18  ;;  %728 = vrot.lane.b32.xlu0 %v6768_v1, %s6673_s21  ;;  %s6678_s18 = smov 111   ;;  %s6679_s21 = smov 112  }
  0x7b   : > { %755 = vrot.lane.b32.xlu1 %v6768_v1, %s6674_s23  ;;  %746 = vrot.lane.b32.xlu0 %v6768_v1, %s6675_s25  ;;  %s6681_s23 = smov 110   ;;  %s6682_s25 = smov 107  }
  0x7f   : > { %773 = vrot.lane.b32.xlu1 %v6768_v1, %s10552_s15  ;;  %764 = vrot.lane.b32.xlu0 %v6768_v1, %s10559_s17 }
  0x83   : > { %797 = vrot.lane.b32.xlu1 %v6768_v1, %s6678_s18  ;;  %787 = vrot.lane.b32.xlu0 %v6768_v1, %s6679_s21  ;;  %s10420_s18 = smov 105   ;;  %s6687_s21 = smov 88  }
  0x87   : > { %817 = vrot.lane.b32.xlu1 %v6768_v1, %s6680_s9  ;;  %807 = vrot.lane.b32.xlu0 %v6768_v1, %s6681_s23  ;;  %s10422_s9 = smov 106   ;;  %s6688_s23 = smov 85  }
  0x8b   : > { %837 = vrot.lane.b32.xlu1 %v6768_v1, %s6682_s25  ;;  %827 = vrot.lane.b32.xlu0 %v6768_v1, %s6683_s10  ;;  %s6686_s10 = smov 87   ;;  %s6689_s25 = smov 86  }
  0x8d   : > { %v333_v5 = vpop.permute.xlu1 %332  ;;  %v315_v6 = vpop.permute.xlu0 %314 }
  0x8e   : > { %v334_v7 = vrot.slane %v333_v5, 1  ;;  %v316_v8 = vrot.slane %v315_v6, 1 }
  0x8f   : > { %857 = vrot.lane.b32.xlu1 %v6768_v1, %s10420_s18  ;;  %847 = vrot.lane.b32.xlu0 %v6768_v1, %s10422_s9  ;;  %s10666_s9 = smov 106   ;;  %s10976_s18 = smov 47  }
  0x90   : > { %v336_v9 = vsel %vm335_vm1, %v333_v5, %v334_v7  ;;  %v318_v10 = vsel %vm317_vm2, %v315_v6, %v316_v8  ;;  %vm443_vm1 = vcmask 801792  }
  0x91   : > { %339 = vst.msk [vmem:[#allocation5 + $0x3] ss:$8 sm:$0x7] %vm6771_vm0, %v336_v9  ;;  %321 = vst.msk [vmem:[#allocation5 + $0x1] ss:$8 sm:$0x7] %vm6771_vm0, %v318_v10  ;;  %v342_v11 = vpop.permute.xlu1 %341  ;;  %v324_v12 = vpop.permute.xlu0 %323 }
  0x92   : > { %v343_v13 = vrot.slane %v342_v11, 1  ;;  %v325_v14 = vrot.slane %v324_v12, 1 }
  0x93   : > { %883 = vrot.lane.b32.xlu1 %v6768_v1, %s6686_s10  ;;  %873 = vrot.lane.b32.xlu0 %v6768_v1, %s6687_s21  ;;  %s6690_s10 = smov 83   ;;  %s6691_s21 = smov 84  }
  0x94   : > { %v345_v15 = vsel %vm344_vm3, %v342_v11, %v343_v13  ;;  %v327_v16 = vsel %vm326_vm4, %v324_v12, %v325_v14  ;;  %vm10403_vm3 = vcmask 654336  }
  0x95   : > { %348 = vst.msk [vmem:[#allocation5 + $0x4] ss:$8 sm:$0x7] %vm6771_vm0, %v345_v15  ;;  %330 = vst.msk [vmem:[#allocation5 + $0x2] ss:$8 sm:$0x7] %vm6771_vm0, %v327_v16  ;;  %v360_v17 = vpop.permute.xlu1 %359  ;;  %v351_v18 = vpop.permute.xlu0 %350 }
  0x96   : > { %v361_v19 = vrot.slane %v360_v17, 1  ;;  %v352_v20 = vrot.slane %v351_v18, 1 }
  0x97   : > { %903 = vrot.lane.b32.xlu1 %v6768_v1, %s6688_s23  ;;  %893 = vrot.lane.b32.xlu0 %v6768_v1, %s6689_s25  ;;  %s10398_s23 = smov 81   ;;  %s10412_s25 = smov 82  }
  0x98   : > { %v363_v21 = vsel %vm362_vm5, %v360_v17, %v361_v19  ;;  %v354_v22 = vsel %vm353_vm6, %v351_v18, %v352_v20  ;;  %vm461_vm5 = vcmask 785408   ;;  %vm10401_vm6 = vcmask 637952   ;;  %v6938_v20 = vld [vmem:[%s10605_s2] sm:$0xff]  }
  0x99   : > { %366 = vst.msk [vmem:[#allocation5 + $0x6] ss:$8 sm:$0x7] %vm6771_vm0, %v363_v21  ;;  %357 = vst.msk [vmem:[#allocation5 + $0x5] ss:$8 sm:$0x7] %vm6771_vm0, %v354_v22  ;;  %v378_v23 = vpop.permute.xlu1 %377  ;;  %v369_v24 = vpop.permute.xlu0 %368 }
  0x9a   : > { %v379_v25 = vrot.slane %v378_v23, 1  ;;  %v370_v26 = vrot.slane %v369_v24, 1  ;;  %v10426_v19 = vmov 0  }
  0x9b   : > { %923 = vrot.lane.b32.xlu1 %v6768_v1, %s6690_s10  ;;  %913 = vrot.lane.b32.xlu0 %v6768_v1, %s6691_s21  ;;  %s6694_s10 = smov 63   ;;  %s6695_s21 = smov 64  }
  0x9c   : > { %v381_v27 = vsel %vm380_vm7, %v378_v23, %v379_v25  ;;  %v372_v28 = vsel %vm371_vm8, %v369_v24, %v370_v26  ;;  %vm10402_vm7 = vcmask 646144   ;;  %vm506_vm8 = vcmask 621568   ;;  %1226 = vmatprep.mubr.bf16.mxu0 %v10426_v19  ;;  %6330 = vset.pattern.permute.xlu1 %v10426_v19 }
  0x9d   : > { %384 = vst.msk [vmem:[#allocation5 + $0x18] ss:$8 sm:$0x7] %vm6771_vm0, %v381_v27  ;;  %375 = vst.msk [vmem:[#allocation5 + $0x7] ss:$8 sm:$0x7] %vm6771_vm0, %v372_v28  ;;  %v396_v29 = vpop.permute.xlu1 %395  ;;  %v387_v30 = vpop.permute.xlu0 %386  ;;  %6329 = vset.pattern.permute.xlu0 %v10426_v19 }
  0x9e   : > { %v397_v31 = vrot.slane %v396_v29, 1  ;;  %v388_v32 = vrot.slane %v387_v30, 1  ;;  %v867_v33 = vrot.slane %v387_v30, 2 }
  0x9f   : > { %943 = vrot.lane.b32.xlu1 %v6768_v1, %s10398_s23  ;;  %933 = vrot.lane.b32.xlu0 %v6768_v1, %s10412_s25  ;;  %s10561_s23 = smov 23   ;;  %s10676_s25 = smov 105  }
  0xa0   : > { %v399_v34 = vsel %vm10405_vm9, %v396_v29, %v397_v31  ;;  %v390_v35 = vsel %vm10406_vm10, %v387_v30, %v388_v32  ;;  %v868_v36 = vsel %vm10406_vm10, %v388_v32, %v867_v33  ;;  %vm821_vm9 = vcmask 891904  }
  0xa1   : > { %402 = vst.msk [vmem:[#allocation5 + $0x1a] ss:$8 sm:$0x7] %vm6771_vm0, %v399_v34  ;;  %393 = vst.msk [vmem:[#allocation5 + $0x19] ss:$8 sm:$0x7] %vm6771_vm0, %v390_v35  ;;  %v414_v37 = vpop.permute.xlu1 %413  ;;  %v405_v38 = vpop.permute.xlu0 %404 }
  0xa2   : > { %871 = vst.msk [vmem:[#allocation5 + $0xae] ss:$8 sm:$0x7] %vm6771_vm0, %v868_v36  ;;  %v415_v39 = vrot.slane %v414_v37, 1  ;;  %v406_v40 = vrot.slane %v405_v38, 1  ;;  %vm811_vm10 = vcmask 900096  }
  0xa3   : > { %969 = vrot.lane.b32.xlu1 %v6768_v1, %s6694_s10  ;;  %959 = vrot.lane.b32.xlu0 %v6768_v1, %s6695_s21  ;;  %s6697_s10 = smov 62   ;;  %s6698_s21 = smov 59  }
  0xa4   : > { %v417_v41 = vsel %vm416_vm11, %v414_v37, %v415_v39  ;;  %v408_v42 = vsel %vm10404_vm12, %v405_v38, %v406_v40  ;;  %v1054_v6 = vld [vmem:[#allocation5 + $0x8] sm:$0xff]  ;;  %v1055_v7 = vld [vmem:[#allocation5 + $0x10] sm:$0xff]  ;;  %v1053_v8 = vld [vmem:[#allocation5] sm:$0xff]  ;;  %vm497_vm11 = vcmask 629760   ;;  %vm731_vm12 = vcmask 48128  }
  0xa5   : > { %420 = vst.msk [vmem:[#allocation5 + $0x1c] ss:$8 sm:$0x7] %vm6771_vm0, %v417_v41  ;;  %411 = vst.msk [vmem:[#allocation5 + $0x1b] ss:$8 sm:$0x7] %vm6771_vm0, %v408_v42  ;;  %v432_v43 = vpop.permute.xlu1 %431  ;;  %v423_v44 = vpop.permute.xlu0 %422 }
  0xa6   : > { %v433_v45 = vrot.slane %v432_v43, 1  ;;  %v424_v46 = vrot.slane %v423_v44, 1 }
  0xa7   : > { %989 = vrot.lane.b32.xlu1 %v6768_v1, %s6696_s29  ;;  %979 = vrot.lane.b32.xlu0 %v6768_v1, %s6697_s10  ;;  %s6699_s29 = smov 60   ;;  %s6700_s10 = smov 57  }
  0xa8   : > { %v435_v47 = vsel %vm434_vm13, %v432_v43, %v433_v45  ;;  %v426_v48 = vsel %vm425_vm14, %v423_v44, %v424_v46  ;;  %vm877_vm13 = vcmask 719872   ;;  %vm524_vm14 = vcmask 605184  }
  0xa9   : > { %438 = vst.msk [vmem:[#allocation5 + $0x1e] ss:$8 sm:$0x7] %vm6771_vm0, %v435_v47  ;;  %429 = vst.msk [vmem:[#allocation5 + $0x1d] ss:$8 sm:$0x7] %vm6771_vm0, %v426_v48  ;;  %v450_v49 = vpop.permute.xlu1 %449  ;;  %v441_v50 = vpop.permute.xlu0 %440  ;;  %6136 = vmatprep.mubr.msk.bf16.mxu1 %vm877_vm13, %v6938_v20 }
  0xaa   : > { %v451_v51 = vrot.slane %v450_v49, 1  ;;  %v442_v52 = vrot.slane %v441_v50, 1 }
  0xab   : > { %1009 = vrot.lane.b32.xlu1 %v6768_v1, %s6698_s21  ;;  %999 = vrot.lane.b32.xlu0 %v6768_v1, %s6699_s29  ;;  %s6701_s21 = smov 58   ;;  %s10565_s29 = smov 46  }
  0xac   : > { %v453_v53 = vsel %vm452_vm15, %v450_v49, %v451_v51  ;;  %v444_v54 = vsel %vm443_vm1, %v441_v50, %v442_v52  ;;  %vm515_vm15 = vcmask 613376   ;;  %vm542_vm1 = vcmask 588800  }
  0xad   : > { %456 = vst.msk [vmem:[#allocation5 + $0x30] ss:$8 sm:$0x7] %vm6771_vm0, %v453_v53  ;;  %447 = vst.msk [vmem:[#allocation5 + $0x1f] ss:$8 sm:$0x7] %vm6771_vm0, %v444_v54  ;;  %v468_v55 = vpop.permute.xlu1 %467  ;;  %v459_v56 = vpop.permute.xlu0 %458 }
  0xae   : > { %v469_v57 = vrot.slane %v468_v55, 1  ;;  %v953_v58 = vrot.slane %v468_v55, 2  ;;  %v460_v59 = vrot.slane %v459_v56, 1 }
  0xaf   : > { %1029 = vrot.lane.b32.xlu1 %v6768_v1, %s6700_s10  ;;  %1019 = vrot.lane.b32.xlu0 %v6768_v1, %s6701_s21  ;;  %s10532_s21 = smov 47   ;;  %s10554_s10 = smov 22  }
  0xb0   : > { %v471_v60 = vsel %vm10403_vm3, %v468_v55, %v469_v57  ;;  %v954_v61 = vsel %vm10403_vm3, %v469_v57, %v953_v58  ;;  %v462_v62 = vsel %vm461_vm5, %v459_v56, %v460_v59  ;;  %vm533_vm5 = vcmask 596992  }
  0xb1   : > { %474 = vst.msk [vmem:[#allocation5 + $0x32] ss:$8 sm:$0x7] %vm6771_vm0, %v471_v60  ;;  %957 = vst.msk [vmem:[#allocation5 + $0xc7] ss:$8 sm:$0x7] %vm6771_vm0, %v954_v61  ;;  %v486_v63 = vpop.permute.xlu1 %485  ;;  %v477_v4 = vpop.permute.xlu0 %476 }
  0xb2   : > { %465 = vst.msk [vmem:[#allocation5 + $0x31] ss:$8 sm:$0x7] %vm6771_vm0, %v462_v62  ;;  %v487_v5 = vrot.slane %v486_v63, 1  ;;  %v478_v1 = vrot.slane %v477_v4, 1  ;;  %v1105_v61 = vld [vmem:[%s10606_s3 + $0x8] sm:$0xff] }
  0xb3   : > { %v1104_v62 = vld [vmem:[%s10606_s3] sm:$0xff]  ;;  %1119 = vperm.xlu1 %6330, %v1105_v61   ;;  %vm740_vm3 = vcmask 39936  }
  0xb4   : > { %v489_v9 = vsel %vm10401_vm6, %v486_v63, %v487_v5  ;;  %v480_v10 = vsel %vm10402_vm7, %v477_v4, %v478_v1  ;;  %v1057_v11 = vld [vmem:[#allocation5 + $0x20] sm:$0xff]  ;;  %v1058_v12 = vld [vmem:[#allocation5 + $0x28] sm:$0xff]  ;;  %v1056_v13 = vld [vmem:[#allocation5 + $0x18] sm:$0xff]  ;;  %1114 = vperm.xlu0 %6329, %v1104_v62   ;;  %vm659_vm6 = vcmask 236544   ;;  %vm713_vm7 = vcmask 64512  }
  0xb5   : > { %492 = vst.msk [vmem:[#allocation5 + $0x34] ss:$8 sm:$0x7] %vm6771_vm0, %v489_v9  ;;  %483 = vst.msk [vmem:[#allocation5 + $0x33] ss:$8 sm:$0x7] %vm6771_vm0, %v480_v10  ;;  %v504_v14 = vpop.permute.xlu1 %503  ;;  %v495_v15 = vpop.permute.xlu0 %494  ;;  %v1087_v16 = vpack.c.bf16 %v1057_v11, %v1054_v6  ;;  %v1088_v17 = vpack.c.bf16 %v1058_v12, %v1055_v7  ;;  %v1086_v18 = vpack.c.bf16 %v1056_v13, %v1053_v8 }
  0xb6   : > { %v505_v21 = vrot.slane %v504_v14, 1  ;;  %v496_v22 = vrot.slane %v495_v15, 1  ;;  %v1106_v6 = vld [vmem:[%s10606_s3 + $0x10] sm:$0xff]  ;;  %v1107_v7 = vld [vmem:[%s10606_s3 + $0x18] sm:$0xff] }
  0xb7   : > { %1194 = vmatprep.subr.bf16.mxu0 %v1087_v16  ;;  %6124 = vmatprep.subr.bf16.mxu1 %v1088_v17 }
  0xb8   : > { %v507_v23 = vsel %vm506_vm8, %v504_v14, %v505_v21  ;;  %v498_v24 = vsel %vm497_vm11, %v495_v15, %v496_v22  ;;  %1195 = vmatpush1.bf16.msra.mxu0 %v1086_v18  ;;  %6125 = vmatpush3.bf16.msra.mxu1 %v1088_v17  ;;  %vm560_vm8 = vcmask 449536   ;;  %vm551_vm11 = vcmask 457728  }
  0xb9   : > { %510 = vst.msk [vmem:[#allocation5 + $0x36] ss:$8 sm:$0x7] %vm6771_vm0, %v507_v23  ;;  %501 = vst.msk [vmem:[#allocation5 + $0x35] ss:$8 sm:$0x7] %vm6771_vm0, %v498_v24  ;;  %v522_v25 = vpop.permute.xlu1 %521  ;;  %v513_v26 = vpop.permute.xlu0 %512  ;;  %1124 = vperm.xlu1 %6330, %v1106_v6   ;;  %1129 = vperm.xlu0 %6329, %v1107_v7  }
  0xba   : > { %v523_v27 = vrot.slane %v522_v25, 1  ;;  %v514_v28 = vrot.slane %v513_v26, 1 }
  0xbc   : > { %v525_v29 = vsel %vm524_vm14, %v522_v25, %v523_v27  ;;  %v516_v30 = vsel %vm515_vm15, %v513_v26, %v514_v28  ;;  %vm578_vm14 = vcmask 433152   ;;  %vm569_vm15 = vcmask 441344   ;;  %v1108_v27 = vld [vmem:[%s10606_s3 + $0x20] sm:$0xff]  ;;  %v1109_v28 = vld [vmem:[%s10606_s3 + $0x28] sm:$0xff] }
  0xbd   : > { %528 = vst.msk [vmem:[#allocation5 + $0x48] ss:$8 sm:$0x7] %vm6771_vm0, %v525_v29  ;;  %519 = vst.msk [vmem:[#allocation5 + $0x37] ss:$8 sm:$0x7] %vm6771_vm0, %v516_v30  ;;  %v540_v31 = vpop.permute.xlu1 %539  ;;  %v531_v32 = vpop.permute.xlu0 %530  ;;  %1134 = vperm.xlu1 %6330, %v1108_v27   ;;  %1139 = vperm.xlu0 %6329, %v1109_v28  }
  0xbe   : > { %v541_v33 = vrot.slane %v540_v31, 1  ;;  %v532_v34 = vrot.slane %v531_v32, 1 }
  0xc0   : > { %v543_v35 = vsel %vm542_vm1, %v540_v31, %v541_v33  ;;  %v534_v36 = vsel %vm533_vm5, %v531_v32, %v532_v34  ;;  %vm596_vm1 = vcmask 416768   ;;  %vm587_vm5 = vcmask 424960  }
  0xc1   : > { %546 = vst.msk [vmem:[#allocation5 + $0x4a] ss:$8 sm:$0x7] %vm6771_vm0, %v543_v35  ;;  %537 = vst.msk [vmem:[#allocation5 + $0x49] ss:$8 sm:$0x7] %vm6771_vm0, %v534_v36  ;;  %v558_v37 = vpop.permute.xlu1 %557  ;;  %v549_v38 = vpop.permute.xlu0 %548 }
  0xc2   : > { %v559_v39 = vrot.slane %v558_v37, 1  ;;  %v550_v40 = vrot.slane %v549_v38, 1  ;;  %v1039_v41 = vrot.slane %v549_v38, 2  ;;  %v1110_v35 = vld [vmem:[%s10606_s3 + $0x30] sm:$0xff]  ;;  %v1111_v36 = vld [vmem:[%s10606_s3 + $0x38] sm:$0xff]  ;;  %s10984_s3 = smov 25  }
  0xc3   : > { %1144 = vperm.xlu1 %6330, %v1110_v35   ;;  %1149 = vperm.xlu0 %6329, %v1111_v36  }
  0xc4   : > { %v561_v42 = vsel %vm560_vm8, %v558_v37, %v559_v39  ;;  %v552_v43 = vsel %vm551_vm11, %v549_v38, %v550_v40  ;;  %v1040_v44 = vsel %vm551_vm11, %v550_v40, %v1039_v41  ;;  %vm614_vm8 = vcmask 400384   ;;  %v1060_v10 = vld [vmem:[#allocation5 + $0x38] sm:$0xff]  ;;  %v1061_v11 = vld [vmem:[#allocation5 + $0x40] sm:$0xff]  ;;  %v1059_v12 = vld [vmem:[#allocation5 + $0x30] sm:$0xff] }
  0xc5   : > { %564 = vst.msk [vmem:[#allocation5 + $0x4c] ss:$8 sm:$0x7] %vm6771_vm0, %v561_v42  ;;  %555 = vst.msk [vmem:[#allocation5 + $0x4b] ss:$8 sm:$0x7] %vm6771_vm0, %v552_v43  ;;  %v576_v45 = vpop.permute.xlu1 %575  ;;  %v567_v46 = vpop.permute.xlu0 %566 }
  0xc6   : > { %1043 = vst.msk [vmem:[#allocation5 + $0xf0] ss:$8 sm:$0x7] %vm6771_vm0, %v1040_v44  ;;  %v577_v47 = vrot.slane %v576_v45, 1  ;;  %v568_v48 = vrot.slane %v567_v46, 1  ;;  %vm10539_vm11 = vcmask 408576  }
  0xc7   : > { %6332 = vrot.lane.b32.xlu1 %v10426_v19, %s10514_s13  ;;  %6337 = vrot.lane.b32.xlu0 %v10426_v19, %s10514_s13 }
  0xc8   : > { %v579_v49 = vsel %vm578_vm14, %v576_v45, %v577_v47  ;;  %v570_v50 = vsel %vm569_vm15, %v567_v46, %v568_v48  ;;  %vm10400_vm14 = vcmask 261120   ;;  %vm10538_vm15 = vcmask 392192  }
  0xc9   : > { %582 = vst.msk [vmem:[#allocation5 + $0x4e] ss:$8 sm:$0x7] %vm6771_vm0, %v579_v49  ;;  %573 = vst.msk [vmem:[#allocation5 + $0x4d] ss:$8 sm:$0x7] %vm6771_vm0, %v570_v50  ;;  %v594_v51 = vpop.permute.xlu1 %593  ;;  %v585_v52 = vpop.permute.xlu0 %584 }
  0xca   : > { %v595_v53 = vrot.slane %v594_v51, 1  ;;  %v586_v54 = vrot.slane %v585_v52, 1 }
  0xcb   : > { %6342 = vrot.lane.b32.xlu1 %v10426_v19, %s10556_s11  ;;  %6347 = vrot.lane.b32.xlu0 %v10426_v19, %s10556_s11 }
  0xcc   : > { %v597_v55 = vsel %vm596_vm1, %v594_v51, %v595_v53  ;;  %v588_v56 = vsel %vm587_vm5, %v585_v52, %v586_v54  ;;  %vm650_vm1 = vcmask 244736   ;;  %vm641_vm5 = vcmask 252928  }
  0xcd   : > { %600 = vst.msk [vmem:[#allocation5 + $0x60] ss:$8 sm:$0x7] %vm6771_vm0, %v597_v55  ;;  %591 = vst.msk [vmem:[#allocation5 + $0x4f] ss:$8 sm:$0x7] %vm6771_vm0, %v588_v56  ;;  %v612_v57 = vpop.permute.xlu1 %611  ;;  %v603_v58 = vpop.permute.xlu0 %602 }
  0xce   : > { %v613_v59 = vrot.slane %v612_v57, 1  ;;  %v604_v60 = vrot.slane %v603_v58, 1 }
  0xcf   : > { %6352 = vrot.lane.b32.xlu1 %v10426_v19, %s10508_s16  ;;  %6357 = vrot.lane.b32.xlu0 %v10426_v19, %s10508_s16 }
  0xd0   : > { %v615_v63 = vsel %vm614_vm8, %v612_v57, %v613_v59  ;;  %v606_v4 = vsel %vm10539_vm11, %v603_v58, %v604_v60 }
  0xd1   : > { %618 = vst.msk [vmem:[#allocation5 + $0x62] ss:$8 sm:$0x7] %vm6771_vm0, %v615_v63  ;;  %609 = vst.msk [vmem:[#allocation5 + $0x61] ss:$8 sm:$0x7] %vm6771_vm0, %v606_v4  ;;  %v630_v5 = vpop.permute.xlu1 %629  ;;  %v621_v1 = vpop.permute.xlu0 %620 }
  0xd2   : > { %v631_v8 = vrot.slane %v630_v5, 1  ;;  %v622_v9 = vrot.slane %v621_v1, 1 }
  0xd3   : > { %6362 = vrot.lane.b32.xlu1 %v10426_v19, %s10532_s21  ;;  %6367 = vrot.lane.b32.xlu0 %v10426_v19, %s10532_s21 }
  0xd4   : > { %v633_v13 = vsel %vm10400_vm14, %v630_v5, %v631_v8  ;;  %v624_v14 = vsel %vm10538_vm15, %v621_v1, %v622_v9  ;;  %v1063_v15 = vld [vmem:[#allocation5 + $0x50] sm:$0xff]  ;;  %v1064_v16 = vld [vmem:[#allocation5 + $0x58] sm:$0xff]  ;;  %v1062_v17 = vld [vmem:[#allocation5 + $0x48] sm:$0xff]  ;;  %vm668_vm14 = vcmask 228352  }
  0xd5   : > { %636 = vst.msk [vmem:[#allocation5 + $0x64] ss:$8 sm:$0x7] %vm6771_vm0, %v633_v13  ;;  %627 = vst.msk [vmem:[#allocation5 + $0x63] ss:$8 sm:$0x7] %vm6771_vm0, %v624_v14  ;;  %v648_v18 = vpop.permute.xlu1 %647  ;;  %v639_v21 = vpop.permute.xlu0 %638  ;;  %v1090_v22 = vpack.c.bf16 %v1063_v15, %v1060_v10  ;;  %v1091_v23 = vpack.c.bf16 %v1064_v16, %v1061_v11  ;;  %v1089_v24 = vpack.c.bf16 %v1062_v17, %v1059_v12 }
  0xd6   : > { %v649_v25 = vrot.slane %v648_v18, 1  ;;  %v640_v26 = vrot.slane %v639_v21, 1 }
  0xd7   : > { %1196 = vmatprep.subr.bf16.mxu0 %v1090_v22  ;;  %6126 = vmatprep.subr.bf16.mxu1 %v1091_v23 }
  0xd8   : > { %v651_v29 = vsel %vm650_vm1, %v648_v18, %v649_v25  ;;  %v642_v30 = vsel %vm641_vm5, %v639_v21, %v640_v26  ;;  %1197 = vmatpush1.bf16.msra.mxu0 %v1089_v24  ;;  %6127 = vmatpush3.bf16.msra.mxu1 %v1091_v23  ;;  %vm686_vm1 = vcmask 211968   ;;  %vm677_vm5 = vcmask 220160  }
  0xd9   : > { %654 = vst.msk [vmem:[#allocation5 + $0x66] ss:$8 sm:$0x7] %vm6771_vm0, %v651_v29  ;;  %645 = vst.msk [vmem:[#allocation5 + $0x65] ss:$8 sm:$0x7] %vm6771_vm0, %v642_v30  ;;  %v666_v31 = vpop.permute.xlu1 %665  ;;  %v657_v32 = vpop.permute.xlu0 %656  ;;  %6372 = vrot.lane.b32.xlu1 %v10426_v19, %s10565_s29  ;;  %6377 = vrot.lane.b32.xlu0 %v10426_v19, %s10565_s29 }
  0xda   : > { %v667_v33 = vrot.slane %v666_v31, 1  ;;  %v658_v34 = vrot.slane %v657_v32, 1 }
  0xdc   : > { %v669_v37 = vsel %vm668_vm14, %v666_v31, %v667_v33  ;;  %v660_v38 = vsel %vm659_vm6, %v657_v32, %v658_v34  ;;  %vm10558_vm6 = vcmask 195584   ;;  %vm695_vm14 = vcmask 203776  }
  0xdd   : > { %672 = vst.msk [vmem:[#allocation5 + $0x78] ss:$8 sm:$0x7] %vm6771_vm0, %v669_v37  ;;  %663 = vst.msk [vmem:[#allocation5 + $0x67] ss:$8 sm:$0x7] %vm6771_vm0, %v660_v38  ;;  %v684_v39 = vpop.permute.xlu1 %683  ;;  %v675_v40 = vpop.permute.xlu0 %674  ;;  %6382 = vrot.lane.b32.xlu1 %v10426_v19, %s10542_s24  ;;  %6387 = vrot.lane.b32.xlu0 %v10426_v19, %s10542_s24 }
  0xde   : > { %v685_v41 = vrot.slane %v684_v39, 1  ;;  %v676_v42 = vrot.slane %v675_v40, 1 }
  0xe0   : > { %v687_v43 = vsel %vm686_vm1, %v684_v39, %v685_v41  ;;  %v678_v44 = vsel %vm677_vm5, %v675_v40, %v676_v42  ;;  %vm722_vm5 = vcmask 56320  }
  0xe1   : > { %690 = vst.msk [vmem:[#allocation5 + $0x7a] ss:$8 sm:$0x7] %vm6771_vm0, %v687_v43  ;;  %681 = vst.msk [vmem:[#allocation5 + $0x79] ss:$8 sm:$0x7] %vm6771_vm0, %v678_v44  ;;  %v702_v45 = vpop.permute.xlu1 %701  ;;  %v693_v46 = vpop.permute.xlu0 %692  ;;  %6392 = vrot.lane.b32.xlu1 %v10426_v19, %s10563_s30  ;;  %6397 = vrot.lane.b32.xlu0 %v10426_v19, %s10563_s30 }
  0xe2   : > { %v703_v47 = vrot.slane %v702_v45, 1  ;;  %v694_v48 = vrot.slane %v693_v46, 1 }
  0xe4   : > { %v705_v49 = vsel %vm10558_vm6, %v702_v45, %v703_v47  ;;  %v696_v50 = vsel %vm695_vm14, %v693_v46, %v694_v48  ;;  %v1066_v12 = vld [vmem:[#allocation5 + $0x68] sm:$0xff]  ;;  %v1067_v13 = vld [vmem:[#allocation5 + $0x70] sm:$0xff]  ;;  %v1065_v14 = vld [vmem:[#allocation5 + $0x60] sm:$0xff] }
  0xe5   : > { %708 = vst.msk [vmem:[#allocation5 + $0x7c] ss:$8 sm:$0x7] %vm6771_vm0, %v705_v49  ;;  %699 = vst.msk [vmem:[#allocation5 + $0x7b] ss:$8 sm:$0x7] %vm6771_vm0, %v696_v50  ;;  %v720_v51 = vpop.permute.xlu1 %719  ;;  %v711_v52 = vpop.permute.xlu0 %710  ;;  %6402 = vrot.lane.b32.xlu1 %v10426_v19, %s10540_s26  ;;  %6407 = vrot.lane.b32.xlu0 %v10426_v19, %s10540_s26 }
  0xe6   : > { %v721_v53 = vrot.slane %v720_v51, 1  ;;  %v712_v54 = vrot.slane %v711_v52, 1 }
  0xe8   : > { %v723_v55 = vsel %vm722_vm5, %v720_v51, %v721_v53  ;;  %v714_v56 = vsel %vm713_vm7, %v711_v52, %v712_v54  ;;  %vm758_vm7 = vcmask 23552   ;;  %vm749_vm5 = vcmask 31744  }
  0xe9   : > { %726 = vst.msk [vmem:[#allocation5 + $0x7e] ss:$8 sm:$0x7] %vm6771_vm0, %v723_v55  ;;  %717 = vst.msk [vmem:[#allocation5 + $0x7d] ss:$8 sm:$0x7] %vm6771_vm0, %v714_v56  ;;  %v738_v57 = vpop.permute.xlu1 %737  ;;  %v729_v58 = vpop.permute.xlu0 %728  ;;  %6412 = vrot.lane.b32.xlu1 %v10426_v19, %s10561_s23  ;;  %6417 = vrot.lane.b32.xlu0 %v10426_v19, %s10561_s23 }
  0xea   : > { %v739_v59 = vrot.slane %v738_v57, 1  ;;  %v730_v60 = vrot.slane %v729_v58, 1 }
  0xec   : > { %v741_v61 = vsel %vm740_vm3, %v738_v57, %v739_v59  ;;  %v732_v62 = vsel %vm731_vm12, %v729_v58, %v730_v60  ;;  %vm776_vm12 = vcmask 7168   ;;  %vm767_vm3 = vcmask 15360  }
  0xed   : > { %744 = vst.msk [vmem:[#allocation5 + $0x90] ss:$8 sm:$0x7] %vm6771_vm0, %v741_v61  ;;  %735 = vst.msk [vmem:[#allocation5 + $0x7f] ss:$8 sm:$0x7] %vm6771_vm0, %v732_v62  ;;  %v756_v63 = vpop.permute.xlu1 %755  ;;  %v747_v4 = vpop.permute.xlu0 %746  ;;  %6422 = vrot.lane.b32.xlu1 %v10426_v19, %s10554_s10  ;;  %6427 = vrot.lane.b32.xlu0 %v10426_v19, %s10554_s10 }
  0xee   : > { %v757_v5 = vrot.slane %v756_v63, 1  ;;  %v748_v1 = vrot.slane %v747_v4, 1 }
  0xf0   : > { %v759_v6 = vsel %vm758_vm7, %v756_v63, %v757_v5  ;;  %v750_v7 = vsel %vm749_vm5, %v747_v4, %v748_v1  ;;  %vm801_vm7 = vcmask 908288   ;;  %vm791_vm5 = vcmask 916480  }
  0xf1   : > { %762 = vst.msk [vmem:[#allocation5 + $0x92] ss:$8 sm:$0x7] %vm6771_vm0, %v759_v6  ;;  %753 = vst.msk [vmem:[#allocation5 + $0x91] ss:$8 sm:$0x7] %vm6771_vm0, %v750_v7  ;;  %v774_v8 = vpop.permute.xlu1 %773  ;;  %v765_v9 = vpop.permute.xlu0 %764  ;;  %6432 = vrot.lane.b32.xlu1 %v10426_v19, %s10559_s17  ;;  %6437 = vrot.lane.b32.xlu0 %v10426_v19, %s10559_s17 }
  0xf2   : > { %v775_v10 = vrot.slane %v774_v8, 1  ;;  %v766_v11 = vrot.slane %v765_v9, 1 }
  0xf4   : > { %v777_v15 = vsel %vm776_vm12, %v774_v8, %v775_v10  ;;  %v768_v16 = vsel %vm767_vm3, %v765_v9, %v766_v11  ;;  %v1069_v17 = vld [vmem:[#allocation5 + $0x80] sm:$0xff]  ;;  %v1070_v18 = vld [vmem:[#allocation5 + $0x88] sm:$0xff]  ;;  %v1068_v21 = vld [vmem:[#allocation5 + $0x78] sm:$0xff] }
  0xf5   : > { %780 = vst.msk [vmem:[#allocation5 + $0x94] ss:$8 sm:$0x7] %vm6771_vm0, %v777_v15  ;;  %771 = vst.msk [vmem:[#allocation5 + $0x93] ss:$8 sm:$0x7] %vm6771_vm0, %v768_v16  ;;  %v798_v22 = vpop.permute.xlu1 %797  ;;  %v788_v23 = vpop.permute.xlu0 %787  ;;  %v1093_v24 = vpack.c.bf16 %v1069_v17, %v1066_v12  ;;  %v1094_v25 = vpack.c.bf16 %v1070_v18, %v1067_v13  ;;  %v1092_v26 = vpack.c.bf16 %v1068_v21, %v1065_v14  ;;  %6442 = vrot.lane.b32.xlu1 %v10426_v19, %s10552_s15 }
  0xf6   : > { %v799_v27 = vrot.slane %v798_v22, 1  ;;  %v800_v28 = vrot.slane %v798_v22, 2  ;;  %v789_v29 = vrot.slane %v788_v23, 1  ;;  %v790_v30 = vrot.slane %v788_v23, 2  ;;  %6447 = vrot.lane.b32.xlu0 %v10426_v19, %s10552_s15 }
  0xf7   : > { %1198 = vmatprep.subr.bf16.mxu0 %v1093_v24  ;;  %6128 = vmatprep.subr.bf16.mxu1 %v1094_v25 }
  0xf8   : > { %v802_v31 = vsel %vm801_vm7, %v799_v27, %v800_v28  ;;  %v792_v32 = vsel %vm791_vm5, %v789_v29, %v790_v30  ;;  %1199 = vmatpush1.bf16.msra.mxu0 %v1092_v26  ;;  %6129 = vmatpush3.bf16.msra.mxu1 %v1094_v25  ;;  %vm841_vm7 = vcmask 875520   ;;  %vm831_vm5 = vcmask 883712  }
  0xf9   : > { %805 = vst.msk [vmem:[#allocation5 + $0x97] ss:$8 sm:$0x7] %vm6771_vm0, %v802_v31  ;;  %795 = vst.msk [vmem:[#allocation5 + $0x96] ss:$8 sm:$0x7] %vm6771_vm0, %v792_v32  ;;  %v818_v33 = vpop.permute.xlu1 %817  ;;  %v808_v34 = vpop.permute.xlu0 %807 }
  0xfa   : > { %v819_v35 = vrot.slane %v818_v33, 1  ;;  %v820_v36 = vrot.slane %v818_v33, 2  ;;  %v809_v37 = vrot.slane %v808_v34, 1  ;;  %v810_v38 = vrot.slane %v808_v34, 2 }
  0xfc   : > { %v822_v39 = vsel %vm821_vm9, %v819_v35, %v820_v36  ;;  %v812_v40 = vsel %vm811_vm10, %v809_v37, %v810_v38  ;;  %vm10407_vm9 = vcmask 859136   ;;  %vm10408_vm10 = vcmask 867328  }
  0xfd   : > { %825 = vst.msk [vmem:[#allocation5 + $0xa9] ss:$8 sm:$0x7] %vm6771_vm0, %v822_v39  ;;  %815 = vst.msk [vmem:[#allocation5 + $0xa8] ss:$8 sm:$0x7] %vm6771_vm0, %v812_v40  ;;  %v838_v41 = vpop.permute.xlu1 %837  ;;  %v828_v42 = vpop.permute.xlu0 %827 }
  0xfe   : > { %v839_v43 = vrot.slane %v838_v41, 1  ;;  %v840_v44 = vrot.slane %v838_v41, 2  ;;  %v829_v45 = vrot.slane %v828_v42, 1  ;;  %v830_v46 = vrot.slane %v828_v42, 2 }
 0x100   : > { %v842_v47 = vsel %vm841_vm7, %v839_v43, %v840_v44  ;;  %v832_v48 = vsel %vm831_vm5, %v829_v45, %v830_v46  ;;  %vm887_vm7 = vcmask 711680   ;;  %vm907_vm5 = vcmask 695296   ;;  %v1072_v18 = vld [vmem:[#allocation5 + $0x98] sm:$0xff]  ;;  %v1073_v21 = vld [vmem:[#allocation5 + $0xa0] sm:$0xff]  ;;  %v1071_v22 = vld [vmem:[#allocation5 + $0x90] sm:$0xff] }
 0x101   : > { %845 = vst.msk [vmem:[#allocation5 + $0xab] ss:$8 sm:$0x7] %vm6771_vm0, %v842_v47  ;;  %835 = vst.msk [vmem:[#allocation5 + $0xaa] ss:$8 sm:$0x7] %vm6771_vm0, %v832_v48  ;;  %v858_v49 = vpop.permute.xlu1 %857  ;;  %v848_v50 = vpop.permute.xlu0 %847 }
 0x102   : > { %v859_v51 = vrot.slane %v858_v49, 1  ;;  %v860_v52 = vrot.slane %v858_v49, 2  ;;  %v849_v53 = vrot.slane %v848_v50, 1  ;;  %v850_v54 = vrot.slane %v848_v50, 2 }
 0x104   : > { %v862_v55 = vsel %vm10407_vm9, %v859_v51, %v860_v52  ;;  %v852_v56 = vsel %vm10408_vm10, %v849_v53, %v850_v54  ;;  %vm897_vm9 = vcmask 703488   ;;  %vm917_vm10 = vcmask 687104  }
 0x105   : > { %865 = vst.msk [vmem:[#allocation5 + $0xad] ss:$8 sm:$0x7] %vm6771_vm0, %v862_v55  ;;  %855 = vst.msk [vmem:[#allocation5 + $0xac] ss:$8 sm:$0x7] %vm6771_vm0, %v852_v56  ;;  %v884_v57 = vpop.permute.xlu1 %883  ;;  %v874_v58 = vpop.permute.xlu0 %873 }
 0x106   : > { %v885_v59 = vrot.slane %v884_v57, 1  ;;  %v886_v60 = vrot.slane %v884_v57, 2  ;;  %v875_v61 = vrot.slane %v874_v58, 1  ;;  %v876_v62 = vrot.slane %v874_v58, 2 }
 0x108   : > { %v888_v63 = vsel %vm887_vm7, %v885_v59, %v886_v60  ;;  %v878_v4 = vsel %vm877_vm13, %v875_v61, %v876_v62  ;;  %vm927_vm7 = vcmask 678912  }
 0x109   : > { %891 = vst.msk [vmem:[#allocation5 + $0xc0] ss:$8 sm:$0x7] %vm6771_vm0, %v888_v63  ;;  %881 = vst.msk [vmem:[#allocation5 + $0xaf] ss:$8 sm:$0x7] %vm6771_vm0, %v878_v4  ;;  %v904_v5 = vpop.permute.xlu1 %903  ;;  %v894_v1 = vpop.permute.xlu0 %893 }
 0x10a   : > { %v905_v6 = vrot.slane %v904_v5, 1  ;;  %v906_v7 = vrot.slane %v904_v5, 2  ;;  %v895_v8 = vrot.slane %v894_v1, 1  ;;  %v896_v9 = vrot.slane %v894_v1, 2 }
 0x10c   : > { %v908_v10 = vsel %vm907_vm5, %v905_v6, %v906_v7  ;;  %v898_v11 = vsel %vm897_vm9, %v895_v8, %v896_v9  ;;  %vm10409_vm9 = vcmask 662528   ;;  %vm10410_vm5 = vcmask 670720  }
 0x10d   : > { %911 = vst.msk [vmem:[#allocation5 + $0xc2] ss:$8 sm:$0x7] %vm6771_vm0, %v908_v10  ;;  %901 = vst.msk [vmem:[#allocation5 + $0xc1] ss:$8 sm:$0x7] %vm6771_vm0, %v898_v11  ;;  %v924_v12 = vpop.permute.xlu1 %923  ;;  %v914_v13 = vpop.permute.xlu0 %913 }
 0x10e   : > { %v925_v14 = vrot.slane %v924_v12, 1  ;;  %v926_v15 = vrot.slane %v924_v12, 2  ;;  %v915_v16 = vrot.slane %v914_v13, 1  ;;  %v916_v17 = vrot.slane %v914_v13, 2  ;;  %v1084_v10 = vld [vmem:[#allocation5 + $0xf8] sm:$0xff]  ;;  %v1085_v11 = vld [vmem:[#allocation5 + $0x100] sm:$0xff] }
 0x10f   : > { %v1083_v12 = vld [vmem:[#allocation5 + $0xf0] sm:$0xff] }
 0x110   : > { %v928_v23 = vsel %vm927_vm7, %v925_v14, %v926_v15  ;;  %v918_v24 = vsel %vm917_vm10, %v915_v16, %v916_v17  ;;  %v1075_v25 = vld [vmem:[#allocation5 + $0xb0] sm:$0xff]  ;;  %v1076_v26 = vld [vmem:[#allocation5 + $0xb8] sm:$0xff]  ;;  %v1074_v27 = vld [vmem:[#allocation5 + $0xa8] sm:$0xff]  ;;  %vm973_vm10 = vcmask 515072   ;;  %vm10411_vm7 = vcmask 523264  }
 0x111   : > { %931 = vst.msk [vmem:[#allocation5 + $0xc4] ss:$8 sm:$0x7] %vm6771_vm0, %v928_v23  ;;  %921 = vst.msk [vmem:[#allocation5 + $0xc3] ss:$8 sm:$0x7] %vm6771_vm0, %v918_v24  ;;  %v944_v28 = vpop.permute.xlu1 %943  ;;  %v934_v29 = vpop.permute.xlu0 %933  ;;  %v1096_v30 = vpack.c.bf16 %v1075_v25, %v1072_v18  ;;  %v1097_v31 = vpack.c.bf16 %v1076_v26, %v1073_v21  ;;  %v1095_v32 = vpack.c.bf16 %v1074_v27, %v1071_v22 }
 0x112   : > { %v945_v33 = vrot.slane %v944_v28, 1  ;;  %v946_v34 = vrot.slane %v944_v28, 2  ;;  %v935_v35 = vrot.slane %v934_v29, 1  ;;  %v936_v36 = vrot.slane %v934_v29, 2  ;;  %v6557_v29 = vld [vmem:[%s10605_s2 + $0x8] sm:$0xff]  }
 0x113   : > { %1200 = vmatprep.subr.bf16.mxu0 %v1096_v30  ;;  %6130 = vmatprep.subr.bf16.mxu1 %v1097_v31  ;;  %v1102_v24 = vpack.c.bf16 %v1084_v10, %v1084_v10  ;;  %v1103_v25 = vpack.c.bf16 %v1085_v11, %v1085_v11  ;;  %v1101_v26 = vpack.c.bf16 %v1083_v12, %v1083_v12  ;;  %v6558_v30 = vld [vmem:[%s10605_s2 + $0x10] sm:$0xff]  }
 0x114   : > { %v948_v37 = vsel %vm10409_vm9, %v945_v33, %v946_v34  ;;  %v938_v38 = vsel %vm10410_vm5, %v935_v35, %v936_v36  ;;  %1201 = vmatpush1.bf16.msra.mxu0 %v1095_v32  ;;  %6131 = vmatpush3.bf16.msra.mxu1 %v1097_v31  ;;  %vm993_vm9 = vcmask 498688   ;;  %vm983_vm5 = vcmask 506880   ;;  %v6559_v31 = vld [vmem:[%s10605_s2 + $0x18] sm:$0xff]   ;;  %s10983_s2 = smov 46  }
 0x115   : > { %951 = vst.msk [vmem:[#allocation5 + $0xc6] ss:$8 sm:$0x7] %vm6771_vm0, %v948_v37  ;;  %941 = vst.msk [vmem:[#allocation5 + $0xc5] ss:$8 sm:$0x7] %vm6771_vm0, %v938_v38  ;;  %v970_v39 = vpop.permute.xlu1 %969  ;;  %v960_v40 = vpop.permute.xlu0 %959 }
 0x116   : > { %v971_v41 = vrot.slane %v970_v39, 1  ;;  %v972_v42 = vrot.slane %v970_v39, 2  ;;  %v961_v43 = vrot.slane %v960_v40, 1  ;;  %v962_v44 = vrot.slane %v960_v40, 2 }
 0x117   : > { %v7171_v35 = vshrl.u32 %v307_v0, 7 }
 0x118   : > { %v974_v45 = vsel %vm973_vm10, %v971_v41, %v972_v42  ;;  %v964_v46 = vsel %vm10411_vm7, %v961_v43, %v962_v44  ;;  %vm1013_vm10 = vcmask 482304   ;;  %vm1003_vm7 = vcmask 490496   ;;  %v302_v41 = vld [vmem:[%s10608_s1] sm:$0x7]  ;;  %s10980_s1 = smov 1  }
 0x119   : > { %977 = vst.msk [vmem:[#allocation5 + $0xd9] ss:$8 sm:$0x7] %vm6771_vm0, %v974_v45  ;;  %967 = vst.msk [vmem:[#allocation5 + $0xd8] ss:$8 sm:$0x7] %vm6771_vm0, %v964_v46  ;;  %v990_v47 = vpop.permute.xlu1 %989  ;;  %v980_v48 = vpop.permute.xlu0 %979 }
 0x11a   : > { %v991_v49 = vrot.slane %v990_v47, 1  ;;  %v992_v50 = vrot.slane %v990_v47, 2  ;;  %v981_v51 = vrot.slane %v980_v48, 1  ;;  %v982_v52 = vrot.slane %v980_v48, 2  ;;  %10607 = vst [vmem:[#allocation7_spill] sm:$0xff] %v7171_v35 }
 0x11b   : > { %v1367_v36 = vsub.s32 2, %v7171_v35  ;;  %v1359_v37 = vsub.s32 0, %v7171_v35  ;;  %v1363_v38 = vsub.s32 1, %v7171_v35 }
 0x11c   : > { %v994_v53 = vsel %vm993_vm9, %v991_v49, %v992_v50  ;;  %v984_v54 = vsel %vm983_vm5, %v981_v51, %v982_v52  ;;  %vm1033_vm9 = vcmask 465920   ;;  %vm1023_vm5 = vcmask 474112   ;;  %v1078_v13 = vld [vmem:[#allocation5 + $0xc8] sm:$0xff]  ;;  %v1079_v14 = vld [vmem:[#allocation5 + $0xd0] sm:$0xff]  ;;  %v1077_v15 = vld [vmem:[#allocation5 + $0xc0] sm:$0xff] }
 0x11d   : > { %997 = vst.msk [vmem:[#allocation5 + $0xdb] ss:$8 sm:$0x7] %vm6771_vm0, %v994_v53  ;;  %987 = vst.msk [vmem:[#allocation5 + $0xda] ss:$8 sm:$0x7] %vm6771_vm0, %v984_v54  ;;  %v1010_v55 = vpop.permute.xlu1 %1009  ;;  %v1000_v56 = vpop.permute.xlu0 %999  ;;  %v7183_v0 = vrot.slane %v302_v41, %v1367_v36  ;;  %v7185_v48 = vrot.slane %v302_v41, %v1359_v37  ;;  %v7187_v50 = vrot.slane %v302_v41, %v1363_v38 }
 0x11e   : > { %v1011_v57 = vrot.slane %v1010_v55, 1  ;;  %v1012_v58 = vrot.slane %v1010_v55, 2  ;;  %v1001_v59 = vrot.slane %v1000_v56, 1  ;;  %v1002_v60 = vrot.slane %v1000_v56, 2 }
 0x11f   : > { %10609 = vst [vmem:[#allocation8_spill] sm:$0xff] %v7183_v0  ;;  %10610 = vst [vmem:[#allocation9_spill] sm:$0xff] %v7185_v48 }
 0x120   : > { %v1014_v61 = vsel %vm1013_vm10, %v1011_v57, %v1012_v58  ;;  %v1004_v62 = vsel %vm1003_vm7, %v1001_v59, %v1002_v60  ;;  %vm1184_vm7 = vcmask 1043456   ;;  %10611 = vst [vmem:[#allocation10_spill] sm:$0xff] %v7187_v50  ;;  %vm1772_vm10 = vcmask 375808  }
 0x121   : > { %1017 = vst.msk [vmem:[#allocation5 + $0xdd] ss:$8 sm:$0x7] %vm6771_vm0, %v1014_v61  ;;  %1007 = vst.msk [vmem:[#allocation5 + $0xdc] ss:$8 sm:$0x7] %vm6771_vm0, %v1004_v62  ;;  %v1030_v63 = vpop.permute.xlu1 %1029  ;;  %v1020_v4 = vpop.permute.xlu0 %1019 }
 0x122   : > { %v1031_v5 = vrot.slane %v1030_v63, 1  ;;  %v1032_v1 = vrot.slane %v1030_v63, 2  ;;  %v1021_v6 = vrot.slane %v1020_v4, 1  ;;  %v1022_v7 = vrot.slane %v1020_v4, 2 }
 0x123   : > { %v1186_v27 = vsel %vm1184_vm7, %v1101_v26, 0  ;;  %v1192_v28 = vsel %vm1184_vm7, %v1103_v25, 0 }
 0x124   : > { %v1034_v8 = vsel %vm1033_vm9, %v1031_v5, %v1032_v1  ;;  %v1024_v9 = vsel %vm1023_vm5, %v1021_v6, %v1022_v7  ;;  %vm2048_vm9 = vcmask 187392   ;;  %vm2117_vm5 = vcmask 179200  }
 0x125   : > { %1037 = vst.msk [vmem:[#allocation5 + $0xdf] ss:$8 sm:$0x7] %vm6771_vm0, %v1034_v8  ;;  %1027 = vst.msk [vmem:[#allocation5 + $0xde] ss:$8 sm:$0x7] %vm6771_vm0, %v1024_v9 }
 0x12c   : > { %v1081_v16 = vld [vmem:[#allocation5 + $0xe0] sm:$0xff]  ;;  %v1082_v17 = vld [vmem:[#allocation5 + $0xe8] sm:$0xff]  ;;  %v1080_v18 = vld [vmem:[#allocation5 + $0xd8] sm:$0xff] }
 0x12d   : > { %v1099_v21 = vpack.c.bf16 %v1081_v16, %v1078_v13  ;;  %v1100_v22 = vpack.c.bf16 %v1082_v17, %v1079_v14  ;;  %v1098_v23 = vpack.c.bf16 %v1080_v18, %v1077_v15 }
 0x12f   : > { %1202 = vmatprep.subr.bf16.mxu0 %v1099_v21  ;;  %6132 = vmatprep.subr.bf16.mxu1 %v1100_v22 }
 0x130   : > { %1203 = vmatpush1.bf16.msra.mxu0 %v1098_v23  ;;  %6133 = vmatpush3.bf16.msra.mxu1 %v1100_v22 }
 0x131   : > { %5821 = vmatprep.subr.msk.bf16.mxu0 %vm1184_vm7, %v1102_v24  ;;  %6234 = vmatprep.subr.msk.bf16.mxu1 %vm1184_vm7, %v1103_v25  ;;  %vm10776_vm7 = vcmask 867328  }
 0x133   : > { %v1115_v32 = vpop.permute.xlu0 %1114 }
 0x134   : > { %1205 = vmatpush1.bf16.msra.mxu0 %v1186_v27  ;;  %6135 = vmatpush3.bf16.msra.mxu1 %v1192_v28 }
 0x137   : > { %5822 = vmatmul.mubr.msk.bf16.vlgmr.msra.gmra.mrb[0].mxu0 %vm877_vm13, %v6938_v20  ;;  %6137 = vmatmul.mubr.msk.bf16.vlgmr.msra.gmra.mrb[0].mxu1 %vm877_vm13, %v6557_v29  ;;  %v1120_v20 = vpop.permute.xlu1 %1119 }
 0x138   : > { %1236 = vmatprep.mubr.bf16.mxu0 %v10426_v19  ;;  %6140 = vmatprep.mubr.msk.bf16.mxu1 %vm877_vm13, %v6558_v30  ;;  %v7168_v34 = vpop.permute.xlu0 %1129 }
 0x13b   : > { %v1125_v33 = vpop.permute.xlu1 %1124 }
 0x13c   : > { %v7178_v40 = vpop.permute.xlu0 %1139 }
 0x13f   : > { %5823 = vmatmul.mubr.msk.bf16.gmra.mrb[4].mxu0 %vm877_vm13, %v6557_v29  ;;  %6141 = vmatmul.mubr.msk.bf16.gmra.mrb[4].mxu1 %vm877_vm13, %v6559_v31  ;;  %v7176_v39 = vpop.permute.xlu1 %1134 }
 0x140   : > { %1246 = vmatprep.mubr.bf16.mxu0 %v10426_v19 }
 0x142   : > { %v7197_v13 = vpop.permute.xlu0 %1149 }
 0x143   : > { %v7195_v12 = vpop.permute.xlu1 %1144 }
 0x147   : > { %5824 = vmatmul.mubr.msk.bf16.gmra.mrb[8].mxu0 %vm877_vm13, %v6558_v30 }
 0x148   : > { %1256 = vmatprep.mubr.bf16.mxu0 %v10426_v19 }
 0x14f   : > { %5825 = vmatmul.mubr.msk.bf16.gmra.mrb[12].mxu0 %vm877_vm13, %v6559_v31  ;;  %vm1703_vm13 = vcmask 384000  }
 0x20a   : > { %v1228_v42 = vpop.f32.mrb[0].mxu0  ;;  %v6138_v43 = vpop.f32.mrb[0].mxu1 }
 0x20b   : > { %v1229_v44 = vadd.f32 %v1228_v42, %v1115_v32  ;;  %v1310_v45 = vadd.f32 %v6138_v43, %v1125_v33  ;;  %v1230_v46 = vpop.f32.mrb[1].mxu0  ;;  %v1301_v47 = vpop.f32.mrb[1].mxu1 }
 0x20c   : > { %v1231_v49 = vadd.f32 %v1230_v46, %v1115_v32  ;;  %v1302_v51 = vadd.f32 %v1301_v47, %v1115_v32  ;;  %v1232_v52 = vpop.f32.mrb[2].mxu0  ;;  %v6139_v53 = vpop.f32.mrb[2].mxu1 }
 0x20d   : > { %v1332_v54 = vmax.f32 %v1229_v44, 0.0  ;;  %v1340_v55 = vmax.f32 %v1310_v45, 0.0  ;;  %v1233_v56 = vadd.f32 %v1232_v52, %v1120_v20  ;;  %v1313_v57 = vadd.f32 %v6139_v53, %v7168_v34  ;;  %v1234_v58 = vpop.f32.mrb[3].mxu0  ;;  %v1304_v59 = vpop.f32.mrb[3].mxu1 }
 0x20e   : > { %v1333_v60 = vmax.f32 %v1231_v49, 0.0  ;;  %v1334_v61 = vmax.f32 %v1302_v51, 0.0  ;;  %v1235_v62 = vadd.f32 %v1234_v58, %v1120_v20  ;;  %v1305_v63 = vadd.f32 %v1304_v59, %v1120_v20 }
 0x20f   : > { %v1380_v4 = vmul.f32 %v7183_v0, %v1340_v55  ;;  %v1335_v5 = vmax.f32 %v1233_v56, 0.0  ;;  %v1343_v1 = vmax.f32 %v1313_v57, 0.0  ;;  %v1372_v9 = vmul.f32 %v7185_v48, %v1332_v54 }
 0x210   : > { %v1374_v6 = vmul.f32 %v7183_v0, %v1334_v61  ;;  %v1336_v7 = vmax.f32 %v1235_v62, 0.0  ;;  %v1337_v8 = vmax.f32 %v1305_v63, 0.0  ;;  %v1373_v14 = vmul.f32 %v7187_v50, %v1333_v60 }
 0x211   : > { %v1375_v10 = vmul.f32 %v7185_v48, %v1335_v5  ;;  %v1383_v11 = vmul.f32 %v7183_v0, %v1343_v1 }
 0x212   : > { %v1376_v15 = vmul.f32 %v7187_v50, %v1336_v7  ;;  %v1377_v16 = vmul.f32 %v7183_v0, %v1337_v8  ;;  %v1238_v17 = vpop.f32.mrb[4].mxu0  ;;  %v6142_v18 = vpop.f32.mrb[4].mxu1 }
 0x213   : > { %v7202_v21 = vpack.c.bf16 %v1375_v10, %v1372_v9  ;;  %v7204_v22 = vpack.c.bf16 %v1383_v11, %v1380_v4  ;;  %v1239_v23 = vadd.f32 %v1238_v17, %v1125_v33  ;;  %v1326_v24 = vadd.f32 %v6142_v18, %v7195_v12  ;;  %v1240_v25 = vpop.f32.mrb[5].mxu0  ;;  %v1317_v26 = vpop.f32.mrb[5].mxu1 }
 0x214   : > { %v7207_v27 = vpack.c.bf16 %v1376_v15, %v1373_v14  ;;  %v7209_v28 = vpack.c.bf16 %v1377_v16, %v1374_v6  ;;  %v1241_v29 = vadd.f32 %v1240_v25, %v1125_v33  ;;  %v1318_v30 = vadd.f32 %v1317_v26, %v7176_v39  ;;  %v1242_v31 = vpop.f32.mrb[6].mxu0  ;;  %v6143_v20 = vpop.f32.mrb[6].mxu1 }
 0x215   : > { %v1338_v32 = vmax.f32 %v1239_v23, 0.0  ;;  %v1352_v36 = vmax.f32 %v1326_v24, 0.0  ;;  %v1243_v37 = vadd.f32 %v1242_v31, %v7168_v34  ;;  %v1329_v38 = vadd.f32 %v6143_v20, %v7197_v13  ;;  %v1244_v41 = vpop.f32.mrb[7].mxu0  ;;  %v1320_v42 = vpop.f32.mrb[7].mxu1  ;;  %1466 = vrot.lane.b32.xlu1 %v7202_v21, %s10514_s13 }
 0x216   : > { %v1339_v43 = vmax.f32 %v1241_v29, 0.0  ;;  %v1346_v44 = vmax.f32 %v1318_v30, 0.0  ;;  %v1245_v45 = vadd.f32 %v1244_v41, %v7168_v34  ;;  %v1321_v33 = vadd.f32 %v1320_v42, %v7178_v40  ;;  %1468 = vrot.lane.b32.xlu0 %v7207_v27, %s10514_s13 }
 0x217   : > { %v1341_v46 = vmax.f32 %v1243_v37, 0.0  ;;  %v1355_v47 = vmax.f32 %v1329_v38, 0.0  ;;  %v1378_v52 = vmul.f32 %v7185_v48, %v1338_v32  ;;  %v1392_v53 = vmul.f32 %v7183_v0, %v1352_v36 }
 0x218   : > { %v1342_v49 = vmax.f32 %v1245_v45, 0.0  ;;  %v1349_v51 = vmax.f32 %v1321_v33, 0.0  ;;  %v1379_v34 = vmul.f32 %v7187_v50, %v1339_v43  ;;  %v1386_v56 = vmul.f32 %v7183_v0, %v1346_v44  ;;  %v7300_v33 = vpop.permute.xlu1 %6332 }
 0x219   : > { %v1381_v54 = vmul.f32 %v7185_v48, %v1341_v46  ;;  %v1395_v55 = vmul.f32 %v7183_v0, %v1355_v47  ;;  %1535 = vrot.lane.b32.xlu1 %v7202_v21, %s10556_s11  ;;  %v7302_v46 = vpop.permute.xlu0 %6337  ;;  %v6335_v2 = vunpack.i.h.bf16 %v7300_v33 }
 0x21a   : > { %v1382_v57 = vmul.f32 %v7187_v50, %v1342_v49  ;;  %v1389_v58 = vmul.f32 %v7183_v0, %v1349_v51  ;;  %v1248_v59 = vpop.f32.mrb[8].mxu0  ;;  %1537 = vrot.lane.b32.xlu0 %v7207_v27, %s10556_s11 }
 0x21b   : > { %v7232_v60 = vpack.c.bf16 %v1381_v54, %v1378_v52  ;;  %v7234_v61 = vpack.c.bf16 %v1395_v55, %v1392_v53  ;;  %v1249_v62 = vadd.f32 %v1248_v59, %v7176_v39  ;;  %v1250_v63 = vpop.f32.mrb[9].mxu0 }
 0x21c   : > { %v7237_v4 = vpack.c.bf16 %v1382_v57, %v1379_v34  ;;  %v7239_v5 = vpack.c.bf16 %v1389_v58, %v1386_v56  ;;  %v1251_v1 = vadd.f32 %v1250_v63, %v7176_v39  ;;  %v1252_v6 = vpop.f32.mrb[10].mxu0  ;;  %v7310_v47 = vpop.permute.xlu1 %6342 }
 0x21d   : > { %v1344_v7 = vmax.f32 %v1249_v62, 0.0  ;;  %v1253_v8 = vadd.f32 %v1252_v6, %v7178_v40  ;;  %v1254_v9 = vpop.f32.mrb[11].mxu0  ;;  %1604 = vrot.lane.b32.xlu1 %v7202_v21, %s10508_s16  ;;  %v7314_v49 = vpop.permute.xlu0 %6347 }
 0x21e   : > { %v1345_v10 = vmax.f32 %v1251_v1, 0.0  ;;  %v1255_v11 = vadd.f32 %v1254_v9, %v7178_v40  ;;  %1606 = vrot.lane.b32.xlu0 %v7207_v27, %s10508_s16 }
 0x21f   : > { %v1347_v14 = vmax.f32 %v1253_v8, 0.0  ;;  %v1384_v16 = vmul.f32 %v7185_v48, %v1344_v7 }
 0x220   : > { %v1348_v15 = vmax.f32 %v1255_v11, 0.0  ;;  %v1385_v17 = vmul.f32 %v7187_v50, %v1345_v10  ;;  %v7320_v51 = vpop.permute.xlu1 %6352 }
 0x221   : > { %v1387_v39 = vmul.f32 %v7185_v48, %v1347_v14  ;;  %1673 = vrot.lane.b32.xlu1 %v7202_v21, %s10532_s21  ;;  %v7322_v52 = vpop.permute.xlu0 %6357 }
 0x222   : > { %v1388_v18 = vmul.f32 %v7187_v50, %v1348_v15  ;;  %v1258_v23 = vpop.f32.mrb[12].mxu0  ;;  %1675 = vrot.lane.b32.xlu0 %v7207_v27, %s10532_s21 }
 0x223   : > { %v7256_v40 = vpack.c.bf16 %v1387_v39, %v1384_v16  ;;  %v1259_v24 = vadd.f32 %v1258_v23, %v7195_v12  ;;  %v1260_v25 = vpop.f32.mrb[13].mxu0  ;;  %v6334_v16 = vunpack.i.l.bf16 %v7300_v33 }
 0x224   : > { %v7259_v26 = vpack.c.bf16 %v1388_v18, %v1385_v17  ;;  %v1261_v29 = vadd.f32 %v1260_v25, %v7195_v12  ;;  %v1262_v30 = vpop.f32.mrb[14].mxu0  ;;  %v7330_v53 = vpop.permute.xlu1 %6362 }
 0x225   : > { %v1350_v31 = vmax.f32 %v1259_v24, 0.0  ;;  %v1263_v20 = vadd.f32 %v1262_v30, %v7197_v13  ;;  %v1264_v32 = vpop.f32.mrb[15].mxu0  ;;  %1742 = vrot.lane.b32.xlu1 %v7202_v21, %s10565_s29  ;;  %v7334_v54 = vpop.permute.xlu0 %6367 }
 0x226   : > { %v1351_v36 = vmax.f32 %v1261_v29, 0.0  ;;  %v1265_v37 = vadd.f32 %v1264_v32, %v7197_v13  ;;  %1744 = vrot.lane.b32.xlu0 %v7207_v27, %s10565_s29 }
 0x227   : > { %v1353_v38 = vmax.f32 %v1263_v20, 0.0  ;;  %v1390_v42 = vmul.f32 %v7185_v48, %v1350_v31 }
 0x228   : > { %v1354_v41 = vmax.f32 %v1265_v37, 0.0  ;;  %v1391_v43 = vmul.f32 %v7187_v50, %v1351_v36  ;;  %v7340_v55 = vpop.permute.xlu1 %6372 }
 0x229   : > { %v1393_v12 = vmul.f32 %v7185_v48, %v1353_v38  ;;  %1811 = vrot.lane.b32.xlu1 %v7202_v21, %s10542_s24  ;;  %v7342_v34 = vpop.permute.xlu0 %6377 }
 0x22a   : > { %v1394_v44 = vmul.f32 %v7187_v50, %v1354_v41  ;;  %1813 = vrot.lane.b32.xlu0 %v7207_v27, %s10542_s24 }
 0x22b   : > { %v7276_v13 = vpack.c.bf16 %v1393_v12, %v1390_v42 }
 0x22c   : > { %v7278_v45 = vpack.c.bf16 %v1394_v44, %v1391_v43  ;;  %v7350_v56 = vpop.permute.xlu1 %6382 }
 0x22d   : > { %1880 = vrot.lane.b32.xlu1 %v7202_v21, %s10563_s30  ;;  %v7354_v57 = vpop.permute.xlu0 %6387 }
 0x22e   : > { %1882 = vrot.lane.b32.xlu0 %v7207_v27, %s10563_s30 }
 0x230   : > { %v7360_v58 = vpop.permute.xlu1 %6392 }
 0x231   : > { %1949 = vrot.lane.b32.xlu1 %v7202_v21, %s10540_s26  ;;  %v7362_v59 = vpop.permute.xlu0 %6397 }
 0x232   : > { %1951 = vrot.lane.b32.xlu0 %v7207_v27, %s10540_s26  ;;  %10612 = vst [vmem:[#allocation11_spill] sm:$0xff] %v7362_v59 }
 0x234   : > { %v7370_v62 = vpop.permute.xlu1 %6402 }
 0x235   : > { %2018 = vrot.lane.b32.xlu1 %v7202_v21, %s10561_s23  ;;  %10613 = vst [vmem:[#allocation12_spill] sm:$0xff] %v7370_v62  ;;  %v7374_v63 = vpop.permute.xlu0 %6407 }
 0x236   : > { %2020 = vrot.lane.b32.xlu0 %v7207_v27, %s10561_s23  ;;  %10614 = vst [vmem:[#allocation13_spill] sm:$0xff] %v7374_v63 }
 0x238   : > { %v7380_v1 = vpop.permute.xlu1 %6412 }
 0x239   : > { %2087 = vrot.lane.b32.xlu1 %v7202_v21, %s10554_s10  ;;  %10615 = vst [vmem:[#allocation14_spill] sm:$0xff] %v7380_v1  ;;  %v7382_v6 = vpop.permute.xlu0 %6417 }
 0x23a   : > { %2089 = vrot.lane.b32.xlu0 %v7207_v27, %s10554_s10  ;;  %10616 = vst [vmem:[#allocation15_spill] sm:$0xff] %v7382_v6 }
 0x23c   : > { %v7390_v7 = vpop.permute.xlu1 %6422 }
 0x23d   : > { %2156 = vrot.lane.b32.xlu1 %v7202_v21, %s10559_s17  ;;  %10617 = vst [vmem:[#allocation16_spill] sm:$0xff] %v7390_v7  ;;  %v7394_v8 = vpop.permute.xlu0 %6427 }
 0x23e   : > { %2158 = vrot.lane.b32.xlu0 %v7207_v27, %s10559_s17  ;;  %10618 = vst [vmem:[#allocation17_spill] sm:$0xff] %v7394_v8 }
 0x240   : > { %v7400_v9 = vpop.permute.xlu1 %6432 }
 0x241   : > { %2225 = vrot.lane.b32.xlu1 %v7202_v21, %s10552_s15  ;;  %10619 = vst [vmem:[#allocation18_spill] sm:$0xff] %v7400_v9  ;;  %v7402_v10 = vpop.permute.xlu0 %6437 }
 0x242   : > { %2227 = vrot.lane.b32.xlu0 %v7207_v27, %s10552_s15  ;;  %10620 = vst [vmem:[#allocation19_spill] sm:$0xff] %v7402_v10 }
 0x244   : > { %v7410_v11 = vpop.permute.xlu1 %6442 }
 0x245   : > { %1476 = vrot.lane.b32.xlu1 %v7237_v4, %s10514_s13  ;;  %10621 = vst [vmem:[#allocation20_spill] sm:$0xff] %v7410_v11  ;;  %v7414_v14 = vpop.permute.xlu0 %6447 }
 0x246   : > { %1474 = vrot.lane.b32.xlu0 %v7232_v60, %s10514_s13  ;;  %10622 = vst [vmem:[#allocation21_spill] sm:$0xff] %v7414_v14 }
 0x249   : > { %1545 = vrot.lane.b32.xlu1 %v7237_v4, %s10556_s11 }
 0x24a   : > { %1543 = vrot.lane.b32.xlu0 %v7232_v60, %s10556_s11 }
 0x24d   : > { %1614 = vrot.lane.b32.xlu1 %v7237_v4, %s10508_s16 }
 0x24e   : > { %1612 = vrot.lane.b32.xlu0 %v7232_v60, %s10508_s16 }
 0x251   : > { %1683 = vrot.lane.b32.xlu1 %v7237_v4, %s10532_s21 }
 0x252   : > { %1681 = vrot.lane.b32.xlu0 %v7232_v60, %s10532_s21 }
 0x255   : > { %1752 = vrot.lane.b32.xlu1 %v7237_v4, %s10565_s29 }
 0x256   : > { %1750 = vrot.lane.b32.xlu0 %v7232_v60, %s10565_s29 }
 0x259   : > { %1821 = vrot.lane.b32.xlu1 %v7237_v4, %s10542_s24 }
 0x25a   : > { %1819 = vrot.lane.b32.xlu0 %v7232_v60, %s10542_s24 }
 0x25d   : > { %1890 = vrot.lane.b32.xlu1 %v7237_v4, %s10563_s30 }
 0x25e   : > { %1888 = vrot.lane.b32.xlu0 %v7232_v60, %s10563_s30 }
 0x261   : > { %1959 = vrot.lane.b32.xlu1 %v7237_v4, %s10540_s26 }
 0x262   : > { %1957 = vrot.lane.b32.xlu0 %v7232_v60, %s10540_s26 }
 0x265   : > { %2028 = vrot.lane.b32.xlu1 %v7237_v4, %s10561_s23 }
 0x266   : > { %2026 = vrot.lane.b32.xlu0 %v7232_v60, %s10561_s23 }
 0x269   : > { %2097 = vrot.lane.b32.xlu1 %v7237_v4, %s10554_s10 }
 0x26a   : > { %2095 = vrot.lane.b32.xlu0 %v7232_v60, %s10554_s10 }
 0x26d   : > { %2166 = vrot.lane.b32.xlu1 %v7237_v4, %s10559_s17 }
 0x26e   : > { %2164 = vrot.lane.b32.xlu0 %v7232_v60, %s10559_s17 }
 0x271   : > { %2235 = vrot.lane.b32.xlu1 %v7237_v4, %s10552_s15 }
 0x272   : > { %2233 = vrot.lane.b32.xlu0 %v7232_v60, %s10552_s15 }
 0x275   : > { %1484 = vrot.lane.b32.xlu1 %v7259_v26, %s10514_s13 }
 0x276   : > { %1482 = vrot.lane.b32.xlu0 %v7256_v40, %s10514_s13 }
 0x279   : > { %1553 = vrot.lane.b32.xlu1 %v7259_v26, %s10556_s11 }
 0x27a   : > { %1551 = vrot.lane.b32.xlu0 %v7256_v40, %s10556_s11 }
 0x27d   : > { %1622 = vrot.lane.b32.xlu1 %v7259_v26, %s10508_s16 }
 0x27e   : > { %1620 = vrot.lane.b32.xlu0 %v7256_v40, %s10508_s16 }
 0x281   : > { %1691 = vrot.lane.b32.xlu1 %v7259_v26, %s10532_s21 }
 0x282   : > { %1689 = vrot.lane.b32.xlu0 %v7256_v40, %s10532_s21 }
 0x285   : > { %1760 = vrot.lane.b32.xlu1 %v7259_v26, %s10565_s29 }
 0x286   : > { %1758 = vrot.lane.b32.xlu0 %v7256_v40, %s10565_s29 }
 0x287   : > { %v1467_v15 = vpop.permute.xlu1 %1466 }
 0x288   : > { %v7421_v39 = vpop.permute.xlu0 %1468  ;;  %v1497_v18 = vsel %vm10539_vm11, %v6334_v16, %v1467_v15 }
 0x289   : > { %10623 = vst [vmem:[#allocation22_spill] sm:$0xff] %v7421_v39  ;;  %1829 = vrot.lane.b32.xlu1 %v7259_v26, %s10542_s24  ;;  %v1498_v17 = vsel %vm10539_vm11, %v1467_v15, %v7421_v39 }
 0x28a   : > { %1827 = vrot.lane.b32.xlu0 %v7256_v40, %s10542_s24  ;;  %3624 = vmatprep.subr.bf16.mxu0 %v1498_v17 }
 0x28b   : > { %3625 = vmatpush1.bf16.msra.mxu0 %v1497_v18  ;;  %v7430_v23 = vpop.permute.xlu1 %1535 }
 0x28c   : > { %v7432_v24 = vpop.permute.xlu0 %1537 }
 0x28d   : > { %10624 = vst [vmem:[#allocation23_spill] sm:$0xff] %v7432_v24  ;;  %1898 = vrot.lane.b32.xlu1 %v7259_v26, %s10563_s30 }
 0x28e   : > { %1896 = vrot.lane.b32.xlu0 %v7256_v40, %s10563_s30 }
 0x28f   : > { %v7438_v25 = vpop.permute.xlu1 %1604 }
 0x290   : > { %v7440_v29 = vpop.permute.xlu0 %1606 }
 0x291   : > { %1967 = vrot.lane.b32.xlu1 %v7259_v26, %s10540_s26 }
 0x292   : > { %1965 = vrot.lane.b32.xlu0 %v7256_v40, %s10540_s26 }
 0x293   : > { %v7446_v30 = vpop.permute.xlu1 %1673 }
 0x294   : > { %v7448_v31 = vpop.permute.xlu0 %1675 }
 0x295   : > { %10625 = vst [vmem:[#allocation24_spill] sm:$0xff] %v7448_v31  ;;  %2036 = vrot.lane.b32.xlu1 %v7259_v26, %s10561_s23 }
 0x296   : > { %2034 = vrot.lane.b32.xlu0 %v7256_v40, %s10561_s23 }
 0x297   : > { %v7454_v20 = vpop.permute.xlu1 %1742 }
 0x298   : > { %v7456_v32 = vpop.permute.xlu0 %1744 }
 0x299   : > { %10626 = vst [vmem:[#allocation25_spill] sm:$0xff] %v7456_v32  ;;  %2105 = vrot.lane.b32.xlu1 %v7259_v26, %s10554_s10 }
 0x29a   : > { %2103 = vrot.lane.b32.xlu0 %v7256_v40, %s10554_s10 }
 0x29b   : > { %v7462_v36 = vpop.permute.xlu1 %1811 }
 0x29c   : > { %v7464_v37 = vpop.permute.xlu0 %1813 }
 0x29d   : > { %10627 = vst [vmem:[#allocation26_spill] sm:$0xff] %v7464_v37  ;;  %2174 = vrot.lane.b32.xlu1 %v7259_v26, %s10559_s17 }
 0x29e   : > { %2172 = vrot.lane.b32.xlu0 %v7256_v40, %s10559_s17 }
 0x29f   : > { %v7470_v38 = vpop.permute.xlu1 %1880 }
 0x2a0   : > { %v7472_v41 = vpop.permute.xlu0 %1882 }
 0x2a1   : > { %10628 = vst [vmem:[#allocation27_spill] sm:$0xff] %v7472_v41  ;;  %2243 = vrot.lane.b32.xlu1 %v7259_v26, %s10552_s15 }
 0x2a2   : > { %2241 = vrot.lane.b32.xlu0 %v7256_v40, %s10552_s15 }
 0x2a3   : > { %v7478_v42 = vpop.permute.xlu1 %1949 }
 0x2a4   : > { %10629 = vst [vmem:[#allocation28_spill] sm:$0xff] %v7478_v42  ;;  %v7480_v12 = vpop.permute.xlu0 %1951 }
 0x2a5   : > { %10630 = vst [vmem:[#allocation29_spill] sm:$0xff] %v7480_v12  ;;  %1490 = vrot.lane.b32.xlu1 %v7276_v13, %s10514_s13 }
 0x2a6   : > { %1492 = vrot.lane.b32.xlu0 %v7278_v45, %s10514_s13 }
 0x2a7   : > { %v7486_v43 = vpop.permute.xlu1 %2018 }
 0x2a8   : > { %10631 = vst [vmem:[#allocation30_spill] sm:$0xff] %v7486_v43  ;;  %v7488_v44 = vpop.permute.xlu0 %2020 }
 0x2a9   : > { %10632 = vst [vmem:[#allocation31_spill] sm:$0xff] %v7488_v44  ;;  %1559 = vrot.lane.b32.xlu1 %v7276_v13, %s10556_s11 }
 0x2aa   : > { %1561 = vrot.lane.b32.xlu0 %v7278_v45, %s10556_s11 }
 0x2ab   : > { %v7494_v15 = vpop.permute.xlu1 %2087 }
 0x2ac   : > { %10633 = vst [vmem:[#allocation32_spill] sm:$0xff] %v7494_v15  ;;  %v7496_v16 = vpop.permute.xlu0 %2089 }
 0x2ad   : > { %10634 = vst [vmem:[#allocation33_spill] sm:$0xff] %v7496_v16  ;;  %1628 = vrot.lane.b32.xlu1 %v7276_v13, %s10508_s16 }
 0x2ae   : > { %1630 = vrot.lane.b32.xlu0 %v7278_v45, %s10508_s16 }
 0x2af   : > { %v7502_v17 = vpop.permute.xlu1 %2156 }
 0x2b0   : > { %10635 = vst [vmem:[#allocation34_spill] sm:$0xff] %v7502_v17  ;;  %v7504_v18 = vpop.permute.xlu0 %2158 }
 0x2b1   : > { %10636 = vst [vmem:[#allocation35_spill] sm:$0xff] %v7504_v18  ;;  %1697 = vrot.lane.b32.xlu1 %v7276_v13, %s10532_s21 }
 0x2b2   : > { %1699 = vrot.lane.b32.xlu0 %v7278_v45, %s10532_s21 }
 0x2b3   : > { %v7510_v3 = vpop.permute.xlu1 %2225 }
 0x2b4   : > { %10637 = vst [vmem:[#allocation36_spill] sm:$0xff] %v7510_v3  ;;  %v7512_v19 = vpop.permute.xlu0 %2227 }
 0x2b5   : > { %10638 = vst [vmem:[#allocation37_spill] sm:$0xff] %v7512_v19  ;;  %1766 = vrot.lane.b32.xlu1 %v7276_v13, %s10565_s29  ;;  %v6562_v19 = vld [vmem:[%s10644_s4 + $0x4] ss:$52 sps:$4 sm:$0xff]  }
 0x2b6   : > { %1768 = vrot.lane.b32.xlu0 %v7278_v45, %s10565_s29  ;;  %3656 = vmatprep.mubr.bf16.mxu0 %v6562_v19 }
 0x2b7   : > { %v7519_v35 = vpop.permute.xlu1 %1476  ;;  %4027 = vmatprep.mubr.bf16.mxu1 %v6562_v19 }
 0x2b8   : > { %10639 = vst [vmem:[#allocation38_spill] sm:$0xff] %v7519_v35  ;;  %v1475_v0 = vpop.permute.xlu0 %1474 }
 0x2b9   : > { %1835 = vrot.lane.b32.xlu1 %v7276_v13, %s10542_s24  ;;  %v1501_v50 = vsel %vm10539_vm11, %v1475_v0, %v7519_v35  ;;  %v1500_v48 = vsel %vm10539_vm11, %v6335_v2, %v1475_v0 }
 0x2ba   : > { %1837 = vrot.lane.b32.xlu0 %v7278_v45, %s10542_s24  ;;  %3626 = vmatprep.subr.bf16.mxu0 %v1501_v50 }
 0x2bb   : > { %3627 = vmatpush1.bf16.msra.mxu0 %v1500_v48  ;;  %v7528_v39 = vpop.permute.xlu1 %1545 }
 0x2bc   : > { %10640 = vst [vmem:[#allocation39_spill] sm:$0xff] %v7528_v39  ;;  %v7530_v14 = vpop.permute.xlu0 %1543 }
 0x2bd   : > { %1904 = vrot.lane.b32.xlu1 %v7276_v13, %s10563_s30 }
 0x2be   : > { %1906 = vrot.lane.b32.xlu0 %v7278_v45, %s10563_s30 }
 0x2bf   : > { %v7536_v33 = vpop.permute.xlu1 %1614 }
 0x2c0   : > { %v7538_v35 = vpop.permute.xlu0 %1612 }
 0x2c1   : > { %1973 = vrot.lane.b32.xlu1 %v7276_v13, %s10540_s26 }
 0x2c2   : > { %1975 = vrot.lane.b32.xlu0 %v7278_v45, %s10540_s26 }
 0x2c3   : > { %v7544_v2 = vpop.permute.xlu1 %1683 }
 0x2c4   : > { %10641 = vst [vmem:[#allocation40_spill] sm:$0xff] %v7544_v2  ;;  %v7546_v0 = vpop.permute.xlu0 %1681 }
 0x2c5   : > { %2042 = vrot.lane.b32.xlu1 %v7276_v13, %s10561_s23 }
 0x2c6   : > { %2044 = vrot.lane.b32.xlu0 %v7278_v45, %s10561_s23 }
 0x2c7   : > { %v7552_v48 = vpop.permute.xlu1 %1752 }
 0x2c8   : > { %10642 = vst [vmem:[#allocation41_spill] sm:$0xff] %v7552_v48  ;;  %v7554_v50 = vpop.permute.xlu0 %1750 }
 0x2c9   : > { %2111 = vrot.lane.b32.xlu1 %v7276_v13, %s10554_s10 }
 0x2ca   : > { %2113 = vrot.lane.b32.xlu0 %v7278_v45, %s10554_s10 }
 0x2cb   : > { %v7560_v11 = vpop.permute.xlu1 %1821 }
 0x2cc   : > { %10643 = vst [vmem:[#allocation42_spill] sm:$0xff] %v7560_v11  ;;  %v7562_v3 = vpop.permute.xlu0 %1819 }
 0x2cd   : > { %2180 = vrot.lane.b32.xlu1 %v7276_v13, %s10559_s17 }
 0x2ce   : > { %2182 = vrot.lane.b32.xlu0 %v7278_v45, %s10559_s17 }
 0x2cf   : > { %v7571_v10 = vpop.permute.xlu1 %1890 }
 0x2d0   : > { %10645 = vst [vmem:[#allocation43_spill] sm:$0xff] %v7571_v10  ;;  %v7573_v9 = vpop.permute.xlu0 %1888 }
 0x2d1   : > { %10646 = vst [vmem:[#allocation44_spill] sm:$0xff] %v7573_v9  ;;  %2249 = vrot.lane.b32.xlu1 %v7276_v13, %s10552_s15  ;;  %v6344_v9 = vunpack.i.l.bf16 %v7310_v47 }
 0x2d2   : > { %2251 = vrot.lane.b32.xlu0 %v7278_v45, %s10552_s15 }
 0x2d3   : > { %v7579_v17 = vpop.permute.xlu1 %1959 }
 0x2d4   : > { %10647 = vst [vmem:[#allocation45_spill] sm:$0xff] %v7579_v17  ;;  %v7581_v18 = vpop.permute.xlu0 %1957 }
 0x2d5   : > { %10648 = vst [vmem:[#allocation46_spill] sm:$0xff] %v7581_v18  ;;  %2310 = vrot.lane.b32.xlu1 %v7207_v27, %s10490_s12 }
 0x2d6   : > { %2312 = vrot.lane.b32.xlu0 %v7209_v28, %s10490_s12 }
 0x2d7   : > { %v7587_v8 = vpop.permute.xlu1 %2028 }
 0x2d8   : > { %10649 = vst [vmem:[#allocation47_spill] sm:$0xff] %v7587_v8  ;;  %v7589_v19 = vpop.permute.xlu0 %2026 }
 0x2d9   : > { %10650 = vst [vmem:[#allocation48_spill] sm:$0xff] %v7589_v19  ;;  %2308 = vrot.lane.b32.xlu1 %v7202_v21, %s10490_s12 }
 0x2da   : > { %2318 = vrot.lane.b32.xlu0 %v7237_v4, %s10490_s12 }
 0x2db   : > { %v7595_v7 = vpop.permute.xlu1 %2097 }
 0x2dc   : > { %10651 = vst [vmem:[#allocation49_spill] sm:$0xff] %v7595_v7  ;;  %v7597_v15 = vpop.permute.xlu0 %2095 }
 0x2dd   : > { %10652 = vst [vmem:[#allocation50_spill] sm:$0xff] %v7597_v15  ;;  %2320 = vrot.lane.b32.xlu1 %v7204_v22, %s10490_s12 }
 0x2de   : > { %2316 = vrot.lane.b32.xlu0 %v7232_v60, %s10490_s12 }
 0x2df   : > { %v7603_v16 = vpop.permute.xlu1 %2166 }
 0x2e0   : > { %10653 = vst [vmem:[#allocation51_spill] sm:$0xff] %v7603_v16  ;;  %v7605_v6 = vpop.permute.xlu0 %2164  ;;  %v6339_v16 = vunpack.i.l.bf16 %v7302_v46 }
 0x2e1   : > { %10654 = vst [vmem:[#allocation52_spill] sm:$0xff] %v7605_v6  ;;  %2326 = vrot.lane.b32.xlu1 %v7259_v26, %s10490_s12 }
 0x2e2   : > { %2328 = vrot.lane.b32.xlu0 %v7239_v5, %s10490_s12 }
 0x2e3   : > { %v7611_v19 = vpop.permute.xlu1 %2235 }
 0x2e4   : > { %10655 = vst [vmem:[#allocation53_spill] sm:$0xff] %v7611_v19  ;;  %v7613_v7 = vpop.permute.xlu0 %2233 }
 0x2e5   : > { %10656 = vst [vmem:[#allocation54_spill] sm:$0xff] %v7613_v7  ;;  %2324 = vrot.lane.b32.xlu1 %v7256_v40, %s10490_s12 }
 0x2e6   : > { %2334 = vrot.lane.b32.xlu0 %v7278_v45, %s10490_s12 }
 0x2e7   : > { %v7620_v15 = vpop.permute.xlu1 %1484 }
 0x2e8   : > { %10657 = vst [vmem:[#allocation55_spill] sm:$0xff] %v7620_v15  ;;  %v1483_v6 = vpop.permute.xlu0 %1482 }
 0x2e9   : > { %2336 = vrot.lane.b32.xlu1 %v7234_v61, %s10490_s12  ;;  %v1504_v8 = vsel %vm10539_vm11, %v1483_v6, %v7620_v15  ;;  %v1503_v19 = vsel %vm10539_vm11, %v6339_v16, %v1483_v6 }
 0x2ea   : > { %2332 = vrot.lane.b32.xlu0 %v7276_v13, %s10490_s12  ;;  %3628 = vmatprep.subr.bf16.mxu0 %v1504_v8  ;;  %s10690_s12 = smov 102  }
 0x2eb   : > { %3629 = vmatpush1.bf16.msra.mxu0 %v1503_v19  ;;  %v7629_v7 = vpop.permute.xlu1 %1553 }
 0x2ec   : > { %10658 = vst [vmem:[#allocation56_spill] sm:$0xff] %v7629_v7  ;;  %v7631_v1 = vpop.permute.xlu0 %1551 }
 0x2ed   : > { %2379 = vrot.lane.b32.xlu1 %v7207_v27, %s10493_s14 }
 0x2ee   : > { %2381 = vrot.lane.b32.xlu0 %v7209_v28, %s10493_s14 }
 0x2ef   : > { %v7637_v43 = vpop.permute.xlu1 %1622 }
 0x2f0   : > { %v7639_v15 = vpop.permute.xlu0 %1620 }
 0x2f1   : > { %2377 = vrot.lane.b32.xlu1 %v7202_v21, %s10493_s14 }
 0x2f2   : > { %2387 = vrot.lane.b32.xlu0 %v7237_v4, %s10493_s14 }
 0x2f3   : > { %v7645_v6 = vpop.permute.xlu1 %1691 }
 0x2f4   : > { %10659 = vst [vmem:[#allocation57_spill] sm:$0xff] %v7645_v6  ;;  %v7647_v8 = vpop.permute.xlu0 %1689 }
 0x2f5   : > { %2389 = vrot.lane.b32.xlu1 %v7204_v22, %s10493_s14 }
 0x2f6   : > { %2385 = vrot.lane.b32.xlu0 %v7232_v60, %s10493_s14 }
 0x2f7   : > { %v7653_v16 = vpop.permute.xlu1 %1760 }
 0x2f8   : > { %10660 = vst [vmem:[#allocation58_spill] sm:$0xff] %v7653_v16  ;;  %v7655_v19 = vpop.permute.xlu0 %1758 }
 0x2f9   : > { %2395 = vrot.lane.b32.xlu1 %v7259_v26, %s10493_s14 }
 0x2fa   : > { %2397 = vrot.lane.b32.xlu0 %v7239_v5, %s10493_s14 }
 0x2fb   : > { %v7661_v44 = vpop.permute.xlu1 %1829 }
 0x2fc   : > { %10661 = vst [vmem:[#allocation59_spill] sm:$0xff] %v7661_v44  ;;  %v7663_v63 = vpop.permute.xlu0 %1827 }
 0x2fd   : > { %2393 = vrot.lane.b32.xlu1 %v7256_v40, %s10493_s14 }
 0x2fe   : > { %2403 = vrot.lane.b32.xlu0 %v7278_v45, %s10493_s14 }
 0x2ff   : > { %v7669_v18 = vpop.permute.xlu1 %1898 }
 0x300   : > { %10662 = vst [vmem:[#allocation60_spill] sm:$0xff] %v7669_v18  ;;  %v7671_v17 = vpop.permute.xlu0 %1896 }
 0x301   : > { %10663 = vst [vmem:[#allocation61_spill] sm:$0xff] %v7671_v17  ;;  %2405 = vrot.lane.b32.xlu1 %v7234_v61, %s10493_s14 }
 0x302   : > { %2401 = vrot.lane.b32.xlu0 %v7276_v13, %s10493_s14  ;;  %s10688_s14 = smov 103  }
 0x303   : > { %v7677_v62 = vpop.permute.xlu1 %1967 }
 0x304   : > { %10664 = vst [vmem:[#allocation62_spill] sm:$0xff] %v7677_v62  ;;  %v7679_v42 = vpop.permute.xlu0 %1965 }
 0x305   : > { %10665 = vst [vmem:[#allocation63_spill] sm:$0xff] %v7679_v42  ;;  %2448 = vrot.lane.b32.xlu1 %v7207_v27, %s10666_s9 }
 0x306   : > { %2450 = vrot.lane.b32.xlu0 %v7209_v28, %s10666_s9 }
 0x307   : > { %v7685_v12 = vpop.permute.xlu1 %2036 }
 0x308   : > { %10667 = vst [vmem:[#allocation64_spill] sm:$0xff] %v7685_v12  ;;  %v7687_v59 = vpop.permute.xlu0 %2034 }
 0x309   : > { %10668 = vst [vmem:[#allocation65_spill] sm:$0xff] %v7687_v59  ;;  %2446 = vrot.lane.b32.xlu1 %v7202_v21, %s10666_s9 }
 0x30a   : > { %2456 = vrot.lane.b32.xlu0 %v7237_v4, %s10666_s9 }
 0x30b   : > { %v7693_v17 = vpop.permute.xlu1 %2105 }
 0x30c   : > { %10669 = vst [vmem:[#allocation66_spill] sm:$0xff] %v7693_v17  ;;  %v7695_v62 = vpop.permute.xlu0 %2103 }
 0x30d   : > { %10670 = vst [vmem:[#allocation67_spill] sm:$0xff] %v7695_v62  ;;  %2458 = vrot.lane.b32.xlu1 %v7204_v22, %s10666_s9 }
 0x30e   : > { %2454 = vrot.lane.b32.xlu0 %v7232_v60, %s10666_s9 }
 0x30f   : > { %v7701_v42 = vpop.permute.xlu1 %2174 }
 0x310   : > { %10671 = vst [vmem:[#allocation68_spill] sm:$0xff] %v7701_v42  ;;  %v7703_v12 = vpop.permute.xlu0 %2172  ;;  %v6340_v42 = vunpack.i.h.bf16 %v7302_v46  ;;  %v1567_v46 = vsel %vm614_vm8, %v7430_v23, %v7432_v24 }
 0x311   : > { %10672 = vst [vmem:[#allocation69_spill] sm:$0xff] %v7703_v12  ;;  %2464 = vrot.lane.b32.xlu1 %v7259_v26, %s10666_s9 }
 0x312   : > { %2466 = vrot.lane.b32.xlu0 %v7239_v5, %s10666_s9 }
 0x313   : > { %v7709_v59 = vpop.permute.xlu1 %2243 }
 0x314   : > { %10673 = vst [vmem:[#allocation70_spill] sm:$0xff] %v7709_v59  ;;  %v7711_v17 = vpop.permute.xlu0 %2241 }
 0x315   : > { %10674 = vst [vmem:[#allocation71_spill] sm:$0xff] %v7711_v17  ;;  %2462 = vrot.lane.b32.xlu1 %v7256_v40, %s10666_s9 }
 0x316   : > { %2472 = vrot.lane.b32.xlu0 %v7278_v45, %s10666_s9 }
 0x317   : > { %v1491_v62 = vpop.permute.xlu1 %1490 }
 0x318   : > { %v7718_v12 = vpop.permute.xlu0 %1492  ;;  %v1506_v17 = vsel %vm10539_vm11, %v6340_v42, %v1491_v62 }
 0x319   : > { %2474 = vrot.lane.b32.xlu1 %v7234_v61, %s10666_s9  ;;  %v1507_v18 = vsel %vm10539_vm11, %v1491_v62, %v7718_v12  ;;  %v1566_v62 = vsel %vm614_vm8, %v6344_v9, %v7430_v23 }
 0x31a   : > { %2470 = vrot.lane.b32.xlu0 %v7276_v13, %s10666_s9  ;;  %3630 = vmatprep.subr.bf16.mxu0 %v1507_v18  ;;  %v6345_v18 = vunpack.i.h.bf16 %v7310_v47  ;;  %v6349_v47 = vunpack.i.l.bf16 %v7314_v49 }
 0x31b   : > { %3631 = vmatpush1.bf16.msra.mxu0 %v1506_v17  ;;  %v1560_v59 = vpop.permute.xlu1 %1559  ;;  %v1570_v17 = vsel %vm614_vm8, %v7530_v14, %v7528_v39 }
 0x31c   : > { %v7731_v10 = vpop.permute.xlu0 %1561  ;;  %3632 = vmatprep.subr.bf16.mxu0 %v1567_v46  ;;  %v1569_v9 = vsel %vm614_vm8, %v6345_v18, %v7530_v14  ;;  %v1573_v46 = vsel %vm614_vm8, %v7631_v1, %v7629_v7  ;;  %v1572_v14 = vsel %vm614_vm8, %v6349_v47, %v7631_v1  ;;  %v1636_v47 = vsel %vm10538_vm15, %v7438_v25, %v7440_v29 }
 0x31d   : > { %10675 = vst [vmem:[#allocation72_spill] sm:$0xff] %v7731_v10  ;;  %2517 = vrot.lane.b32.xlu1 %v7207_v27, %s10676_s25  ;;  %v1576_v18 = vsel %vm614_vm8, %v1560_v59, %v7731_v10 }
 0x31e   : > { %2519 = vrot.lane.b32.xlu0 %v7209_v28, %s10676_s25 }
 0x31f   : > { %3633 = vmatpush1.bf16.msra.mxu0 %v1566_v62  ;;  %v7739_v42 = vpop.permute.xlu1 %1628 }
 0x320   : > { %v7745_v24 = vpop.permute.xlu0 %1630  ;;  %3634 = vmatprep.subr.bf16.mxu0 %v1570_v17 }
 0x321   : > { %2515 = vrot.lane.b32.xlu1 %v7202_v21, %s10676_s25 }
 0x322   : > { %2525 = vrot.lane.b32.xlu0 %v7237_v4, %s10676_s25 }
 0x323   : > { %3635 = vmatpush1.bf16.msra.mxu0 %v1569_v9  ;;  %v7753_v23 = vpop.permute.xlu1 %1697  ;;  %v6350_v9 = vunpack.i.h.bf16 %v7314_v49  ;;  %v6354_v49 = vunpack.i.l.bf16 %v7320_v51 }
 0x324   : > { %v7759_v62 = vpop.permute.xlu0 %1699  ;;  %3636 = vmatprep.subr.bf16.mxu0 %v1573_v46 }
 0x325   : > { %10677 = vst [vmem:[#allocation73_spill] sm:$0xff] %v7759_v62  ;;  %2527 = vrot.lane.b32.xlu1 %v7204_v22, %s10676_s25  ;;  %v1575_v46 = vsel %vm614_vm8, %v6350_v9, %v1560_v59  ;;  %v1635_v59 = vsel %vm10538_vm15, %v6354_v49, %v7438_v25  ;;  %v1639_v9 = vsel %vm10538_vm15, %v7538_v35, %v7536_v33 }
 0x326   : > { %2523 = vrot.lane.b32.xlu0 %v7232_v60, %s10676_s25  ;;  %v1642_v49 = vsel %vm10538_vm15, %v7639_v15, %v7637_v43 }
 0x327   : > { %3637 = vmatpush1.bf16.msra.mxu0 %v1572_v14  ;;  %v7767_v17 = vpop.permute.xlu1 %1766 }
 0x328   : > { %v7772_v7 = vpop.permute.xlu0 %1768  ;;  %3638 = vmatprep.subr.bf16.mxu0 %v1576_v18 }
 0x329   : > { %10678 = vst [vmem:[#allocation74_spill] sm:$0xff] %v7772_v7  ;;  %2533 = vrot.lane.b32.xlu1 %v7259_v26, %s10676_s25 }
 0x32a   : > { %2535 = vrot.lane.b32.xlu0 %v7239_v5, %s10676_s25 }
 0x32b   : > { %3639 = vmatpush1.bf16.msra.mxu0 %v1575_v46  ;;  %v7779_v1 = vpop.permute.xlu1 %1835  ;;  %v6355_v46 = vunpack.i.h.bf16 %v7320_v51  ;;  %v6359_v51 = vunpack.i.l.bf16 %v7322_v52 }
 0x32c   : > { %v7785_v14 = vpop.permute.xlu0 %1837  ;;  %3640 = vmatprep.subr.bf16.mxu0 %v1636_v47 }
 0x32d   : > { %10679 = vst [vmem:[#allocation75_spill] sm:$0xff] %v7785_v14  ;;  %2531 = vrot.lane.b32.xlu1 %v7256_v40, %s10676_s25  ;;  %v1638_v25 = vsel %vm10538_vm15, %v6355_v46, %v7538_v35  ;;  %v1641_v35 = vsel %vm10538_vm15, %v6359_v51, %v7639_v15  ;;  %v1645_v46 = vsel %vm10538_vm15, %v7739_v42, %v7745_v24  ;;  %v6364_v51 = vunpack.i.l.bf16 %v7330_v53 }
 0x32e   : > { %2541 = vrot.lane.b32.xlu0 %v7278_v45, %s10676_s25 }
 0x32f   : > { %3641 = vmatpush1.bf16.msra.mxu0 %v1635_v59  ;;  %v7793_v18 = vpop.permute.xlu1 %1904 }
 0x330   : > { %v7799_v10 = vpop.permute.xlu0 %1906  ;;  %3642 = vmatprep.subr.bf16.mxu0 %v1639_v9 }
 0x331   : > { %10680 = vst [vmem:[#allocation76_spill] sm:$0xff] %v7799_v10  ;;  %2543 = vrot.lane.b32.xlu1 %v7234_v61, %s10676_s25 }
 0x332   : > { %2539 = vrot.lane.b32.xlu0 %v7276_v13, %s10676_s25 }
 0x333   : > { %3643 = vmatpush1.bf16.msra.mxu0 %v1638_v25  ;;  %v7807_v47 = vpop.permute.xlu1 %1973  ;;  %v6360_v25 = vunpack.i.h.bf16 %v7322_v52  ;;  %v1705_v52 = vsel %vm1703_vm13, %v7446_v30, %v7448_v31 }
 0x334   : > { %v7813_v59 = vpop.permute.xlu0 %1975  ;;  %3644 = vmatprep.subr.bf16.mxu0 %v1642_v49 }
 0x335   : > { %10681 = vst [vmem:[#allocation77_spill] sm:$0xff] %v7813_v59  ;;  %2586 = vrot.lane.b32.xlu1 %v7207_v27, %s10682_s19  ;;  %v1644_v15 = vsel %vm10538_vm15, %v6360_v25, %v7739_v42  ;;  %v1704_v42 = vsel %vm1703_vm13, %v6364_v51, %v7446_v30  ;;  %v1708_v25 = vsel %vm1703_vm13, %v7546_v0, %v7544_v2 }
 0x336   : > { %2588 = vrot.lane.b32.xlu0 %v7209_v28, %s10682_s19  ;;  %v1711_v51 = vsel %vm1703_vm13, %v7647_v8, %v7645_v6 }
 0x337   : > { %3645 = vmatpush1.bf16.msra.mxu0 %v1641_v35  ;;  %v7821_v9 = vpop.permute.xlu1 %2042 }
 0x338   : > { %v7827_v39 = vpop.permute.xlu0 %2044  ;;  %3646 = vmatprep.subr.bf16.mxu0 %v1645_v46 }
 0x339   : > { %10683 = vst [vmem:[#allocation78_spill] sm:$0xff] %v7827_v39  ;;  %2584 = vrot.lane.b32.xlu1 %v7202_v21, %s10682_s19 }
 0x33a   : > { %2594 = vrot.lane.b32.xlu0 %v7237_v4, %s10682_s19 }
 0x33b   : > { %3647 = vmatpush1.bf16.msra.mxu0 %v1644_v15  ;;  %v7835_v49 = vpop.permute.xlu1 %2111  ;;  %v6365_v15 = vunpack.i.h.bf16 %v7330_v53  ;;  %v6369_v53 = vunpack.i.l.bf16 %v7334_v54 }
 0x33c   : > { %v7841_v35 = vpop.permute.xlu0 %2113  ;;  %3648 = vmatprep.subr.bf16.mxu0 %v1705_v52 }
 0x33d   : > { %10684 = vst [vmem:[#allocation79_spill] sm:$0xff] %v7841_v35  ;;  %2596 = vrot.lane.b32.xlu1 %v7204_v22, %s10682_s19  ;;  %v1707_v30 = vsel %vm1703_vm13, %v6365_v15, %v7546_v0  ;;  %v1710_v0 = vsel %vm1703_vm13, %v6369_v53, %v7647_v8  ;;  %v1714_v15 = vsel %vm1703_vm13, %v7753_v23, %v7759_v62 }
 0x33e   : > { %2592 = vrot.lane.b32.xlu0 %v7232_v60, %s10682_s19 }
 0x33f   : > { %3649 = vmatpush1.bf16.msra.mxu0 %v1704_v42  ;;  %v7849_v46 = vpop.permute.xlu1 %2180 }
 0x340   : > { %v7855_v31 = vpop.permute.xlu0 %2182  ;;  %3650 = vmatprep.subr.bf16.mxu0 %v1708_v25 }
 0x341   : > { %10685 = vst [vmem:[#allocation80_spill] sm:$0xff] %v7855_v31  ;;  %2602 = vrot.lane.b32.xlu1 %v7259_v26, %s10682_s19 }
 0x342   : > { %2604 = vrot.lane.b32.xlu0 %v7239_v5, %s10682_s19 }
 0x343   : > { %3651 = vmatpush1.bf16.msra.mxu0 %v1707_v30  ;;  %v7863_v52 = vpop.permute.xlu1 %2249  ;;  %v6370_v30 = vunpack.i.h.bf16 %v7334_v54  ;;  %v1774_v54 = vsel %vm1772_vm10, %v7454_v20, %v7456_v32 }
 0x344   : > { %v7869_v42 = vpop.permute.xlu0 %2251  ;;  %3652 = vmatprep.subr.bf16.mxu0 %v1711_v51  ;;  %v6560_v51 = vld [vmem:[%s10644_s4] ss:$52 sps:$4 sm:$0xff]  }
 0x345   : > { %10686 = vst [vmem:[#allocation81_spill] sm:$0xff] %v7869_v42  ;;  %2600 = vrot.lane.b32.xlu1 %v7256_v40, %s10682_s19  ;;  %v1713_v8 = vsel %vm1703_vm13, %v6370_v30, %v7753_v23 }
 0x346   : > { %2610 = vrot.lane.b32.xlu0 %v7278_v45, %s10682_s19 }
 0x347   : > { %3653 = vmatpush1.bf16.msra.mxu0 %v1710_v0  ;;  %v7877_v25 = vpop.permute.xlu1 %2310  ;;  %v6563_v0 = vld [vmem:[%s10644_s4 + $0x6c] ss:$52 sps:$4 sm:$0xff]  }
 0x348   : > { %v7883_v6 = vpop.permute.xlu0 %2312  ;;  %3654 = vmatprep.subr.bf16.mxu0 %v1714_v15  ;;  %v6374_v15 = vunpack.i.l.bf16 %v7340_v55 }
 0x349   : > { %10687 = vst [vmem:[#allocation82_spill] sm:$0xff] %v7883_v6  ;;  %2612 = vrot.lane.b32.xlu1 %v7234_v61, %s10682_s19 }
 0x34a   : > { %2608 = vrot.lane.b32.xlu0 %v7276_v13, %s10682_s19  ;;  %v1773_v23 = vsel %vm1772_vm10, %v6374_v15, %v7454_v20  ;;  %v6568_v15 = vld [vmem:[%s10644_s4 + $0xc] ss:$52 sps:$4 sm:$0xff]  }
 0x34b   : > { %3655 = vmatpush1.bf16.msra.mxu0 %v1713_v8  ;;  %v7894_v53 = vpop.permute.xlu1 %2308  ;;  %v1777_v8 = vsel %vm1772_vm10, %v7554_v50, %v7552_v48 }
 0x34c   : > { %v7903_v62 = vpop.permute.xlu0 %2318  ;;  %3677 = vmatprep.subr.bf16.mxu0 %v1774_v54  ;;  %v6375_v54 = vunpack.i.h.bf16 %v7340_v55  ;;  %v1780_v55 = vsel %vm1772_vm10, %v7655_v19, %v7653_v16 }
 0x34d   : > { %2655 = vrot.lane.b32.xlu1 %v7207_v27, %s10688_s14 }
 0x34e   : > { %2657 = vrot.lane.b32.xlu0 %v7209_v28, %s10688_s14  ;;  %3657 = vmatmul.mubr.bf16.vlgmr.msra.gmra.mrb[16].mxu0 %v6560_v51  ;;  %v1776_v20 = vsel %vm1772_vm10, %v6375_v54, %v7554_v50  ;;  %v6565_v51 = vld [vmem:[%s10644_s4 + $0x68] ss:$52 sps:$4 sm:$0xff]  }
 0x34f   : > { %3678 = vmatpush1.bf16.msra.mxu0 %v1773_v23  ;;  %v7911_v30 = vpop.permute.xlu1 %2320  ;;  %3666 = vmatprep.mubr.bf16.mxu0 %v6563_v0  ;;  %v6379_v23 = vunpack.i.l.bf16 %v7342_v34 }
 0x350   : > { %v7917_v32 = vpop.permute.xlu0 %2316  ;;  %3679 = vmatprep.subr.bf16.mxu0 %v1777_v8 }
 0x351   : > { %2653 = vrot.lane.b32.xlu1 %v7202_v21, %s10688_s14  ;;  %v1779_v50 = vsel %vm1772_vm10, %v6379_v23, %v7655_v19 }
 0x352   : > { %2663 = vrot.lane.b32.xlu0 %v7237_v4, %s10688_s14 }
 0x353   : > { %3680 = vmatpush1.bf16.msra.mxu0 %v1776_v20  ;;  %v7928_v0 = vpop.permute.xlu1 %2326  ;;  %v1783_v20 = vsel %vm1772_vm10, %v7767_v17, %v7772_v7 }
 0x354   : > { %v7937_v8 = vpop.permute.xlu0 %2328  ;;  %3681 = vmatprep.subr.bf16.mxu0 %v1780_v55  ;;  %v6380_v55 = vunpack.i.h.bf16 %v7342_v34  ;;  %v6384_v34 = vunpack.i.l.bf16 %v7350_v56 }
 0x355   : > { %2665 = vrot.lane.b32.xlu1 %v7204_v22, %s10688_s14 }
 0x356   : > { %2661 = vrot.lane.b32.xlu0 %v7232_v60, %s10688_s14  ;;  %3667 = vmatmul.mubr.bf16.gmra.mrb[20].mxu0 %v6565_v51  ;;  %v1782_v19 = vsel %vm1772_vm10, %v6380_v55, %v7767_v17  ;;  %v1842_v17 = vsel %vm686_vm1, %v6384_v34, %v7462_v36  ;;  %v6385_v55 = vunpack.i.h.bf16 %v7350_v56  ;;  %v1849_v34 = vsel %vm686_vm1, %v7663_v63, %v7661_v44 }
 0x357   : > { %3682 = vmatpush1.bf16.msra.mxu0 %v1779_v50  ;;  %v7945_v54 = vpop.permute.xlu1 %2324  ;;  %3709 = vmatprep.mubr.bf16.mxu0 %v6568_v15  ;;  %v1843_v15 = vsel %vm686_vm1, %v7462_v36, %v7464_v37  ;;  %v6389_v56 = vunpack.i.l.bf16 %v7354_v57 }
 0x358   : > { %v7951_v16 = vpop.permute.xlu0 %2334  ;;  %3683 = vmatprep.subr.bf16.mxu0 %v1783_v20  ;;  %v1846_v20 = vsel %vm686_vm1, %v7562_v3, %v7560_v11  ;;  %v1845_v36 = vsel %vm686_vm1, %v6385_v55, %v7562_v3  ;;  %v1852_v55 = vsel %vm686_vm1, %v7779_v1, %v7785_v14  ;;  %v6395_v11 = vunpack.i.h.bf16 %v7360_v58 }
 0x359   : > { %2671 = vrot.lane.b32.xlu1 %v7259_v26, %s10688_s14  ;;  %v1848_v3 = vsel %vm686_vm1, %v6389_v56, %v7663_v63  ;;  %v1912_v56 = vsel %vm695_vm14, %v7470_v38, %v7472_v41 }
 0x35a   : > { %2673 = vrot.lane.b32.xlu0 %v7239_v5, %s10688_s14 }
 0x35b   : > { %3684 = vmatpush1.bf16.msra.mxu0 %v1782_v19  ;;  %v7959_v51 = vpop.permute.xlu1 %2336 }
 0x35c   : > { %10689 = vst [vmem:[#allocation83_spill] sm:$0xff] %v7959_v51  ;;  %v7965_v23 = vpop.permute.xlu0 %2332  ;;  %3685 = vmatprep.subr.bf16.mxu0 %v1843_v15 }
 0x35d   : > { %2669 = vrot.lane.b32.xlu1 %v7256_v40, %s10688_s14 }
 0x35e   : > { %1608 = vrot.lane.b32.xlu0 %v7209_v28, %s10508_s16 }
 0x35f   : > { %3686 = vmatpush1.bf16.msra.mxu0 %v1842_v17  ;;  %v7973_v50 = vpop.permute.xlu1 %2379 }
 0x360   : > { %v7979_v19 = vpop.permute.xlu0 %2381  ;;  %3687 = vmatprep.subr.bf16.mxu0 %v1846_v20 }
 0x361   : > { %2679 = vrot.lane.b32.xlu1 %v7278_v45, %s10688_s14 }
 0x362   : > { %2681 = vrot.lane.b32.xlu0 %v7234_v61, %s10688_s14 }
 0x363   : > { %3688 = vmatpush1.bf16.msra.mxu0 %v1845_v36  ;;  %v7987_v15 = vpop.permute.xlu1 %2377  ;;  %v6390_v36 = vunpack.i.h.bf16 %v7354_v57  ;;  %v6394_v57 = vunpack.i.l.bf16 %v7360_v58  ;;  %v10695_v58 = vld [vmem:[#allocation11_spill] sm:$0xff] }
 0x364   : > { %v7993_v17 = vpop.permute.xlu0 %2387  ;;  %3689 = vmatprep.subr.bf16.mxu0 %v1849_v34  ;;  %v6399_v48 = vunpack.i.l.bf16 %v10695_v58 }
 0x365   : > { %1470 = vrot.lane.b32.xlu1 %v7209_v28, %s10514_s13  ;;  %v1851_v63 = vsel %vm686_vm1, %v6390_v36, %v7779_v1  ;;  %v1911_v1 = vsel %vm695_vm14, %v6394_v57, %v7470_v38  ;;  %v10691_v36 = vld [vmem:[#allocation43_spill] sm:$0xff]  ;;  %v10693_v57 = vld [vmem:[#allocation60_spill] sm:$0xff] }
 0x366   : > { %2677 = vrot.lane.b32.xlu0 %v7276_v13, %s10688_s14 }
 0x367   : > { %3690 = vmatpush1.bf16.msra.mxu0 %v1848_v3  ;;  %v8001_v20 = vpop.permute.xlu1 %2389 }
 0x368   : > { %v8007_v44 = vpop.permute.xlu0 %2385  ;;  %3691 = vmatprep.subr.bf16.mxu0 %v1852_v55 }
 0x369   : > { %1616 = vrot.lane.b32.xlu1 %v7204_v22, %s10508_s16 }
 0x36a   : > { %2724 = vrot.lane.b32.xlu0 %v7207_v27, %s10690_s12 }
 0x36b   : > { %3692 = vmatpush1.bf16.msra.mxu0 %v1851_v63  ;;  %v8015_v34 = vpop.permute.xlu1 %2395  ;;  %v10692_v63 = vld [vmem:[#allocation44_spill] sm:$0xff] }
 0x36c   : > { %v8021_v3 = vpop.permute.xlu0 %2397  ;;  %3693 = vmatprep.subr.bf16.mxu0 %v1912_v56  ;;  %v1915_v14 = vsel %vm695_vm14, %v10692_v63, %v10691_v36  ;;  %v1914_v38 = vsel %vm695_vm14, %v6395_v11, %v10692_v63  ;;  %v1921_v63 = vsel %vm695_vm14, %v7793_v18, %v7799_v10 }
 0x36d   : > { %2726 = vrot.lane.b32.xlu1 %v7209_v28, %s10690_s12 }
 0x36e   : > { %1478 = vrot.lane.b32.xlu0 %v7204_v22, %s10514_s13 }
 0x36f   : > { %3694 = vmatpush1.bf16.msra.mxu0 %v1911_v1  ;;  %v8029_v55 = vpop.permute.xlu1 %2393  ;;  %v10694_v1 = vld [vmem:[#allocation61_spill] sm:$0xff] }
 0x370   : > { %v8035_v37 = vpop.permute.xlu0 %2403  ;;  %3695 = vmatprep.subr.bf16.mxu0 %v1915_v14  ;;  %v1918_v7 = vsel %vm695_vm14, %v10694_v1, %v10693_v57  ;;  %v1917_v11 = vsel %vm695_vm14, %v6399_v48, %v10694_v1  ;;  %v10697_v1 = vld [vmem:[#allocation29_spill] sm:$0xff] }
 0x371   : > { %2722 = vrot.lane.b32.xlu1 %v7202_v21, %s10690_s12 }
 0x372   : > { %1624 = vrot.lane.b32.xlu0 %v7239_v5, %s10508_s16 }
 0x373   : > { %3696 = vmatpush1.bf16.msra.mxu0 %v1914_v38  ;;  %v8043_v56 = vpop.permute.xlu1 %2405  ;;  %v6400_v38 = vunpack.i.h.bf16 %v10695_v58  ;;  %v10699_v58 = vld [vmem:[#allocation12_spill] sm:$0xff] }
 0x374   : > { %v8049_v36 = vpop.permute.xlu0 %2401  ;;  %3697 = vmatprep.subr.bf16.mxu0 %v1918_v7  ;;  %v6404_v41 = vunpack.i.l.bf16 %v10699_v58 }
 0x375   : > { %2732 = vrot.lane.b32.xlu1 %v7237_v4, %s10690_s12  ;;  %v1920_v7 = vsel %vm695_vm14, %v6400_v38, %v7793_v18  ;;  %v10702_v38 = vld [vmem:[#allocation45_spill] sm:$0xff] }
 0x376   : > { %2734 = vrot.lane.b32.xlu0 %v7204_v22, %s10690_s12 }
 0x377   : > { %3698 = vmatpush1.bf16.msra.mxu0 %v1917_v11  ;;  %v8057_v14 = vpop.permute.xlu1 %2448  ;;  %v10698_v11 = vld [vmem:[#allocation28_spill] sm:$0xff] }
 0x378   : > { %v8063_v57 = vpop.permute.xlu0 %2450  ;;  %3699 = vmatprep.subr.bf16.mxu0 %v1921_v63  ;;  %v1981_v10 = vsel %vm10558_vm6, %v10698_v11, %v10697_v1  ;;  %v1980_v18 = vsel %vm10558_vm6, %v6404_v41, %v10698_v11  ;;  %v10706_v11 = vld [vmem:[#allocation62_spill] sm:$0xff] }
 0x379   : > { %1486 = vrot.lane.b32.xlu1 %v7239_v5, %s10514_s13 }
 0x37a   : > { %2730 = vrot.lane.b32.xlu0 %v7232_v60, %s10690_s12 }
 0x37b   : > { %3700 = vmatpush1.bf16.msra.mxu0 %v1920_v7  ;;  %v8071_v48 = vpop.permute.xlu1 %2446  ;;  %v10703_v7 = vld [vmem:[#allocation46_spill] sm:$0xff] }
 0x37c   : > { %10696 = vst [vmem:[#allocation44_spill] sm:$0xff] %v8071_v48  ;;  %v8077_v2 = vpop.permute.xlu0 %2456  ;;  %3701 = vmatprep.subr.bf16.mxu0 %v1981_v10  ;;  %v1984_v1 = vsel %vm10558_vm6, %v10703_v7, %v10702_v38  ;;  %v6405_v48 = vunpack.i.h.bf16 %v10699_v58  ;;  %v10708_v58 = vld [vmem:[#allocation13_spill] sm:$0xff] }
 0x37d   : > { %10700 = vst [vmem:[#allocation61_spill] sm:$0xff] %v8077_v2  ;;  %1632 = vrot.lane.b32.xlu1 %v7234_v61, %s10508_s16  ;;  %s10720_s16 = smov 82  }
 0x37e   : > { %2740 = vrot.lane.b32.xlu0 %v7259_v26, %s10690_s12  ;;  %v1983_v10 = vsel %vm10558_vm6, %v6405_v48, %v10703_v7  ;;  %v1990_v7 = vsel %vm10558_vm6, %v7807_v47, %v7813_v59  ;;  %v6569_v59 = vld [vmem:[%s10644_s4 + $0x74] ss:$52 sps:$4 sm:$0xff]  }
 0x37f   : > { %3702 = vmatpush1.bf16.msra.mxu0 %v1980_v18  ;;  %v8085_v63 = vpop.permute.xlu1 %2458  ;;  %v10707_v18 = vld [vmem:[#allocation63_spill] sm:$0xff] }
 0x380   : > { %10701 = vst [vmem:[#allocation11_spill] sm:$0xff] %v8085_v63  ;;  %v8091_v2 = vpop.permute.xlu0 %2454  ;;  %3703 = vmatprep.subr.bf16.mxu0 %v1984_v1  ;;  %v1987_v38 = vsel %vm10558_vm6, %v10707_v18, %v10706_v11  ;;  %v6409_v63 = vunpack.i.l.bf16 %v10708_v58 }
 0x381   : > { %10704 = vst [vmem:[#allocation28_spill] sm:$0xff] %v8091_v2  ;;  %2742 = vrot.lane.b32.xlu1 %v7239_v5, %s10690_s12 }
 0x382   : > { %1494 = vrot.lane.b32.xlu0 %v7234_v61, %s10514_s13  ;;  %v1986_v48 = vsel %vm10558_vm6, %v6409_v63, %v10707_v18  ;;  %s10756_s13 = smov 81  }
 0x383   : > { %3704 = vmatpush1.bf16.msra.mxu0 %v1983_v10  ;;  %v8099_v41 = vpop.permute.xlu1 %2464  ;;  %v6410_v10 = vunpack.i.h.bf16 %v10708_v58  ;;  %v10712_v58 = vld [vmem:[#allocation31_spill] sm:$0xff] }
 0x384   : > { %10705 = vst [vmem:[#allocation12_spill] sm:$0xff] %v8099_v41  ;;  %v8105_v2 = vpop.permute.xlu0 %2466  ;;  %3705 = vmatprep.subr.bf16.mxu0 %v1987_v38  ;;  %v6566_v38 = vld [vmem:[%s10644_s4 + $0x8] ss:$52 sps:$4 sm:$0xff]  }
 0x385   : > { %2738 = vrot.lane.b32.xlu1 %v7256_v40, %s10690_s12  ;;  %v1989_v63 = vsel %vm10558_vm6, %v6410_v10, %v7807_v47 }
 0x386   : > { %1677 = vrot.lane.b32.xlu0 %v7209_v28, %s10532_s21 }
 0x387   : > { %3706 = vmatpush1.bf16.msra.mxu0 %v1986_v48  ;;  %v8113_v1 = vpop.permute.xlu1 %2462  ;;  %v10713_v48 = vld [vmem:[#allocation30_spill] sm:$0xff] }
 0x388   : > { %10709 = vst [vmem:[#allocation46_spill] sm:$0xff] %v8113_v1  ;;  %v8119_v11 = vpop.permute.xlu0 %2472  ;;  %3707 = vmatprep.subr.bf16.mxu0 %v1990_v7  ;;  %v2050_v7 = vsel %vm2048_vm9, %v10713_v48, %v10712_v58  ;;  %v10718_v58 = vld [vmem:[#allocation48_spill] sm:$0xff] }
 0x389   : > { %10710 = vst [vmem:[#allocation63_spill] sm:$0xff] %v8119_v11  ;;  %2748 = vrot.lane.b32.xlu1 %v7278_v45, %s10690_s12  ;;  %v10714_v11 = vld [vmem:[#allocation14_spill] sm:$0xff] }
 0x38a   : > { %2750 = vrot.lane.b32.xlu0 %v7234_v61, %s10690_s12  ;;  %v6414_v1 = vunpack.i.l.bf16 %v10714_v11 }
 0x38b   : > { %3708 = vmatpush1.bf16.msra.mxu0 %v1989_v63  ;;  %v8130_v18 = vpop.permute.xlu1 %2474  ;;  %v10717_v63 = vld [vmem:[#allocation47_spill] sm:$0xff] }
 0x38c   : > { %10711 = vst [vmem:[#allocation13_spill] sm:$0xff] %v8130_v18  ;;  %v8139_v41 = vpop.permute.xlu0 %2470  ;;  %3730 = vmatprep.subr.bf16.mxu0 %v2050_v7  ;;  %v2049_v47 = vsel %vm2048_vm9, %v6414_v1, %v10713_v48  ;;  %v2053_v18 = vsel %vm2048_vm9, %v10718_v58, %v10717_v63  ;;  %v6415_v7 = vunpack.i.h.bf16 %v10714_v11  ;;  %v10721_v11 = vld [vmem:[#allocation64_spill] sm:$0xff]  ;;  %v10722_v48 = vld [vmem:[#allocation65_spill] sm:$0xff]  ;;  %v10723_v63 = vld [vmem:[#allocation15_spill] sm:$0xff] }
 0x38d   : > { %10715 = vst [vmem:[#allocation30_spill] sm:$0xff] %v8139_v41  ;;  %1539 = vrot.lane.b32.xlu1 %v7209_v28, %s10556_s11 }
 0x38e   : > { %2746 = vrot.lane.b32.xlu0 %v7276_v13, %s10690_s12  ;;  %3710 = vmatmul.mubr.bf16.vlgmr.msra.gmra.mrb[16].mxu0 %v6566_v38  ;;  %v2052_v1 = vsel %vm2048_vm9, %v6415_v7, %v10718_v58  ;;  %v6571_v38 = vld [vmem:[%s10644_s4 + $0x70] ss:$52 sps:$4 sm:$0xff]  }
 0x38f   : > { %3731 = vmatpush1.bf16.msra.mxu0 %v2049_v47  ;;  %v8147_v10 = vpop.permute.xlu1 %2517  ;;  %3719 = vmatprep.mubr.bf16.mxu0 %v6569_v59  ;;  %v6574_v47 = vld [vmem:[%s10644_s4 + $0x14] ss:$52 sps:$4 sm:$0xff]  }
 0x390   : > { %10716 = vst [vmem:[#allocation14_spill] sm:$0xff] %v8147_v10  ;;  %v8153_v41 = vpop.permute.xlu0 %2519  ;;  %3732 = vmatprep.subr.bf16.mxu0 %v2053_v18  ;;  %v2056_v18 = vsel %vm2048_vm9, %v10722_v48, %v10721_v11  ;;  %v6419_v10 = vunpack.i.l.bf16 %v10723_v63 }
 0x391   : > { %10719 = vst [vmem:[#allocation48_spill] sm:$0xff] %v8153_v41  ;;  %1685 = vrot.lane.b32.xlu1 %v7204_v22, %s10532_s21 }
 0x392   : > { %2793 = vrot.lane.b32.xlu0 %v7207_v27, %s10720_s16  ;;  %v2055_v58 = vsel %vm2048_vm9, %v6419_v10, %v10722_v48  ;;  %v10727_v48 = vld [vmem:[#allocation33_spill] sm:$0xff] }
 0x393   : > { %3733 = vmatpush1.bf16.msra.mxu0 %v2052_v1  ;;  %v8164_v59 = vpop.permute.xlu1 %2515  ;;  %v2059_v1 = vsel %vm2048_vm9, %v7821_v9, %v7827_v39 }
 0x394   : > { %v8173_v41 = vpop.permute.xlu0 %2525  ;;  %3734 = vmatprep.subr.bf16.mxu0 %v2056_v18  ;;  %v6420_v18 = vunpack.i.h.bf16 %v10723_v63 }
 0x395   : > { %2795 = vrot.lane.b32.xlu1 %v7209_v28, %s10720_s16 }
 0x396   : > { %1547 = vrot.lane.b32.xlu0 %v7204_v22, %s10556_s11  ;;  %3720 = vmatmul.mubr.bf16.gmra.mrb[20].mxu0 %v6571_v38  ;;  %v2058_v10 = vsel %vm2048_vm9, %v6420_v18, %v7821_v9 }
 0x397   : > { %3735 = vmatpush1.bf16.msra.mxu0 %v2055_v58  ;;  %v8181_v7 = vpop.permute.xlu1 %2527  ;;  %3762 = vmatprep.mubr.bf16.mxu0 %v6574_v47  ;;  %v10728_v47 = vld [vmem:[#allocation32_spill] sm:$0xff] }
 0x398   : > { %10724 = vst [vmem:[#allocation65_spill] sm:$0xff] %v8181_v7  ;;  %v8187_v11 = vpop.permute.xlu0 %2523  ;;  %3736 = vmatprep.subr.bf16.mxu0 %v2059_v1  ;;  %v2119_v63 = vsel %vm2117_vm5, %v10728_v47, %v10727_v48  ;;  %v10729_v58 = vld [vmem:[#allocation16_spill] sm:$0xff] }
 0x399   : > { %10725 = vst [vmem:[#allocation15_spill] sm:$0xff] %v8187_v11  ;;  %2791 = vrot.lane.b32.xlu1 %v7202_v21, %s10720_s16  ;;  %v6424_v39 = vunpack.i.l.bf16 %v10729_v58  ;;  %v6425_v11 = vunpack.i.h.bf16 %v10729_v58  ;;  %v10738_v58 = vld [vmem:[#allocation17_spill] sm:$0xff] }
 0x39a   : > { %1693 = vrot.lane.b32.xlu0 %v7239_v5, %s10532_s21 }
 0x39b   : > { %3737 = vmatpush1.bf16.msra.mxu0 %v2058_v10  ;;  %v8195_v38 = vpop.permute.xlu1 %2533  ;;  %v2118_v9 = vsel %vm2117_vm5, %v6424_v39, %v10728_v47  ;;  %v10732_v10 = vld [vmem:[#allocation49_spill] sm:$0xff] }
 0x39c   : > { %10726 = vst [vmem:[#allocation84_spill] sm:$0xff] %v8195_v38  ;;  %v8201_v1 = vpop.permute.xlu0 %2535  ;;  %3738 = vmatprep.subr.bf16.mxu0 %v2119_v63  ;;  %v10733_v38 = vld [vmem:[#allocation50_spill] sm:$0xff] }
 0x39d   : > { %10730 = vst [vmem:[#allocation32_spill] sm:$0xff] %v8201_v1  ;;  %2801 = vrot.lane.b32.xlu1 %v7237_v4, %s10720_s16  ;;  %v2122_v48 = vsel %vm2117_vm5, %v10733_v38, %v10732_v10  ;;  %v2121_v39 = vsel %vm2117_vm5, %v6425_v11, %v10733_v38  ;;  %v10736_v63 = vld [vmem:[#allocation66_spill] sm:$0xff] }
 0x39e   : > { %2803 = vrot.lane.b32.xlu0 %v7204_v22, %s10720_s16 }
 0x39f   : > { %3739 = vmatpush1.bf16.msra.mxu0 %v2118_v9  ;;  %v8209_v18 = vpop.permute.xlu1 %2531  ;;  %v10737_v9 = vld [vmem:[#allocation67_spill] sm:$0xff] }
 0x3a0   : > { %10731 = vst [vmem:[#allocation16_spill] sm:$0xff] %v8209_v18  ;;  %v8215_v1 = vpop.permute.xlu0 %2541  ;;  %3740 = vmatprep.subr.bf16.mxu0 %v2122_v48  ;;  %v2125_v10 = vsel %vm2117_vm5, %v10737_v9, %v10736_v63  ;;  %v6429_v18 = vunpack.i.l.bf16 %v10738_v58  ;;  %v2128_v48 = vsel %vm2117_vm5, %v7835_v49, %v7841_v35 }
 0x3a1   : > { %10734 = vst [vmem:[#allocation50_spill] sm:$0xff] %v8215_v1  ;;  %1555 = vrot.lane.b32.xlu1 %v7239_v5, %s10556_s11 }
 0x3a2   : > { %2799 = vrot.lane.b32.xlu0 %v7232_v60, %s10720_s16  ;;  %v2124_v11 = vsel %vm2117_vm5, %v6429_v18, %v10737_v9  ;;  %v10742_v9 = vld [vmem:[#allocation35_spill] sm:$0xff] }
 0x3a3   : > { %3741 = vmatpush1.bf16.msra.mxu0 %v2121_v39  ;;  %v8223_v47 = vpop.permute.xlu1 %2543  ;;  %v6430_v39 = vunpack.i.h.bf16 %v10738_v58  ;;  %v10744_v58 = vld [vmem:[#allocation18_spill] sm:$0xff] }
 0x3a4   : > { %10735 = vst [vmem:[#allocation85_spill] sm:$0xff] %v8223_v47  ;;  %v8229_v1 = vpop.permute.xlu0 %2539  ;;  %3742 = vmatprep.subr.bf16.mxu0 %v2125_v10 }
 0x3a5   : > { %1701 = vrot.lane.b32.xlu1 %v7234_v61, %s10532_s21  ;;  %v2127_v18 = vsel %vm2117_vm5, %v6430_v39, %v7835_v49  ;;  %v10747_v39 = vld [vmem:[#allocation51_spill] sm:$0xff]  ;;  %s10773_s21 = smov 80  }
 0x3a6   : > { %2809 = vrot.lane.b32.xlu0 %v7259_v26, %s10720_s16 }
 0x3a7   : > { %3743 = vmatpush1.bf16.msra.mxu0 %v2124_v11  ;;  %v8237_v38 = vpop.permute.xlu1 %2586  ;;  %v10743_v11 = vld [vmem:[#allocation34_spill] sm:$0xff] }
 0x3a8   : > { %10739 = vst [vmem:[#allocation67_spill] sm:$0xff] %v8237_v38  ;;  %v8243_v63 = vpop.permute.xlu0 %2588  ;;  %3744 = vmatprep.subr.bf16.mxu0 %v2128_v48  ;;  %v2188_v35 = vsel %vm767_vm3, %v10743_v11, %v10742_v9  ;;  %v6434_v38 = vunpack.i.l.bf16 %v10744_v58 }
 0x3a9   : > { %10740 = vst [vmem:[#allocation17_spill] sm:$0xff] %v8243_v63  ;;  %2811 = vrot.lane.b32.xlu1 %v7239_v5, %s10720_s16 }
 0x3aa   : > { %1563 = vrot.lane.b32.xlu0 %v7234_v61, %s10556_s11  ;;  %v2187_v49 = vsel %vm767_vm3, %v6434_v38, %v10743_v11  ;;  %v10750_v11 = vld [vmem:[#allocation68_spill] sm:$0xff]  ;;  %s10968_s11 = smov 23  }
 0x3ab   : > { %3745 = vmatpush1.bf16.msra.mxu0 %v2127_v18  ;;  %v8251_v10 = vpop.permute.xlu1 %2584  ;;  %v10748_v18 = vld [vmem:[#allocation52_spill] sm:$0xff] }
 0x3ac   : > { %10741 = vst [vmem:[#allocation86_spill] sm:$0xff] %v8251_v10  ;;  %v8257_v63 = vpop.permute.xlu0 %2594  ;;  %3746 = vmatprep.subr.bf16.mxu0 %v2188_v35  ;;  %v2191_v9 = vsel %vm767_vm3, %v10748_v18, %v10747_v39  ;;  %v6435_v10 = vunpack.i.h.bf16 %v10744_v58  ;;  %v10752_v58 = vld [vmem:[#allocation19_spill] sm:$0xff] }
 0x3ad   : > { %10745 = vst [vmem:[#allocation34_spill] sm:$0xff] %v8257_v63  ;;  %2807 = vrot.lane.b32.xlu1 %v7256_v40, %s10720_s16 }
 0x3ae   : > { %1884 = vrot.lane.b32.xlu0 %v7209_v28, %s10563_s30  ;;  %v2190_v35 = vsel %vm767_vm3, %v6435_v10, %v10748_v18  ;;  %v2197_v18 = vsel %vm767_vm3, %v7849_v46, %v7855_v31 }
 0x3af   : > { %3747 = vmatpush1.bf16.msra.mxu0 %v2187_v49  ;;  %v8265_v48 = vpop.permute.xlu1 %2596  ;;  %v10751_v49 = vld [vmem:[#allocation69_spill] sm:$0xff] }
 0x3b0   : > { %10746 = vst [vmem:[#allocation18_spill] sm:$0xff] %v8265_v48  ;;  %v8271_v63 = vpop.permute.xlu0 %2592  ;;  %3748 = vmatprep.subr.bf16.mxu0 %v2191_v9  ;;  %v2194_v39 = vsel %vm767_vm3, %v10751_v49, %v10750_v11  ;;  %v6439_v48 = vunpack.i.l.bf16 %v10752_v58 }
 0x3b1   : > { %10749 = vst [vmem:[#allocation52_spill] sm:$0xff] %v8271_v63  ;;  %2817 = vrot.lane.b32.xlu1 %v7278_v45, %s10720_s16 }
 0x3b2   : > { %2819 = vrot.lane.b32.xlu0 %v7234_v61, %s10720_s16  ;;  %v2193_v10 = vsel %vm767_vm3, %v6439_v48, %v10751_v49  ;;  %v10758_v49 = vld [vmem:[#allocation37_spill] sm:$0xff] }
 0x3b3   : > { %3749 = vmatpush1.bf16.msra.mxu0 %v2190_v35  ;;  %v8279_v38 = vpop.permute.xlu1 %2602  ;;  %v6440_v35 = vunpack.i.h.bf16 %v10752_v58  ;;  %v10760_v58 = vld [vmem:[#allocation20_spill] sm:$0xff] }
 0x3b4   : > { %v8285_v63 = vpop.permute.xlu0 %2604  ;;  %3750 = vmatprep.subr.bf16.mxu0 %v2194_v39 }
 0x3b5   : > { %10753 = vst [vmem:[#allocation69_spill] sm:$0xff] %v8285_v63  ;;  %1746 = vrot.lane.b32.xlu1 %v7209_v28, %s10565_s29  ;;  %v2196_v48 = vsel %vm767_vm3, %v6440_v35, %v7849_v46  ;;  %v10763_v35 = vld [vmem:[#allocation53_spill] sm:$0xff] }
 0x3b6   : > { %2815 = vrot.lane.b32.xlu0 %v7276_v13, %s10720_s16 }
 0x3b7   : > { %3751 = vmatpush1.bf16.msra.mxu0 %v2193_v10  ;;  %v8293_v9 = vpop.permute.xlu1 %2600  ;;  %v10759_v10 = vld [vmem:[#allocation36_spill] sm:$0xff] }
 0x3b8   : > { %10754 = vst [vmem:[#allocation19_spill] sm:$0xff] %v8293_v9  ;;  %v8299_v11 = vpop.permute.xlu0 %2610  ;;  %3752 = vmatprep.subr.bf16.mxu0 %v2197_v18  ;;  %v2257_v31 = vsel %vm776_vm12, %v10759_v10, %v10758_v49  ;;  %v6444_v9 = vunpack.i.l.bf16 %v10760_v58 }
 0x3b9   : > { %10755 = vst [vmem:[#allocation87_spill] sm:$0xff] %v8299_v11  ;;  %1892 = vrot.lane.b32.xlu1 %v7204_v22, %s10563_s30 }
 0x3ba   : > { %2862 = vrot.lane.b32.xlu0 %v7207_v27, %s10756_s13  ;;  %v2256_v46 = vsel %vm776_vm12, %v6444_v9, %v10759_v10  ;;  %v10766_v10 = vld [vmem:[#allocation70_spill] sm:$0xff] }
 0x3bb   : > { %3753 = vmatpush1.bf16.msra.mxu0 %v2196_v48  ;;  %v8307_v39 = vpop.permute.xlu1 %2612  ;;  %v10764_v48 = vld [vmem:[#allocation54_spill] sm:$0xff] }
 0x3bc   : > { %10757 = vst [vmem:[#allocation88_spill] sm:$0xff] %v8307_v39  ;;  %v8313_v11 = vpop.permute.xlu0 %2608  ;;  %3754 = vmatprep.subr.bf16.mxu0 %v2257_v31  ;;  %v2260_v49 = vsel %vm776_vm12, %v10764_v48, %v10763_v35  ;;  %v6445_v39 = vunpack.i.h.bf16 %v10760_v58  ;;  %v10768_v58 = vld [vmem:[#allocation21_spill] sm:$0xff] }
 0x3bd   : > { %10761 = vst [vmem:[#allocation36_spill] sm:$0xff] %v8313_v11  ;;  %2864 = vrot.lane.b32.xlu1 %v7209_v28, %s10756_s13 }
 0x3be   : > { %1754 = vrot.lane.b32.xlu0 %v7204_v22, %s10565_s29  ;;  %v2259_v31 = vsel %vm776_vm12, %v6445_v39, %v10764_v48  ;;  %v2266_v48 = vsel %vm776_vm12, %v7863_v52, %v7869_v42 }
 0x3bf   : > { %3755 = vmatpush1.bf16.msra.mxu0 %v2256_v46  ;;  %v8321_v18 = vpop.permute.xlu1 %2655  ;;  %v10767_v46 = vld [vmem:[#allocation71_spill] sm:$0xff] }
 0x3c0   : > { %10762 = vst [vmem:[#allocation20_spill] sm:$0xff] %v8321_v18  ;;  %v8327_v11 = vpop.permute.xlu0 %2657  ;;  %3756 = vmatprep.subr.bf16.mxu0 %v2260_v49  ;;  %v2263_v35 = vsel %vm776_vm12, %v10767_v46, %v10766_v10  ;;  %v6449_v18 = vunpack.i.l.bf16 %v10768_v58 }
 0x3c1   : > { %10765 = vst [vmem:[#allocation54_spill] sm:$0xff] %v8327_v11  ;;  %2860 = vrot.lane.b32.xlu1 %v7202_v21, %s10756_s13 }
 0x3c2   : > { %1900 = vrot.lane.b32.xlu0 %v7239_v5, %s10563_s30  ;;  %v2262_v39 = vsel %vm776_vm12, %v6449_v18, %v10767_v46 }
 0x3c3   : > { %3757 = vmatpush1.bf16.msra.mxu0 %v2259_v31  ;;  %v8335_v9 = vpop.permute.xlu1 %2653  ;;  %v6450_v31 = vunpack.i.h.bf16 %v10768_v58  ;;  %v6575_v58 = vld [vmem:[%s10644_s4 + $0x7c] ss:$52 sps:$4 sm:$0xff]  }
 0x3c4   : > { %v8341_v11 = vpop.permute.xlu0 %2663  ;;  %3758 = vmatprep.subr.bf16.mxu0 %v2263_v35  ;;  %v6572_v35 = vld [vmem:[%s10644_s4 + $0x10] ss:$52 sps:$4 sm:$0xff]  }
 0x3c5   : > { %2870 = vrot.lane.b32.xlu1 %v7237_v4, %s10756_s13  ;;  %v2265_v18 = vsel %vm776_vm12, %v6450_v31, %v7863_v52 }
 0x3c6   : > { %2872 = vrot.lane.b32.xlu0 %v7204_v22, %s10756_s13 }
 0x3c7   : > { %3759 = vmatpush1.bf16.msra.mxu0 %v2262_v39  ;;  %v8349_v49 = vpop.permute.xlu1 %2665 }
 0x3c8   : > { %v8355_v10 = vpop.permute.xlu0 %2661  ;;  %3760 = vmatprep.subr.bf16.mxu0 %v2266_v48 }
 0x3c9   : > { %1762 = vrot.lane.b32.xlu1 %v7239_v5, %s10565_s29 }
 0x3ca   : > { %2868 = vrot.lane.b32.xlu0 %v7232_v60, %s10756_s13 }
 0x3cb   : > { %3761 = vmatpush1.bf16.msra.mxu0 %v2265_v18  ;;  %v8366_v46 = vpop.permute.xlu1 %2671  ;;  %v6577_v18 = vld [vmem:[%s10644_s4 + $0x78] ss:$52 sps:$4 sm:$0xff]  }
 0x3cc   : > { %v8371_v39 = vpop.permute.xlu0 %2673  ;;  %3783 = vmatprep.subr.bf16.mxu0 %v7207_v27 }
 0x3cd   : > { %1908 = vrot.lane.b32.xlu1 %v7234_v61, %s10563_s30 }
 0x3ce   : > { %2878 = vrot.lane.b32.xlu0 %v7259_v26, %s10756_s13  ;;  %3763 = vmatmul.mubr.bf16.vlgmr.msra.gmra.mrb[16].mxu0 %v6572_v35 }
 0x3cf   : > { %3784 = vmatpush1.bf16.msra.mxu0 %v7202_v21  ;;  %v8379_v52 = vpop.permute.xlu1 %2669  ;;  %3772 = vmatprep.mubr.bf16.mxu0 %v6575_v58  ;;  %v6580_v58 = vld [vmem:[%s10644_s4 + $0x1c] ss:$52 sps:$4 sm:$0xff]  }
 0x3d0   : > { %v1609_v48 = vpop.permute.xlu0 %1608  ;;  %3785 = vmatprep.subr.bf16.mxu0 %v7237_v4 }
 0x3d1   : > { %2880 = vrot.lane.b32.xlu1 %v7239_v5, %s10756_s13  ;;  %v1637_v31 = vsel %vm10538_vm15, %v7440_v29, %v1609_v48  ;;  %v10771_v48 = vld [vmem:[#allocation22_spill] sm:$0xff] }
 0x3d2   : > { %1770 = vrot.lane.b32.xlu0 %v7234_v61, %s10565_s29  ;;  %5881 = vmatprep.subr.bf16.mxu1 %v1637_v31 }
 0x3d3   : > { %3786 = vmatpush1.bf16.msra.mxu0 %v7232_v60  ;;  %v8392_v35 = vpop.permute.xlu1 %2679 }
 0x3d4   : > { %10769 = vst [vmem:[#allocation71_spill] sm:$0xff] %v8392_v35  ;;  %v8397_v42 = vpop.permute.xlu0 %2681  ;;  %3787 = vmatprep.subr.bf16.mxu0 %v7259_v26 }
 0x3d5   : > { %10770 = vst [vmem:[#allocation21_spill] sm:$0xff] %v8397_v42  ;;  %2876 = vrot.lane.b32.xlu1 %v7256_v40, %s10756_s13 }
 0x3d6   : > { %1953 = vrot.lane.b32.xlu0 %v7209_v28, %s10540_s26  ;;  %3773 = vmatmul.mubr.bf16.gmra.mrb[20].mxu0 %v6577_v18 }
 0x3d7   : > { %3788 = vmatpush1.bf16.msra.mxu0 %v7256_v40  ;;  %v1471_v29 = vpop.permute.xlu1 %1470  ;;  %3815 = vmatprep.mubr.bf16.mxu0 %v6580_v58  ;;  %v2342_v58 = vsel %vm317_vm2, %v7877_v25, %v7883_v6 }
 0x3d8   : > { %v1499_v31 = vsel %vm10539_vm11, %v10771_v48, %v1471_v29  ;;  %v8407_v35 = vpop.permute.xlu0 %2677  ;;  %3789 = vmatprep.subr.bf16.mxu0 %v7278_v45  ;;  %v2341_v48 = vsel %vm317_vm2, %v7894_v53, %v7877_v25  ;;  %v2344_v25 = vsel %vm317_vm2, %v7917_v32, %v7903_v62  ;;  %v2347_v32 = vsel %vm317_vm2, %v7945_v54, %v7928_v0 }
 0x3d9   : > { %2886 = vrot.lane.b32.xlu1 %v7278_v45, %s10756_s13  ;;  %5882 = vmatpush3.bf16.msra.mxu1 %v1499_v31  ;;  %v2411_v54 = vsel %vm326_vm4, %v7973_v50, %v7979_v19 }
 0x3da   : > { %2888 = vrot.lane.b32.xlu0 %v7234_v61, %s10756_s13 }
 0x3db   : > { %3790 = vmatpush1.bf16.msra.mxu0 %v7276_v13  ;;  %v1617_v18 = vpop.permute.xlu1 %1616 }
 0x3dc   : > { %v8418_v42 = vpop.permute.xlu0 %2724  ;;  %3791 = vmatprep.subr.bf16.mxu0 %v2342_v58  ;;  %v1640_v29 = vsel %vm10538_vm15, %v7536_v33, %v1617_v18  ;;  %v2345_v58 = vsel %vm317_vm2, %v7903_v62, %v7911_v30  ;;  %v10772_v33 = vld [vmem:[#allocation38_spill] sm:$0xff] }
 0x3dd   : > { %1815 = vrot.lane.b32.xlu1 %v7209_v28, %s10542_s24  ;;  %5883 = vmatprep.subr.bf16.mxu1 %v1640_v29  ;;  %v2348_v29 = vsel %vm317_vm2, %v7928_v0, %v7937_v8 }
 0x3de   : > { %2884 = vrot.lane.b32.xlu0 %v7276_v13, %s10756_s13 }
 0x3df   : > { %3792 = vmatpush1.bf16.msra.mxu0 %v2341_v48  ;;  %v8429_v31 = vpop.permute.xlu1 %2726 }
 0x3e0   : > { %v1479_v6 = vpop.permute.xlu0 %1478  ;;  %3793 = vmatprep.subr.bf16.mxu0 %v2345_v58  ;;  %v2351_v58 = vsel %vm317_vm2, %v7951_v16, %v7959_v51  ;;  %v10838_v51 = vld [vmem:[#allocation43_spill] sm:$0xff] }
 0x3e1   : > { %v1502_v18 = vsel %vm10539_vm11, %v10772_v33, %v1479_v6  ;;  %1961 = vrot.lane.b32.xlu1 %v7204_v22, %s10540_s26 }
 0x3e2   : > { %2931 = vrot.lane.b32.xlu0 %v7207_v27, %s10773_s21  ;;  %5884 = vmatpush3.bf16.msra.mxu1 %v1502_v18  ;;  %v10774_v18 = vld [vmem:[#allocation55_spill] sm:$0xff] }
 0x3e3   : > { %3794 = vmatpush1.bf16.msra.mxu0 %v2344_v25  ;;  %v8443_v53 = vpop.permute.xlu1 %2722 }
 0x3e4   : > { %v1625_v48 = vpop.permute.xlu0 %1624  ;;  %3795 = vmatprep.subr.bf16.mxu0 %v2348_v29 }
 0x3e5   : > { %2933 = vrot.lane.b32.xlu1 %v7209_v28, %s10773_s21  ;;  %v1643_v6 = vsel %vm10538_vm15, %v7637_v43, %v1625_v48  ;;  %v2350_v43 = vsel %vm317_vm2, %v7965_v23, %v7951_v16  ;;  %v2410_v16 = vsel %vm326_vm4, %v7987_v15, %v7973_v50  ;;  %v2414_v48 = vsel %vm326_vm4, %v7993_v17, %v8001_v20 }
 0x3e6   : > { %1823 = vrot.lane.b32.xlu0 %v7204_v22, %s10542_s24  ;;  %5885 = vmatprep.subr.bf16.mxu1 %v1643_v6  ;;  %v2413_v50 = vsel %vm326_vm4, %v8007_v44, %v7993_v17  ;;  %v2416_v44 = vsel %vm326_vm4, %v8029_v55, %v8015_v34 }
 0x3e7   : > { %3796 = vmatpush1.bf16.msra.mxu0 %v2347_v32  ;;  %v8457_v62 = vpop.permute.xlu1 %2732 }
 0x3e8   : > { %v8462_v33 = vpop.permute.xlu0 %2734  ;;  %3797 = vmatprep.subr.bf16.mxu0 %v2351_v58  ;;  %v2417_v58 = vsel %vm326_vm4, %v8015_v34, %v8021_v3  ;;  %v2419_v34 = vsel %vm326_vm4, %v8049_v36, %v8035_v37 }
 0x3e9   : > { %2929 = vrot.lane.b32.xlu1 %v7202_v21, %s10773_s21 }
 0x3ea   : > { %1969 = vrot.lane.b32.xlu0 %v7239_v5, %s10540_s26 }
 0x3eb   : > { %3798 = vmatpush1.bf16.msra.mxu0 %v2350_v43  ;;  %v1487_v0 = vpop.permute.xlu1 %1486 }
 0x3ec   : > { %v1505_v25 = vsel %vm10539_vm11, %v10774_v18, %v1487_v0  ;;  %v8476_v29 = vpop.permute.xlu0 %2730  ;;  %3799 = vmatprep.subr.bf16.mxu0 %v2411_v54  ;;  %v2420_v0 = vsel %vm326_vm4, %v8035_v37, %v8043_v56 }
 0x3ed   : > { %2939 = vrot.lane.b32.xlu1 %v7237_v4, %s10773_s21  ;;  %5886 = vmatpush3.bf16.msra.mxu1 %v1505_v25  ;;  %v2480_v25 = vsel %vm10776_vm7, %v8057_v14, %v8063_v57 }
 0x3ee   : > { %2941 = vrot.lane.b32.xlu0 %v7204_v22, %s10773_s21 }
 0x3ef   : > { %3800 = vmatpush1.bf16.msra.mxu0 %v2410_v16  ;;  %v1633_v23 = vpop.permute.xlu1 %1632 }
 0x3f0   : > { %v8488_v6 = vpop.permute.xlu0 %2740  ;;  %3801 = vmatprep.subr.bf16.mxu0 %v2414_v48  ;;  %v1646_v32 = vsel %vm10538_vm15, %v7745_v24, %v1633_v23  ;;  %v10777_v23 = vld [vmem:[#allocation44_spill] sm:$0xff]  ;;  %vm10778_vm15 = vmmov %vm10776_vm7  ;;  %v10779_v48 = vld [vmem:[#allocation11_spill] sm:$0xff] }
 0x3f1   : > { %1831 = vrot.lane.b32.xlu1 %v7239_v5, %s10542_s24  ;;  %5887 = vmatprep.subr.bf16.mxu1 %v1646_v32  ;;  %v2479_v37 = vsel %vm10778_vm15, %v10777_v23, %v8057_v14  ;;  %v10780_v32 = vld [vmem:[#allocation61_spill] sm:$0xff]  ;;  %v10783_v14 = vld [vmem:[#allocation28_spill] sm:$0xff]  ;;  %vm10784_vm15 = vmmov %vm10776_vm7 }
 0x3f2   : > { %2937 = vrot.lane.b32.xlu0 %v7232_v60, %s10773_s21  ;;  %v10788_v23 = vld [vmem:[#allocation46_spill] sm:$0xff] }
 0x3f3   : > { %3802 = vmatpush1.bf16.msra.mxu0 %v2413_v50  ;;  %v8499_v15 = vpop.permute.xlu1 %2742 }
 0x3f4   : > { %v1495_v43 = vpop.permute.xlu0 %1494  ;;  %3803 = vmatprep.subr.bf16.mxu0 %v2417_v58  ;;  %v10782_v58 = vld [vmem:[#allocation23_spill] sm:$0xff] }
 0x3f5   : > { %v1508_v24 = vsel %vm10539_vm11, %v7718_v12, %v1495_v43  ;;  %1977 = vrot.lane.b32.xlu1 %v7234_v61, %s10540_s26  ;;  %v10775_v12 = vld [vmem:[#allocation24_spill] sm:$0xff]  ;;  %vm10781_vm11 = vmmov %vm10776_vm7  ;;  %s10970_s26 = smov 2  }
 0x3f6   : > { %2947 = vrot.lane.b32.xlu0 %v7259_v26, %s10773_s21  ;;  %5888 = vmatpush3.bf16.msra.mxu1 %v1508_v24  ;;  %v2483_v50 = vsel %vm10781_vm11, %v10780_v32, %v10779_v48  ;;  %vm10786_vm11 = vmmov %vm10776_vm7 }
 0x3f7   : > { %3804 = vmatpush1.bf16.msra.mxu0 %v2416_v44  ;;  %v8513_v17 = vpop.permute.xlu1 %2738  ;;  %v2482_v44 = vsel %vm10784_vm15, %v10783_v14, %v10780_v32  ;;  %v10789_v32 = vld [vmem:[#allocation13_spill] sm:$0xff]  ;;  %vm10791_vm15 = vmmov %vm10776_vm7  ;;  %v10792_v14 = vld [vmem:[#allocation39_spill] sm:$0xff] }
 0x3f8   : > { %v1678_v54 = vpop.permute.xlu0 %1677  ;;  %3805 = vmatprep.subr.bf16.mxu0 %v2420_v0 }
 0x3f9   : > { %2949 = vrot.lane.b32.xlu1 %v7239_v5, %s10773_s21  ;;  %v1706_v18 = vsel %vm1703_vm13, %v10775_v12, %v1678_v54  ;;  %v10785_v54 = vld [vmem:[#allocation12_spill] sm:$0xff] }
 0x3fa   : > { %1839 = vrot.lane.b32.xlu0 %v7234_v61, %s10542_s24  ;;  %5889 = vmatprep.subr.bf16.mxu1 %v1706_v18  ;;  %v2486_v12 = vsel %vm10786_vm11, %v10785_v54, %v8105_v2  ;;  %vm10794_vm11 = vmmov %vm10776_vm7  ;;  %s10842_s24 = smov 78  }
 0x3fb   : > { %3806 = vmatpush1.bf16.msra.mxu0 %v2419_v34  ;;  %v8527_v55 = vpop.permute.xlu1 %2748  ;;  %v10787_v34 = vld [vmem:[#allocation40_spill] sm:$0xff] }
 0x3fc   : > { %v8532_v16 = vpop.permute.xlu0 %2750  ;;  %3807 = vmatprep.subr.bf16.mxu0 %v2480_v25 }
 0x3fd   : > { %2945 = vrot.lane.b32.xlu1 %v7256_v40, %s10773_s21 }
 0x3fe   : > { %2160 = vrot.lane.b32.xlu0 %v7209_v28, %s10559_s17 }
 0x3ff   : > { %3808 = vmatpush1.bf16.msra.mxu0 %v2479_v37  ;;  %v1540_v36 = vpop.permute.xlu1 %1539  ;;  %v2485_v37 = vsel %vm10776_vm7, %v10788_v23, %v10785_v54  ;;  %vm10798_vm7 = vcmask 859136  }
 0x400   : > { %v1568_v43 = vsel %vm614_vm8, %v10782_v58, %v1540_v36  ;;  %v8546_v24 = vpop.permute.xlu0 %2746  ;;  %3809 = vmatprep.subr.bf16.mxu0 %v2483_v50  ;;  %v10790_v50 = vld [vmem:[#allocation63_spill] sm:$0xff] }
 0x401   : > { %2955 = vrot.lane.b32.xlu1 %v7278_v45, %s10773_s21  ;;  %5890 = vmatpush3.bf16.msra.mxu1 %v1568_v43  ;;  %v2489_v58 = vsel %vm10791_vm15, %v10790_v50, %v10789_v32  ;;  %vm10802_vm15 = vmmov %vm10798_vm7 }
 0x402   : > { %2957 = vrot.lane.b32.xlu0 %v7234_v61, %s10773_s21 }
 0x403   : > { %3810 = vmatpush1.bf16.msra.mxu0 %v2482_v44  ;;  %v1686_v0 = vpop.permute.xlu1 %1685 }
 0x404   : > { %v8558_v18 = vpop.permute.xlu0 %2793  ;;  %3811 = vmatprep.subr.bf16.mxu0 %v2486_v12  ;;  %v1709_v25 = vsel %vm1703_vm13, %v10787_v34, %v1686_v0  ;;  %v10793_v0 = vld [vmem:[#allocation30_spill] sm:$0xff]  ;;  %v10796_v34 = vld [vmem:[#allocation48_spill] sm:$0xff] }
 0x405   : > { %2022 = vrot.lane.b32.xlu1 %v7209_v28, %s10561_s23  ;;  %5891 = vmatprep.subr.bf16.mxu1 %v1709_v25  ;;  %v2488_v54 = vsel %vm10794_vm11, %v10793_v0, %v10790_v50  ;;  %v10797_v25 = vld [vmem:[#allocation14_spill] sm:$0xff]  ;;  %v8596_v50 = vld [vmem:[%s10644_s4 + $0x84] ss:$52 sps:$4 sm:$0xff]   ;;  %vm10803_vm11 = vmmov %vm10798_vm7 }
 0x406   : > { %2953 = vrot.lane.b32.xlu0 %v7276_v13, %s10773_s21  ;;  %v2549_v23 = vsel %vm10798_vm7, %v10797_v25, %v10796_v34  ;;  %10800 = vst [vmem:[#allocation38_spill] sm:$0xff] %v8596_v50  ;;  %v10814_v34 = vld [vmem:[#allocation73_spill] sm:$0xff] }
 0x407   : > { %3812 = vmatpush1.bf16.msra.mxu0 %v2485_v37  ;;  %v8569_v36 = vpop.permute.xlu1 %2795  ;;  %v8591_v37 = vld [vmem:[%s10644_s4 + $0x18] ss:$52 sps:$4 sm:$0xff]  }
 0x408   : > { %v1548_v43 = vpop.permute.xlu0 %1547  ;;  %3813 = vmatprep.subr.bf16.mxu0 %v2489_v58  ;;  %10799 = vst [vmem:[#allocation22_spill] sm:$0xff] %v8591_v37 }
 0x409   : > { %v1571_v44 = vsel %vm614_vm8, %v10792_v14, %v1548_v43  ;;  %2168 = vrot.lane.b32.xlu1 %v7204_v22, %s10559_s17  ;;  %v10801_v43 = vld [vmem:[#allocation57_spill] sm:$0xff] }
 0x40a   : > { %3000 = vrot.lane.b32.xlu0 %v7207_v27, %s10795_s20  ;;  %5892 = vmatpush3.bf16.msra.mxu1 %v1571_v44  ;;  %v2548_v44 = vsel %vm10802_vm15, %v8164_v59, %v10797_v25  ;;  %v10804_v59 = vld [vmem:[#allocation15_spill] sm:$0xff]  ;;  %vm10809_vm15 = vmmov %vm10798_vm7 }
 0x40b   : > { %3814 = vmatpush1.bf16.msra.mxu0 %v2488_v54  ;;  %v8583_v12 = vpop.permute.xlu1 %2791  ;;  %v2551_v25 = vsel %vm10798_vm7, %v10804_v59, %v8173_v41  ;;  %v10811_v59 = vld [vmem:[#allocation16_spill] sm:$0xff] }
 0x40c   : > { %v1694_v58 = vpop.permute.xlu0 %1693  ;;  %3836 = vmatprep.subr.bf16.mxu0 %v2549_v23  ;;  %v2552_v23 = vsel %vm10803_vm11, %v8173_v41, %v8181_v7  ;;  %v10807_v7 = vld [vmem:[#allocation32_spill] sm:$0xff]  ;;  %vm10812_vm11 = vmmov %vm10798_vm7 }
 0x40d   : > { %3002 = vrot.lane.b32.xlu1 %v7209_v28, %s10795_s20  ;;  %v1712_v14 = vsel %vm1703_vm13, %v10801_v43, %v1694_v58  ;;  %v8626_v43 = vld [vmem:[%s10644_s4 + $0x80] ss:$52 sps:$4 sm:$0xff]   ;;  %v8638_v41 = vld [vmem:[%s10644_s4 + $0x24] ss:$52 sps:$4 sm:$0xff]  }
 0x40e   : > { %2030 = vrot.lane.b32.xlu0 %v7204_v22, %s10561_s23  ;;  %5893 = vmatprep.subr.bf16.mxu1 %v1712_v14  ;;  %10805 = vst [vmem:[#allocation55_spill] sm:$0xff] %v8626_v43  ;;  %v10806_v14 = vld [vmem:[#allocation56_spill] sm:$0xff]  ;;  %10810 = vst [vmem:[#allocation24_spill] sm:$0xff] %v8638_v41 }
 0x40f   : > { %3816 = vmatmul.mubr.bf16.vlgmr.msra.gmra.mrb[16].mxu0 %v8591_v37  ;;  %v8608_v0 = vpop.permute.xlu1 %2801 }
 0x410   : > { %3837 = vmatpush1.bf16.msra.mxu0 %v2548_v44  ;;  %v8610_v54 = vpop.permute.xlu0 %2803  ;;  %3825 = vmatprep.mubr.bf16.mxu0 %v8596_v50  ;;  %v10808_v50 = vld [vmem:[#allocation84_spill] sm:$0xff] }
 0x411   : > { %3838 = vmatprep.subr.bf16.mxu0 %v2552_v23  ;;  %2998 = vrot.lane.b32.xlu1 %v7202_v21, %s10795_s20  ;;  %v2555_v37 = vsel %vm10809_vm15, %v10808_v50, %v10807_v7  ;;  %v10813_v7 = vld [vmem:[#allocation50_spill] sm:$0xff]  ;;  %vm10815_vm15 = vmmov %vm10798_vm7 }
 0x412   : > { %2176 = vrot.lane.b32.xlu0 %v7239_v5, %s10559_s17 }
 0x413   : > { %v1556_v58 = vpop.permute.xlu1 %1555 }
 0x414   : > { %3839 = vmatpush1.bf16.msra.mxu0 %v2551_v25  ;;  %v1574_v44 = vsel %vm614_vm8, %v10806_v14, %v1556_v58  ;;  %v8630_v23 = vpop.permute.xlu0 %2799  ;;  %v2554_v25 = vsel %vm10812_vm11, %v10811_v59, %v10808_v50  ;;  %v2557_v50 = vsel %vm10815_vm15, %v8229_v1, %v10813_v7  ;;  %vm10818_vm11 = vcmask 850944  }
 0x415   : > { %3840 = vmatprep.subr.bf16.mxu0 %v2555_v37  ;;  %3008 = vrot.lane.b32.xlu1 %v7237_v4, %s10795_s20  ;;  %v2558_v37 = vsel %vm10798_vm7, %v10813_v7, %v8223_v47  ;;  %v10816_v47 = vld [vmem:[#allocation17_spill] sm:$0xff]  ;;  %v10820_v7 = vld [vmem:[#allocation86_spill] sm:$0xff]  ;;  %vm10821_vm7 = vmmov %vm10818_vm11 }
 0x416   : > { %5894 = vmatpush3.bf16.msra.mxu1 %v1574_v44  ;;  %3010 = vrot.lane.b32.xlu0 %v7204_v22, %s10795_s20  ;;  %vm10824_vm15 = vmmov %vm10821_vm7 }
 0x417   : > { %v1702_v58 = vpop.permute.xlu1 %1701  ;;  %3826 = vmatmul.mubr.bf16.gmra.mrb[20].mxu0 %v8626_v43  ;;  %v10823_v43 = vld [vmem:[#allocation34_spill] sm:$0xff] }
 0x418   : > { %3841 = vmatpush1.bf16.msra.mxu0 %v2554_v25  ;;  %v8648_v14 = vpop.permute.xlu0 %2809  ;;  %v1715_v44 = vsel %vm1703_vm13, %v10814_v34, %v1702_v58  ;;  %3868 = vmatprep.mubr.bf16.mxu0 %v8638_v41  ;;  %v10817_v34 = vld [vmem:[#allocation67_spill] sm:$0xff] }
 0x419   : > { %3842 = vmatprep.subr.bf16.mxu0 %v2558_v37  ;;  %2038 = vrot.lane.b32.xlu1 %v7239_v5, %s10561_s23  ;;  %v2618_v58 = vsel %vm10818_vm11, %v10817_v34, %v10816_v47  ;;  %v10819_v37 = vld [vmem:[#allocation72_spill] sm:$0xff]  ;;  %v2617_v1 = vsel %vm10821_vm7, %v10820_v7, %v10817_v34  ;;  %v10822_v47 = vld [vmem:[#allocation18_spill] sm:$0xff]  ;;  %vm10827_vm11 = vmmov %vm10821_vm7 }
 0x41a   : > { %5895 = vmatprep.subr.bf16.mxu1 %v1715_v44  ;;  %3006 = vrot.lane.b32.xlu0 %v7232_v60, %s10795_s20 }
 0x41b   : > { %v8663_v59 = vpop.permute.xlu1 %2811 }
 0x41c   : > { %3843 = vmatpush1.bf16.msra.mxu0 %v2557_v50  ;;  %v1564_v25 = vpop.permute.xlu0 %1563 }
 0x41d   : > { %v1577_v41 = vsel %vm614_vm8, %v10819_v37, %v1564_v25  ;;  %3844 = vmatprep.subr.bf16.mxu0 %v2618_v58  ;;  %2184 = vrot.lane.b32.xlu1 %v7234_v61, %s10559_s17  ;;  %v2621_v25 = vsel %vm10824_vm15, %v10823_v43, %v10822_v47  ;;  %v10825_v58 = vld [vmem:[#allocation27_spill] sm:$0xff]  ;;  %vm10829_vm15 = vmmov %vm10821_vm7  ;;  %v10831_v47 = vld [vmem:[#allocation88_spill] sm:$0xff]  ;;  %s10923_s17 = smov 50  }
 0x41e   : > { %3016 = vrot.lane.b32.xlu0 %v7259_v26, %s10795_s20  ;;  %5896 = vmatpush3.bf16.msra.mxu1 %v1577_v41  ;;  %v10826_v41 = vld [vmem:[#allocation52_spill] sm:$0xff] }
 0x41f   : > { %v8677_v44 = vpop.permute.xlu1 %2807  ;;  %v2620_v34 = vsel %vm10827_vm11, %v10826_v41, %v10823_v43  ;;  %v10828_v43 = vld [vmem:[#allocation19_spill] sm:$0xff]  ;;  %vm10833_vm11 = vmmov %vm10821_vm7 }
 0x420   : > { %3845 = vmatpush1.bf16.msra.mxu0 %v2617_v1  ;;  %v1885_v50 = vpop.permute.xlu0 %1884  ;;  %v6605_v1 = vld [vmem:[%s10644_s4] ss:$52 sps:$4 sm:$0xff]  }
 0x421   : > { %3846 = vmatprep.subr.bf16.mxu0 %v2621_v25  ;;  %3018 = vrot.lane.b32.xlu1 %v7239_v5, %s10795_s20  ;;  %v1913_v37 = vsel %vm695_vm14, %v10825_v58, %v1885_v50  ;;  %v2624_v50 = vsel %vm10821_vm7, %v8279_v38, %v8285_v63  ;;  %v6606_v58 = vld [vmem:[%s10644_s4 + $0x6c] ss:$52 sps:$4 sm:$0xff]  }
 0x422   : > { %2046 = vrot.lane.b32.xlu0 %v7234_v61, %s10561_s23  ;;  %5909 = vmatprep.subr.bf16.mxu1 %v1913_v37  ;;  %v2623_v37 = vsel %vm10829_vm15, %v10828_v43, %v8279_v38  ;;  %v10834_v38 = vld [vmem:[#allocation36_spill] sm:$0xff]  ;;  %vm10837_vm15 = vcmask 842752   ;;  %s10963_s23 = smov 48  }
 0x423   : > { %v8691_v7 = vpop.permute.xlu1 %2817  ;;  %4028 = vmatmul.mubr.bf16.vlgmr.msra.gmra.mrb[8].mxu1 %v6605_v1 }
 0x424   : > { %3847 = vmatpush1.bf16.msra.mxu0 %v2620_v34  ;;  %v8696_v25 = vpop.permute.xlu0 %2819  ;;  %4035 = vmatprep.mubr.bf16.mxu1 %v6606_v58  ;;  %v10830_v34 = vld [vmem:[#allocation25_spill] sm:$0xff]  ;;  %v10832_v58 = vld [vmem:[#allocation87_spill] sm:$0xff] }
 0x425   : > { %3848 = vmatprep.subr.bf16.mxu0 %v2624_v50  ;;  %3014 = vrot.lane.b32.xlu1 %v7256_v40, %s10795_s20  ;;  %v2627_v50 = vsel %vm10833_vm11, %v10832_v58, %v10831_v47  ;;  %v2626_v43 = vsel %vm10821_vm7, %v10834_v38, %v10832_v58  ;;  %v10836_v47 = vld [vmem:[#allocation20_spill] sm:$0xff]  ;;  %v6608_v58 = vld [vmem:[%s10644_s4 + $0xc] ss:$52 sps:$4 sm:$0xff]   ;;  %vm10839_vm11 = vmmov %vm10837_vm15 }
 0x426   : > { %2229 = vrot.lane.b32.xlu0 %v7209_v28, %s10552_s15  ;;  %v2686_v38 = vsel %vm10839_vm11, %v8335_v9, %v10836_v47  ;;  %vm10840_vm7 = vmmov %vm10839_vm11 }
 0x427   : > { %v1747_v41 = vpop.permute.xlu1 %1746  ;;  %vm10844_vm11 = vmmov %vm10840_vm7 }
 0x428   : > { %3849 = vmatpush1.bf16.msra.mxu0 %v2623_v37  ;;  %v1775_v1 = vsel %vm1772_vm10, %v10830_v34, %v1747_v41  ;;  %v8713_v63 = vpop.permute.xlu0 %2815  ;;  %v6607_v41 = vld [vmem:[%s10644_s4 + $0x68] ss:$52 sps:$4 sm:$0xff]  }
 0x429   : > { %3850 = vmatprep.subr.bf16.mxu0 %v2627_v50  ;;  %3024 = vrot.lane.b32.xlu1 %v7278_v45, %s10795_s20  ;;  %v10835_v50 = vld [vmem:[#allocation54_spill] sm:$0xff] }
 0x42a   : > { %5910 = vmatpush3.bf16.msra.mxu1 %v1775_v1  ;;  %3026 = vrot.lane.b32.xlu0 %v7234_v61, %s10795_s20  ;;  %v2687_v1 = vsel %vm10837_vm15, %v10836_v47, %v10835_v50  ;;  %vm10843_vm15 = vmmov %vm10840_vm7 }
 0x42b   : > { %v1893_v37 = vpop.permute.xlu1 %1892  ;;  %4036 = vmatmul.mubr.bf16.gmra.mrb[12].mxu1 %v6607_v41  ;;  %v10841_v41 = vld [vmem:[#allocation41_spill] sm:$0xff]  ;;  %v2689_v47 = vsel %vm10843_vm15, %v8355_v10, %v8341_v11  ;;  %vm10848_vm15 = vmmov %vm10840_vm7 }
 0x42c   : > { %3851 = vmatpush1.bf16.msra.mxu0 %v2626_v43  ;;  %v8728_v34 = vpop.permute.xlu0 %2862  ;;  %v1916_v32 = vsel %vm695_vm14, %v10838_v51, %v1893_v37  ;;  %4076 = vmatprep.mubr.bf16.mxu1 %v6608_v58  ;;  %v2690_v37 = vsel %vm10840_vm7, %v8341_v11, %v8349_v49  ;;  %v2693_v58 = vsel %vm10844_vm11, %v8366_v46, %v8371_v39  ;;  %vm10849_vm11 = vmmov %vm10840_vm7 }
 0x42d   : > { %3852 = vmatprep.subr.bf16.mxu0 %v2687_v1  ;;  %2091 = vrot.lane.b32.xlu1 %v7209_v28, %s10554_s10  ;;  %v2692_v11 = vsel %vm10840_vm7, %v8379_v52, %v8366_v46  ;;  %vm10851_vm7 = vcmask 834560  }
 0x42e   : > { %5911 = vmatprep.subr.bf16.mxu1 %v1916_v32  ;;  %3022 = vrot.lane.b32.xlu0 %v7276_v13, %s10795_s20 }
 0x42f   : > { %v8745_v43 = vpop.permute.xlu1 %2864 }
 0x430   : > { %3853 = vmatpush1.bf16.msra.mxu0 %v2686_v38  ;;  %v1755_v51 = vpop.permute.xlu0 %1754  ;;  %v10845_v38 = vld [vmem:[#allocation60_spill] sm:$0xff] }
 0x431   : > { %v1778_v1 = vsel %vm1772_vm10, %v10841_v41, %v1755_v51  ;;  %3854 = vmatprep.subr.bf16.mxu0 %v2690_v37  ;;  %2237 = vrot.lane.b32.xlu1 %v7204_v22, %s10552_s15  ;;  %v10846_v37 = vld [vmem:[#allocation21_spill] sm:$0xff]  ;;  %v10847_v41 = vld [vmem:[#allocation71_spill] sm:$0xff] }
 0x432   : > { %3069 = vrot.lane.b32.xlu0 %v7207_v27, %s10842_s24  ;;  %5912 = vmatpush3.bf16.msra.mxu1 %v1778_v1  ;;  %v2696_v1 = vsel %vm10848_vm15, %v10847_v41, %v10846_v37  ;;  %v2695_v46 = vsel %vm10849_vm11, %v8407_v35, %v10847_v41  ;;  %vm10852_vm15 = vmmov %vm10851_vm7  ;;  %v10854_v41 = vld [vmem:[#allocation76_spill] sm:$0xff] }
 0x433   : > { %v8759_v9 = vpop.permute.xlu1 %2860  ;;  %vm10853_vm11 = vmmov %vm10851_vm7 }
 0x434   : > { %3855 = vmatpush1.bf16.msra.mxu0 %v2689_v47  ;;  %v1901_v32 = vpop.permute.xlu0 %1900  ;;  %v10850_v47 = vld [vmem:[#allocation58_spill] sm:$0xff] }
 0x435   : > { %3856 = vmatprep.subr.bf16.mxu0 %v2693_v58  ;;  %3071 = vrot.lane.b32.xlu1 %v7209_v28, %s10842_s24  ;;  %v1919_v27 = vsel %vm695_vm14, %v10845_v38, %v1901_v32  ;;  %v2756_v38 = vsel %vm10851_vm7, %v8418_v42, %v8429_v31 }
 0x436   : > { %2099 = vrot.lane.b32.xlu0 %v7204_v22, %s10554_s10  ;;  %5913 = vmatprep.subr.bf16.mxu1 %v1919_v27 }
 0x437   : > { %v8773_v10 = vpop.permute.xlu1 %2870 }
 0x438   : > { %3857 = vmatpush1.bf16.msra.mxu0 %v2692_v11  ;;  %v8775_v51 = vpop.permute.xlu0 %2872  ;;  %v2759_v11 = vsel %vm10853_vm11, %v8457_v62, %v8462_v33  ;;  %vm10857_vm11 = vmmov %vm10851_vm7 }
 0x439   : > { %3858 = vmatprep.subr.bf16.mxu0 %v2696_v1  ;;  %3067 = vrot.lane.b32.xlu1 %v7202_v21, %s10842_s24  ;;  %v2755_v21 = vsel %vm10852_vm15, %v8443_v53, %v8418_v42  ;;  %vm10855_vm15 = vmmov %vm10851_vm7 }
 0x43a   : > { %2245 = vrot.lane.b32.xlu0 %v7239_v5, %s10552_s15 }
 0x43b   : > { %v1763_v52 = vpop.permute.xlu1 %1762 }
 0x43c   : > { %3859 = vmatpush1.bf16.msra.mxu0 %v2695_v46  ;;  %v1781_v32 = vsel %vm1772_vm10, %v10850_v47, %v1763_v52  ;;  %v8789_v58 = vpop.permute.xlu0 %2868  ;;  %v2762_v46 = vsel %vm10855_vm15, %v8488_v6, %v8499_v15  ;;  %v10856_v52 = vld [vmem:[#allocation74_spill] sm:$0xff]  ;;  %vm10859_vm15 = vmmov %vm10851_vm7 }
 0x43d   : > { %3860 = vmatprep.subr.bf16.mxu0 %v2756_v38  ;;  %3077 = vrot.lane.b32.xlu1 %v7237_v4, %s10842_s24  ;;  %v2758_v4 = vsel %vm10851_vm7, %v8476_v29, %v8457_v62  ;;  %v10858_v38 = vld [vmem:[#allocation29_spill] sm:$0xff] }
 0x43e   : > { %5914 = vmatpush3.bf16.msra.mxu1 %v1781_v32  ;;  %3079 = vrot.lane.b32.xlu0 %v7204_v22, %s10842_s24  ;;  %v2765_v32 = vsel %vm10851_vm7, %v8527_v55, %v8532_v16 }
 0x43f   : > { %v1909_v35 = vpop.permute.xlu1 %1908 }
 0x440   : > { %3861 = vmatpush1.bf16.msra.mxu0 %v2755_v21  ;;  %v8801_v27 = vpop.permute.xlu0 %2878  ;;  %v1922_v1 = vsel %vm695_vm14, %v10854_v41, %v1909_v35  ;;  %v8848_v21 = vld [vmem:[%s10644_s4 + $0x20] ss:$52 sps:$4 sm:$0xff]  }
 0x441   : > { %3862 = vmatprep.subr.bf16.mxu0 %v2759_v11  ;;  %2107 = vrot.lane.b32.xlu1 %v7239_v5, %s10554_s10  ;;  %v8858_v41 = vld [vmem:[%s10644_s4 + $0x8c] ss:$52 sps:$4 sm:$0xff]  }
 0x442   : > { %5915 = vmatprep.subr.bf16.mxu1 %v1922_v1  ;;  %3075 = vrot.lane.b32.xlu0 %v7232_v60, %s10842_s24  ;;  %v2761_v60 = vsel %vm10857_vm11, %v8513_v17, %v8488_v6  ;;  %v2764_v6 = vsel %vm10859_vm15, %v8546_v24, %v8527_v55  ;;  %vm10860_vm11 = vcmask 670720   ;;  %v10862_v55 = vmov 0  }
 0x443   : > { %v8815_v42 = vpop.permute.xlu1 %2880  ;;  %v2825_v11 = vsel %vm10860_vm11, %v8558_v18, %v8569_v36  ;;  %vm10863_vm7 = vmmov %vm10860_vm11 }
 0x444   : > { %3863 = vmatpush1.bf16.msra.mxu0 %v2758_v4  ;;  %v1771_v53 = vpop.permute.xlu0 %1770  ;;  %v2824_v24 = vsel %vm10863_vm7, %v8583_v12, %v8558_v18  ;;  %v10864_v4 = vld [vmem:[#allocation26_spill] sm:$0xff]  ;;  %vm10865_vm15 = vmmov %vm10863_vm7 }
 0x445   : > { %v1784_v47 = vsel %vm1772_vm10, %v10856_v52, %v1771_v53  ;;  %3864 = vmatprep.subr.bf16.mxu0 %v2762_v46  ;;  %2253 = vrot.lane.b32.xlu1 %v7234_v61, %s10552_s15  ;;  %vm10866_vm11 = vmmov %vm10863_vm7  ;;  %v8886_v52 = vld [vmem:[%s10644_s4 + $0x88] ss:$52 sps:$4 sm:$0xff]   ;;  %s10873_s15 = smov 127  }
 0x446   : > { %3085 = vrot.lane.b32.xlu0 %v7259_v26, %s10842_s24  ;;  %5916 = vmatpush3.bf16.msra.mxu1 %v1784_v47  ;;  %v2827_v18 = vsel %vm10866_vm11, %v8630_v23, %v8608_v0  ;;  %vm10869_vm11 = vmmov %vm10863_vm7 }
 0x447   : > { %v8829_v62 = vpop.permute.xlu1 %2876 }
 0x448   : > { %3865 = vmatpush1.bf16.msra.mxu0 %v2761_v60  ;;  %v1954_v29 = vpop.permute.xlu0 %1953  ;;  %v10867_v60 = vld [vmem:[#allocation45_spill] sm:$0xff] }
 0x449   : > { %3866 = vmatprep.subr.bf16.mxu0 %v2765_v32  ;;  %3087 = vrot.lane.b32.xlu1 %v7239_v5, %s10842_s24  ;;  %v1982_v26 = vsel %vm10558_vm6, %v10858_v38, %v1954_v29 }
 0x44a   : > { %2115 = vrot.lane.b32.xlu0 %v7234_v61, %s10554_s10  ;;  %5917 = vmatprep.subr.bf16.mxu1 %v1982_v26  ;;  %s10861_s10 = smov 126   ;;  %v2834_v26 = vsel %vm10869_vm11, %v8691_v7, %v8696_v25 }
 0x44b   : > { %v8843_v17 = vpop.permute.xlu1 %2886 }
 0x44c   : > { %3867 = vmatpush1.bf16.msra.mxu0 %v2764_v6  ;;  %v8850_v35 = vpop.permute.xlu0 %2888 }
 0x44d   : > { %3889 = vmatprep.subr.bf16.mxu0 %v2825_v11  ;;  %3083 = vrot.lane.b32.xlu1 %v7256_v40, %s10842_s24  ;;  %v2828_v40 = vsel %vm10865_vm15, %v8608_v0, %v8610_v54  ;;  %v8898_v0 = vld [vmem:[%s10644_s4 + $0x2c] ss:$52 sps:$4 sm:$0xff]   ;;  %vm10868_vm15 = vmmov %vm10863_vm7 }
 0x44e   : > { %2383 = vrot.lane.b32.xlu0 %v10862_v55, %s10861_s10  ;;  %v2830_v23 = vsel %vm10868_vm15, %v8677_v44, %v8648_v14  ;;  %vm10871_vm15 = vcmask 662528  }
 0x44f   : > { %3869 = vmatmul.mubr.bf16.vlgmr.msra.gmra.mrb[16].mxu0 %v8848_v21  ;;  %v1816_v1 = vpop.permute.xlu1 %1815  ;;  %vm10874_vm11 = vmmov %vm10871_vm15 }
 0x450   : > { %3890 = vmatpush1.bf16.msra.mxu0 %v2824_v24  ;;  %v1844_v53 = vsel %vm686_vm1, %v10864_v4, %v1816_v1  ;;  %v8870_v46 = vpop.permute.xlu0 %2884  ;;  %3878 = vmatprep.mubr.bf16.mxu0 %v8858_v41  ;;  %v2894_v24 = vsel %vm10871_vm15, %v8728_v34, %v8745_v43  ;;  %v10872_v1 = vld [vmem:[#allocation62_spill] sm:$0xff] }
 0x451   : > { %3891 = vmatprep.subr.bf16.mxu0 %v2828_v40  ;;  %3093 = vrot.lane.b32.xlu1 %v7278_v45, %s10842_s24  ;;  %v2831_v45 = vsel %vm10863_vm7, %v8648_v14, %v8663_v59  ;;  %v2833_v14 = vsel %vm10863_vm7, %v8713_v63, %v8691_v7  ;;  %v2893_v63 = vsel %vm10874_vm11, %v8759_v9, %v8728_v34  ;;  %vm10875_vm7 = vmmov %vm10874_vm11  ;;  %v10877_v9 = vld [vmem:[#allocation59_spill] sm:$0xff] }
 0x452   : > { %5918 = vmatpush3.bf16.msra.mxu1 %v1844_v53  ;;  %3095 = vrot.lane.b32.xlu0 %v7234_v61, %s10842_s24  ;;  %v2897_v40 = vsel %vm10875_vm7, %v8773_v10, %v8775_v51  ;;  %vm10876_vm15 = vmmov %vm10875_vm7 }
 0x453   : > { %v1962_v12 = vpop.permute.xlu1 %1961  ;;  %vm10878_vm11 = vmmov %vm10875_vm7 }
 0x454   : > { %3892 = vmatpush1.bf16.msra.mxu0 %v2827_v18  ;;  %v8888_v47 = vpop.permute.xlu0 %2931  ;;  %v1985_v29 = vsel %vm10558_vm6, %v10867_v60, %v1962_v12  ;;  %v2896_v18 = vsel %vm10876_vm15, %v8789_v58, %v8773_v10  ;;  %v2900_v60 = vsel %vm10878_vm11, %v8801_v27, %v8815_v42  ;;  %v2899_v10 = vsel %vm10875_vm7, %v8829_v62, %v8801_v27  ;;  %vm10879_vm15 = vmmov %vm10875_vm7 }
 0x455   : > { %3893 = vmatprep.subr.bf16.mxu0 %v2831_v45  ;;  %3091 = vrot.lane.b32.xlu1 %v7276_v13, %s10842_s24  ;;  %v10870_v13 = vld [vmem:[#allocation42_spill] sm:$0xff]  ;;  %vm10881_vm11 = vmmov %vm10875_vm7  ;;  %vm10882_vm7 = vcmask 654336  }
 0x456   : > { %5919 = vmatprep.subr.bf16.mxu1 %v1985_v29  ;;  %2391 = vrot.lane.b32.xlu0 %v10862_v55, %s10861_s10  ;;  %v2902_v27 = vsel %vm10881_vm11, %v8870_v46, %v8843_v17  ;;  %vm10885_vm11 = vmmov %vm10882_vm7 }
 0x457   : > { %v8907_v32 = vpop.permute.xlu1 %2933  ;;  %3879 = vmatmul.mubr.bf16.gmra.mrb[20].mxu0 %v8886_v52 }
 0x458   : > { %3894 = vmatpush1.bf16.msra.mxu0 %v2830_v23  ;;  %v1824_v38 = vpop.permute.xlu0 %1823  ;;  %3921 = vmatprep.mubr.bf16.mxu0 %v8898_v0  ;;  %v2903_v23 = vsel %vm10879_vm15, %v8843_v17, %v8850_v35  ;;  %vm10884_vm15 = vmmov %vm10882_vm7 }
 0x459   : > { %v1847_v6 = vsel %vm686_vm1, %v10870_v13, %v1824_v38  ;;  %3895 = vmatprep.subr.bf16.mxu0 %v2834_v26  ;;  %2399 = vrot.lane.b32.xlu1 %v10862_v55, %s10861_s10  ;;  %v10880_v38 = vld [vmem:[#allocation77_spill] sm:$0xff] }
 0x45a   : > { %2407 = vrot.lane.b32.xlu0 %v10862_v55, %s10861_s10  ;;  %5920 = vmatpush3.bf16.msra.mxu1 %v1847_v6  ;;  %v2963_v6 = vsel %vm10882_vm7, %v8888_v47, %v8907_v32 }
 0x45b   : > { %v2930_v44 = vpop.permute.xlu1 %2929 }
 0x45c   : > { %3896 = vmatpush1.bf16.msra.mxu0 %v2833_v14  ;;  %v1970_v11 = vpop.permute.xlu0 %1969  ;;  %v10883_v14 = vld [vmem:[#allocation75_spill] sm:$0xff]  ;;  %v2962_v17 = vsel %vm10884_vm15, %v2930_v44, %v8888_v47  ;;  %vm10887_vm15 = vmmov %vm10882_vm7 }
 0x45d   : > { %3897 = vmatprep.subr.bf16.mxu0 %v2894_v24  ;;  %2452 = vrot.lane.b32.xlu1 %v10862_v55, %s10666_s9  ;;  %v1988_v4 = vsel %vm10558_vm6, %v10872_v1, %v1970_v11 }
 0x45e   : > { %2314 = vrot.lane.b32.xlu0 %v10862_v55, %s10873_s15  ;;  %5921 = vmatprep.subr.bf16.mxu1 %v1988_v4  ;;  %v10886_v4 = vld [vmem:[#allocation35_spill] sm:$0xff] }
 0x45f   : > { %v2940_v7 = vpop.permute.xlu1 %2939 }
 0x460   : > { %3898 = vmatpush1.bf16.msra.mxu0 %v2893_v63  ;;  %v8935_v53 = vpop.permute.xlu0 %2941 }
 0x461   : > { %3899 = vmatprep.subr.bf16.mxu0 %v2897_v40  ;;  %2460 = vrot.lane.b32.xlu1 %v10862_v55, %s10666_s9  ;;  %v2966_v1 = vsel %vm10885_vm11, %v2940_v7, %v8935_v53  ;;  %v6609_v40 = vld [vmem:[%s10644_s4 + $0x8] ss:$52 sps:$4 sm:$0xff]   ;;  %vm10888_vm11 = vmmov %vm10882_vm7 }
 0x462   : > { %2322 = vrot.lane.b32.xlu0 %v10862_v55, %s10873_s15 }
 0x463   : > { %v1832_v34 = vpop.permute.xlu1 %1831 }
 0x464   : > { %3900 = vmatpush1.bf16.msra.mxu0 %v2896_v18  ;;  %v1850_v12 = vsel %vm686_vm1, %v10877_v9, %v1832_v34  ;;  %v2938_v45 = vpop.permute.xlu0 %2937  ;;  %v6610_v18 = vld [vmem:[%s10644_s4 + $0x74] ss:$52 sps:$4 sm:$0xff]  }
 0x465   : > { %3901 = vmatprep.subr.bf16.mxu0 %v2900_v60  ;;  %2468 = vrot.lane.b32.xlu1 %v10862_v55, %s10666_s9  ;;  %v2965_v47 = vsel %vm10882_vm7, %v2938_v45, %v2940_v7  ;;  %v10889_v45 = vld [vmem:[#allocation31_spill] sm:$0xff] }
 0x466   : > { %5922 = vmatpush3.bf16.msra.mxu1 %v1850_v12  ;;  %2330 = vrot.lane.b32.xlu0 %v10862_v55, %s10873_s15 }
 0x467   : > { %v1978_v58 = vpop.permute.xlu1 %1977 }
 0x468   : > { %3902 = vmatpush1.bf16.msra.mxu0 %v2899_v10  ;;  %v2948_v29 = vpop.permute.xlu0 %2947  ;;  %v1991_v26 = vsel %vm10558_vm6, %v10880_v38, %v1978_v58  ;;  %vm10890_vm6 = vmmov %vm10882_vm7  ;;  %v6611_v38 = vld [vmem:[%s10644_s4 + $0x70] ss:$52 sps:$4 sm:$0xff]  }
 0x469   : > { %3903 = vmatprep.subr.bf16.mxu0 %v2903_v23  ;;  %2476 = vrot.lane.b32.xlu1 %v10862_v55, %s10666_s9 }
 0x46a   : > { %5923 = vmatprep.subr.bf16.mxu1 %v1991_v26  ;;  %2338 = vrot.lane.b32.xlu0 %v10862_v55, %s10873_s15  ;;  %v6612_v26 = vld [vmem:[%s10644_s4 + $0x14] ss:$52 sps:$4 sm:$0xff]  }
 0x46b   : > { %v8971_v62 = vpop.permute.xlu1 %2949 }
 0x46c   : > { %3904 = vmatpush1.bf16.msra.mxu0 %v2902_v27  ;;  %v1840_v13 = vpop.permute.xlu0 %1839  ;;  %v2969_v9 = vsel %vm10887_vm15, %v2948_v29, %v8971_v62 }
 0x46d   : > { %v1853_v11 = vsel %vm686_vm1, %v10883_v14, %v1840_v13  ;;  %3905 = vmatprep.subr.bf16.mxu0 %v2963_v6  ;;  %2659 = vrot.lane.b32.xlu1 %v10862_v55, %s10688_s14  ;;  %v10891_v13 = vld [vmem:[#allocation51_spill] sm:$0xff] }
 0x46e   : > { %2521 = vrot.lane.b32.xlu0 %v10862_v55, %s10676_s25  ;;  %5924 = vmatpush3.bf16.msra.mxu1 %v1853_v11 }
 0x46f   : > { %v2946_v46 = vpop.permute.xlu1 %2945 }
 0x470   : > { %3906 = vmatpush1.bf16.msra.mxu0 %v2962_v17  ;;  %v2161_v24 = vpop.permute.xlu0 %2160  ;;  %v2968_v7 = vsel %vm10888_vm11, %v2946_v46, %v2948_v29  ;;  %v10893_v46 = vld [vmem:[#allocation47_spill] sm:$0xff] }
 0x471   : > { %3907 = vmatprep.subr.bf16.mxu0 %v2966_v1  ;;  %2667 = vrot.lane.b32.xlu1 %v10862_v55, %s10688_s14  ;;  %v2189_v63 = vsel %vm767_vm3, %v10886_v4, %v2161_v24 }
 0x472   : > { %4077 = vmatmul.mubr.bf16.vlgmr.msra.gmra.mrb[16].mxu1 %v6609_v40  ;;  %2529 = vrot.lane.b32.xlu0 %v10862_v55, %s10676_s25  ;;  %v10895_v40 = vld [vmem:[#allocation68_spill] sm:$0xff] }
 0x473   : > { %5937 = vmatprep.subr.bf16.mxu1 %v2189_v63  ;;  %v2956_v44 = vpop.permute.xlu1 %2955  ;;  %4084 = vmatprep.mubr.bf16.mxu1 %v6610_v18 }
 0x474   : > { %3908 = vmatpush1.bf16.msra.mxu0 %v2965_v47  ;;  %v8999_v34 = vpop.permute.xlu0 %2957 }
 0x475   : > { %3909 = vmatprep.subr.bf16.mxu0 %v2969_v9  ;;  %2675 = vrot.lane.b32.xlu1 %v10862_v55, %s10688_s14  ;;  %v2972_v58 = vsel %vm10882_vm7, %v2956_v44, %v8999_v34 }
 0x476   : > { %2537 = vrot.lane.b32.xlu0 %v10862_v55, %s10676_s25 }
 0x477   : > { %v2023_v12 = vpop.permute.xlu1 %2022 }
 0x478   : > { %3910 = vmatpush1.bf16.msra.mxu0 %v2968_v7  ;;  %v2051_v60 = vsel %vm2048_vm9, %v10889_v45, %v2023_v12  ;;  %v2954_v10 = vpop.permute.xlu0 %2953  ;;  %v10897_v12 = vld [vmem:[#allocation64_spill] sm:$0xff] }
 0x479   : > { %v2971_v23 = vsel %vm10890_vm6, %v2954_v10, %v2956_v44  ;;  %3911 = vmatprep.subr.bf16.mxu0 %v2972_v58  ;;  %2683 = vrot.lane.b32.xlu1 %v10862_v55, %s10688_s14  ;;  %vm10892_vm6 = vcmask 646144  }
 0x47a   : > { %4085 = vmatmul.mubr.bf16.gmra.mrb[20].mxu1 %v6611_v38  ;;  %2545 = vrot.lane.b32.xlu0 %v10862_v55, %s10676_s25  ;;  %vm10894_vm15 = vmmov %vm10892_vm6  ;;  %v10899_v38 = vld [vmem:[#allocation80_spill] sm:$0xff] }
 0x47b   : > { %5938 = vmatpush3.bf16.msra.mxu1 %v2051_v60  ;;  %v2169_v29 = vpop.permute.xlu1 %2168  ;;  %4125 = vmatprep.mubr.bf16.mxu1 %v6612_v26  ;;  %vm10896_vm11 = vmmov %vm10892_vm6 }
 0x47c   : > { %3912 = vmatpush1.bf16.msra.mxu0 %v2971_v23  ;;  %v3001_v27 = vpop.permute.xlu0 %3000  ;;  %v2192_v6 = vsel %vm767_vm3, %v10891_v13, %v2169_v29  ;;  %vm10898_vm7 = vmmov %vm10892_vm6 }
 0x47d   : > { %2728 = vrot.lane.b32.xlu1 %v10862_v55, %s10690_s12  ;;  %5939 = vmatprep.subr.bf16.mxu1 %v2192_v6  ;;  %v10900_v6 = vld [vmem:[#allocation78_spill] sm:$0xff] }
 0x47e   : > { %2590 = vrot.lane.b32.xlu0 %v10862_v55, %s10682_s19 }
 0x47f   : > { %v9029_v14 = vpop.permute.xlu1 %3002 }
 0x480   : > { %v2031_v11 = vpop.permute.xlu0 %2030  ;;  %v3032_v17 = vsel %vm10892_vm6, %v3001_v27, %v9029_v14 }
 0x481   : > { %v2054_v24 = vsel %vm2048_vm9, %v10893_v46, %v2031_v11  ;;  %2736 = vrot.lane.b32.xlu1 %v10862_v55, %s10690_s12  ;;  %3913 = vmatprep.subr.bf16.mxu0 %v3032_v17 }
 0x482   : > { %2598 = vrot.lane.b32.xlu0 %v10862_v55, %s10682_s19  ;;  %5940 = vmatpush3.bf16.msra.mxu1 %v2054_v24 }
 0x483   : > { %v2999_v1 = vpop.permute.xlu1 %2998 }
 0x484   : > { %v3031_v4 = vsel %vm10894_vm15, %v2999_v1, %v3001_v27  ;;  %v2177_v63 = vpop.permute.xlu0 %2176  ;;  %vm10901_vm15 = vmmov %vm10892_vm6  ;;  %v10902_v1 = vld [vmem:[#allocation37_spill] sm:$0xff] }
 0x485   : > { %2744 = vrot.lane.b32.xlu1 %v10862_v55, %s10690_s12  ;;  %3914 = vmatpush1.bf16.msra.mxu0 %v3031_v4  ;;  %v2195_v47 = vsel %vm767_vm3, %v10895_v40, %v2177_v63 }
 0x486   : > { %2606 = vrot.lane.b32.xlu0 %v10862_v55, %s10682_s19  ;;  %5941 = vmatprep.subr.bf16.mxu1 %v2195_v47 }
 0x487   : > { %v3009_v44 = vpop.permute.xlu1 %3008 }
 0x488   : > { %v9046_v18 = vpop.permute.xlu0 %3010 }
 0x489   : > { %2752 = vrot.lane.b32.xlu1 %v10862_v55, %s10690_s12  ;;  %v3035_v9 = vsel %vm10896_vm11, %v3009_v44, %v9046_v18  ;;  %vm10903_vm11 = vmmov %vm10892_vm6 }
 0x48a   : > { %2614 = vrot.lane.b32.xlu0 %v10862_v55, %s10682_s19  ;;  %3915 = vmatprep.subr.bf16.mxu0 %v3035_v9  ;;  %v10904_v9 = vld [vmem:[#allocation33_spill] sm:$0xff] }
 0x48b   : > { %v2039_v7 = vpop.permute.xlu1 %2038 }
 0x48c   : > { %v2057_v45 = vsel %vm2048_vm9, %v10897_v12, %v2039_v7  ;;  %v3007_v60 = vpop.permute.xlu0 %3006 }
 0x48d   : > { %v3034_v10 = vsel %vm10898_vm7, %v3007_v60, %v3009_v44  ;;  %2935 = vrot.lane.b32.xlu1 %v10862_v55, %s10773_s21  ;;  %5942 = vmatpush3.bf16.msra.mxu1 %v2057_v45  ;;  %vm10905_vm7 = vmmov %vm10892_vm6  ;;  %v9102_v60 = vld [vmem:[%s10644_s4 + $0x28] ss:$52 sps:$4 sm:$0xff]  }
 0x48e   : > { %2797 = vrot.lane.b32.xlu0 %v10862_v55, %s10720_s16  ;;  %3916 = vmatpush1.bf16.msra.mxu0 %v3034_v10 }
 0x48f   : > { %v2185_v58 = vpop.permute.xlu1 %2184 }
 0x490   : > { %v3017_v23 = vpop.permute.xlu0 %3016  ;;  %v2198_v29 = vsel %vm767_vm3, %v10899_v38, %v2185_v58  ;;  %v9107_v58 = vld [vmem:[%s10644_s4 + $0x94] ss:$52 sps:$4 sm:$0xff]   ;;  %v10906_v38 = vld [vmem:[#allocation53_spill] sm:$0xff] }
 0x491   : > { %2943 = vrot.lane.b32.xlu1 %v10862_v55, %s10773_s21  ;;  %5943 = vmatprep.subr.bf16.mxu1 %v2198_v29 }
 0x492   : > { %2805 = vrot.lane.b32.xlu0 %v10862_v55, %s10720_s16 }
 0x493   : > { %v9067_v26 = vpop.permute.xlu1 %3018 }
 0x494   : > { %v2047_v27 = vpop.permute.xlu0 %2046  ;;  %v3038_v13 = vsel %vm10892_vm6, %v3017_v23, %v9067_v26  ;;  %vm10907_vm6 = vcmask 637952  }
 0x495   : > { %v2060_v11 = vsel %vm2048_vm9, %v10900_v6, %v2047_v27  ;;  %2951 = vrot.lane.b32.xlu1 %v10862_v55, %s10773_s21  ;;  %3917 = vmatprep.subr.bf16.mxu0 %v3038_v13 }
 0x496   : > { %2813 = vrot.lane.b32.xlu0 %v10862_v55, %s10720_s16  ;;  %5944 = vmatpush3.bf16.msra.mxu1 %v2060_v11  ;;  %v10908_v11 = vld [vmem:[#allocation49_spill] sm:$0xff] }
 0x497   : > { %v3015_v17 = vpop.permute.xlu1 %3014 }
 0x498   : > { %v3037_v46 = vsel %vm10901_vm15, %v3015_v17, %v3017_v23  ;;  %v2230_v24 = vpop.permute.xlu0 %2229  ;;  %vm10909_vm15 = vmmov %vm10907_vm6 }
 0x499   : > { %2959 = vrot.lane.b32.xlu1 %v10862_v55, %s10773_s21  ;;  %3918 = vmatpush1.bf16.msra.mxu0 %v3037_v46  ;;  %v2258_v4 = vsel %vm776_vm12, %v10902_v1, %v2230_v24  ;;  %v9130_v24 = vld [vmem:[%s10644_s4 + $0x90] ss:$52 sps:$4 sm:$0xff]  }
 0x49a   : > { %2821 = vrot.lane.b32.xlu0 %v10862_v55, %s10720_s16  ;;  %5945 = vmatprep.subr.bf16.mxu1 %v2258_v4 }
 0x49b   : > { %v3025_v63 = vpop.permute.xlu1 %3024 }
 0x49c   : > { %v9084_v40 = vpop.permute.xlu0 %3026 }
 0x49d   : > { %3004 = vrot.lane.b32.xlu1 %v10862_v55, %s10795_s20  ;;  %v3041_v47 = vsel %vm10903_vm11, %v3025_v63, %v9084_v40  ;;  %vm10911_vm11 = vmmov %vm10907_vm6 }
 0x49e   : > { %2866 = vrot.lane.b32.xlu0 %v10862_v55, %s10756_s13  ;;  %3919 = vmatprep.subr.bf16.mxu0 %v3041_v47 }
 0x49f   : > { %v2092_v44 = vpop.permute.xlu1 %2091 }
 0x4a0   : > { %v2120_v7 = vsel %vm2117_vm5, %v10904_v9, %v2092_v44  ;;  %v3023_v12 = vpop.permute.xlu0 %3022 }
 0x4a1   : > { %v3040_v45 = vsel %vm10905_vm7, %v3023_v12, %v3025_v63  ;;  %3012 = vrot.lane.b32.xlu1 %v10862_v55, %s10795_s20  ;;  %5946 = vmatpush3.bf16.msra.mxu1 %v2120_v7  ;;  %v10910_v63 = vld [vmem:[#allocation70_spill] sm:$0xff]  ;;  %v3464_v12 = vld [vmem:[%s10912_s5] sm:$0xff]  ;;  %vm10914_vm7 = vmmov %vm10907_vm6 }
 0x4a2   : > { %2874 = vrot.lane.b32.xlu0 %v10862_v55, %s10756_s13  ;;  %3920 = vmatpush1.bf16.msra.mxu0 %v3040_v45 }
 0x4a3   : > { %v2238_v10 = vpop.permute.xlu1 %2237 }
 0x4a4   : > { %v3070_v23 = vpop.permute.xlu0 %3069  ;;  %v2261_v29 = vsel %vm776_vm12, %v10906_v38, %v2238_v10  ;;  %v3465_v10 = vld [vmem:[%s10912_s5 + $0x8] sm:$0xff] }
 0x4a5   : > { %3020 = vrot.lane.b32.xlu1 %v10862_v55, %s10795_s20  ;;  %5947 = vmatprep.subr.bf16.mxu1 %v2261_v29 }
 0x4a6   : > { %2882 = vrot.lane.b32.xlu0 %v10862_v55, %s10756_s13  ;;  %3922 = vmatmul.mubr.bf16.vlgmr.msra.gmra.mrb[16].mxu0 %v9102_v60 }
 0x4a7   : > { %v9116_v27 = vpop.permute.xlu1 %3071  ;;  %3931 = vmatprep.mubr.bf16.mxu0 %v9107_v58 }
 0x4a8   : > { %v2100_v13 = vpop.permute.xlu0 %2099  ;;  %v3101_v6 = vsel %vm10907_vm6, %v3070_v23, %v9116_v27 }
 0x4a9   : > { %v2123_v17 = vsel %vm2117_vm5, %v10908_v11, %v2100_v13  ;;  %3028 = vrot.lane.b32.xlu1 %v10862_v55, %s10795_s20  ;;  %3942 = vmatprep.subr.bf16.mxu0 %v3101_v6  ;;  %v3466_v6 = vld [vmem:[%s10912_s5 + $0x10] sm:$0xff] }
 0x4aa   : > { %2890 = vrot.lane.b32.xlu0 %v10862_v55, %s10756_s13  ;;  %5948 = vmatpush3.bf16.msra.mxu1 %v2123_v17  ;;  %v3467_v17 = vld [vmem:[%s10912_s5 + $0x18] sm:$0xff] }
 0x4ab   : > { %v3068_v46 = vpop.permute.xlu1 %3067 }
 0x4ac   : > { %v3100_v1 = vsel %vm10909_vm15, %v3068_v46, %v3070_v23  ;;  %v2246_v4 = vpop.permute.xlu0 %2245  ;;  %v10913_v23 = vld [vmem:[#allocation66_spill] sm:$0xff]  ;;  %vm10917_vm15 = vmmov %vm10907_vm6 }
 0x4ad   : > { %3073 = vrot.lane.b32.xlu1 %v10862_v55, %s10842_s24  ;;  %3943 = vmatpush1.bf16.msra.mxu0 %v3100_v1  ;;  %v2264_v47 = vsel %vm776_vm12, %v10910_v63, %v2246_v4  ;;  %v10915_v1 = vld [vmem:[#allocation81_spill] sm:$0xff] }
 0x4ae   : > { %3081 = vrot.lane.b32.xlu0 %v10862_v55, %s10842_s24  ;;  %5949 = vmatprep.subr.bf16.mxu1 %v2264_v47 }
 0x4af   : > { %v3078_v44 = vpop.permute.xlu1 %3077  ;;  %3932 = vmatmul.mubr.bf16.gmra.mrb[20].mxu0 %v9130_v24 }
 0x4b0   : > { %v9140_v9 = vpop.permute.xlu0 %3079  ;;  %3974 = vmatprep.mubr.bf16.mxu0 %v10862_v55 }
 0x4b1   : > { %3089 = vrot.lane.b32.xlu1 %v10862_v55, %s10842_s24  ;;  %v3104_v7 = vsel %vm10911_vm11, %v3078_v44, %v9140_v9  ;;  %vm10918_vm11 = vmmov %vm10907_vm6 }
 0x4b2   : > { %3097 = vrot.lane.b32.xlu0 %v10862_v55, %s10842_s24  ;;  %3944 = vmatprep.subr.bf16.mxu0 %v3104_v7  ;;  %v10916_v7 = vld [vmem:[#allocation79_spill] sm:$0xff] }
 0x4b3   : > { %v2108_v45 = vpop.permute.xlu1 %2107 }
 0x4b4   : > { %v2126_v38 = vsel %vm2117_vm5, %v10913_v23, %v2108_v45  ;;  %v3076_v29 = vpop.permute.xlu0 %3075 }
 0x4b5   : > { %v3103_v13 = vsel %vm10914_vm7, %v3076_v29, %v3078_v44  ;;  %3470 = vperm.xlu1 %6330, %v3464_v12   ;;  %5950 = vmatpush3.bf16.msra.mxu1 %v2126_v38  ;;  %v6613_v38 = vld [vmem:[%s10644_s4 + $0x10] ss:$52 sps:$4 sm:$0xff]   ;;  %vm10919_vm7 = vmmov %vm10907_vm6 }
 0x4b6   : > { %3475 = vperm.xlu0 %6329, %v3465_v10   ;;  %3945 = vmatpush1.bf16.msra.mxu0 %v3103_v13  ;;  %v6614_v13 = vld [vmem:[%s10644_s4 + $0x7c] ss:$52 sps:$4 sm:$0xff]  }
 0x4b7   : > { %v2254_v11 = vpop.permute.xlu1 %2253 }
 0x4b8   : > { %v3086_v46 = vpop.permute.xlu0 %3085  ;;  %v2267_v4 = vsel %vm776_vm12, %v10915_v1, %v2254_v11 }
 0x4b9   : > { %3480 = vperm.xlu1 %6330, %v3466_v6   ;;  %5951 = vmatprep.subr.bf16.mxu1 %v2267_v4 }
 0x4ba   : > { %3485 = vperm.xlu0 %6329, %v3467_v17  }
 0x4bb   : > { %v9166_v63 = vpop.permute.xlu1 %3087 }
 0x4bc   : > { %v2116_v47 = vpop.permute.xlu0 %2115  ;;  %v3107_v44 = vsel %vm10907_vm6, %v3086_v46, %v9166_v63  ;;  %vm10920_vm6 = vcmask 523264  }
 0x4bd   : > { %v2129_v12 = vsel %vm2117_vm5, %v10916_v7, %v2116_v47  ;;  %3946 = vmatprep.subr.bf16.mxu0 %v3107_v44  ;;  %v6616_v44 = vld [vmem:[%s10644_s4 + $0x1c] ss:$52 sps:$4 sm:$0xff]   ;;  %6452 = vrot.lane.b32.xlu1 %v10862_v55, %s10923_s17 }
 0x4be   : > { %5952 = vmatpush3.bf16.msra.mxu1 %v2129_v12  ;;  %6457 = vrot.lane.b32.xlu0 %v10862_v55, %s10975_s22 }
 0x4bf   : > { %v3084_v45 = vpop.permute.xlu1 %3083 }
 0x4c0   : > { %v3106_v10 = vsel %vm10917_vm15, %v3084_v45, %v3086_v46  ;;  %v2384_v23 = vpop.permute.xlu0 %2383  ;;  %vm10921_vm15 = vcmask 867328  }
 0x4c1   : > { %3947 = vmatpush1.bf16.msra.mxu0 %v3106_v10  ;;  %4126 = vmatmul.mubr.bf16.vlgmr.msra.gmra.mrb[24].mxu1 %v6613_v38  ;;  %v2412_v29 = vsel %vm326_vm4, %v7979_v19, %v2384_v23  ;;  %v9190_v19 = vld [vmem:[%s10644_s4 + $0x30] ss:$52 sps:$4 sm:$0xff]  }
 0x4c2   : > { %5965 = vmatprep.subr.bf16.mxu1 %v2412_v29  ;;  %4133 = vmatprep.mubr.bf16.mxu1 %v6614_v13 }
 0x4c3   : > { %5966 = vmatpush3.bf16.msra.mxu1 %v7209_v28  ;;  %v3094_v6 = vpop.permute.xlu1 %3093  ;;  %v6615_v28 = vld [vmem:[%s10644_s4 + $0x78] ss:$52 sps:$4 sm:$0xff]   ;;  %6462 = vrot.lane.b32.xlu1 %v10862_v55, %s10963_s23 }
 0x4c4   : > { %v9182_v11 = vpop.permute.xlu0 %3095  ;;  %6467 = vrot.lane.b32.xlu0 %v10862_v55, %s10976_s18 }
 0x4c5   : > { %v3110_v17 = vsel %vm10918_vm11, %v3094_v6, %v9182_v11  ;;  %vm10922_vm11 = vmmov %vm10920_vm6 }
 0x4c6   : > { %3948 = vmatprep.subr.bf16.mxu0 %v3110_v17 }
 0x4c7   : > { %v3092_v46 = vpop.permute.xlu1 %3091  ;;  %6472 = vrot.lane.b32.xlu1 %v10862_v55, %s10565_s29  ;;  %s10978_s29 = smov 24  }
 0x4c8   : > { %v3109_v1 = vsel %vm10919_vm7, %v3092_v46, %v3094_v6  ;;  %v2392_v4 = vpop.permute.xlu0 %2391  ;;  %vm10925_vm7 = vmmov %vm10921_vm15 }
 0x4c9   : > { %3949 = vmatpush1.bf16.msra.mxu0 %v3109_v1  ;;  %4134 = vmatmul.mubr.bf16.gmra.mrb[28].mxu1 %v6615_v28  ;;  %v2415_v47 = vsel %vm326_vm4, %v8001_v20, %v2392_v4 }
 0x4ca   : > { %5967 = vmatprep.subr.bf16.mxu1 %v2415_v47  ;;  %4174 = vmatprep.mubr.bf16.mxu1 %v6616_v44  ;;  %v10927_v47 = vld [vmem:[#allocation13_spill] sm:$0xff] }
 0x4cb   : > { %5968 = vmatpush3.bf16.msra.mxu1 %v7204_v22  ;;  %v2400_v7 = vpop.permute.xlu1 %2399  ;;  %v9212_v22 = vld [vmem:[%s10644_s4 + $0x98] ss:$52 sps:$4 sm:$0xff]   ;;  %6482 = vrot.lane.b32.xlu1 %v10862_v55, %s10563_s30  ;;  %s10977_s30 = smov 26  }
 0x4cc   : > { %v2408_v12 = vpop.permute.xlu0 %2407  ;;  %5856 = vmatmul.mubr.msk.bf16.vlgmr.msra.gmra.mrb[16].mxu0 %vm10920_vm6, %v9190_v19  ;;  %v2418_v45 = vsel %vm326_vm4, %v8021_v3, %v2400_v7  ;;  %vm10926_vm6 = vmmov %vm10925_vm7  ;;  %v10929_v7 = vld [vmem:[#allocation83_spill] sm:$0xff]  ;;  %6477 = vrot.lane.b32.xlu0 %v10862_v55, %s10977_s30 }
 0x4cd   : > { %5969 = vmatprep.subr.bf16.mxu1 %v2418_v45  ;;  %3984 = vmatprep.mubr.bf16.mxu0 %v10862_v55  ;;  %v2421_v10 = vsel %vm326_vm4, %v8043_v56, %v2408_v12 }
 0x4cf   : > { %5970 = vmatpush3.bf16.msra.mxu1 %v7239_v5  ;;  %v2453_v20 = vpop.permute.xlu1 %2452  ;;  %v10924_v5 = vld [vmem:[#allocation82_spill] sm:$0xff]  ;;  %6492 = vrot.lane.b32.xlu1 %v10862_v55, %s10968_s11 }
 0x4d0   : > { %v2315_v23 = vpop.permute.xlu0 %2314  ;;  %5971 = vmatprep.subr.bf16.mxu1 %v2421_v10  ;;  %v2481_v3 = vsel %vm10921_vm15, %v8063_v57, %v2453_v20  ;;  %vm10928_vm15 = vmmov %vm10926_vm6  ;;  %v10931_v20 = vld [vmem:[#allocation48_spill] sm:$0xff]  ;;  %v10933_v10 = vld [vmem:[#allocation22_spill] sm:$0xff]  ;;  %6487 = vrot.lane.b32.xlu0 %v10862_v55, %s10978_s29 }
 0x4d1   : > { %v2343_v56 = vsel %vm317_vm2, %v10924_v5, %v2315_v23  ;;  %v10936_v5 = vld [vmem:[#allocation65_spill] sm:$0xff] }
 0x4d3   : > { %5972 = vmatpush3.bf16.msra.mxu1 %v7234_v61  ;;  %v2461_v38 = vpop.permute.xlu1 %2460  ;;  %6502 = vrot.lane.b32.xlu1 %v10862_v55, %s10970_s26 }
 0x4d4   : > { %v2323_v29 = vpop.permute.xlu0 %2322  ;;  %5857 = vmatmul.mubr.msk.bf16.gmra.mrb[20].mxu0 %vm10922_vm11, %v9212_v22  ;;  %5973 = vmatprep.subr.bf16.mxu1 %v2481_v3  ;;  %v2484_v61 = vsel %vm10925_vm7, %v10779_v48, %v2461_v38  ;;  %vm10930_vm11 = vcmask 842752   ;;  %vm10932_vm7 = vcmask 859136   ;;  %v10935_v3 = vld [vmem:[#allocation38_spill] sm:$0xff] }
 0x4d5   : > { %v2346_v57 = vsel %vm317_vm2, %v7911_v30, %v2323_v29  ;;  %6497 = vrot.lane.b32.xlu0 %v10862_v55, %s10979_s0 }
 0x4d7   : > { %5974 = vmatpush3.bf16.msra.mxu1 %v2343_v56  ;;  %v2469_v13 = vpop.permute.xlu1 %2468 }
 0x4d8   : > { %v2331_v6 = vpop.permute.xlu0 %2330  ;;  %5975 = vmatprep.subr.bf16.mxu1 %v2484_v61  ;;  %v2487_v46 = vsel %vm10926_vm6, %v8105_v2, %v2469_v13  ;;  %vm10934_vm6 = vmmov %vm10930_vm11 }
 0x4d9   : > { %v2349_v4 = vsel %vm317_vm2, %v7937_v8, %v2331_v6  ;;  %v10939_v6 = vld [vmem:[#allocation32_spill] sm:$0xff]  ;;  %6507 = vrot.lane.b32.xlu0 %v10862_v55, %s10980_s1 }
 0x4db   : > { %5976 = vmatpush3.bf16.msra.mxu1 %v2346_v57  ;;  %v2477_v17 = vpop.permute.xlu1 %2476 }
 0x4dc   : > { %v2339_v1 = vpop.permute.xlu0 %2338  ;;  %5977 = vmatprep.subr.bf16.mxu1 %v2487_v46  ;;  %v2490_v48 = vsel %vm10928_vm15, %v10927_v47, %v2477_v17  ;;  %vm10937_vm15 = vmmov %vm10932_vm7  ;;  %v10940_v17 = vld [vmem:[#allocation55_spill] sm:$0xff] }
 0x4dd   : > { %v2352_v30 = vsel %vm317_vm2, %v10929_v7, %v2339_v1  ;;  %v10941_v1 = vld [vmem:[#allocation24_spill] sm:$0xff]  ;;  %v10945_v7 = vld [vmem:[#allocation17_spill] sm:$0xff] }
 0x4df   : > { %5978 = vmatpush3.bf16.msra.mxu1 %v2349_v4  ;;  %v2660_v28 = vpop.permute.xlu1 %2659 }
 0x4e0   : > { %v2522_v44 = vpop.permute.xlu0 %2521  ;;  %5979 = vmatprep.subr.bf16.mxu1 %v2490_v48  ;;  %v2688_v2 = vsel %vm10930_vm11, %v10835_v50, %v2660_v28  ;;  %vm10938_vm11 = vmmov %vm10934_vm6  ;;  %v10942_v28 = vld [vmem:[#allocation85_spill] sm:$0xff] }
 0x4e1   : > { %v2550_v8 = vsel %vm10932_vm7, %v10931_v20, %v2522_v44 }
 0x4e3   : > { %5980 = vmatpush3.bf16.msra.mxu1 %v2352_v30  ;;  %v2668_v12 = vpop.permute.xlu1 %2667 }
 0x4e4   : > { %v2530_v45 = vpop.permute.xlu0 %2529  ;;  %5993 = vmatprep.subr.bf16.mxu1 %v2688_v2  ;;  %v2691_v38 = vsel %vm10934_vm6, %v8349_v49, %v2668_v12 }
 0x4e5   : > { %v2553_v56 = vsel %vm10937_vm15, %v10936_v5, %v2530_v45  ;;  %vm10943_vm15 = vmmov %vm10932_vm7 }
 0x4e6   : > { %4175 = vmatmul.mubr.bf16.vlgmr.msra.gmra.mrb[32].mxu1 %v10933_v10 }
 0x4e7   : > { %5994 = vmatpush3.bf16.msra.mxu1 %v2550_v8  ;;  %v2676_v23 = vpop.permute.xlu1 %2675  ;;  %4182 = vmatprep.mubr.bf16.mxu1 %v10935_v3 }
 0x4e8   : > { %v2538_v29 = vpop.permute.xlu0 %2537  ;;  %5995 = vmatprep.subr.bf16.mxu1 %v2691_v38  ;;  %v2694_v13 = vsel %vm10938_vm11, %v8371_v39, %v2676_v23  ;;  %vm10944_vm11 = vcmask 834560   ;;  %v10948_v38 = vld [vmem:[#allocation18_spill] sm:$0xff] }
 0x4e9   : > { %v2556_v57 = vsel %vm10932_vm7, %v10939_v6, %v2538_v29  ;;  %vm10946_vm7 = vcmask 850944  }
 0x4eb   : > { %5996 = vmatpush3.bf16.msra.mxu1 %v2553_v56  ;;  %v2684_v50 = vpop.permute.xlu1 %2683 }
 0x4ec   : > { %v2546_v61 = vpop.permute.xlu0 %2545  ;;  %5997 = vmatprep.subr.bf16.mxu1 %v2694_v13  ;;  %v2697_v46 = vsel %vm10934_vm6, %v10846_v37, %v2684_v50  ;;  %vm10947_vm6 = vmmov %vm10944_vm11 }
 0x4ed   : > { %v2559_v47 = vsel %vm10943_vm15, %v10942_v28, %v2546_v61  ;;  %vm10949_vm15 = vmmov %vm10946_vm7 }
 0x4ee   : > { %4183 = vmatmul.mubr.bf16.gmra.mrb[36].mxu1 %v10940_v17 }
 0x4ef   : > { %5998 = vmatpush3.bf16.msra.mxu1 %v2556_v57  ;;  %v2729_v49 = vpop.permute.xlu1 %2728  ;;  %4223 = vmatprep.mubr.bf16.mxu1 %v10941_v1 }
 0x4f0   : > { %v2591_v4 = vpop.permute.xlu0 %2590  ;;  %5999 = vmatprep.subr.bf16.mxu1 %v2697_v46  ;;  %v2757_v48 = vsel %vm10944_vm11, %v8429_v31, %v2729_v49  ;;  %vm10950_vm11 = vmmov %vm10947_vm6 }
 0x4f1   : > { %v2619_v30 = vsel %vm10946_vm7, %v10945_v7, %v2591_v4  ;;  %v10952_v4 = vld [vmem:[#allocation88_spill] sm:$0xff] }
 0x4f3   : > { %6000 = vmatpush3.bf16.msra.mxu1 %v2559_v47  ;;  %v2737_v39 = vpop.permute.xlu1 %2736 }
 0x4f4   : > { %v2599_v44 = vpop.permute.xlu0 %2598  ;;  %6001 = vmatprep.subr.bf16.mxu1 %v2757_v48  ;;  %v2760_v2 = vsel %vm10947_vm6, %v8462_v33, %v2737_v39  ;;  %v10951_v33 = vld [vmem:[#allocation69_spill] sm:$0xff] }
 0x4f5   : > { %v2622_v31 = vsel %vm10949_vm15, %v10948_v38, %v2599_v44  ;;  %vm10953_vm15 = vmmov %vm10946_vm7 }
 0x4f6   : > { %v5897_v12 = vpop.f32.mrb[8].mxu1 }
 0x4f7   : > { %6002 = vmatpush3.bf16.msra.mxu1 %v2619_v30  ;;  %v2745_v37 = vpop.permute.xlu1 %2744  ;;  %v5898_v45 = vpop.f32.mrb[9].mxu1 }
 0x4f8   : > { %v2607_v20 = vpop.permute.xlu0 %2606  ;;  %6003 = vmatprep.subr.bf16.mxu1 %v2760_v2  ;;  %v9261_v8 = vadd.f32 %v5898_v45, %v5897_v12  ;;  %v5900_v10 = vpop.f32.mrb[10].mxu1  ;;  %v2763_v5 = vsel %vm10950_vm11, %v8499_v15, %v2745_v37  ;;  %vm10954_vm11 = vcmask 654336  }
 0x4f9   : > { %v5901_v23 = vpop.f32.mrb[11].mxu1  ;;  %v2625_v50 = vsel %vm10946_vm7, %v10951_v33, %v2607_v20  ;;  %vm10955_vm7 = vcmask 670720  }
 0x4fa   : > { %v9265_v3 = vadd.f32 %v5901_v23, %v5900_v10 }
 0x4fb   : > { %6004 = vmatpush3.bf16.msra.mxu1 %v2622_v31  ;;  %v2753_v29 = vpop.permute.xlu1 %2752 }
 0x4fc   : > { %v2615_v56 = vpop.permute.xlu0 %2614  ;;  %6005 = vmatprep.subr.bf16.mxu1 %v2763_v5  ;;  %v2766_v6 = vsel %vm10947_vm6, %v8532_v16, %v2753_v29  ;;  %vm10956_vm6 = vmmov %vm10954_vm11 }
 0x4fd   : > { %v2628_v15 = vsel %vm10953_vm15, %v10952_v4, %v2615_v56  ;;  %vm10957_vm15 = vmmov %vm10955_vm7 }
 0x4fe   : > { %v5903_v13 = vpop.f32.mrb[12].mxu1 }
 0x4ff   : > { %6006 = vmatpush3.bf16.msra.mxu1 %v2625_v50  ;;  %v2936_v61 = vpop.permute.xlu1 %2935  ;;  %v5904_v57 = vpop.f32.mrb[13].mxu1 }
 0x500   : > { %v2798_v17 = vpop.permute.xlu0 %2797  ;;  %6007 = vmatprep.subr.bf16.mxu1 %v2766_v6  ;;  %v9273_v49 = vadd.f32 %v5904_v57, %v5903_v13  ;;  %v5906_v46 = vpop.f32.mrb[14].mxu1  ;;  %v2964_v39 = vsel %vm10954_vm11, %v8907_v32, %v2936_v61  ;;  %vm10958_vm11 = vmmov %vm10956_vm6 }
 0x501   : > { %v5907_v1 = vpop.f32.mrb[15].mxu1  ;;  %v2826_v16 = vsel %vm10955_vm7, %v8569_v36, %v2798_v17 }
 0x502   : > { %v9277_v28 = vadd.f32 %v5907_v1, %v5906_v46 }
 0x503   : > { %6008 = vmatpush3.bf16.msra.mxu1 %v2628_v15  ;;  %v2944_v47 = vpop.permute.xlu1 %2943 }
 0x504   : > { %v2806_v48 = vpop.permute.xlu0 %2805  ;;  %6021 = vmatprep.subr.bf16.mxu1 %v2964_v39  ;;  %v2967_v7 = vsel %vm10956_vm6, %v8935_v53, %v2944_v47 }
 0x505   : > { %v2829_v12 = vsel %vm10957_vm15, %v8610_v54, %v2806_v48  ;;  %vm10959_vm15 = vmmov %vm10955_vm7 }
 0x506   : > { %4224 = vmatmul.mubr.bf16.vlgmr.msra.gmra.mrb[40].mxu1 %v8848_v21 }
 0x507   : > { %6022 = vmatpush3.bf16.msra.mxu1 %v2826_v16  ;;  %v2952_v44 = vpop.permute.xlu1 %2951  ;;  %4231 = vmatprep.mubr.bf16.mxu1 %v8858_v41 }
 0x508   : > { %v2814_v30 = vpop.permute.xlu0 %2813  ;;  %6023 = vmatprep.subr.bf16.mxu1 %v2967_v7  ;;  %v2970_v37 = vsel %vm10958_vm11, %v8971_v62, %v2952_v44  ;;  %vm10960_vm11 = vcmask 646144  }
 0x509   : > { %v2832_v21 = vsel %vm10955_vm7, %v8663_v59, %v2814_v30  ;;  %vm10961_vm7 = vcmask 662528  }
 0x50b   : > { %6024 = vmatpush3.bf16.msra.mxu1 %v2829_v12  ;;  %v2960_v32 = vpop.permute.xlu1 %2959 }
 0x50c   : > { %v2822_v36 = vpop.permute.xlu0 %2821  ;;  %6025 = vmatprep.subr.bf16.mxu1 %v2970_v37  ;;  %v2973_v41 = vsel %vm10956_vm6, %v8999_v34, %v2960_v32  ;;  %vm10962_vm6 = vmmov %vm10960_vm11 }
 0x50d   : > { %v2835_v2 = vsel %vm10959_vm15, %v8696_v25, %v2822_v36  ;;  %vm10964_vm15 = vmmov %vm10961_vm7 }
 0x50e   : > { %4232 = vmatmul.mubr.bf16.gmra.mrb[44].mxu1 %v8886_v52 }
 0x50f   : > { %6026 = vmatpush3.bf16.msra.mxu1 %v2832_v21  ;;  %v3005_v53 = vpop.permute.xlu1 %3004  ;;  %4272 = vmatprep.mubr.bf16.mxu1 %v8898_v0 }
 0x510   : > { %v2867_v54 = vpop.permute.xlu0 %2866  ;;  %6027 = vmatprep.subr.bf16.mxu1 %v2973_v41  ;;  %v3033_v45 = vsel %vm10960_vm11, %v9029_v14, %v3005_v53  ;;  %vm10965_vm11 = vmmov %vm10962_vm6 }
 0x511   : > { %v2895_v52 = vsel %vm10961_vm7, %v8745_v43, %v2867_v54 }
 0x513   : > { %6028 = vmatpush3.bf16.msra.mxu1 %v2835_v2  ;;  %v3013_v62 = vpop.permute.xlu1 %3012 }
 0x514   : > { %v2875_v59 = vpop.permute.xlu0 %2874  ;;  %6029 = vmatprep.subr.bf16.mxu1 %v3033_v45  ;;  %v3036_v0 = vsel %vm10962_vm6, %v9046_v18, %v3013_v62 }
 0x515   : > { %v2898_v25 = vsel %vm10964_vm15, %v8775_v51, %v2875_v59  ;;  %vm10966_vm15 = vmmov %vm10961_vm7 }
 0x517   : > { %6030 = vmatpush3.bf16.msra.mxu1 %v2895_v52  ;;  %v3021_v20 = vpop.permute.xlu1 %3020 }
 0x518   : > { %v2883_v34 = vpop.permute.xlu0 %2882  ;;  %6031 = vmatprep.subr.bf16.mxu1 %v3036_v0  ;;  %v3039_v10 = vsel %vm10965_vm11, %v9067_v26, %v3021_v20  ;;  %vm10967_vm11 = vcmask 637952  }
 0x519   : > { %v2901_v43 = vsel %vm10961_vm7, %v8815_v42, %v2883_v34  ;;  %vm10969_vm7 = vmmov %vm10967_vm11 }
 0x51b   : > { %6032 = vmatpush3.bf16.msra.mxu1 %v2898_v25  ;;  %v3029_v14 = vpop.permute.xlu1 %3028 }
 0x51c   : > { %6033 = vmatprep.subr.bf16.mxu1 %v3039_v10  ;;  %v2891_v18 = vpop.permute.xlu0 %2890  ;;  %v3042_v23 = vsel %vm10962_vm6, %v9084_v40, %v3029_v14  ;;  %vm10971_vm6 = vmmov %vm10969_vm7 }
 0x51d   : > { %v2904_v51 = vsel %vm10966_vm15, %v8850_v35, %v2891_v18  ;;  %vm10972_vm15 = vmmov %vm10971_vm6  ;;  %v10981_v18 = vld [vmem:[#allocation9_spill] sm:$0xff] }
 0x51f   : > { %6034 = vmatpush3.bf16.msra.mxu1 %v2901_v43  ;;  %v3074_v38 = vpop.permute.xlu1 %3073 }
 0x520   : > { %6035 = vmatprep.subr.bf16.mxu1 %v3042_v23  ;;  %v3102_v26 = vsel %vm10967_vm11, %v9116_v27, %v3074_v38  ;;  %v3082_v31 = vpop.permute.xlu0 %3081  ;;  %vm10973_vm11 = vcmask 523264  }
 0x521   : > { %v3105_v42 = vsel %vm10969_vm7, %v9140_v9, %v3082_v31  ;;  %vm10974_vm7 = vmmov %vm10973_vm11 }
 0x523   : > { %6036 = vmatpush3.bf16.msra.mxu1 %v2904_v51  ;;  %v3090_v40 = vpop.permute.xlu1 %3089  ;;  %v10982_v51 = vld [vmem:[#allocation10_spill] sm:$0xff] }
 0x524   : > { %6144 = vmatprep.subr.bf16.mxu1 %v3102_v26  ;;  %v3108_v35 = vsel %vm10971_vm6, %v9166_v63, %v3090_v40  ;;  %v3098_v27 = vpop.permute.xlu0 %3097  ;;  %vm11000_vm6 = vcmask 408576  }
 0x526   : > { %4273 = vmatmul.mubr.bf16.vlgmr.msra.gmra.mrb[48].mxu1 %v9102_v60  ;;  %v3111_v60 = vsel %vm10972_vm15, %v9182_v11, %v3098_v27  ;;  %vm11001_vm15 = vmmov %vm11000_vm6 }
 0x527   : > { %6145 = vmatpush3.bf16.msra.mxu1 %v3102_v26  ;;  %4280 = vmatprep.mubr.bf16.mxu1 %v9107_v58 }
 0x528   : > { %6146 = vmatprep.subr.bf16.mxu1 %v3105_v42 }
 0x52b   : > { %6147 = vmatpush3.bf16.msra.mxu1 %v3105_v42 }
 0x52c   : > { %6148 = vmatprep.subr.bf16.mxu1 %v3108_v35 }
 0x52e   : > { %4281 = vmatmul.mubr.bf16.gmra.mrb[52].mxu1 %v9130_v24 }
 0x52f   : > { %6149 = vmatpush3.bf16.msra.mxu1 %v3108_v35  ;;  %6152 = vmatprep.mubr.msk.bf16.mxu1 %vm10973_vm11, %v9190_v19  ;;  %vm11008_vm11 = vmmov %vm11000_vm6 }
 0x530   : > { %6150 = vmatprep.subr.bf16.mxu1 %v3111_v60 }
 0x533   : > { %6151 = vmatpush3.bf16.msra.mxu1 %v3111_v60 }
 0x534   : > { %v3471_v58 = vpop.permute.xlu1 %3470 }
 0x535   : > { %v3476_v29 = vpop.permute.xlu0 %3475  ;;  %v4030_v5 = vadd.f32 %v9261_v8, %v3471_v58 }
 0x536   : > { %6153 = vmatmul.mubr.msk.bf16.vlgmr.msra.gmra.mrb[56].mxu1 %vm10974_vm7, %v9212_v22  ;;  %v4033_v11 = vadd.f32 %v9265_v3, %v3476_v29  ;;  %vm11009_vm7 = vmmov %vm11000_vm6 }
 0x538   : > { %v3481_v19 = vpop.permute.xlu1 %3480 }
 0x539   : > { %v3486_v57 = vpop.permute.xlu0 %3485  ;;  %v4038_v22 = vadd.f32 %v9273_v49, %v3481_v19 }
 0x53a   : > { %v4041_v8 = vadd.f32 %v9277_v28, %v3486_v57 }
 0x545   : > { %v5925_v9 = vpop.f32.mrb[16].mxu1 }
 0x546   : > { %v5926_v63 = vpop.f32.mrb[17].mxu1 }
 0x547   : > { %v5927_v56 = vadd.f32 %v5926_v63, %v5925_v9  ;;  %v5928_v24 = vpop.f32.mrb[18].mxu1 }
 0x548   : > { %v5929_v33 = vpop.f32.mrb[19].mxu1 }
 0x549   : > { %v4079_v50 = vadd.f32 %v5927_v56, %v4030_v5  ;;  %v5930_v13 = vadd.f32 %v5929_v33, %v5928_v24 }
 0x54b   : > { %v4082_v61 = vadd.f32 %v5930_v13, %v4033_v11 }
 0x54d   : > { %v5931_v6 = vpop.f32.mrb[20].mxu1 }
 0x54e   : > { %v5932_v17 = vpop.f32.mrb[21].mxu1 }
 0x54f   : > { %v5933_v46 = vadd.f32 %v5932_v17, %v5931_v6  ;;  %v5934_v1 = vpop.f32.mrb[22].mxu1 }
 0x550   : > { %v5935_v4 = vpop.f32.mrb[23].mxu1 }
 0x551   : > { %v4087_v15 = vadd.f32 %v5933_v46, %v4038_v22  ;;  %v5936_v47 = vadd.f32 %v5935_v4, %v5934_v1 }
 0x553   : > { %v4090_v39 = vadd.f32 %v5936_v47, %v4041_v8 }
 0x594   : > { %v5953_v3 = vpop.f32.mrb[24].mxu1 }
 0x595   : > { %v5954_v49 = vpop.f32.mrb[25].mxu1 }
 0x596   : > { %v5955_v28 = vadd.f32 %v5954_v49, %v5953_v3  ;;  %v5956_v48 = vpop.f32.mrb[26].mxu1 }
 0x597   : > { %v5957_v16 = vpop.f32.mrb[27].mxu1 }
 0x598   : > { %v4128_v44 = vadd.f32 %v5955_v28, %v4079_v50  ;;  %v5958_v7 = vadd.f32 %v5957_v16, %v5956_v48 }
 0x59a   : > { %v4131_v30 = vadd.f32 %v5958_v7, %v4082_v61 }
 0x59c   : > { %v5959_v12 = vpop.f32.mrb[28].mxu1 }
 0x59d   : > { %v5960_v32 = vpop.f32.mrb[29].mxu1 }
 0x59e   : > { %v5961_v37 = vadd.f32 %v5960_v32, %v5959_v12  ;;  %v5962_v36 = vpop.f32.mrb[30].mxu1 }
 0x59f   : > { %v3976_v21 = vpop.f32.mrb[16].mxu0  ;;  %v5963_v53 = vpop.f32.mrb[31].mxu1 }
 0x5a0   : > { %v4136_v41 = vadd.f32 %v5961_v37, %v4087_v15  ;;  %v6164_v54 = vadd.f32 %v3976_v21, %v3471_v58  ;;  %v5964_v2 = vadd.f32 %v5963_v53, %v5962_v36  ;;  %v3978_v62 = vpop.f32.mrb[17].mxu0 }
 0x5a1   : > { %v6165_v45 = vadd.f32 %v3978_v62, %v3471_v58  ;;  %v3980_v59 = vpop.f32.mrb[18].mxu0 }
 0x5a2   : > { %v4338_v52 = vmax.f32 %v6164_v54, 0.0  ;;  %v4139_v20 = vadd.f32 %v5964_v2, %v4090_v39  ;;  %v6166_v0 = vadd.f32 %v3980_v59, %v3476_v29  ;;  %v3982_v34 = vpop.f32.mrb[19].mxu0 }
 0x5a3   : > { %v4339_v25 = vmax.f32 %v6165_v45, 0.0  ;;  %v6167_v14 = vadd.f32 %v3982_v34, %v3476_v29  ;;  %v9412_v34 = vpop.permute.xlu1 %6452 }
 0x5a4   : > { %v4341_v10 = vmax.f32 %v6166_v0, 0.0  ;;  %v4350_v23 = vmul.f32 %v4338_v52, %v10981_v18 }
 0x5a5   : > { %v4342_v43 = vmax.f32 %v6167_v14, 0.0  ;;  %v4351_v26 = vmul.f32 %v4339_v25, %v10982_v51 }
 0x5a6   : > { %v4353_v38 = vmul.f32 %v4341_v10, %v10981_v18 }
 0x5a7   : > { %v4354_v31 = vmul.f32 %v4342_v43, %v10982_v51  ;;  %v3986_v42 = vpop.f32.mrb[20].mxu0 }
 0x5a8   : > { %v9360_v40 = vpack.c.bf16 %v4353_v38, %v4350_v23  ;;  %v6168_v35 = vadd.f32 %v3986_v42, %v3481_v19  ;;  %v3988_v27 = vpop.f32.mrb[21].mxu0 }
 0x5a9   : > { %v9362_v60 = vpack.c.bf16 %v4354_v31, %v4351_v26  ;;  %v6169_v58 = vadd.f32 %v3988_v27, %v3481_v19  ;;  %v3990_v9 = vpop.f32.mrb[22].mxu0 }
 0x5aa   : > { %v4344_v29 = vmax.f32 %v6168_v35, 0.0  ;;  %v6170_v63 = vadd.f32 %v3990_v9, %v3486_v57  ;;  %v3992_v5 = vpop.f32.mrb[23].mxu0  ;;  %4398 = vrot.lane.b32.xlu1 %v9360_v40, %s10923_s17 }
 0x5ab   : > { %v4345_v56 = vmax.f32 %v6169_v58, 0.0  ;;  %v6171_v24 = vadd.f32 %v3992_v5, %v3486_v57 }
 0x5ac   : > { %v4347_v33 = vmax.f32 %v6170_v63, 0.0  ;;  %v4356_v11 = vmul.f32 %v4344_v29, %v10981_v18 }
 0x5ad   : > { %v4348_v50 = vmax.f32 %v6171_v24, 0.0  ;;  %v4357_v61 = vmul.f32 %v4345_v56, %v10982_v51 }
 0x5ae   : > { %v4359_v13 = vmul.f32 %v4347_v33, %v10981_v18  ;;  %4466 = vrot.lane.b32.xlu1 %v9360_v40, %s10963_s23 }
 0x5af   : > { %v4360_v19 = vmul.f32 %v4348_v50, %v10982_v51  ;;  %v9416_v51 = vpop.permute.xlu1 %6462 }
 0x5b0   : > { %v9372_v6 = vpack.c.bf16 %v4359_v13, %v4356_v11 }
 0x5b1   : > { %v9374_v17 = vpack.c.bf16 %v4360_v19, %v4357_v61 }
 0x5b2   : > { %4534 = vrot.lane.b32.xlu1 %v9360_v40, %s10983_s2 }
 0x5b3   : > { %v9418_v9 = vpop.permute.xlu1 %6472 }
 0x5b6   : > { %4602 = vrot.lane.b32.xlu1 %v9360_v40, %s10984_s3 }
 0x5b7   : > { %v9420_v50 = vpop.permute.xlu1 %6482 }
 0x5b9   : > { %v5981_v57 = vpop.f32.mrb[32].mxu1 }
 0x5ba   : > { %v5982_v22 = vpop.f32.mrb[33].mxu1  ;;  %4670 = vrot.lane.b32.xlu1 %v9360_v40, %s10968_s11 }
 0x5bb   : > { %v5983_v46 = vadd.f32 %v5982_v22, %v5981_v57  ;;  %v5984_v1 = vpop.f32.mrb[34].mxu1 }
 0x5bc   : > { %v5985_v4 = vpop.f32.mrb[35].mxu1 }
 0x5bd   : > { %v4177_v15 = vadd.f32 %v5983_v46, %v4128_v44  ;;  %v5986_v8 = vadd.f32 %v5985_v4, %v5984_v1 }
 0x5be   : > { %4738 = vrot.lane.b32.xlu1 %v9360_v40, %s10970_s26 }
 0x5bf   : > { %v4180_v47 = vadd.f32 %v5986_v8, %v4131_v30 }
 0x5c1   : > { %v5987_v39 = vpop.f32.mrb[36].mxu1 }
 0x5c2   : > { %v5988_v3 = vpop.f32.mrb[37].mxu1  ;;  %4812 = vrot.lane.b32.xlu1 %v9360_v40, %s10873_s15 }
 0x5c3   : > { %v5989_v49 = vadd.f32 %v5988_v3, %v5987_v39  ;;  %v5990_v28 = vpop.f32.mrb[38].mxu1  ;;  %v9424_v39 = vpop.permute.xlu1 %6492 }
 0x5c4   : > { %v5991_v48 = vpop.f32.mrb[39].mxu1 }
 0x5c5   : > { %v4185_v16 = vadd.f32 %v5989_v49, %v4136_v41  ;;  %v5992_v7 = vadd.f32 %v5991_v48, %v5990_v28 }
 0x5c6   : > { %4434 = vrot.lane.b32.xlu1 %v9362_v60, %s10975_s22 }
 0x5c7   : > { %v4188_v12 = vadd.f32 %v5992_v7, %v4139_v20 }
 0x5ca   : > { %4502 = vrot.lane.b32.xlu1 %v9362_v60, %s10976_s18 }
 0x5ce   : > { %4570 = vrot.lane.b32.xlu1 %v9362_v60, %s10977_s30 }
 0x5d2   : > { %4638 = vrot.lane.b32.xlu1 %v9362_v60, %s10978_s29 }
 0x5d6   : > { %4706 = vrot.lane.b32.xlu1 %v9362_v60, %s10979_s0 }
 0x5d9   : > { %v6009_v44 = vpop.f32.mrb[40].mxu1 }
 0x5da   : > { %v6010_v30 = vpop.f32.mrb[41].mxu1  ;;  %4774 = vrot.lane.b32.xlu1 %v9362_v60, %s10980_s1 }
 0x5db   : > { %v6011_v32 = vadd.f32 %v6010_v30, %v6009_v44  ;;  %v6012_v37 = vpop.f32.mrb[42].mxu1 }
 0x5dc   : > { %v6013_v36 = vpop.f32.mrb[43].mxu1 }
 0x5dd   : > { %v4226_v21 = vadd.f32 %v6011_v32, %v4177_v15  ;;  %v6014_v53 = vadd.f32 %v6013_v36, %v6012_v37  ;;  %v10985_v15 = vld [vmem:[#allocation8_spill] sm:$0xff] }
 0x5de   : > { %4814 = vrot.lane.b32.xlu1 %v9362_v60, %s10873_s15 }
 0x5df   : > { %v4229_v41 = vadd.f32 %v6014_v53, %v4180_v47 }
 0x5e1   : > { %v6015_v54 = vpop.f32.mrb[44].mxu1 }
 0x5e2   : > { %v6016_v2 = vpop.f32.mrb[45].mxu1  ;;  %4440 = vrot.lane.b32.xlu1 %v9372_v6, %s10975_s22 }
 0x5e3   : > { %v6017_v62 = vadd.f32 %v6016_v2, %v6015_v54  ;;  %v6018_v45 = vpop.f32.mrb[46].mxu1 }
 0x5e4   : > { %v6019_v59 = vpop.f32.mrb[47].mxu1 }
 0x5e5   : > { %v4234_v52 = vadd.f32 %v6017_v62, %v4185_v16  ;;  %v6020_v20 = vadd.f32 %v6019_v59, %v6018_v45  ;;  %v9436_v16 = vpop.permute.xlu1 %6502 }
 0x5e6   : > { %4508 = vrot.lane.b32.xlu1 %v9372_v6, %s10976_s18 }
 0x5e7   : > { %v4237_v0 = vadd.f32 %v6020_v20, %v4188_v12  ;;  %v9548_v20 = vpop.permute.xlu0 %6457 }
 0x5ea   : > { %4576 = vrot.lane.b32.xlu1 %v9372_v6, %s10977_s30 }
 0x5ee   : > { %4644 = vrot.lane.b32.xlu1 %v9372_v6, %s10978_s29 }
 0x5f2   : > { %4712 = vrot.lane.b32.xlu1 %v9372_v6, %s10979_s0 }
 0x5f6   : > { %4780 = vrot.lane.b32.xlu1 %v9372_v6, %s10980_s1 }
 0x5f9   : > { %v6037_v25 = vpop.f32.mrb[48].mxu1 }
 0x5fa   : > { %v6038_v14 = vpop.f32.mrb[49].mxu1  ;;  %4408 = vrot.lane.b32.xlu1 %v9374_v17, %s10923_s17 }
 0x5fb   : > { %v6039_v10 = vadd.f32 %v6038_v14, %v6037_v25  ;;  %v6040_v43 = vpop.f32.mrb[50].mxu1  ;;  %v9558_v25 = vpop.permute.xlu0 %6467 }
 0x5fc   : > { %v6041_v18 = vpop.f32.mrb[51].mxu1 }
 0x5fd   : > { %v6042_v23 = vadd.f32 %v6041_v18, %v6040_v43  ;;  %v4275_v38 = vadd.f32 %v6039_v10, %v4226_v21 }
 0x5ff   : > { %v4278_v26 = vadd.f32 %v6042_v23, %v4229_v41  ;;  %v9568_v10 = vpop.permute.xlu0 %6477 }
 0x601   : > { %v6043_v31 = vpop.f32.mrb[52].mxu1 }
 0x602   : > { %v6044_v42 = vpop.f32.mrb[53].mxu1 }
 0x603   : > { %v6045_v35 = vadd.f32 %v6044_v42, %v6043_v31  ;;  %v6046_v27 = vpop.f32.mrb[54].mxu1  ;;  %v9578_v18 = vpop.permute.xlu0 %6487 }
 0x604   : > { %v6047_v58 = vpop.f32.mrb[55].mxu1 }
 0x605   : > { %v6048_v29 = vadd.f32 %v6047_v58, %v6046_v27  ;;  %v4283_v63 = vadd.f32 %v6045_v35, %v4234_v52 }
 0x607   : > { %v4286_v5 = vadd.f32 %v6048_v29, %v4237_v0 }
 0x609   : > { %v6154_v56 = vpop.f32.mrb[56].mxu1 }
 0x60a   : > { %v4332_v24 = vadd.f32 %v6154_v56, %v4283_v63  ;;  %v4323_v33 = vpop.f32.mrb[57].mxu1 }
 0x60b   : > { %v4324_v11 = vadd.f32 %v4323_v33, %v4275_v38  ;;  %v6155_v13 = vpop.f32.mrb[58].mxu1  ;;  %v9588_v38 = vpop.permute.xlu0 %6497 }
 0x60c   : > { %v4346_v61 = vmax.f32 %v4332_v24, 0.0  ;;  %v4335_v19 = vadd.f32 %v6155_v13, %v4286_v5  ;;  %v4326_v57 = vpop.f32.mrb[59].mxu1  ;;  %v9627_v5 = vld [vmem:[%s10389_s6] sm:$0xff] }
 0x60d   : > { %v4340_v22 = vmax.f32 %v4324_v11, 0.0  ;;  %v4327_v46 = vadd.f32 %v4326_v57, %v4278_v26  ;;  %v5861_v56 = vcombine.high %v9627_v5, %v9627_v5 }
 0x60e   : > { %v4349_v1 = vmax.f32 %v4335_v19, 0.0  ;;  %v4358_v8 = vmul.f32 %v4346_v61, %v10985_v15 }
 0x60f   : > { %v4343_v4 = vmax.f32 %v4327_v46, 0.0  ;;  %v4352_v3 = vmul.f32 %v4340_v22, %v10985_v15  ;;  %v9598_v31 = vpop.permute.xlu0 %6507  ;;  %5439 = vmatprep.mubr.bf16.mxu1 %v5861_v56  ;;  %5603 = vmatprep.mubr.bf16.mxu0 %v5861_v56  ;;  %v6454_v46 = vunpack.i.l.bf16 %v9412_v34 }
 0x610   : > { %v4361_v47 = vmul.f32 %v4349_v1, %v10985_v15 }
 0x611   : > { %v4355_v49 = vmul.f32 %v4343_v4, %v10985_v15 }
 0x612   : > { %v9428_v28 = vpack.c.bf16 %v4361_v47, %v4358_v8 }
 0x613   : > { %v9430_v48 = vpack.c.bf16 %v4355_v49, %v4352_v3 }
 0x614   : > { %4824 = vrot.lane.b32.xlu1 %v9428_v28, %s10873_s15 }
 0x615   : > { %4816 = vrot.lane.b32.xlu0 %v9430_v48, %s10873_s15 }
 0x618   : > { %4848 = vrot.lane.b32.xlu1 %v9362_v60, %s10861_s10 }
 0x619   : > { %4432 = vrot.lane.b32.xlu0 %v9360_v40, %s10975_s22 }
 0x61c   : > { %4846 = vrot.lane.b32.xlu1 %v9360_v40, %s10861_s10  ;;  %v9444_v7 = vpop.permute.xlu1 %4398 }
 0x61d   : > { %4500 = vrot.lane.b32.xlu0 %v9360_v40, %s10976_s18  ;;  %v4412_v8 = vsel %vm11001_vm15, %v6454_v46, %v9444_v7  ;;  %vm11014_vm15 = vcmask 842752  }
 0x620   : > { %4476 = vrot.lane.b32.xlu1 %v9374_v17, %s10963_s23  ;;  %v9450_v12 = vpop.permute.xlu1 %4466 }
 0x621   : > { %4568 = vrot.lane.b32.xlu0 %v9360_v40, %s10977_s30 }
 0x624   : > { %4858 = vrot.lane.b32.xlu1 %v9428_v28, %s10861_s10  ;;  %v9456_v44 = vpop.permute.xlu1 %4534 }
 0x625   : > { %4636 = vrot.lane.b32.xlu0 %v9360_v40, %s10978_s29 }
 0x628   : > { %4882 = vrot.lane.b32.xlu1 %v9362_v60, %s10666_s9  ;;  %v9462_v30 = vpop.permute.xlu1 %4602 }
 0x629   : > { %4704 = vrot.lane.b32.xlu0 %v9360_v40, %s10979_s0 }
 0x62c   : > { %4880 = vrot.lane.b32.xlu1 %v9360_v40, %s10666_s9  ;;  %v9468_v32 = vpop.permute.xlu1 %4670 }
 0x62d   : > { %4772 = vrot.lane.b32.xlu0 %v9360_v40, %s10980_s1 }
 0x630   : > { %4544 = vrot.lane.b32.xlu1 %v9374_v17, %s10983_s2  ;;  %v9474_v37 = vpop.permute.xlu1 %4738 }
 0x631   : > { %4400 = vrot.lane.b32.xlu0 %v9362_v60, %s10923_s17 }
 0x634   : > { %4892 = vrot.lane.b32.xlu1 %v9428_v28, %s10666_s9  ;;  %v9480_v36 = vpop.permute.xlu1 %4812 }
 0x635   : > { %10986 = vst [vmem:[#allocation44_spill] sm:$0xff] %v9480_v36  ;;  %4468 = vrot.lane.b32.xlu0 %v9362_v60, %s10963_s23 }
 0x638   : > { %4916 = vrot.lane.b32.xlu1 %v9362_v60, %s10676_s25  ;;  %v9486_v21 = vpop.permute.xlu1 %4434 }
 0x639   : > { %10987 = vst [vmem:[#allocation11_spill] sm:$0xff] %v9486_v21  ;;  %4536 = vrot.lane.b32.xlu0 %v9362_v60, %s10983_s2 }
 0x63c   : > { %4914 = vrot.lane.b32.xlu1 %v9360_v40, %s10676_s25  ;;  %v9492_v53 = vpop.permute.xlu1 %4502 }
 0x63d   : > { %10988 = vst [vmem:[#allocation61_spill] sm:$0xff] %v9492_v53  ;;  %4604 = vrot.lane.b32.xlu0 %v9362_v60, %s10984_s3 }
 0x640   : > { %4612 = vrot.lane.b32.xlu1 %v9374_v17, %s10984_s3  ;;  %v9498_v41 = vpop.permute.xlu1 %4570 }
 0x641   : > { %4672 = vrot.lane.b32.xlu0 %v9362_v60, %s10968_s11 }
 0x644   : > { %4926 = vrot.lane.b32.xlu1 %v9428_v28, %s10676_s25  ;;  %v9506_v54 = vpop.permute.xlu1 %4638 }
 0x645   : > { %4740 = vrot.lane.b32.xlu0 %v9362_v60, %s10970_s26 }
 0x648   : > { %4950 = vrot.lane.b32.xlu1 %v9362_v60, %s10682_s19  ;;  %v9512_v2 = vpop.permute.xlu1 %4706 }
 0x649   : > { %4406 = vrot.lane.b32.xlu0 %v9372_v6, %s10923_s17 }
 0x64c   : > { %4948 = vrot.lane.b32.xlu1 %v9360_v40, %s10682_s19  ;;  %v9522_v62 = vpop.permute.xlu1 %4774 }
 0x64d   : > { %4474 = vrot.lane.b32.xlu0 %v9372_v6, %s10963_s23  ;;  %10989 = vst [vmem:[#allocation23_spill] sm:$0xff] %v9522_v62 }
 0x650   : > { %4680 = vrot.lane.b32.xlu1 %v9374_v17, %s10968_s11  ;;  %v9528_v45 = vpop.permute.xlu1 %4814 }
 0x651   : > { %4542 = vrot.lane.b32.xlu0 %v9372_v6, %s10983_s2  ;;  %10990 = vst [vmem:[#allocation28_spill] sm:$0xff] %v9528_v45 }
 0x654   : > { %4960 = vrot.lane.b32.xlu1 %v9428_v28, %s10682_s19  ;;  %v9538_v59 = vpop.permute.xlu1 %4440 }
 0x655   : > { %4610 = vrot.lane.b32.xlu0 %v9372_v6, %s10984_s3 }
 0x658   : > { %4984 = vrot.lane.b32.xlu1 %v9362_v60, %s10688_s14  ;;  %v9544_v52 = vpop.permute.xlu1 %4508 }
 0x659   : > { %4678 = vrot.lane.b32.xlu0 %v9372_v6, %s10968_s11 }
 0x65c   : > { %4982 = vrot.lane.b32.xlu1 %v9360_v40, %s10688_s14  ;;  %v9556_v0 = vpop.permute.xlu1 %4576 }
 0x65d   : > { %4746 = vrot.lane.b32.xlu0 %v9372_v6, %s10970_s26 }
 0x660   : > { %4748 = vrot.lane.b32.xlu1 %v9374_v17, %s10970_s26  ;;  %v9564_v14 = vpop.permute.xlu1 %4644 }
 0x661   : > { %4820 = vrot.lane.b32.xlu0 %v9372_v6, %s10873_s15 }
 0x664   : > { %4994 = vrot.lane.b32.xlu1 %v9428_v28, %s10688_s14  ;;  %v9576_v43 = vpop.permute.xlu1 %4712 }
 0x665   : > { %4850 = vrot.lane.b32.xlu0 %v9430_v48, %s10861_s10 }
 0x668   : > { %5018 = vrot.lane.b32.xlu1 %v9362_v60, %s10690_s12  ;;  %v9584_v23 = vpop.permute.xlu1 %4780 }
 0x669   : > { %4442 = vrot.lane.b32.xlu0 %v9374_v17, %s10975_s22 }
 0x66c   : > { %5016 = vrot.lane.b32.xlu1 %v9360_v40, %s10690_s12  ;;  %v9596_v26 = vpop.permute.xlu1 %4408 }
 0x66d   : > { %4854 = vrot.lane.b32.xlu0 %v9372_v6, %s10861_s10  ;;  %10991 = vst [vmem:[#allocation12_spill] sm:$0xff] %v9596_v26 }
 0x670   : > { %5028 = vrot.lane.b32.xlu1 %v9428_v28, %s10690_s12 }
 0x671   : > { %4884 = vrot.lane.b32.xlu0 %v9430_v48, %s10666_s9 }
 0x674   : > { %5052 = vrot.lane.b32.xlu1 %v9362_v60, %s10720_s16 }
 0x675   : > { %4510 = vrot.lane.b32.xlu0 %v9374_v17, %s10976_s18 }
 0x678   : > { %5050 = vrot.lane.b32.xlu1 %v9360_v40, %s10720_s16 }
 0x679   : > { %4888 = vrot.lane.b32.xlu0 %v9372_v6, %s10666_s9 }
 0x67c   : > { %5062 = vrot.lane.b32.xlu1 %v9428_v28, %s10720_s16 }
 0x67d   : > { %4918 = vrot.lane.b32.xlu0 %v9430_v48, %s10676_s25 }
 0x680   : > { %5086 = vrot.lane.b32.xlu1 %v9362_v60, %s10756_s13 }
 0x681   : > { %4578 = vrot.lane.b32.xlu0 %v9374_v17, %s10977_s30 }
 0x684   : > { %5084 = vrot.lane.b32.xlu1 %v9360_v40, %s10756_s13 }
 0x685   : > { %4922 = vrot.lane.b32.xlu0 %v9372_v6, %s10676_s25 }
 0x686   : > { %v9604_v42 = vpop.permute.xlu1 %4824 }
 0x687   : > { %10992 = vst [vmem:[#allocation40_spill] sm:$0xff] %v9604_v42  ;;  %v9606_v35 = vpop.permute.xlu0 %4816 }
 0x688   : > { %10993 = vst [vmem:[#allocation46_spill] sm:$0xff] %v9606_v35  ;;  %5096 = vrot.lane.b32.xlu1 %v9428_v28, %s10756_s13 }
 0x689   : > { %4952 = vrot.lane.b32.xlu0 %v9430_v48, %s10682_s19 }
 0x68a   : > { %v9612_v27 = vpop.permute.xlu1 %4848 }
 0x68b   : > { %10994 = vst [vmem:[#allocation63_spill] sm:$0xff] %v9612_v27  ;;  %v9614_v58 = vpop.permute.xlu0 %4432  ;;  %v6459_v27 = vunpack.i.l.bf16 %v9548_v20 }
 0x68c   : > { %4538 = vrot.lane.b32.xlu1 %v9430_v48, %s10983_s2 }
 0x68d   : > { %4646 = vrot.lane.b32.xlu0 %v9374_v17, %s10978_s29 }
 0x68e   : > { %v9620_v29 = vpop.permute.xlu1 %4846 }
 0x68f   : > { %10995 = vst [vmem:[#allocation39_spill] sm:$0xff] %v9620_v29  ;;  %v9622_v63 = vpop.permute.xlu0 %4500 }
 0x690   : > { %5120 = vrot.lane.b32.xlu1 %v9362_v60, %s10773_s21 }
 0x691   : > { %4956 = vrot.lane.b32.xlu0 %v9372_v6, %s10682_s19 }
 0x692   : > { %v9635_v24 = vpop.permute.xlu1 %4476 }
 0x693   : > { %10996 = vst [vmem:[#allocation30_spill] sm:$0xff] %v9635_v24  ;;  %v9637_v33 = vpop.permute.xlu0 %4568 }
 0x694   : > { %5118 = vrot.lane.b32.xlu1 %v9360_v40, %s10773_s21 }
 0x695   : > { %4986 = vrot.lane.b32.xlu0 %v9430_v48, %s10688_s14 }
 0x696   : > { %v9643_v11 = vpop.permute.xlu1 %4858 }
 0x697   : > { %10997 = vst [vmem:[#allocation14_spill] sm:$0xff] %v9643_v11  ;;  %v9645_v13 = vpop.permute.xlu0 %4636 }
 0x698   : > { %4410 = vrot.lane.b32.xlu1 %v9428_v28, %s10923_s17 }
 0x699   : > { %4714 = vrot.lane.b32.xlu0 %v9374_v17, %s10979_s0 }
 0x69a   : > { %v9651_v61 = vpop.permute.xlu1 %4882 }
 0x69b   : > { %10998 = vst [vmem:[#allocation57_spill] sm:$0xff] %v9651_v61  ;;  %v9653_v19 = vpop.permute.xlu0 %4704 }
 0x69c   : > { %5130 = vrot.lane.b32.xlu1 %v9428_v28, %s10773_s21 }
 0x69d   : > { %4990 = vrot.lane.b32.xlu0 %v9372_v6, %s10688_s14 }
 0x69e   : > { %v9659_v57 = vpop.permute.xlu1 %4880 }
 0x69f   : > { %10999 = vst [vmem:[#allocation15_spill] sm:$0xff] %v9659_v57  ;;  %v9661_v22 = vpop.permute.xlu0 %4772 }
 0x6a0   : > { %4572 = vrot.lane.b32.xlu1 %v9430_v48, %s10977_s30 }
 0x6a1   : > { %5020 = vrot.lane.b32.xlu0 %v9430_v48, %s10690_s12 }
 0x6a2   : > { %v9668_v1 = vpop.permute.xlu1 %4544 }
 0x6a3   : > { %v9670_v4 = vpop.permute.xlu0 %4400 }
 0x6a4   : > { %5154 = vrot.lane.b32.xlu1 %v9362_v60, %s10795_s20  ;;  %v4413_v15 = vsel %vm11000_vm6, %v9444_v7, %v9670_v4  ;;  %vm11010_vm6 = vcmask 850944  }
 0x6a5   : > { %5024 = vrot.lane.b32.xlu0 %v9372_v6, %s10690_s12  ;;  %5407 = vmatprep.subr.bf16.mxu1 %v4413_v15 }
 0x6a6   : > { %v9681_v47 = vpop.permute.xlu1 %4892  ;;  %5408 = vmatpush1.bf16.msra.mxu1 %v4412_v8 }
 0x6a7   : > { %11002 = vst [vmem:[#allocation56_spill] sm:$0xff] %v9681_v47  ;;  %v9683_v3 = vpop.permute.xlu0 %4468  ;;  %v6455_v47 = vunpack.i.h.bf16 %v9412_v34  ;;  %v4447_v34 = vsel %vm614_vm8, %v9614_v58, %v9486_v21 }
 0x6a8   : > { %5152 = vrot.lane.b32.xlu1 %v9360_v40, %s10795_s20 }
 0x6a9   : > { %5054 = vrot.lane.b32.xlu0 %v9430_v48, %s10720_s16 }
 0x6aa   : > { %v9689_v49 = vpop.permute.xlu1 %4916 }
 0x6ab   : > { %11003 = vst [vmem:[#allocation84_spill] sm:$0xff] %v9689_v49  ;;  %v9691_v56 = vpop.permute.xlu0 %4536 }
 0x6ac   : > { %4444 = vrot.lane.b32.xlu1 %v9428_v28, %s10975_s22 }
 0x6ad   : > { %5058 = vrot.lane.b32.xlu0 %v9372_v6, %s10720_s16 }
 0x6ae   : > { %v9697_v7 = vpop.permute.xlu1 %4914 }
 0x6af   : > { %11004 = vst [vmem:[#allocation16_spill] sm:$0xff] %v9697_v7  ;;  %v9699_v46 = vpop.permute.xlu0 %4604 }
 0x6b0   : > { %5164 = vrot.lane.b32.xlu1 %v9428_v28, %s10795_s20 }
 0x6b1   : > { %5088 = vrot.lane.b32.xlu0 %v9430_v48, %s10756_s13 }
 0x6b2   : > { %v9705_v15 = vpop.permute.xlu1 %4612 }
 0x6b3   : > { %v9707_v8 = vpop.permute.xlu0 %4672 }
 0x6b4   : > { %4606 = vrot.lane.b32.xlu1 %v9430_v48, %s10984_s3 }
 0x6b5   : > { %5092 = vrot.lane.b32.xlu0 %v9372_v6, %s10756_s13 }
 0x6b6   : > { %v9713_v49 = vpop.permute.xlu1 %4926 }
 0x6b7   : > { %11005 = vst [vmem:[#allocation50_spill] sm:$0xff] %v9713_v49  ;;  %v9715_v7 = vpop.permute.xlu0 %4740 }
 0x6b8   : > { %11006 = vst [vmem:[#allocation73_spill] sm:$0xff] %v9715_v7  ;;  %4614 = vrot.lane.b32.xlu1 %v9428_v28, %s10984_s3 }
 0x6b9   : > { %4402 = vrot.lane.b32.xlu0 %v9430_v48, %s10923_s17 }
 0x6ba   : > { %v9722_v57 = vpop.permute.xlu1 %4950 }
 0x6bb   : > { %11007 = vst [vmem:[#allocation67_spill] sm:$0xff] %v9722_v57  ;;  %v4407_v61 = vpop.permute.xlu0 %4406 }
 0x6bc   : > { %5188 = vrot.lane.b32.xlu1 %v9362_v60, %s10842_s24  ;;  %v4416_v11 = vsel %vm11008_vm11, %v4407_v61, %v9596_v26  ;;  %v4415_v49 = vsel %vm11009_vm7, %v6455_v47, %v4407_v61  ;;  %vm11021_vm11 = vcmask 392192   ;;  %vm11022_vm7 = vcmask 834560  }
 0x6bd   : > { %4782 = vrot.lane.b32.xlu0 %v9374_v17, %s10980_s1  ;;  %5409 = vmatprep.subr.bf16.mxu1 %v4416_v11  ;;  %v4446_v11 = vsel %vm614_vm8, %v6459_v27, %v9614_v58  ;;  %v4481_v35 = vsel %vm11021_vm11, %v9450_v12, %v9683_v3 }
 0x6be   : > { %v4949_v29 = vpop.permute.xlu1 %4948  ;;  %5410 = vmatpush1.bf16.msra.mxu1 %v4415_v49 }
 0x6bf   : > { %v9737_v42 = vsel %vm11010_vm6, %v4949_v29, %v9722_v57  ;;  %v4475_v36 = vpop.permute.xlu0 %4474  ;;  %5411 = vmatprep.subr.bf16.mxu1 %v4447_v34  ;;  %vm11023_vm6 = vmmov %vm11021_vm11 }
 0x6c0   : > { %11011 = vst [vmem:[#allocation72_spill] sm:$0xff] %v9737_v42  ;;  %5186 = vrot.lane.b32.xlu1 %v9360_v40, %s10842_s24  ;;  %vm11026_vm11 = vmmov %vm11023_vm6 }
 0x6c1   : > { %5122 = vrot.lane.b32.xlu0 %v9430_v48, %s10773_s21 }
 0x6c2   : > { %v9745_v61 = vpop.permute.xlu1 %4680  ;;  %5412 = vmatpush1.bf16.msra.mxu1 %v4446_v11 }
 0x6c3   : > { %v9747_v47 = vpop.permute.xlu0 %4542 }
 0x6c4   : > { %4504 = vrot.lane.b32.xlu1 %v9430_v48, %s10976_s18 }
 0x6c5   : > { %4546 = vrot.lane.b32.xlu0 %v9428_v28, %s10983_s2 }
 0x6c6   : > { %v9753_v29 = vpop.permute.xlu1 %4960 }
 0x6c7   : > { %11012 = vst [vmem:[#allocation86_spill] sm:$0xff] %v9753_v29  ;;  %v9755_v49 = vpop.permute.xlu0 %4610 }
 0x6c8   : > { %5198 = vrot.lane.b32.xlu1 %v9428_v28, %s10842_s24 }
 0x6c9   : > { %4822 = vrot.lane.b32.xlu0 %v9374_v17, %s10873_s15 }
 0x6ca   : > { %v9761_v27 = vpop.permute.xlu1 %4984 }
 0x6cb   : > { %11013 = vst [vmem:[#allocation34_spill] sm:$0xff] %v9761_v27  ;;  %v9763_v58 = vpop.permute.xlu0 %4678 }
 0x6cc   : > { %4648 = vrot.lane.b32.xlu1 %v9428_v28, %s10978_s29 }
 0x6cd   : > { %4856 = vrot.lane.b32.xlu0 %v9374_v17, %s10861_s10 }
 0x6ce   : > { %v4983_v34 = vpop.permute.xlu1 %4982 }
 0x6cf   : > { %v9771_v11 = vsel %vm11014_vm15, %v4983_v34, %v9761_v27  ;;  %v9773_v21 = vpop.permute.xlu0 %4746  ;;  %v6460_v27 = vunpack.i.h.bf16 %v9548_v20  ;;  %vm11024_vm15 = vmmov %vm11023_vm6 }
 0x6d0   : > { %11015 = vst [vmem:[#allocation27_spill] sm:$0xff] %v9771_v11  ;;  %4674 = vrot.lane.b32.xlu1 %v9430_v48, %s10968_s11 }
 0x6d1   : > { %4890 = vrot.lane.b32.xlu0 %v9374_v17, %s10666_s9  ;;  %v4449_v20 = vsel %vm614_vm8, %v6460_v27, %v9538_v59 }
 0x6d2   : > { %v9779_v29 = vpop.permute.xlu1 %4748 }
 0x6d3   : > { %11016 = vst [vmem:[#allocation52_spill] sm:$0xff] %v9779_v29  ;;  %v9781_v42 = vpop.permute.xlu0 %4820 }
 0x6d4   : > { %11017 = vst [vmem:[#allocation19_spill] sm:$0xff] %v9781_v42  ;;  %6517 = vrot.lane.b32.xlu1 %v10862_v55, %s10676_s25 }
 0x6d5   : > { %4924 = vrot.lane.b32.xlu0 %v9374_v17, %s10676_s25 }
 0x6d6   : > { %v9787_v34 = vpop.permute.xlu1 %4994 }
 0x6d7   : > { %11018 = vst [vmem:[#allocation25_spill] sm:$0xff] %v9787_v34  ;;  %v9789_v11 = vpop.permute.xlu0 %4850 }
 0x6d8   : > { %11019 = vst [vmem:[#allocation87_spill] sm:$0xff] %v9789_v11  ;;  %6522 = vrot.lane.b32.xlu1 %v10862_v55, %s10873_s15  ;;  %v6464_v11 = vunpack.i.l.bf16 %v9416_v51 }
 0x6d9   : > { %4958 = vrot.lane.b32.xlu0 %v9374_v17, %s10682_s19 }
 0x6da   : > { %v9796_v57 = vpop.permute.xlu1 %5018 }
 0x6db   : > { %v9798_v42 = vpop.permute.xlu0 %4442 }
 0x6dc   : > { %11020 = vst [vmem:[#allocation36_spill] sm:$0xff] %v9798_v42  ;;  %6527 = vrot.lane.b32.xlu1 %v10862_v55, %s10756_s13  ;;  %v4450_v34 = vsel %vm614_vm8, %v9538_v59, %v9798_v42  ;;  %v4480_v59 = vsel %vm11023_vm6, %v6464_v11, %v9450_v12  ;;  %v4515_v11 = vsel %vm1703_vm13, %v9622_v63, %v9492_v53  ;;  %vm11029_vm6 = vcmask 662528  }
 0x6dd   : > { %4992 = vrot.lane.b32.xlu0 %v9374_v17, %s10688_s14  ;;  %5413 = vmatprep.subr.bf16.mxu1 %v4450_v34  ;;  %v4484_v34 = vsel %vm11024_vm15, %v4475_v36, %v9635_v24  ;;  %vm11031_vm15 = vcmask 195584  }
 0x6de   : > { %v5017_v45 = vpop.permute.xlu1 %5016  ;;  %5414 = vmatpush1.bf16.msra.mxu1 %v4449_v20 }
 0x6df   : > { %v9815_v26 = vsel %vm11022_vm7, %v5017_v45, %v9796_v57  ;;  %v9817_v42 = vpop.permute.xlu0 %4854  ;;  %5415 = vmatprep.subr.bf16.mxu1 %v4481_v35  ;;  %v6465_v45 = vunpack.i.h.bf16 %v9416_v51  ;;  %v6469_v51 = vunpack.i.l.bf16 %v9558_v25  ;;  %vm11028_vm7 = vcmask 670720  }
 0x6e0   : > { %4716 = vrot.lane.b32.xlu1 %v9428_v28, %s10979_s0 }
 0x6e1   : > { %5026 = vrot.lane.b32.xlu0 %v9374_v17, %s10690_s12  ;;  %v4483_v35 = vsel %vm11026_vm11, %v6465_v45, %v4475_v36  ;;  %v4514_v36 = vsel %vm1703_vm13, %v6469_v51, %v9622_v63  ;;  %vm11032_vm11 = vcmask 654336  }
 0x6e2   : > { %v9825_v27 = vpop.permute.xlu1 %5028  ;;  %5416 = vmatpush1.bf16.msra.mxu1 %v4480_v59 }
 0x6e3   : > { %v9830_v20 = vpop.permute.xlu0 %4884  ;;  %5417 = vmatprep.subr.bf16.mxu1 %v4484_v34  ;;  %v6470_v34 = vunpack.i.h.bf16 %v9558_v25  ;;  %v6474_v25 = vunpack.i.l.bf16 %v9418_v9 }
 0x6e4   : > { %11025 = vst [vmem:[#allocation54_spill] sm:$0xff] %v9830_v20  ;;  %4742 = vrot.lane.b32.xlu1 %v9430_v48, %s10970_s26 }
 0x6e5   : > { %5060 = vrot.lane.b32.xlu0 %v9374_v17, %s10720_s16  ;;  %v4517_v63 = vsel %vm1703_vm13, %v6470_v34, %v9544_v52  ;;  %v4552_v34 = vsel %vm1772_vm10, %v9747_v47, %v9668_v1 }
 0x6e6   : > { %v9837_v12 = vpop.permute.xlu1 %5052  ;;  %5418 = vmatpush1.bf16.msra.mxu1 %v4483_v35 }
 0x6e7   : > { %v9843_v59 = vpop.permute.xlu0 %4510  ;;  %5419 = vmatprep.subr.bf16.mxu1 %v4515_v11 }
 0x6e8   : > { %11027 = vst [vmem:[#allocation20_spill] sm:$0xff] %v9843_v59  ;;  %6547 = vrot.lane.b32.xlu1 %v10862_v55, %s10688_s14  ;;  %v4518_v35 = vsel %vm1703_vm13, %v9544_v52, %v9843_v59 }
 0x6e9   : > { %5094 = vrot.lane.b32.xlu0 %v9374_v17, %s10756_s13 }
 0x6ea   : > { %v5051_v45 = vpop.permute.xlu1 %5050  ;;  %5420 = vmatpush1.bf16.msra.mxu1 %v4514_v36  ;;  %v4549_v36 = vsel %vm1772_vm10, %v9456_v44, %v9691_v56 }
 0x6eb   : > { %v9857_v11 = vsel %vm11028_vm7, %v5051_v45, %v9837_v12  ;;  %v9859_v53 = vpop.permute.xlu0 %4888  ;;  %5421 = vmatprep.subr.bf16.mxu1 %v4518_v35  ;;  %v4548_v35 = vsel %vm1772_vm10, %v6474_v25, %v9456_v44  ;;  %vm11033_vm7 = vmmov %vm11031_vm15 }
 0x6ec   : > { %6552 = vrot.lane.b32.xlu1 %v10862_v55, %s10666_s9 }
 0x6ed   : > { %5128 = vrot.lane.b32.xlu0 %v9374_v17, %s10773_s21 }
 0x6ee   : > { %v9868_v51 = vpop.permute.xlu1 %5062  ;;  %5422 = vmatpush1.bf16.msra.mxu1 %v4517_v63  ;;  %v6475_v63 = vunpack.i.h.bf16 %v9418_v9  ;;  %v6479_v9 = vunpack.i.l.bf16 %v9568_v10 }
 0x6ef   : > { %v9873_v45 = vpop.permute.xlu0 %4918  ;;  %5423 = vmatprep.subr.bf16.mxu1 %v4549_v36  ;;  %v4583_v36 = vsel %vm686_vm1, %v9637_v33, %v9498_v41 }
 0x6f0   : > { %5158 = vrot.lane.b32.xlu1 %v10862_v55, %s10795_s20  ;;  %v4551_v44 = vsel %vm1772_vm10, %v6475_v63, %v9747_v47  ;;  %v6480_v47 = vunpack.i.h.bf16 %v9568_v10  ;;  %v4582_v63 = vsel %vm686_vm1, %v6479_v9, %v9637_v33  ;;  %v6484_v10 = vunpack.i.l.bf16 %v9420_v50 }
 0x6f1   : > { %5126 = vrot.lane.b32.xlu0 %v9372_v6, %s10773_s21  ;;  %v4617_v9 = vsel %vm695_vm14, %v9462_v30, %v9699_v46 }
 0x6f2   : > { %v9881_v52 = vpop.permute.xlu1 %5086  ;;  %5424 = vmatpush1.bf16.msra.mxu1 %v4548_v35  ;;  %v4585_v33 = vsel %vm686_vm1, %v6480_v47, %v9556_v0  ;;  %v4620_v47 = vsel %vm695_vm14, %v9755_v49, %v9705_v15 }
 0x6f3   : > { %v9887_v59 = vpop.permute.xlu0 %4578  ;;  %5425 = vmatprep.subr.bf16.mxu1 %v4552_v34 }
 0x6f4   : > { %4784 = vrot.lane.b32.xlu1 %v9428_v28, %s10980_s1 }
 0x6f5   : > { %4436 = vrot.lane.b32.xlu0 %v9430_v48, %s10975_s22 }
 0x6f6   : > { %v5085_v25 = vpop.permute.xlu1 %5084  ;;  %5426 = vmatpush1.bf16.msra.mxu1 %v4551_v44 }
 0x6f7   : > { %v9901_v35 = vsel %vm11029_vm6, %v5085_v25, %v9881_v52  ;;  %v9903_v34 = vpop.permute.xlu0 %4922  ;;  %5427 = vmatprep.subr.bf16.mxu1 %v4583_v36  ;;  %v4586_v25 = vsel %vm686_vm1, %v9556_v0, %v9887_v59  ;;  %vm11034_vm6 = vmmov %vm11033_vm7 }
 0x6f8   : > { %5030 = vrot.lane.b32.xlu1 %v10862_v55, %s10690_s12 }
 0x6f9   : > { %5156 = vrot.lane.b32.xlu0 %v9430_v48, %s10795_s20 }
 0x6fa   : > { %v9912_v44 = vpop.permute.xlu1 %5096  ;;  %5428 = vmatpush1.bf16.msra.mxu1 %v4582_v63 }
 0x6fb   : > { %11030 = vst [vmem:[#allocation43_spill] sm:$0xff] %v9912_v44  ;;  %v9917_v24 = vpop.permute.xlu0 %4952  ;;  %5429 = vmatprep.subr.bf16.mxu1 %v4586_v25  ;;  %v4616_v44 = vsel %vm695_vm14, %v6484_v10, %v9462_v30  ;;  %v4651_v30 = vsel %vm11031_vm15, %v9645_v13, %v9506_v54  ;;  %vm11036_vm15 = vmmov %vm11034_vm6 }
 0x6fc   : > { %5200 = vrot.lane.b32.xlu1 %v10862_v55, %s10842_s24 }
 0x6fd   : > { %4580 = vrot.lane.b32.xlu0 %v9428_v28, %s10977_s30 }
 0x6fe   : > { %v4539_v36 = vpop.permute.xlu1 %4538  ;;  %5430 = vmatpush1.bf16.msra.mxu1 %v4585_v33  ;;  %v6485_v33 = vunpack.i.h.bf16 %v9420_v50 }
 0x6ff   : > { %v9929_v63 = vpop.permute.xlu0 %4646  ;;  %5431 = vmatprep.subr.bf16.mxu1 %v4617_v9  ;;  %v4550_v25 = vsel %vm1772_vm10, %v9691_v56, %v4539_v36 }
 0x700   : > { %6055 = vmatprep.subr.bf16.mxu0 %v4550_v25  ;;  %v4619_v56 = vsel %vm695_vm14, %v6485_v33, %v9755_v49  ;;  %v6490_v25 = vunpack.i.h.bf16 %v9578_v18 }
 0x701   : > { %5162 = vrot.lane.b32.xlu0 %v9374_v17, %s10795_s20 }
 0x702   : > { %v9937_v0 = vpop.permute.xlu1 %5120  ;;  %5432 = vmatpush1.bf16.msra.mxu1 %v4616_v44  ;;  %v6489_v44 = vunpack.i.l.bf16 %v9578_v18  ;;  %v6494_v18 = vunpack.i.l.bf16 %v9424_v39 }
 0x703   : > { %v9943_v9 = vpop.permute.xlu0 %4956  ;;  %5433 = vmatprep.subr.bf16.mxu1 %v4620_v47  ;;  %v4654_v47 = vsel %vm11034_vm6, %v9564_v14, %v9929_v63 }
 0x704   : > { %v4650_v49 = vsel %vm11033_vm7, %v6489_v44, %v9645_v13  ;;  %v4653_v13 = vsel %vm11036_vm15, %v6490_v25, %v9564_v14  ;;  %v4684_v14 = vsel %vm2048_vm9, %v6494_v18, %v9468_v32  ;;  %v6495_v25 = vunpack.i.h.bf16 %v9424_v39 }
 0x705   : > { %5160 = vrot.lane.b32.xlu0 %v9372_v6, %s10795_s20  ;;  %v6499_v18 = vunpack.i.l.bf16 %v9588_v38  ;;  %v6500_v39 = vunpack.i.h.bf16 %v9588_v38  ;;  %vm11038_vm7 = vcmask 408576  }
 0x706   : > { %v5119_v36 = vpop.permute.xlu1 %5118  ;;  %5434 = vmatpush1.bf16.msra.mxu1 %v4619_v56  ;;  %v9972_v56 = vld [vmem:[%s10389_s6 + $0x8] sm:$0xff]  ;;  %vm11041_vm6 = vmmov %vm11038_vm7 }
 0x707   : > { %v9955_v50 = vsel %vm11032_vm11, %v5119_v36, %v9937_v0  ;;  %v9957_v10 = vpop.permute.xlu0 %4986  ;;  %5435 = vmatprep.subr.bf16.mxu1 %v4651_v30  ;;  %v9981_v36 = vcombine.low %v9627_v5, %v9627_v5  ;;  %v4685_v30 = vsel %vm2048_vm9, %v9468_v32, %v9707_v8  ;;  %v9988_v44 = vcombine.high %v9972_v56, %v9972_v56 }
 0x708   : > { %v4688_v5 = vsel %vm2048_vm9, %v9763_v58, %v9745_v61  ;;  %v4719_v32 = vsel %vm2117_vm5, %v9653_v19, %v9512_v2  ;;  %v4721_v38 = vsel %vm2117_vm5, %v6500_v39, %v9576_v43  ;;  %vm11037_vm11 = vcmask 662528  }
 0x709   : > { %4470 = vrot.lane.b32.xlu0 %v9430_v48, %s10963_s23 }
 0x70a   : > { %5436 = vmatpush1.bf16.msra.mxu1 %v4650_v49 }
 0x70b   : > { %v9967_v33 = vpop.permute.xlu0 %4714  ;;  %5437 = vmatprep.subr.bf16.mxu1 %v4654_v47 }
 0x70c   : > { %11035 = vst [vmem:[#allocation41_spill] sm:$0xff] %v9967_v33 }
 0x70d   : > { %4478 = vrot.lane.b32.xlu0 %v9428_v28, %s10963_s23 }
 0x70e   : > { %5438 = vmatpush1.bf16.msra.mxu1 %v4653_v13  ;;  %v4687_v13 = vsel %vm2048_vm9, %v6495_v25, %v9763_v58  ;;  %v4722_v58 = vsel %vm2117_vm5, %v9576_v43, %v9967_v33  ;;  %v6504_v25 = vunpack.i.l.bf16 %v9436_v16  ;;  %v6505_v43 = vunpack.i.h.bf16 %v9436_v16  ;;  %v11075_v33 = vld [vmem:[#allocation25_spill] sm:$0xff] }
 0x70f   : > { %v9990_v49 = vpop.permute.xlu0 %4990  ;;  %5448 = vmatprep.subr.bf16.mxu1 %v4685_v30  ;;  %v6509_v16 = vunpack.i.l.bf16 %v9598_v31 }
 0x711   : > { %5190 = vrot.lane.b32.xlu0 %v9430_v48, %s10842_s24  ;;  %5440 = vmatmul.mubr.bf16.vlgmr.msra.gmra.mrb[60].mxu1 %v9981_v36 }
 0x712   : > { %5449 = vmatpush1.bf16.msra.mxu1 %v4684_v14  ;;  %5480 = vmatprep.mubr.bf16.mxu1 %v9988_v44  ;;  %v4718_v14 = vsel %vm2117_vm5, %v6499_v18, %v9653_v19  ;;  %v4753_v19 = vsel %vm767_vm3, %v9474_v37, %v9715_v7  ;;  %v4756_v18 = vsel %vm767_vm3, %v9773_v21, %v9779_v29  ;;  %v11061_v29 = vld [vmem:[#allocation16_spill] sm:$0xff] }
 0x713   : > { %v10002_v47 = vpop.permute.xlu0 %5020  ;;  %5450 = vmatprep.subr.bf16.mxu1 %v4688_v5 }
 0x715   : > { %4640 = vrot.lane.b32.xlu0 %v9430_v48, %s10978_s29  ;;  %s6236_s29 = smul.u32 3, %s11145_s28 }
 0x716   : > { %5451 = vmatpush1.bf16.msra.mxu1 %v4687_v13 }
 0x717   : > { %v10012_v30 = vpop.permute.xlu0 %5024  ;;  %5452 = vmatprep.subr.bf16.mxu1 %v4719_v32  ;;  %v4752_v32 = vsel %vm767_vm3, %v6504_v25, %v9474_v37  ;;  %v4755_v37 = vsel %vm767_vm3, %v6505_v43, %v9773_v21  ;;  %s300_s25 = scalar_lea.vmem %s10391_s8, %s6236_s29 }
 0x719   : > { %5196 = vrot.lane.b32.xlu0 %v9374_v17, %s10842_s24 }
 0x71a   : > { %5453 = vmatpush1.bf16.msra.mxu1 %v4718_v14 }
 0x71b   : > { %v10022_v5 = vpop.permute.xlu0 %5054  ;;  %5454 = vmatprep.subr.bf16.mxu1 %v4722_v58  ;;  %v4787_v58 = vsel %vm776_vm12, %v9661_v22, %v9522_v62 }
 0x71d   : > { %5194 = vrot.lane.b32.xlu0 %v9372_v6, %s10842_s24 }
 0x71e   : > { %5455 = vmatpush1.bf16.msra.mxu1 %v4721_v38  ;;  %v4411_v38 = vpop.permute.xlu1 %4410 }
 0x71f   : > { %v10032_v13 = vpop.permute.xlu0 %5058  ;;  %5456 = vmatprep.subr.bf16.mxu1 %v4753_v19 }
 0x721   : > { %4512 = vrot.lane.b32.xlu0 %v9428_v28, %s10976_s18 }
 0x722   : > { %5457 = vmatpush1.bf16.msra.mxu1 %v4752_v32  ;;  %v6510_v32 = vunpack.i.h.bf16 %v9598_v31  ;;  %v10070_v43 = vpop.permute.xlu1 %5130 }
 0x723   : > { %v10042_v39 = vpop.permute.xlu0 %5088  ;;  %5458 = vmatprep.subr.bf16.mxu1 %v4756_v18 }
 0x724   : > { %v10047_v14 = vsel %vm11037_vm11, %v9881_v52, %v10042_v39  ;;  %v4786_v52 = vsel %vm776_vm12, %v6509_v16, %v9661_v22 }
 0x725   : > { %6512 = vrot.lane.b32.xlu0 %v10862_v55, %s10720_s16 }
 0x726   : > { %5459 = vmatpush1.bf16.msra.mxu1 %v4755_v37  ;;  %v4573_v37 = vpop.permute.xlu1 %4572 }
 0x727   : > { %v10057_v25 = vpop.permute.xlu0 %5092  ;;  %5460 = vmatprep.subr.bf16.mxu1 %v4787_v58 }
 0x729   : > { %4682 = vrot.lane.b32.xlu0 %v9428_v28, %s10968_s11 }
 0x72a   : > { %5461 = vmatpush1.bf16.msra.mxu1 %v4786_v52  ;;  %v11040_v52 = vld [vmem:[#allocation12_spill] sm:$0xff] }
 0x72b   : > { %v4403_v19 = vpop.permute.xlu0 %4402 }
 0x72c   : > { %v4414_v21 = vsel %vm11038_vm7, %v9670_v4, %v4403_v19  ;;  %v4789_v4 = vsel %vm776_vm12, %v6510_v32, %v9584_v23  ;;  %v11043_v19 = vld [vmem:[#allocation28_spill] sm:$0xff] }
 0x72d   : > { %4708 = vrot.lane.b32.xlu0 %v9430_v48, %s10979_s0  ;;  %6056 = vmatpush3.bf16.msra.mxu0 %v4414_v21 }
 0x72f   : > { %v10068_v18 = vpop.permute.xlu0 %4782 }
 0x730   : > { %11039 = vst [vmem:[#allocation60_spill] sm:$0xff] %v10068_v18  ;;  %v4790_v22 = vsel %vm776_vm12, %v9584_v23, %v10068_v18  ;;  %v4417_v23 = vsel %vm11041_vm6, %v11040_v52, %v4411_v38  ;;  %v11044_v38 = vld [vmem:[#allocation44_spill] sm:$0xff]  ;;  %v11048_v52 = vld [vmem:[#allocation63_spill] sm:$0xff]  ;;  %vm11060_vm6 = vcmask 859136  }
 0x731   : > { %6532 = vrot.lane.b32.xlu0 %v10862_v55, %s10682_s19  ;;  %5462 = vmatprep.subr.bf16.mxu1 %v4790_v22  ;;  %v4828_v32 = vsel %vm317_vm2, %v11044_v38, %v11043_v19 }
 0x732   : > { %5463 = vmatpush1.bf16.msra.mxu1 %v4789_v4 }
 0x733   : > { %v10079_v31 = vpop.permute.xlu0 %5122  ;;  %5464 = vmatprep.subr.bf16.mxu1 %v9362_v60  ;;  %v11042_v60 = vld [vmem:[#allocation46_spill] sm:$0xff] }
 0x735   : > { %6537 = vrot.lane.b32.xlu0 %v10862_v55, %s10861_s10 }
 0x736   : > { %5465 = vmatpush1.bf16.msra.mxu1 %v9360_v40  ;;  %v4829_v40 = vsel %vm317_vm2, %v11043_v19, %v11042_v60 }
 0x737   : > { %v4547_v58 = vpop.permute.xlu0 %4546  ;;  %5466 = vmatprep.subr.bf16.mxu1 %v9374_v17  ;;  %v4584_v17 = vsel %vm686_vm1, %v9498_v41, %v4573_v37 }
 0x738   : > { %v4553_v16 = vsel %vm1772_vm10, %v9668_v1, %v4547_v58  ;;  %v10098_v1 = vpop.permute.xlu1 %5154  ;;  %v11046_v58 = vld [vmem:[#allocation19_spill] sm:$0xff]  ;;  %vm11052_vm10 = vcmask 867328  }
 0x739   : > { %6542 = vrot.lane.b32.xlu0 %v10862_v55, %s10773_s21  ;;  %6057 = vmatprep.subr.bf16.mxu0 %v4553_v16  ;;  %v11047_v16 = vld [vmem:[#allocation87_spill] sm:$0xff]  ;;  %vm11054_vm15 = vmmov %vm11052_vm10 }
 0x73a   : > { %6058 = vmatpush3.bf16.msra.mxu0 %v4417_v23  ;;  %5467 = vmatpush1.bf16.msra.mxu1 %v9372_v6  ;;  %v11045_v6 = vld [vmem:[#allocation40_spill] sm:$0xff]  ;;  %v4863_v23 = vsel %vm326_vm4, %v11048_v52, %v11047_v16  ;;  %vm11056_vm11 = vmmov %vm11052_vm10 }
 0x73b   : > { %v4823_v21 = vpop.permute.xlu0 %4822  ;;  %5468 = vmatprep.subr.bf16.mxu1 %v4829_v40  ;;  %6059 = vmatprep.subr.bf16.mxu0 %v4584_v17  ;;  %v11049_v40 = vld [vmem:[#allocation39_spill] sm:$0xff]  ;;  %vm11057_vm7 = vmmov %vm11052_vm10 }
 0x73c   : > { %v4832_v22 = vsel %vm317_vm2, %v4823_v21, %v11045_v6  ;;  %v4831_v41 = vsel %vm317_vm2, %v11046_v58, %v4823_v21  ;;  %v10111_v37 = vpop.permute.xlu1 %5152  ;;  %v4862_v17 = vsel %vm326_vm4, %v11049_v40, %v11048_v52  ;;  %v11050_v21 = vld [vmem:[#allocation14_spill] sm:$0xff]  ;;  %v11053_v40 = vld [vmem:[#allocation15_spill] sm:$0xff] }
 0x73d   : > { %4750 = vrot.lane.b32.xlu0 %v9428_v28, %s10970_s26  ;;  %v11077_v6 = vld [vmem:[#allocation11_spill] sm:$0xff] }
 0x73e   : > { %5469 = vmatpush1.bf16.msra.mxu1 %v4828_v32 }
 0x73f   : > { %v4857_v4 = vpop.permute.xlu0 %4856  ;;  %5470 = vmatprep.subr.bf16.mxu1 %v4832_v22 }
 0x740   : > { %v4866_v38 = vsel %vm326_vm4, %v4857_v4, %v11050_v21  ;;  %v10123_v22 = vpop.permute.xlu1 %4444  ;;  %v4865_v58 = vsel %vm326_vm4, %v9817_v42, %v4857_v4  ;;  %v11055_v42 = vld [vmem:[#allocation56_spill] sm:$0xff] }
 0x741   : > { %4776 = vrot.lane.b32.xlu0 %v9430_v48, %s10980_s1 }
 0x742   : > { %5471 = vmatpush1.bf16.msra.mxu1 %v4831_v41  ;;  %v11051_v41 = vld [vmem:[#allocation57_spill] sm:$0xff] }
 0x743   : > { %v4891_v19 = vpop.permute.xlu0 %4890  ;;  %5472 = vmatprep.subr.bf16.mxu1 %v4863_v23  ;;  %v4897_v52 = vsel %vm11052_vm10, %v11051_v41, %v9830_v20  ;;  %vm11062_vm10 = vmmov %vm11060_vm6 }
 0x744   : > { %v4900_v4 = vsel %vm11056_vm11, %v4891_v19, %v11055_v42  ;;  %vm11065_vm11 = vmmov %vm11060_vm6 }
 0x745   : > { %5022 = vrot.lane.b32.xlu0 %v10862_v55, %s10690_s12 }
 0x746   : > { %5473 = vmatpush1.bf16.msra.mxu1 %v4862_v17  ;;  %v4896_v17 = vsel %vm11054_vm15, %v11053_v40, %v11051_v41  ;;  %v4899_v41 = vsel %vm11057_vm7, %v9859_v53, %v4891_v19  ;;  %v10153_v40 = vcombine.low %v9972_v56, %v9972_v56  ;;  %v11063_v56 = vld [vmem:[#allocation50_spill] sm:$0xff]  ;;  %vm11064_vm15 = vmmov %vm11060_vm6  ;;  %vm11067_vm7 = vcmask 850944  }
 0x747   : > { %v4925_v32 = vpop.permute.xlu0 %4924  ;;  %5474 = vmatprep.subr.bf16.mxu1 %v4866_v38  ;;  %v10137_v38 = vpop.permute.xlu1 %5164 }
 0x748   : > { %11058 = vst [vmem:[#allocation21_spill] sm:$0xff] %v10153_v40  ;;  %v4934_v19 = vsel %vm11064_vm15, %v4925_v32, %v11063_v56  ;;  %vm11073_vm15 = vcmask 842752  }
 0x749   : > { %5166 = vrot.lane.b32.xlu0 %v10862_v55, %s10795_s20 }
 0x74a   : > { %5475 = vmatpush1.bf16.msra.mxu1 %v4865_v58  ;;  %v5374_v58 = vld [vmem:[%s10390_s7] sm:$0xff] }
 0x74b   : > { %v4959_v23 = vpop.permute.xlu0 %4958  ;;  %5476 = vmatprep.subr.bf16.mxu1 %v4897_v52  ;;  %v10147_v52 = vld [vmem:[%s10389_s6 + $0x10] sm:$0xff]  ;;  %v4607_v20 = vpop.permute.xlu1 %4606 }
 0x74d   : > { %5192 = vrot.lane.b32.xlu0 %v10862_v55, %s10842_s24 }
 0x74e   : > { %5477 = vmatpush1.bf16.msra.mxu1 %v4896_v17  ;;  %v11059_v17 = vld [vmem:[#allocation84_spill] sm:$0xff] }
 0x74f   : > { %v4993_v18 = vpop.permute.xlu0 %4992  ;;  %5478 = vmatprep.subr.bf16.mxu1 %v4900_v4  ;;  %v4931_v42 = vsel %vm11060_vm6, %v11059_v17, %v9873_v45  ;;  %v10160_v4 = vcombine.high %v10147_v52, %v10147_v52  ;;  %v4930_v53 = vsel %vm11062_vm10, %v11061_v29, %v11059_v17  ;;  %v4615_v21 = vpop.permute.xlu1 %4614  ;;  %v11068_v17 = vld [vmem:[#allocation72_spill] sm:$0xff]  ;;  %vm11070_vm6 = vmmov %vm11067_vm7 }
 0x750   : > { %vm11071_vm10 = vmmov %vm11070_vm6 }
 0x751   : > { %5377 = vperm.xlu0 %6329, %v5374_v58  }
 0x752   : > { %5479 = vmatpush1.bf16.msra.mxu1 %v4899_v41  ;;  %v4933_v41 = vsel %vm11065_vm11, %v9903_v34, %v4925_v32  ;;  %v4967_v34 = vsel %vm11071_vm10, %v9943_v9, %v4959_v23  ;;  %v11072_v32 = vld [vmem:[#allocation34_spill] sm:$0xff]  ;;  %vm11076_vm11 = vmmov %vm11073_vm15 }
 0x753   : > { %v5027_v62 = vpop.permute.xlu0 %5026  ;;  %5489 = vmatprep.subr.bf16.mxu1 %v4931_v42  ;;  %v11066_v42 = vld [vmem:[#allocation67_spill] sm:$0xff] }
 0x754   : > { %v4965_v7 = vsel %vm11067_vm7, %v11066_v42, %v9917_v24  ;;  %vm11078_vm7 = vmmov %vm11076_vm11 }
 0x755   : > { %5481 = vmatmul.mubr.bf16.vlgmr.msra.gmra.mrb[60].mxu1 %v10153_v40 }
 0x756   : > { %5490 = vmatpush1.bf16.msra.mxu1 %v4930_v53  ;;  %5521 = vmatprep.mubr.bf16.mxu1 %v10160_v4  ;;  %v11069_v53 = vld [vmem:[#allocation86_spill] sm:$0xff] }
 0x757   : > { %v5061_v58 = vpop.permute.xlu0 %5060  ;;  %5491 = vmatprep.subr.bf16.mxu1 %v4934_v19  ;;  %v4968_v40 = vsel %vm11070_vm6, %v4959_v23, %v11069_v53  ;;  %v10179_v19 = vpop.permute.xlu1 %5188  ;;  %v5001_v23 = vsel %vm11078_vm7, %v9990_v49, %v4993_v18  ;;  %vm11079_vm6 = vcmask 834560   ;;  %vm11086_vm7 = vcmask 392192  }
 0x758   : > { %vm11080_vm10 = vmmov %vm11079_vm6 }
 0x75a   : > { %5492 = vmatpush1.bf16.msra.mxu1 %v4933_v41  ;;  %v4999_v41 = vsel %vm11073_vm15, %v11072_v32, %v9957_v10  ;;  %vm11082_vm15 = vmmov %vm11079_vm6 }
 0x75b   : > { %v5095_v29 = vpop.permute.xlu0 %5094  ;;  %5493 = vmatprep.subr.bf16.mxu1 %v4965_v7  ;;  %v10188_v7 = vpop.permute.xlu1 %5186 }
 0x75e   : > { %5494 = vmatpush1.bf16.msra.mxu1 %v11068_v17  ;;  %v11074_v17 = vld [vmem:[#allocation27_spill] sm:$0xff] }
 0x75f   : > { %v10177_v16 = vpop.permute.xlu0 %5128  ;;  %5495 = vmatprep.subr.bf16.mxu1 %v4968_v40  ;;  %v5002_v40 = vsel %vm11076_vm11, %v4993_v18, %v11075_v33  ;;  %v11081_v18 = vld [vmem:[#allocation36_spill] sm:$0xff]  ;;  %vm11083_vm11 = vcmask 670720  }
 0x762   : > { %5496 = vmatpush1.bf16.msra.mxu1 %v4967_v34  ;;  %v5033_v34 = vsel %vm11079_vm6, %v9796_v57, %v10002_v47  ;;  %v5035_v57 = vsel %vm11082_vm15, %v10012_v30, %v5027_v62  ;;  %vm11088_vm6 = vcmask 662528  }
 0x763   : > { %v10186_v42 = vpop.permute.xlu0 %5126  ;;  %5497 = vmatprep.subr.bf16.mxu1 %v4999_v41  ;;  %v4505_v41 = vpop.permute.xlu1 %4504  ;;  %vm11091_vm15 = vmmov %vm11088_vm6 }
 0x766   : > { %5498 = vmatpush1.bf16.msra.mxu1 %v11074_v17  ;;  %v5036_v17 = vsel %vm11080_vm10, %v5027_v62, %v9825_v27  ;;  %vm11090_vm10 = vmmov %vm11086_vm7 }
 0x767   : > { %v4437_v53 = vpop.permute.xlu0 %4436  ;;  %5499 = vmatprep.subr.bf16.mxu1 %v5002_v40 }
 0x768   : > { %v4448_v9 = vsel %vm614_vm8, %v11077_v6, %v4437_v53  ;;  %v4451_v6 = vsel %vm614_vm8, %v11081_v18, %v10123_v22  ;;  %v10212_v53 = vpop.permute.xlu1 %5198  ;;  %vm11084_vm8 = vmmov %vm11083_vm11 }
 0x769   : > { %6060 = vmatpush3.bf16.msra.mxu0 %v4448_v9  ;;  %v4618_v9 = vsel %vm695_vm14, %v9699_v46, %v4607_v20  ;;  %v5070_v62 = vsel %vm11084_vm8, %v5061_v58, %v9868_v51  ;;  %v4621_v20 = vsel %vm695_vm14, %v9705_v15, %v4615_v21  ;;  %vm11092_vm14 = vcmask 654336  }
 0x76a   : > { %5500 = vmatpush1.bf16.msra.mxu1 %v5001_v23  ;;  %v5135_v15 = vsel %vm11092_vm14, %v9937_v0, %v10079_v31 }
 0x76b   : > { %v10200_v32 = vpop.permute.xlu0 %5156  ;;  %5501 = vmatprep.subr.bf16.mxu1 %v5033_v34 }
 0x76c   : > { %v4649_v22 = vpop.permute.xlu1 %4648 }
 0x76e   : > { %5502 = vmatpush1.bf16.msra.mxu1 %v9815_v26  ;;  %v5067_v26 = vsel %vm11083_vm11, %v9837_v12, %v10022_v5  ;;  %vm11093_vm11 = vmmov %vm11092_vm14 }
 0x76f   : > { %v4581_v40 = vpop.permute.xlu0 %4580  ;;  %5503 = vmatprep.subr.bf16.mxu1 %v5036_v17 }
 0x770   : > { %v4587_v49 = vsel %vm686_vm1, %v9887_v59, %v4581_v40  ;;  %vm11085_vm1 = vmmov %vm11084_vm8  ;;  %v10229_v12 = vpop.permute.xlu1 %4674  ;;  %v5138_v40 = vsel %vm11093_vm11, %v10177_v16, %v10070_v43  ;;  %vm11094_vm8 = vcmask 195584  }
 0x771   : > { %6061 = vmatprep.subr.bf16.mxu0 %v4587_v49  ;;  %v5069_v23 = vsel %vm11085_vm1, %v10032_v13, %v5061_v58  ;;  %v11089_v58 = vld [vmem:[#allocation30_spill] sm:$0xff]  ;;  %vm11096_vm1 = vmmov %vm11093_vm11  ;;  %vm11102_vm11 = vcmask 637952  }
 0x772   : > { %5504 = vmatpush1.bf16.msra.mxu1 %v5035_v57  ;;  %6062 = vmatpush3.bf16.msra.mxu0 %v4451_v6  ;;  %v5137_v0 = vsel %vm11096_vm1, %v10186_v42, %v10177_v16 }
 0x773   : > { %v5163_v59 = vpop.permute.xlu0 %5162  ;;  %5505 = vmatprep.subr.bf16.mxu1 %v5067_v26  ;;  %6063 = vmatprep.subr.bf16.mxu0 %v4618_v9 }
 0x776   : > { %5506 = vmatpush1.bf16.msra.mxu1 %v9857_v11  ;;  %v11087_v11 = vld [vmem:[#allocation43_spill] sm:$0xff] }
 0x777   : > { %v5161_v30 = vpop.permute.xlu0 %5160  ;;  %5507 = vmatprep.subr.bf16.mxu1 %v5070_v62  ;;  %v5104_v17 = vsel %vm11088_vm6, %v5095_v29, %v11087_v11  ;;  %vm11098_vm6 = vmmov %vm11094_vm8  ;;  %v10269_v62 = vcombine.low %v10147_v52, %v10147_v52 }
 0x778   : > { %v4655_v57 = vsel %vm11098_vm6, %v9929_v63, %v4649_v22  ;;  %vm11108_vm6 = vcmask 859136  }
 0x77a   : > { %5508 = vmatpush1.bf16.msra.mxu1 %v5069_v23 }
 0x77b   : > { %v4471_v34 = vpop.permute.xlu0 %4470  ;;  %5509 = vmatprep.subr.bf16.mxu1 %v10047_v14 }
 0x77c   : > { %v4482_v46 = vsel %vm11086_vm7, %v9683_v3, %v4471_v34  ;;  %v5103_v3 = vsel %vm11091_vm15, %v10057_v25, %v5095_v29  ;;  %v11095_v29 = vld [vmem:[#allocation61_spill] sm:$0xff]  ;;  %vm11097_vm7 = vcmask 646144  }
 0x77d   : > { %6064 = vmatpush3.bf16.msra.mxu0 %v4482_v46  ;;  %v4516_v18 = vsel %vm1703_vm13, %v11095_v29, %v4505_v41  ;;  %vm11100_vm15 = vmmov %vm11097_vm7 }
 0x77e   : > { %5510 = vmatpush1.bf16.msra.mxu1 %v9901_v35  ;;  %6065 = vmatprep.subr.bf16.mxu0 %v4621_v20  ;;  %v6518_v35 = vpop.permute.xlu1 %6517  ;;  %v5172_v16 = vsel %vm11100_vm15, %v5163_v59, %v10137_v38  ;;  %vm11101_vm14 = vmmov %vm11097_vm7 }
 0x77f   : > { %v4479_v13 = vpop.permute.xlu0 %4478  ;;  %5511 = vmatprep.subr.bf16.mxu1 %v5104_v17  ;;  %v5171_v9 = vsel %vm11101_vm14, %v5161_v30, %v5163_v59  ;;  %v6519_v30 = vunpack.i.l.bf16 %v6518_v35  ;;  %v6520_v17 = vunpack.i.h.bf16 %v6518_v35  ;;  %vm11110_vm15 = vmmov %vm11108_vm6  ;;  %vm11111_vm14 = vcmask 662528  }
 0x780   : > { %v4485_v14 = vsel %vm11090_vm10, %v11089_v58, %v4479_v13  ;;  %vm11099_vm10 = vmmov %vm11097_vm7 }
 0x781   : > { %6066 = vmatpush3.bf16.msra.mxu0 %v4485_v14  ;;  %v5168_v41 = vsel %vm11099_vm10, %v10111_v37, %v10098_v1 }
 0x782   : > { %5512 = vmatpush1.bf16.msra.mxu1 %v5103_v3  ;;  %v10254_v6 = vpop.permute.xlu1 %6522  ;;  %v4686_v3 = vsel %vm2048_vm9, %v9707_v8, %v10229_v12 }
 0x783   : > { %v10241_v21 = vpop.permute.xlu0 %5190  ;;  %5513 = vmatprep.subr.bf16.mxu1 %v5135_v15  ;;  %v6525_v8 = vunpack.i.h.bf16 %v10254_v6 }
 0x784   : > { %v5203_v63 = vsel %vm11102_vm11, %v10179_v19, %v10241_v21 }
 0x786   : > { %5514 = vmatpush1.bf16.msra.mxu1 %v9955_v50  ;;  %v5169_v50 = vsel %vm11097_vm7, %v10098_v1, %v10200_v32  ;;  %v6528_v26 = vpop.permute.xlu1 %6527  ;;  %v11103_v1 = vld [vmem:[#allocation20_spill] sm:$0xff]  ;;  %vm11107_vm7 = vcmask 670720  }
 0x787   : > { %v4641_v49 = vpop.permute.xlu0 %4640  ;;  %5515 = vmatprep.subr.bf16.mxu1 %v5138_v40  ;;  %v6529_v58 = vunpack.i.l.bf16 %v6528_v26  ;;  %vm11109_vm10 = vmmov %vm11107_vm7  ;;  %v6530_v35 = vunpack.i.h.bf16 %v6528_v26  ;;  %v11119_v26 = vld [vmem:[#allocation87_spill] sm:$0xff] }
 0x788   : > { %v4652_v25 = vsel %vm11094_vm8, %v9506_v54, %v4641_v49  ;;  %vm11104_vm8 = vmmov %vm11102_vm11  ;;  %vm11112_vm11 = vcmask 261120  }
 0x789   : > { %6067 = vmatprep.subr.bf16.mxu0 %v4652_v25  ;;  %v5202_v23 = vsel %vm11104_vm8, %v10188_v7, %v10179_v19  ;;  %vm11105_vm1 = vmmov %vm11104_vm8  ;;  %vm11113_vm8 = vcmask 850944  }
 0x78a   : > { %5516 = vmatpush1.bf16.msra.mxu1 %v5137_v0  ;;  %6068 = vmatpush3.bf16.msra.mxu0 %v4516_v18  ;;  %v10280_v59 = vpop.permute.xlu1 %4716  ;;  %v11115_v0 = vld [vmem:[#allocation40_spill] sm:$0xff] }
 0x78b   : > { %v5197_v54 = vpop.permute.xlu0 %5196  ;;  %5517 = vmatprep.subr.bf16.mxu1 %v5169_v50  ;;  %6069 = vmatprep.subr.bf16.mxu0 %v4655_v57 }
 0x78c   : > { %v5206_v52 = vsel %vm11105_vm1, %v5197_v54, %v10212_v53 }
 0x78e   : > { %5518 = vmatpush1.bf16.msra.mxu1 %v5168_v41  ;;  %v4743_v14 = vpop.permute.xlu1 %4742 }
 0x78f   : > { %v5195_v42 = vpop.permute.xlu0 %5194  ;;  %5519 = vmatprep.subr.bf16.mxu1 %v5172_v16 }
 0x792   : > { %5520 = vmatpush1.bf16.msra.mxu1 %v5171_v9  ;;  %v6548_v15 = vpop.permute.xlu1 %6547 }
 0x793   : > { %v4513_v22 = vpop.permute.xlu0 %4512  ;;  %5530 = vmatprep.subr.bf16.mxu1 %v5203_v63 }
 0x794   : > { %v4519_v37 = vsel %vm1703_vm13, %v11103_v1, %v4513_v22  ;;  %vm11106_vm13 = vmmov %vm11105_vm1  ;;  %v6550_v22 = vunpack.i.h.bf16 %v6548_v15 }
 0x795   : > { %5522 = vmatmul.mubr.bf16.vlgmr.msra.gmra.mrb[60].mxu1 %v10269_v62  ;;  %6070 = vmatpush3.bf16.msra.mxu0 %v4519_v37  ;;  %v5205_v19 = vsel %vm11106_vm13, %v5195_v42, %v5197_v54  ;;  %vm11114_vm1 = vmmov %vm11111_vm14  ;;  %vm11121_vm13 = vcmask 842752  }
 0x796   : > { %5531 = vmatpush1.bf16.msra.mxu1 %v5202_v23  ;;  %5562 = vmatprep.mubr.bf16.mxu1 %v10862_v55  ;;  %v4932_v55 = vsel %vm11108_vm6, %v9873_v45, %v6519_v30  ;;  %v5102_v45 = vsel %vm11111_vm14, %v10042_v39, %v6529_v58  ;;  %v6553_v29 = vpop.permute.xlu1 %6552  ;;  %vm11126_vm6 = vcmask 646144  }
 0x797   : > { %v6513_v34 = vpop.permute.xlu0 %6512  ;;  %5532 = vmatprep.subr.bf16.mxu1 %v5206_v52  ;;  %v6554_v30 = vunpack.i.l.bf16 %v6553_v29 }
 0x798   : > { %v6515_v46 = vunpack.i.h.bf16 %v6513_v34  ;;  %v6514_v20 = vunpack.i.l.bf16 %v6513_v34  ;;  %5604 = vmatmul.mubr.bf16.vlgmr.msra.gmra.mrb[24].mxu0 %v9981_v36  ;;  %v11124_v34 = vld [vmem:[#allocation14_spill] sm:$0xff] }
 0x799   : > { %5683 = vmatprep.mubr.bf16.mxu0 %v10160_v4  ;;  %v10298_v4 = vld [vmem:[%s10389_s6 + $0x18] ss:$0 sps:$4 sm:$0xff]  }
 0x79a   : > { %5533 = vmatpush1.bf16.msra.mxu1 %v5205_v19  ;;  %v5068_v7 = vsel %vm11107_vm7, %v10022_v5, %v6514_v20  ;;  %v5071_v36 = vsel %vm11109_vm10, %v9868_v51, %v6515_v46  ;;  %v6524_v51 = vunpack.i.l.bf16 %v10254_v6  ;;  %v4833_v6 = vsel %vm317_vm2, %v11115_v0, %v6525_v8  ;;  %v5159_v42 = vpop.permute.xlu1 %5158 }
 0x79b   : > { %v4683_v13 = vpop.permute.xlu0 %4682  ;;  %6077 = vmatprep.subr.bf16.mxu1 %v9430_v48  ;;  %6099 = vmatprep.subr.bf16.mxu0 %v5068_v7  ;;  %v4935_v48 = vsel %vm11110_vm15, %v11063_v56, %v6520_v17  ;;  %v6555_v17 = vunpack.i.h.bf16 %v6553_v29  ;;  %vm11129_vm10 = vcmask 867328  }
 0x79c   : > { %6100 = vmatpush3.bf16.msra.mxu0 %v4932_v55  ;;  %v4689_v39 = vsel %vm2048_vm9, %v9745_v61, %v4683_v13  ;;  %v4830_v49 = vsel %vm317_vm2, %v11042_v60, %v6524_v51  ;;  %v11116_v60 = vld [vmem:[#allocation86_spill] sm:$0xff]  ;;  %vm11117_vm9 = vmmov %vm11113_vm8  ;;  %vm11120_vm2 = vcmask 654336   ;;  %v11135_v51 = vld [vmem:[#allocation60_spill] sm:$0xff] }
 0x79d   : > { %6101 = vmatprep.subr.bf16.mxu0 %v5071_v36  ;;  %vm11122_vm7 = vmmov %vm11120_vm2  ;;  %v11128_v13 = vld [vmem:[#allocation54_spill] sm:$0xff] }
 0x79e   : > { %v4785_v19 = vpop.permute.xlu1 %4784  ;;  %v4898_v55 = vsel %vm11129_vm10, %v11128_v13, %v6554_v30  ;;  %vm11133_vm15 = vmmov %vm11129_vm10 }
 0x79f   : > { %v4709_v5 = vpop.permute.xlu0 %4708 }
 0x7a0   : > { %6102 = vmatpush3.bf16.msra.mxu0 %v4935_v48  ;;  %v4720_v61 = vsel %vm2117_vm5, %v9512_v2, %v4709_v5 }
 0x7a1   : > { %5867 = vmatmul.mubr.msk.bf16.vlgmr.msra.gmra.mrb[60].mxu1 %vm11112_vm11, %v10298_v4  ;;  %6103 = vmatprep.subr.bf16.mxu0 %v5102_v45  ;;  %vm11138_vm11 = vcmask 637952  }
 0x7a2   : > { %6078 = vmatpush3.bf16.msra.mxu1 %v4686_v3  ;;  %5643 = vmatprep.mubr.bf16.mxu1 %v9988_v44  ;;  %v5031_v5 = vpop.permute.xlu1 %5030 }
 0x7a3   : > { %6079 = vmatprep.subr.bf16.mxu1 %v9428_v28  ;;  %v6533_v56 = vpop.permute.xlu0 %6532  ;;  %v5105_v28 = vsel %vm11114_vm1, %v11087_v11, %v6530_v35  ;;  %v11118_v11 = vld [vmem:[#allocation41_spill] sm:$0xff]  ;;  %vm11141_vm1 = vcmask 261120  }
 0x7a4   : > { %v6534_v40 = vunpack.i.l.bf16 %v6533_v56  ;;  %v6535_v12 = vunpack.i.h.bf16 %v6533_v56  ;;  %v4723_v16 = vsel %vm2117_vm5, %v11118_v11, %v10280_v59  ;;  %v11123_v59 = vld [vmem:[#allocation73_spill] sm:$0xff]  ;;  %vm11125_vm5 = vmmov %vm11121_vm13  ;;  %v11137_v56 = vmov 0.0  }
 0x7a5   : > { %v4754_v52 = vsel %vm767_vm3, %v11123_v59, %v4743_v14  ;;  %v5003_v20 = vsel %vm11125_vm5, %v11075_v33, %v6550_v22  ;;  %v11131_v33 = vld [vmem:[#allocation23_spill] sm:$0xff] }
 0x7a6   : > { %6080 = vmatpush3.bf16.msra.mxu1 %v4689_v39  ;;  %v4966_v25 = vsel %vm11113_vm8, %v9917_v24, %v6534_v40  ;;  %v4969_v50 = vsel %vm11117_vm9, %v11116_v60, %v6535_v12  ;;  %v6549_v24 = vunpack.i.l.bf16 %v6548_v15  ;;  %v4791_v15 = vsel %vm776_vm12, %v11135_v51, %v4785_v19  ;;  %v11139_v39 = vld [vmem:[#allocation21_spill] sm:$0xff] }
 0x7a7   : > { %6081 = vmatprep.subr.bf16.mxu1 %v4830_v49  ;;  %v6538_v44 = vpop.permute.xlu0 %6537  ;;  %6104 = vmatpush3.bf16.msra.mxu0 %v4966_v25  ;;  %vm6707_vm8 = vmmov 0   ;;  %v6708_v60 = vmov 1966171168  }
 0x7a8   : > { %6105 = vmatprep.subr.bf16.mxu0 %v5105_v28  ;;  %v6539_v18 = vunpack.i.l.bf16 %v6538_v44  ;;  %v6540_v2 = vunpack.i.h.bf16 %v6538_v44  ;;  %v5000_v37 = vsel %vm11121_vm13, %v9957_v10, %v6549_v24  ;;  %v5170_v10 = vsel %vm11126_vm6, %v10200_v32, %v5159_v42  ;;  %v11132_v32 = vld [vmem:[#allocation56_spill] sm:$0xff] }
 0x7a9   : > { %v4901_v48 = vsel %vm11133_vm15, %v11132_v32, %v6555_v17 }
 0x7aa   : > { %6082 = vmatpush3.bf16.msra.mxu1 %v4720_v61  ;;  %v4864_v9 = vsel %vm326_vm4, %v11119_v26, %v6539_v18 }
 0x7ab   : > { %6083 = vmatprep.subr.bf16.mxu1 %v4833_v6  ;;  %v6543_v57 = vpop.permute.xlu0 %6542  ;;  %6106 = vmatpush3.bf16.msra.mxu0 %v4969_v50  ;;  %v5736_v50 = vunpack.c.l.s4 %v6708_v60 }
 0x7ac   : > { %v6545_v54 = vunpack.i.h.bf16 %v6543_v57  ;;  %v6544_v41 = vunpack.i.l.bf16 %v6543_v57 }
 0x7ae   : > { %6084 = vmatpush3.bf16.msra.mxu1 %v4723_v16  ;;  %v5136_v63 = vsel %vm11120_vm2, %v10079_v31, %v6544_v41  ;;  %v5139_v23 = vsel %vm11122_vm7, %v10070_v43, %v6545_v54  ;;  %v4867_v31 = vsel %vm326_vm4, %v11124_v34, %v6540_v2  ;;  %v11127_v43 = vld [vmem:[#allocation52_spill] sm:$0xff]  ;;  %vm11130_vm4 = vcmask 834560  }
 0x7af   : > { %6085 = vmatprep.subr.bf16.mxu1 %v4864_v9  ;;  %v4751_v1 = vpop.permute.xlu0 %4750  ;;  %6107 = vmatprep.subr.bf16.mxu0 %v5136_v63  ;;  %vm11136_vm14 = vmmov %vm11130_vm4  ;;  %v5737_v2 = vunpack.c.0.s8 %v5736_v50 }
 0x7b0   : > { %6108 = vmatpush3.bf16.msra.mxu0 %v5000_v37  ;;  %v4757_v7 = vsel %vm767_vm3, %v11127_v43, %v4751_v1  ;;  %vm11134_vm3 = vmmov %vm11126_vm6  ;;  %v11142_v1 = vld [vmem:[#allocation7_spill] sm:$0xff] }
 0x7b1   : > { %6109 = vmatprep.subr.bf16.mxu0 %v5139_v23  ;;  %v5740_v37 = vsub.s32 %v5737_v2, %v11142_v1 }
 0x7b2   : > { %6086 = vmatpush3.bf16.msra.mxu1 %v4754_v52 }
 0x7b3   : > { %6087 = vmatprep.subr.bf16.mxu1 %v4867_v31  ;;  %v4777_v46 = vpop.permute.xlu0 %4776 }
 0x7b4   : > { %6110 = vmatpush3.bf16.msra.mxu0 %v5003_v20  ;;  %v4788_v36 = vsel %vm776_vm12, %v11131_v33, %v4777_v46  ;;  %vm11140_vm12 = vmmov %vm11138_vm11 }
 0x7b5   : > { %6111 = vmatprep.subr.bf16.mxu0 %v5170_v10 }
 0x7b6   : > { %6088 = vmatpush3.bf16.msra.mxu1 %v4757_v7 }
 0x7b7   : > { %6089 = vmatprep.subr.bf16.mxu1 %v4898_v55  ;;  %v5023_v58 = vpop.permute.xlu0 %5022 }
 0x7b8   : > { %v5034_v14 = vsel %vm11130_vm4, %v10002_v47, %v5023_v58  ;;  %v5037_v47 = vsel %vm11136_vm14, %v9825_v27, %v5031_v5 }
 0x7b9   : > { %6112 = vmatpush3.bf16.msra.mxu0 %v5034_v14 }
 0x7ba   : > { %6090 = vmatpush3.bf16.msra.mxu1 %v4788_v36 }
 0x7bb   : > { %6091 = vmatprep.subr.bf16.mxu1 %v4901_v48  ;;  %v5167_v45 = vpop.permute.xlu0 %5166 }
 0x7bc   : > { %v5173_v3 = vsel %vm11134_vm3, %v10137_v38, %v5167_v45  ;;  %v5201_v38 = vpop.permute.xlu1 %5200 }
 0x7bd   : > { %6113 = vmatprep.subr.bf16.mxu0 %v5173_v3  ;;  %v5207_v27 = vsel %vm11140_vm12, %v10212_v53, %v5201_v38 }
 0x7be   : > { %6092 = vmatpush3.bf16.msra.mxu1 %v4791_v15  ;;  %6114 = vmatpush3.bf16.msra.mxu0 %v5037_v47 }
 0x7bf   : > { %v5193_v35 = vpop.permute.xlu0 %5192  ;;  %6156 = vmatprep.subr.bf16.mxu1 %v11137_v56 }
 0x7c0   : > { %v5204_v40 = vsel %vm11138_vm11, %v10241_v21, %v5193_v35 }
 0x7c1   : > { %5644 = vmatmul.mubr.bf16.vlgmr.msra.gmra.mrb[64].mxu1 %v11139_v39  ;;  %5684 = vmatmul.mubr.bf16.vlgmr.msra.gmra.mrb[28].mxu0 %v10269_v62 }
 0x7c2   : > { %6157 = vmatpush3.bf16.msra.mxu1 %v5204_v40  ;;  %6160 = vmatprep.mubr.msk.bf16.mxu1 %vm6707_vm8, %v11137_v56 }
 0x7c3   : > { %6158 = vmatprep.subr.bf16.mxu1 %v11137_v56 }
 0x7c6   : > { %6159 = vmatpush3.bf16.msra.mxu1 %v5207_v27 }
 0x7c9   : > { %6161 = vmatmul.mubr.msk.bf16.vlgmr.msra.gmra.mrb[68].mxu1 %vm11141_vm1, %v10298_v4 }
 0x7d0   : > { %v5378_v62 = vpop.permute.xlu0 %5377 }
 0x86b   : > { %v6071_v8 = vpop.f32.mrb[24].mxu0 }
 0x86c   : > { %v6072_v21 = vpop.f32.mrb[25].mxu0 }
 0x86d   : > { %v6073_v12 = vadd.f32 %v6072_v21, %v6071_v8  ;;  %v6074_v49 = vpop.f32.mrb[26].mxu0 }
 0x86e   : > { %v6075_v25 = vpop.f32.mrb[27].mxu0 }
 0x86f   : > { %v5606_v54 = vadd.f32 %v6073_v12, %v5378_v62 }
 0x874   : > { %v5564_v44 = vpop.f32.mrb[60].mxu1 }
 0x875   : > { %v6172_v28 = vadd.f32 %v5564_v44, %v5378_v62  ;;  %v5566_v29 = vpop.f32.mrb[61].mxu1 }
 0x876   : > { %v6173_v61 = vadd.f32 %v5566_v29, %v5378_v62  ;;  %v5568_v18 = vpop.f32.mrb[62].mxu1 }
 0x877   : > { %v5569_v0 = vpop.f32.mrb[63].mxu1 }
 0x878   : > { %v5734_v6 = vcombine.low %v6172_v28, %v6173_v61 }
 0x87a   : > { %v5741_v34 = vrot.slane %v5734_v6, %v5740_v37 }
 0x894   : > { %v6093_v53 = vpop.f32.mrb[64].mxu1  ;;  %v6115_v24 = vpop.f32.mrb[28].mxu0 }
 0x895   : > { %v6094_v57 = vpop.f32.mrb[65].mxu1  ;;  %v6116_v4 = vpop.f32.mrb[29].mxu0 }
 0x896   : > { %v6095_v41 = vadd.f32 %v6094_v57, %v6093_v53  ;;  %v6096_v11 = vpop.f32.mrb[66].mxu1  ;;  %v6117_v16 = vadd.f32 %v6116_v4, %v6115_v24  ;;  %v6118_v42 = vpop.f32.mrb[30].mxu0 }
 0x897   : > { %v6097_v26 = vpop.f32.mrb[67].mxu1  ;;  %v6119_v9 = vpop.f32.mrb[31].mxu0 }
 0x898   : > { %v5646_v63 = vadd.f32 %v6095_v41, %v5606_v54 }
 0x89a   : > { %v5686_v22 = vadd.f32 %v6117_v16, %v5646_v63 }
 0x89c   : > { %v5725_v23 = vpop.f32.mrb[68].mxu1 }
 0x89d   : > { %v5726_v59 = vadd.f32 %v5725_v23, %v5686_v22  ;;  %v6162_v52 = vpop.f32.mrb[69].mxu1 }
 0x89e   : > { %v5728_v30 = vpop.f32.mrb[70].mxu1 }
 0x89f   : > { %v5748_v31 = vrot.slane %v5726_v59, %v5740_v37  ;;  %v6163_v46 = vpop.f32.mrb[71].mxu1 }
 0x8a1   : > { %v5749_v20 = vcombine.low %v5741_v34, %v5748_v31 }
 0x8a3   : > { %v5756_v19 = vrot.slane %v5749_v20, %v5740_v37 }
 0x8a5   : > { %5758 = vst.msk [vmem:[%s300_s25] sm:$0x7] %vm6771_vm0, %v5756_v19 }
 0x8a6 PF: > { %s18_s27 = sadd.s32 1, %s6623_s27  }
 0x8a7   : > { %p15_p4 = scmp.ge.s32.totalorder %s18_s27, 4  }
 0x8a9   :  { %17 = sbr.rel (!%p15_p4) target bundleno = 7 (0x7), region = 162 }

</bundles_post_ra>
